<compile_context>
chip_gen: v7x
topology: tpu7x:2x2x1
jax: 0.10.0
libtpu: 0.0.40
codegen_flags: <defaults>
</compile_context>

<pallas_src>
import functools

import jax
import jax.numpy as jnp
import numpy as np
from jax.experimental import pallas as pl
from jax.experimental.pallas import tpu as pltpu

BB = 8  # padded batch rows per grid block (one sublane tile)


def bilstm_fc_kernel(
    x_ref,      # (T*BB, E)     time-major flattened embeddings for this batch block
    wih_ref,    # (E, 8*Hp)     fused + gate-padded [fwd | bwd] input-projection weights
    b_ref,      # (1, 8*Hp)     fused gate biases (b_ih + b_hh per direction), gate-padded
    whh_ref,    # (2*Hp, 8*Hp)  block-diagonal fused recurrent weights
    fcwf_ref,   # (1, Hp)       fc weights acting on the forward hidden half (lane-padded)
    fcwb_ref,   # (1, Hp)       fc weights acting on the backward hidden half (lane-padded)
    fcb_ref,    # (1, 1)        fc bias (SMEM scalar)
    out_ref,    # (BB, T)       sigmoid(logits): batch on sublanes, time on lanes
    xp_ref,     # VMEM (T*BB, 8*Hp) scratch: staged input projection
    lgf_ref,    # VMEM (BB, T)  scratch: per-time forward fc contributions
    lgb_ref,    # VMEM (BB, T)  scratch: per-time backward fc contributions
    *, T, BB, Hp,
):
    H4 = 4 * Hp

    # Whole-block input projection staged into sublane/lane-aligned VMEM scratch so that
    # every per-step gate read below is a full (8,128)-tile load (no XLU relayout).
    xp_ref[...] = (
        jnp.dot(x_ref[...], wih_ref[...], preferred_element_type=jnp.float32)
        + b_ref[...]
    )

    fcw_f = fcwf_ref[...]                       # (1, Hp) -- hoisted, one vreg each
    fcw_b = fcwb_ref[...]

    def cell(gates, c):
        # Gate lane order (i, f, o, g), each padded to Hp lanes -> whole-vreg selects.
        # One sigmoid over the 3*Hp prefix, one tanh over the Hp tail (no wasted EUP lanes).
        sig = jax.nn.sigmoid(gates[:, : 3 * Hp])
        i = sig[:, 0 * Hp:1 * Hp]
        f = sig[:, 1 * Hp:2 * Hp]
        o = sig[:, 2 * Hp:3 * Hp]
        g = jnp.tanh(gates[:, 3 * Hp:4 * Hp])
        c_new = f * c + i * g
        h_new = o * jnp.tanh(c_new)
        return h_new, c_new

    h_f = jnp.zeros((BB, Hp), jnp.float32)
    c_f = jnp.zeros((BB, Hp), jnp.float32)
    h_b = jnp.zeros((BB, Hp), jnp.float32)
    c_b = jnp.zeros((BB, Hp), jnp.float32)

    # Interleaved fwd/bwd recurrence. The two per-step recurrent matmuls are fused into a
    # single (BB, 2Hp) x (2Hp, 8Hp) MXU matmul via the block-diagonal whh.
    # TODO(synk): for realistic T switch to lax.fori_loop(..., unroll=k) with dynamic
    #             xp_ref indexing to bound vreg pressure and compile time.
    for s in range(T):                          # T is small & static -> unrolled
        tf = s
        tb = T - 1 - s
        h_cat = jnp.concatenate([h_f, h_b], axis=-1)                       # (BB, 2*Hp)
        rec = jnp.dot(h_cat, whh_ref[...], preferred_element_type=jnp.float32)  # (BB, 8*Hp)
        gates_f = xp_ref[tf * BB:(tf + 1) * BB, :H4] + rec[:, :H4]
        gates_b = xp_ref[tb * BB:(tb + 1) * BB, H4:] + rec[:, H4:]
        h_f, c_f = cell(gates_f, c_f)
        h_b, c_b = cell(gates_b, c_b)
        # fc folded into the loop: per-time logit contributions go straight to (BB, T)
        # scratch (off the recurrence's critical path) -> O(1) live hidden state, no
        # epilogue concat of T hidden tiles.
        lgf_ref[:, tf:tf + 1] = jnp.sum(h_f * fcw_f, axis=-1, keepdims=True)
        lgb_ref[:, tb:tb + 1] = jnp.sum(h_b * fcw_b, axis=-1, keepdims=True)

    # Single lane-dense (BB, T) store; rows already match PyTorch's b*T + t ordering.
    out_ref[...] = jax.nn.sigmoid(lgf_ref[...] + lgb_ref[...] + fcb_ref[0, 0])


def prepare_params(params):
    """One-time weight prep (transpose/concat/pad) hoisted out of the per-call forward."""
    H = params["whh_f"].shape[1]
    E = params["embedding"].shape[1]
    Hp = ((H + 127) // 128) * 128        # pad each gate segment to a 128-lane boundary
    perm = (0, 1, 3, 2)                  # kernel gate order (i, f, o, g) <- torch (i, f, g, o)

    def pad_ih(w):                       # (4H, E) -> (E, 4Hp)
        out = jnp.zeros((E, 4 * Hp), jnp.float32)
        for s, p in enumerate(perm):
            out = out.at[:, s * Hp:s * Hp + H].set(w[p * H:(p + 1) * H, :].T)
        return out

    def pad_hh(w):                       # (4H, H) -> (Hp, 4Hp)
        out = jnp.zeros((Hp, 4 * Hp), jnp.float32)
        for s, p in enumerate(perm):
            out = out.at[:H, s * Hp:s * Hp + H].set(w[p * H:(p + 1) * H, :].T)
        return out

    def pad_bias(b_ih, b_hh):            # (4H,) -> (4Hp,)
        b = b_ih + b_hh
        out = jnp.zeros((4 * Hp,), jnp.float32)
        for s, p in enumerate(perm):
            out = out.at[s * Hp:s * Hp + H].set(b[p * H:(p + 1) * H])
        return out

    whh = jnp.zeros((2 * Hp, 8 * Hp), jnp.float32)          # block-diagonal fused W_hh
    whh = whh.at[:Hp, :4 * Hp].set(pad_hh(params["whh_f"]))
    whh = whh.at[Hp:, 4 * Hp:].set(pad_hh(params["whh_b"]))

    return {
        "embedding": params["embedding"].astype(jnp.float32),
        "wih": jnp.concatenate([pad_ih(params["wih_f"]), pad_ih(params["wih_b"])], axis=1),
        "bias": jnp.concatenate([pad_bias(params["bih_f"], params["bhh_f"]),
                                 pad_bias(params["bih_b"], params["bhh_b"])])[None, :],
        "whh": whh,
        "fcw_f": jnp.zeros((1, Hp), jnp.float32).at[0, :H].set(params["fc_w"][0, :H]),
        "fcw_b": jnp.zeros((1, Hp), jnp.float32).at[0, :H].set(params["fc_w"][0, H:]),
        "fcb": params["fc_b"].reshape(1, 1).astype(jnp.float32),
    }


@jax.jit
def net_forward(tokens, prep):
    """tokens: (B, T) int32 -> (B*T, 1) float32, matching the PyTorch Net.forward."""
    emb = prep["embedding"]
    B, T = tokens.shape
    E = emb.shape[1]
    Hp = prep["fcw_f"].shape[1]
    num_bb = pl.cdiv(B, BB)
    Bp = num_bb * BB

    # Pad batch to full 8-sublane blocks and lay the tokens out block-major / time-major:
    # flat row = j*(T*BB) + t*BB + b  (transpose the tiny int tokens, not the activations).
    tok = jnp.zeros((Bp, T), jnp.int32).at[:B, :].set(tokens)
    tok = tok.reshape(num_bb, BB, T).transpose(0, 2, 1).reshape(num_bb * T * BB)
    x = jnp.take(emb, tok, axis=0)                                    # (num_bb*T*BB, E)

    kernel = functools.partial(bilstm_fc_kernel, T=T, BB=BB, Hp=Hp)
    out = pl.pallas_call(
        kernel,
        grid=(num_bb,),
        out_shape=jax.ShapeDtypeStruct((Bp, T), jnp.float32),
        in_specs=[
            pl.BlockSpec((T * BB, E), lambda j: (j, 0)),              # per-block embeddings
            pl.BlockSpec((E, 8 * Hp), lambda j: (0, 0)),              # resident weights
            pl.BlockSpec((1, 8 * Hp), lambda j: (0, 0)),
            pl.BlockSpec((2 * Hp, 8 * Hp), lambda j: (0, 0)),
            pl.BlockSpec((1, Hp), lambda j: (0, 0)),
            pl.BlockSpec((1, Hp), lambda j: (0, 0)),
            pl.BlockSpec(memory_space=pltpu.MemorySpace.SMEM),        # fc bias scalar
        ],
        out_specs=pl.BlockSpec((BB, T), lambda j: (j, 0)),            # lane-dense per block
        scratch_shapes=[
            pltpu.VMEM((T * BB, 8 * Hp), jnp.float32),                # staged x @ W_ih
            pltpu.VMEM((BB, T), jnp.float32),                         # fwd logit contributions
            pltpu.VMEM((BB, T), jnp.float32),                         # bwd logit contributions
        ],
        compiler_params=pltpu.CompilerParams(
            dimension_semantics=("parallel",),          # batch blocks -> both v7x TCs
            vmem_limit_bytes=32 * 1024 * 1024,          # ~3 MiB used; within v5e 16 MiB default too
        ),
    )(x, prep["wih"], prep["bias"], prep["whh"], prep["fcw_f"], prep["fcw_b"], prep["fcb"])

    # Drop batch padding; rows are already ordered b*T + t (PyTorch's .view(-1, 2H) order).
    return out[:B, :].reshape(B * T, 1)


def _reference_forward(tokens, params):
    """Pure-JAX reference (same math) to validate the kernel."""
    x = jnp.take(params["embedding"], tokens, axis=0)  # (B, T, E)
    B, T, _ = x.shape
    H = params["whh_f"].shape[1]

    def run_dir(wih, whh, bih, bhh, reverse):
        h = jnp.zeros((B, H), jnp.float32)
        c = jnp.zeros((B, H), jnp.float32)
        hs = []
        rng = range(T - 1, -1, -1) if reverse else range(T)
        for t in rng:
            gates = x[:, t, :] @ wih.T + h @ whh.T + bih + bhh
            i = jax.nn.sigmoid(gates[:, :H])
            f = jax.nn.sigmoid(gates[:, H:2 * H])
            g = jnp.tanh(gates[:, 2 * H:3 * H])
            o = jax.nn.sigmoid(gates[:, 3 * H:])
            c = f * c + i * g
            h = o * jnp.tanh(c)
            hs.append(h)
        if reverse:
            hs = hs[::-1]
        return jnp.stack(hs, axis=1)                   # (B, T, H)

    hf = run_dir(params["wih_f"], params["whh_f"], params["bih_f"], params["bhh_f"], False)
    hb = run_dir(params["wih_b"], params["whh_b"], params["bih_b"], params["bhh_b"], True)
    hcat = jnp.concatenate([hf, hb], axis=-1).reshape(B * T, 2 * H)
    return jax.nn.sigmoid(hcat @ params["fc_w"].T + params["fc_b"])


def init_params(key, vocab_size, embedding_dim, hidden_dim):
    ks = jax.random.split(key, 11)
    bound = 1.0 / np.sqrt(hidden_dim)
    u = lambda k, shape: jax.random.uniform(k, shape, jnp.float32, -bound, bound)
    return {
        "embedding": jax.random.normal(ks[0], (vocab_size, embedding_dim), jnp.float32),
        "wih_f": u(ks[1], (4 * hidden_dim, embedding_dim)),
        "whh_f": u(ks[2], (4 * hidden_dim, hidden_dim)),
        "bih_f": u(ks[3], (4 * hidden_dim,)),
        "bhh_f": u(ks[4], (4 * hidden_dim,)),
        "wih_b": u(ks[5], (4 * hidden_dim, embedding_dim)),
        "whh_b": u(ks[6], (4 * hidden_dim, hidden_dim)),
        "bih_b": u(ks[7], (4 * hidden_dim,)),
        "bhh_b": u(ks[8], (4 * hidden_dim,)),
        "fc_w": u(ks[9], (1, 2 * hidden_dim)),
        "fc_b": u(ks[10], (1,)),
    }


if __name__ == "__main__":
    VOCAB, EMB, HID = 20, 32, 32
    B, T = 2, 8

    key = jax.random.PRNGKey(0)
    k_tok, k_par = jax.random.split(key)
    tokens = jax.random.randint(k_tok, (B, T), 0, VOCAB, dtype=jnp.int32)
    params = init_params(k_par, VOCAB, EMB, HID)

    prepped = prepare_params(params)             # one-time weight prep (outside the jit)

    out = net_forward(tokens, prepped)
    out = jax.block_until_ready(out)

    ref = jax.block_until_ready(_reference_forward(tokens, params))
    assert out.shape == (B * T, 1), out.shape
    np.testing.assert_allclose(np.asarray(out), np.asarray(ref), rtol=1e-5, atol=1e-5)

    print("KERNEL_OK")
</pallas_src>

<mosaic_0001>
module attributes {stable_mosaic.version = 11 : i64} {
  func.func @bilstm_fc_kernel(%arg0: i32, %arg1: memref<64x32xf32, #tpu.memory_space<vmem>>, %arg2: memref<32x1024xf32, #tpu.memory_space<vmem>>, %arg3: memref<1x1024xf32, #tpu.memory_space<vmem>>, %arg4: memref<256x1024xf32, #tpu.memory_space<vmem>>, %arg5: memref<1x128xf32, #tpu.memory_space<vmem>>, %arg6: memref<1x128xf32, #tpu.memory_space<vmem>>, %arg7: memref<1x1xf32, #tpu.memory_space<smem>>, %arg8: memref<8x8xf32, #tpu.memory_space<vmem>>, %arg9: memref<64x1024xf32, #tpu.memory_space<vmem>>, %arg10: memref<8x8xf32, #tpu.memory_space<vmem>>, %arg11: memref<8x8xf32, #tpu.memory_space<vmem>>) attributes {dimension_semantics = [#tpu.dimension_semantics<parallel>], iteration_bounds = array<i64: 1>, scalar_prefetch = 0 : i64, scratch_operands = 3 : i64, tpu.core_type = #tpu.core_type<tc>, window_params = [{transform_indices = @transform_0, window_bounds = array<i64: 64, 32>}, {pipeline_mode = #tpu.pipeline_mode<synchronous>, transform_indices = @transform_1, window_bounds = array<i64: 32, 1024>}, {pipeline_mode = #tpu.pipeline_mode<synchronous>, transform_indices = @transform_2, window_bounds = array<i64: 1, 1024>}, {pipeline_mode = #tpu.pipeline_mode<synchronous>, transform_indices = @transform_3, window_bounds = array<i64: 256, 1024>}, {pipeline_mode = #tpu.pipeline_mode<synchronous>, transform_indices = @transform_4, window_bounds = array<i64: 1, 128>}, {pipeline_mode = #tpu.pipeline_mode<synchronous>, transform_indices = @transform_5, window_bounds = array<i64: 1, 128>}, {transform_indices = @transform_6, window_bounds = array<i64: 1, 1>}, {transform_indices = @transform_7, window_bounds = array<i64: 8, 8>}]} {
    %c0 = arith.constant 0 : index
    %c0_0 = arith.constant 0 : index
    %0 = vector.load %arg1[%c0, %c0_0] : memref<64x32xf32, #tpu.memory_space<vmem>>, vector<64x32xf32>
    %c0_1 = arith.constant 0 : index
    %c0_2 = arith.constant 0 : index
    %1 = vector.load %arg2[%c0_1, %c0_2] : memref<32x1024xf32, #tpu.memory_space<vmem>>, vector<32x1024xf32>
    %cst = arith.constant dense<0.000000e+00> : vector<64x1024xf32>
    %2 = tpu.matmul %0, %1, %cst {dimension_numbers = #tpu.dot_dimension_numbers<[1], [0], [0], [1], [0, 0, 1, 1], [], []>} : vector<64x32xf32>, vector<32x1024xf32>, vector<64x1024xf32> -> vector<64x1024xf32>
    %c0_3 = arith.constant 0 : index
    %c0_4 = arith.constant 0 : index
    %3 = vector.load %arg3[%c0_3, %c0_4] : memref<1x1024xf32, #tpu.memory_space<vmem>>, vector<1x1024xf32>
    %4 = vector.broadcast %3 : vector<1x1024xf32> to vector<64x1024xf32>
    %5 = arith.addf %2, %4 : vector<64x1024xf32>
    %c0_5 = arith.constant 0 : index
    %c0_6 = arith.constant 0 : index
    %6 = vector.load %arg9[%c0_5, %c0_6] : memref<64x1024xf32, #tpu.memory_space<vmem>>, vector<64x1024xf32>
    tpu.vector_store %arg9[%c0_5, %c0_6], %5 {strides = array<i32>} : memref<64x1024xf32, #tpu.memory_space<vmem>>, vector<64x1024xf32>,
    %c0_7 = arith.constant 0 : index
    %c0_8 = arith.constant 0 : index
    %7 = vector.load %arg5[%c0_7, %c0_8] : memref<1x128xf32, #tpu.memory_space<vmem>>, vector<1x128xf32>
    %c0_9 = arith.constant 0 : index
    %c0_10 = arith.constant 0 : index
    %8 = vector.load %arg6[%c0_9, %c0_10] : memref<1x128xf32, #tpu.memory_space<vmem>>, vector<1x128xf32>
    %cst_11 = arith.constant 0.000000e+00 : f32
    %9 = vector.broadcast %cst_11 : f32 to vector<8x128xf32>
    %cst_12 = arith.constant 0.000000e+00 : f32
    %10 = vector.broadcast %cst_12 : f32 to vector<8x128xf32>
    %cst_13 = arith.constant 0.000000e+00 : f32
    %11 = vector.broadcast %cst_13 : f32 to vector<8x128xf32>
    %cst_14 = arith.constant 0.000000e+00 : f32
    %12 = vector.broadcast %cst_14 : f32 to vector<8x128xf32>
    %13 = tpu.concatenate %9, %11 in 1 : vector<8x128xf32>, vector<8x128xf32> -> vector<8x256xf32>
    %c0_15 = arith.constant 0 : index
    %c0_16 = arith.constant 0 : index
    %14 = vector.load %arg4[%c0_15, %c0_16] : memref<256x1024xf32, #tpu.memory_space<vmem>>, vector<256x1024xf32>
    %cst_17 = arith.constant dense<0.000000e+00> : vector<8x1024xf32>
    %15 = tpu.matmul %13, %14, %cst_17 {dimension_numbers = #tpu.dot_dimension_numbers<[1], [0], [0], [1], [0, 0, 1, 1], [], []>} : vector<8x256xf32>, vector<256x1024xf32>, vector<8x1024xf32> -> vector<8x1024xf32>
    %c0_18 = arith.constant 0 : index
    %c0_19 = arith.constant 0 : index
    %16 = vector.load %arg9[%c0_18, %c0_19] : memref<64x1024xf32, #tpu.memory_space<vmem>>, vector<8x512xf32>
    %17 = vector.extract_strided_slice %15 {offsets = [0, 0], sizes = [8, 512], strides = [1, 1]} : vector<8x1024xf32> to vector<8x512xf32>
    %18 = arith.addf %16, %17 : vector<8x512xf32>
    %c56 = arith.constant 56 : index
    %c512 = arith.constant 512 : index
    %19 = vector.load %arg9[%c56, %c512] : memref<64x1024xf32, #tpu.memory_space<vmem>>, vector<8x512xf32>
    %20 = vector.extract_strided_slice %15 {offsets = [0, 512], sizes = [8, 512], strides = [1, 1]} : vector<8x1024xf32> to vector<8x512xf32>
    %21 = arith.addf %19, %20 : vector<8x512xf32>
    %22 = vector.extract_strided_slice %18 {offsets = [0, 0], sizes = [8, 384], strides = [1, 1]} : vector<8x512xf32> to vector<8x384xf32>
    %23 = arith.negf %22 : vector<8x384xf32>
    %24 = math.exp %23 : vector<8x384xf32>
    %cst_20 = arith.constant 1.000000e+00 : f32
    %25 = vector.broadcast %cst_20 : f32 to vector<8x384xf32>
    %26 = arith.addf %25, %24 : vector<8x384xf32>
    %27 = arith.divf %25, %26 : vector<8x384xf32>
    %28 = vector.extract_strided_slice %27 {offsets = [0, 0], sizes = [8, 128], strides = [1, 1]} : vector<8x384xf32> to vector<8x128xf32>
    %29 = vector.extract_strided_slice %27 {offsets = [0, 128], sizes = [8, 128], strides = [1, 1]} : vector<8x384xf32> to vector<8x128xf32>
    %30 = vector.extract_strided_slice %27 {offsets = [0, 256], sizes = [8, 128], strides = [1, 1]} : vector<8x384xf32> to vector<8x128xf32>
    %31 = vector.extract_strided_slice %18 {offsets = [0, 384], sizes = [8, 128], strides = [1, 1]} : vector<8x512xf32> to vector<8x128xf32>
    %32 = math.tanh %31 : vector<8x128xf32>
    %33 = arith.mulf %29, %10 : vector<8x128xf32>
    %34 = arith.mulf %28, %32 : vector<8x128xf32>
    %35 = arith.addf %33, %34 : vector<8x128xf32>
    %36 = math.tanh %35 : vector<8x128xf32>
    %37 = arith.mulf %30, %36 : vector<8x128xf32>
    %38 = vector.extract_strided_slice %21 {offsets = [0, 0], sizes = [8, 384], strides = [1, 1]} : vector<8x512xf32> to vector<8x384xf32>
    %39 = arith.negf %38 : vector<8x384xf32>
    %40 = math.exp %39 : vector<8x384xf32>
    %cst_21 = arith.constant 1.000000e+00 : f32
    %41 = vector.broadcast %cst_21 : f32 to vector<8x384xf32>
    %42 = arith.addf %41, %40 : vector<8x384xf32>
    %43 = arith.divf %41, %42 : vector<8x384xf32>
    %44 = vector.extract_strided_slice %43 {offsets = [0, 0], sizes = [8, 128], strides = [1, 1]} : vector<8x384xf32> to vector<8x128xf32>
    %45 = vector.extract_strided_slice %43 {offsets = [0, 128], sizes = [8, 128], strides = [1, 1]} : vector<8x384xf32> to vector<8x128xf32>
    %46 = vector.extract_strided_slice %43 {offsets = [0, 256], sizes = [8, 128], strides = [1, 1]} : vector<8x384xf32> to vector<8x128xf32>
    %47 = vector.extract_strided_slice %21 {offsets = [0, 384], sizes = [8, 128], strides = [1, 1]} : vector<8x512xf32> to vector<8x128xf32>
    %48 = math.tanh %47 : vector<8x128xf32>
    %49 = arith.mulf %45, %12 : vector<8x128xf32>
    %50 = arith.mulf %44, %48 : vector<8x128xf32>
    %51 = arith.addf %49, %50 : vector<8x128xf32>
    %52 = math.tanh %51 : vector<8x128xf32>
    %53 = arith.mulf %46, %52 : vector<8x128xf32>
    %54 = vector.broadcast %7 : vector<1x128xf32> to vector<8x128xf32>
    %55 = arith.mulf %37, %54 : vector<8x128xf32>
    %cst_22 = arith.constant dense<0.000000e+00> : vector<8xf32>
    %56 = vector.multi_reduction <add>, %55, %cst_22 [1] : vector<8x128xf32> to vector<8xf32>
    %57 = vector.shape_cast %56 : vector<8xf32> to vector<8x1xf32>
    %c0_23 = arith.constant 0 : index
    %c0_24 = arith.constant 0 : index
    %58 = vector.load %arg10[%c0_23, %c0_24] : memref<8x8xf32, #tpu.memory_space<vmem>>, vector<8x1xf32>
    tpu.vector_store %arg10[%c0_23, %c0_24], %57 {strides = array<i32>} : memref<8x8xf32, #tpu.memory_space<vmem>>, vector<8x1xf32>,
    %59 = vector.broadcast %8 : vector<1x128xf32> to vector<8x128xf32>
    %60 = arith.mulf %53, %59 : vector<8x128xf32>
    %cst_25 = arith.constant dense<0.000000e+00> : vector<8xf32>
    %61 = vector.multi_reduction <add>, %60, %cst_25 [1] : vector<8x128xf32> to vector<8xf32>
    %62 = vector.shape_cast %61 : vector<8xf32> to vector<8x1xf32>
    %c0_26 = arith.constant 0 : index
    %c7 = arith.constant 7 : index
    %63 = vector.load %arg11[%c0_26, %c7] : memref<8x8xf32, #tpu.memory_space<vmem>>, vector<8x1xf32>
    tpu.vector_store %arg11[%c0_26, %c7], %62 {strides = array<i32>} : memref<8x8xf32, #tpu.memory_space<vmem>>, vector<8x1xf32>,
    %64 = tpu.concatenate %37, %53 in 1 : vector<8x128xf32>, vector<8x128xf32> -> vector<8x256xf32>
    %c0_27 = arith.constant 0 : index
    %c0_28 = arith.constant 0 : index
    %65 = vector.load %arg4[%c0_27, %c0_28] : memref<256x1024xf32, #tpu.memory_space<vmem>>, vector<256x1024xf32>
    %cst_29 = arith.constant dense<0.000000e+00> : vector<8x1024xf32>
    %66 = tpu.matmul %64, %65, %cst_29 {dimension_numbers = #tpu.dot_dimension_numbers<[1], [0], [0], [1], [0, 0, 1, 1], [], []>} : vector<8x256xf32>, vector<256x1024xf32>, vector<8x1024xf32> -> vector<8x1024xf32>
    %c8 = arith.constant 8 : index
    %c0_30 = arith.constant 0 : index
    %67 = vector.load %arg9[%c8, %c0_30] : memref<64x1024xf32, #tpu.memory_space<vmem>>, vector<8x512xf32>
    %68 = vector.extract_strided_slice %66 {offsets = [0, 0], sizes = [8, 512], strides = [1, 1]} : vector<8x1024xf32> to vector<8x512xf32>
    %69 = arith.addf %67, %68 : vector<8x512xf32>
    %c48 = arith.constant 48 : index
    %c512_31 = arith.constant 512 : index
    %70 = vector.load %arg9[%c48, %c512_31] : memref<64x1024xf32, #tpu.memory_space<vmem>>, vector<8x512xf32>
    %71 = vector.extract_strided_slice %66 {offsets = [0, 512], sizes = [8, 512], strides = [1, 1]} : vector<8x1024xf32> to vector<8x512xf32>
    %72 = arith.addf %70, %71 : vector<8x512xf32>
    %73 = vector.extract_strided_slice %69 {offsets = [0, 0], sizes = [8, 384], strides = [1, 1]} : vector<8x512xf32> to vector<8x384xf32>
    %74 = arith.negf %73 : vector<8x384xf32>
    %75 = math.exp %74 : vector<8x384xf32>
    %cst_32 = arith.constant 1.000000e+00 : f32
    %76 = vector.broadcast %cst_32 : f32 to vector<8x384xf32>
    %77 = arith.addf %76, %75 : vector<8x384xf32>
    %78 = arith.divf %76, %77 : vector<8x384xf32>
    %79 = vector.extract_strided_slice %78 {offsets = [0, 0], sizes = [8, 128], strides = [1, 1]} : vector<8x384xf32> to vector<8x128xf32>
    %80 = vector.extract_strided_slice %78 {offsets = [0, 128], sizes = [8, 128], strides = [1, 1]} : vector<8x384xf32> to vector<8x128xf32>
    %81 = vector.extract_strided_slice %78 {offsets = [0, 256], sizes = [8, 128], strides = [1, 1]} : vector<8x384xf32> to vector<8x128xf32>
    %82 = vector.extract_strided_slice %69 {offsets = [0, 384], sizes = [8, 128], strides = [1, 1]} : vector<8x512xf32> to vector<8x128xf32>
    %83 = math.tanh %82 : vector<8x128xf32>
    %84 = arith.mulf %80, %35 : vector<8x128xf32>
    %85 = arith.mulf %79, %83 : vector<8x128xf32>
    %86 = arith.addf %84, %85 : vector<8x128xf32>
    %87 = math.tanh %86 : vector<8x128xf32>
    %88 = arith.mulf %81, %87 : vector<8x128xf32>
    %89 = vector.extract_strided_slice %72 {offsets = [0, 0], sizes = [8, 384], strides = [1, 1]} : vector<8x512xf32> to vector<8x384xf32>
    %90 = arith.negf %89 : vector<8x384xf32>
    %91 = math.exp %90 : vector<8x384xf32>
    %cst_33 = arith.constant 1.000000e+00 : f32
    %92 = vector.broadcast %cst_33 : f32 to vector<8x384xf32>
    %93 = arith.addf %92, %91 : vector<8x384xf32>
    %94 = arith.divf %92, %93 : vector<8x384xf32>
    %95 = vector.extract_strided_slice %94 {offsets = [0, 0], sizes = [8, 128], strides = [1, 1]} : vector<8x384xf32> to vector<8x128xf32>
    %96 = vector.extract_strided_slice %94 {offsets = [0, 128], sizes = [8, 128], strides = [1, 1]} : vector<8x384xf32> to vector<8x128xf32>
    %97 = vector.extract_strided_slice %94 {offsets = [0, 256], sizes = [8, 128], strides = [1, 1]} : vector<8x384xf32> to vector<8x128xf32>
    %98 = vector.extract_strided_slice %72 {offsets = [0, 384], sizes = [8, 128], strides = [1, 1]} : vector<8x512xf32> to vector<8x128xf32>
    %99 = math.tanh %98 : vector<8x128xf32>
    %100 = arith.mulf %96, %51 : vector<8x128xf32>
    %101 = arith.mulf %95, %99 : vector<8x128xf32>
    %102 = arith.addf %100, %101 : vector<8x128xf32>
    %103 = math.tanh %102 : vector<8x128xf32>
    %104 = arith.mulf %97, %103 : vector<8x128xf32>
    %105 = vector.broadcast %7 : vector<1x128xf32> to vector<8x128xf32>
    %106 = arith.mulf %88, %105 : vector<8x128xf32>
    %cst_34 = arith.constant dense<0.000000e+00> : vector<8xf32>
    %107 = vector.multi_reduction <add>, %106, %cst_34 [1] : vector<8x128xf32> to vector<8xf32>
    %108 = vector.shape_cast %107 : vector<8xf32> to vector<8x1xf32>
    %c0_35 = arith.constant 0 : index
    %c1 = arith.constant 1 : index
    %109 = vector.load %arg10[%c0_35, %c1] : memref<8x8xf32, #tpu.memory_space<vmem>>, vector<8x1xf32>
    tpu.vector_store %arg10[%c0_35, %c1], %108 {strides = array<i32>} : memref<8x8xf32, #tpu.memory_space<vmem>>, vector<8x1xf32>,
    %110 = vector.broadcast %8 : vector<1x128xf32> to vector<8x128xf32>
    %111 = arith.mulf %104, %110 : vector<8x128xf32>
    %cst_36 = arith.constant dense<0.000000e+00> : vector<8xf32>
    %112 = vector.multi_reduction <add>, %111, %cst_36 [1] : vector<8x128xf32> to vector<8xf32>
    %113 = vector.shape_cast %112 : vector<8xf32> to vector<8x1xf32>
    %c0_37 = arith.constant 0 : index
    %c6 = arith.constant 6 : index
    %114 = vector.load %arg11[%c0_37, %c6] : memref<8x8xf32, #tpu.memory_space<vmem>>, vector<8x1xf32>
    tpu.vector_store %arg11[%c0_37, %c6], %113 {strides = array<i32>} : memref<8x8xf32, #tpu.memory_space<vmem>>, vector<8x1xf32>,
    %115 = tpu.concatenate %88, %104 in 1 : vector<8x128xf32>, vector<8x128xf32> -> vector<8x256xf32>
    %c0_38 = arith.constant 0 : index
    %c0_39 = arith.constant 0 : index
    %116 = vector.load %arg4[%c0_38, %c0_39] : memref<256x1024xf32, #tpu.memory_space<vmem>>, vector<256x1024xf32>
    %cst_40 = arith.constant dense<0.000000e+00> : vector<8x1024xf32>
    %117 = tpu.matmul %115, %116, %cst_40 {dimension_numbers = #tpu.dot_dimension_numbers<[1], [0], [0], [1], [0, 0, 1, 1], [], []>} : vector<8x256xf32>, vector<256x1024xf32>, vector<8x1024xf32> -> vector<8x1024xf32>
    %c16 = arith.constant 16 : index
    %c0_41 = arith.constant 0 : index
    %118 = vector.load %arg9[%c16, %c0_41] : memref<64x1024xf32, #tpu.memory_space<vmem>>, vector<8x512xf32>
    %119 = vector.extract_strided_slice %117 {offsets = [0, 0], sizes = [8, 512], strides = [1, 1]} : vector<8x1024xf32> to vector<8x512xf32>
    %120 = arith.addf %118, %119 : vector<8x512xf32>
    %c40 = arith.constant 40 : index
    %c512_42 = arith.constant 512 : index
    %121 = vector.load %arg9[%c40, %c512_42] : memref<64x1024xf32, #tpu.memory_space<vmem>>, vector<8x512xf32>
    %122 = vector.extract_strided_slice %117 {offsets = [0, 512], sizes = [8, 512], strides = [1, 1]} : vector<8x1024xf32> to vector<8x512xf32>
    %123 = arith.addf %121, %122 : vector<8x512xf32>
    %124 = vector.extract_strided_slice %120 {offsets = [0, 0], sizes = [8, 384], strides = [1, 1]} : vector<8x512xf32> to vector<8x384xf32>
    %125 = arith.negf %124 : vector<8x384xf32>
    %126 = math.exp %125 : vector<8x384xf32>
    %cst_43 = arith.constant 1.000000e+00 : f32
    %127 = vector.broadcast %cst_43 : f32 to vector<8x384xf32>
    %128 = arith.addf %127, %126 : vector<8x384xf32>
    %129 = arith.divf %127, %128 : vector<8x384xf32>
    %130 = vector.extract_strided_slice %129 {offsets = [0, 0], sizes = [8, 128], strides = [1, 1]} : vector<8x384xf32> to vector<8x128xf32>
    %131 = vector.extract_strided_slice %129 {offsets = [0, 128], sizes = [8, 128], strides = [1, 1]} : vector<8x384xf32> to vector<8x128xf32>
    %132 = vector.extract_strided_slice %129 {offsets = [0, 256], sizes = [8, 128], strides = [1, 1]} : vector<8x384xf32> to vector<8x128xf32>
    %133 = vector.extract_strided_slice %120 {offsets = [0, 384], sizes = [8, 128], strides = [1, 1]} : vector<8x512xf32> to vector<8x128xf32>
    %134 = math.tanh %133 : vector<8x128xf32>
    %135 = arith.mulf %131, %86 : vector<8x128xf32>
    %136 = arith.mulf %130, %134 : vector<8x128xf32>
    %137 = arith.addf %135, %136 : vector<8x128xf32>
    %138 = math.tanh %137 : vector<8x128xf32>
    %139 = arith.mulf %132, %138 : vector<8x128xf32>
    %140 = vector.extract_strided_slice %123 {offsets = [0, 0], sizes = [8, 384], strides = [1, 1]} : vector<8x512xf32> to vector<8x384xf32>
    %141 = arith.negf %140 : vector<8x384xf32>
    %142 = math.exp %141 : vector<8x384xf32>
    %cst_44 = arith.constant 1.000000e+00 : f32
    %143 = vector.broadcast %cst_44 : f32 to vector<8x384xf32>
    %144 = arith.addf %143, %142 : vector<8x384xf32>
    %145 = arith.divf %143, %144 : vector<8x384xf32>
    %146 = vector.extract_strided_slice %145 {offsets = [0, 0], sizes = [8, 128], strides = [1, 1]} : vector<8x384xf32> to vector<8x128xf32>
    %147 = vector.extract_strided_slice %145 {offsets = [0, 128], sizes = [8, 128], strides = [1, 1]} : vector<8x384xf32> to vector<8x128xf32>
    %148 = vector.extract_strided_slice %145 {offsets = [0, 256], sizes = [8, 128], strides = [1, 1]} : vector<8x384xf32> to vector<8x128xf32>
    %149 = vector.extract_strided_slice %123 {offsets = [0, 384], sizes = [8, 128], strides = [1, 1]} : vector<8x512xf32> to vector<8x128xf32>
    %150 = math.tanh %149 : vector<8x128xf32>
    %151 = arith.mulf %147, %102 : vector<8x128xf32>
    %152 = arith.mulf %146, %150 : vector<8x128xf32>
    %153 = arith.addf %151, %152 : vector<8x128xf32>
    %154 = math.tanh %153 : vector<8x128xf32>
    %155 = arith.mulf %148, %154 : vector<8x128xf32>
    %156 = vector.broadcast %7 : vector<1x128xf32> to vector<8x128xf32>
    %157 = arith.mulf %139, %156 : vector<8x128xf32>
    %cst_45 = arith.constant dense<0.000000e+00> : vector<8xf32>
    %158 = vector.multi_reduction <add>, %157, %cst_45 [1] : vector<8x128xf32> to vector<8xf32>
    %159 = vector.shape_cast %158 : vector<8xf32> to vector<8x1xf32>
    %c0_46 = arith.constant 0 : index
    %c2 = arith.constant 2 : index
    %160 = vector.load %arg10[%c0_46, %c2] : memref<8x8xf32, #tpu.memory_space<vmem>>, vector<8x1xf32>
    tpu.vector_store %arg10[%c0_46, %c2], %159 {strides = array<i32>} : memref<8x8xf32, #tpu.memory_space<vmem>>, vector<8x1xf32>,
    %161 = vector.broadcast %8 : vector<1x128xf32> to vector<8x128xf32>
    %162 = arith.mulf %155, %161 : vector<8x128xf32>
    %cst_47 = arith.constant dense<0.000000e+00> : vector<8xf32>
    %163 = vector.multi_reduction <add>, %162, %cst_47 [1] : vector<8x128xf32> to vector<8xf32>
    %164 = vector.shape_cast %163 : vector<8xf32> to vector<8x1xf32>
    %c0_48 = arith.constant 0 : index
    %c5 = arith.constant 5 : index
    %165 = vector.load %arg11[%c0_48, %c5] : memref<8x8xf32, #tpu.memory_space<vmem>>, vector<8x1xf32>
    tpu.vector_store %arg11[%c0_48, %c5], %164 {strides = array<i32>} : memref<8x8xf32, #tpu.memory_space<vmem>>, vector<8x1xf32>,
    %166 = tpu.concatenate %139, %155 in 1 : vector<8x128xf32>, vector<8x128xf32> -> vector<8x256xf32>
    %c0_49 = arith.constant 0 : index
    %c0_50 = arith.constant 0 : index
    %167 = vector.load %arg4[%c0_49, %c0_50] : memref<256x1024xf32, #tpu.memory_space<vmem>>, vector<256x1024xf32>
    %cst_51 = arith.constant dense<0.000000e+00> : vector<8x1024xf32>
    %168 = tpu.matmul %166, %167, %cst_51 {dimension_numbers = #tpu.dot_dimension_numbers<[1], [0], [0], [1], [0, 0, 1, 1], [], []>} : vector<8x256xf32>, vector<256x1024xf32>, vector<8x1024xf32> -> vector<8x1024xf32>
    %c24 = arith.constant 24 : index
    %c0_52 = arith.constant 0 : index
    %169 = vector.load %arg9[%c24, %c0_52] : memref<64x1024xf32, #tpu.memory_space<vmem>>, vector<8x512xf32>
    %170 = vector.extract_strided_slice %168 {offsets = [0, 0], sizes = [8, 512], strides = [1, 1]} : vector<8x1024xf32> to vector<8x512xf32>
    %171 = arith.addf %169, %170 : vector<8x512xf32>
    %c32 = arith.constant 32 : index
    %c512_53 = arith.constant 512 : index
    %172 = vector.load %arg9[%c32, %c512_53] : memref<64x1024xf32, #tpu.memory_space<vmem>>, vector<8x512xf32>
    %173 = vector.extract_strided_slice %168 {offsets = [0, 512], sizes = [8, 512], strides = [1, 1]} : vector<8x1024xf32> to vector<8x512xf32>
    %174 = arith.addf %172, %173 : vector<8x512xf32>
    %175 = vector.extract_strided_slice %171 {offsets = [0, 0], sizes = [8, 384], strides = [1, 1]} : vector<8x512xf32> to vector<8x384xf32>
    %176 = arith.negf %175 : vector<8x384xf32>
    %177 = math.exp %176 : vector<8x384xf32>
    %cst_54 = arith.constant 1.000000e+00 : f32
    %178 = vector.broadcast %cst_54 : f32 to vector<8x384xf32>
    %179 = arith.addf %178, %177 : vector<8x384xf32>
    %180 = arith.divf %178, %179 : vector<8x384xf32>
    %181 = vector.extract_strided_slice %180 {offsets = [0, 0], sizes = [8, 128], strides = [1, 1]} : vector<8x384xf32> to vector<8x128xf32>
    %182 = vector.extract_strided_slice %180 {offsets = [0, 128], sizes = [8, 128], strides = [1, 1]} : vector<8x384xf32> to vector<8x128xf32>
    %183 = vector.extract_strided_slice %180 {offsets = [0, 256], sizes = [8, 128], strides = [1, 1]} : vector<8x384xf32> to vector<8x128xf32>
    %184 = vector.extract_strided_slice %171 {offsets = [0, 384], sizes = [8, 128], strides = [1, 1]} : vector<8x512xf32> to vector<8x128xf32>
    %185 = math.tanh %184 : vector<8x128xf32>
    %186 = arith.mulf %182, %137 : vector<8x128xf32>
    %187 = arith.mulf %181, %185 : vector<8x128xf32>
    %188 = arith.addf %186, %187 : vector<8x128xf32>
    %189 = math.tanh %188 : vector<8x128xf32>
    %190 = arith.mulf %183, %189 : vector<8x128xf32>
    %191 = vector.extract_strided_slice %174 {offsets = [0, 0], sizes = [8, 384], strides = [1, 1]} : vector<8x512xf32> to vector<8x384xf32>
    %192 = arith.negf %191 : vector<8x384xf32>
    %193 = math.exp %192 : vector<8x384xf32>
    %cst_55 = arith.constant 1.000000e+00 : f32
    %194 = vector.broadcast %cst_55 : f32 to vector<8x384xf32>
    %195 = arith.addf %194, %193 : vector<8x384xf32>
    %196 = arith.divf %194, %195 : vector<8x384xf32>
    %197 = vector.extract_strided_slice %196 {offsets = [0, 0], sizes = [8, 128], strides = [1, 1]} : vector<8x384xf32> to vector<8x128xf32>
    %198 = vector.extract_strided_slice %196 {offsets = [0, 128], sizes = [8, 128], strides = [1, 1]} : vector<8x384xf32> to vector<8x128xf32>
    %199 = vector.extract_strided_slice %196 {offsets = [0, 256], sizes = [8, 128], strides = [1, 1]} : vector<8x384xf32> to vector<8x128xf32>
    %200 = vector.extract_strided_slice %174 {offsets = [0, 384], sizes = [8, 128], strides = [1, 1]} : vector<8x512xf32> to vector<8x128xf32>
    %201 = math.tanh %200 : vector<8x128xf32>
    %202 = arith.mulf %198, %153 : vector<8x128xf32>
    %203 = arith.mulf %197, %201 : vector<8x128xf32>
    %204 = arith.addf %202, %203 : vector<8x128xf32>
    %205 = math.tanh %204 : vector<8x128xf32>
    %206 = arith.mulf %199, %205 : vector<8x128xf32>
    %207 = vector.broadcast %7 : vector<1x128xf32> to vector<8x128xf32>
    %208 = arith.mulf %190, %207 : vector<8x128xf32>
    %cst_56 = arith.constant dense<0.000000e+00> : vector<8xf32>
    %209 = vector.multi_reduction <add>, %208, %cst_56 [1] : vector<8x128xf32> to vector<8xf32>
    %210 = vector.shape_cast %209 : vector<8xf32> to vector<8x1xf32>
    %c0_57 = arith.constant 0 : index
    %c3 = arith.constant 3 : index
    %211 = vector.load %arg10[%c0_57, %c3] : memref<8x8xf32, #tpu.memory_space<vmem>>, vector<8x1xf32>
    tpu.vector_store %arg10[%c0_57, %c3], %210 {strides = array<i32>} : memref<8x8xf32, #tpu.memory_space<vmem>>, vector<8x1xf32>,
    %212 = vector.broadcast %8 : vector<1x128xf32> to vector<8x128xf32>
    %213 = arith.mulf %206, %212 : vector<8x128xf32>
    %cst_58 = arith.constant dense<0.000000e+00> : vector<8xf32>
    %214 = vector.multi_reduction <add>, %213, %cst_58 [1] : vector<8x128xf32> to vector<8xf32>
    %215 = vector.shape_cast %214 : vector<8xf32> to vector<8x1xf32>
    %c0_59 = arith.constant 0 : index
    %c4 = arith.constant 4 : index
    %216 = vector.load %arg11[%c0_59, %c4] : memref<8x8xf32, #tpu.memory_space<vmem>>, vector<8x1xf32>
    tpu.vector_store %arg11[%c0_59, %c4], %215 {strides = array<i32>} : memref<8x8xf32, #tpu.memory_space<vmem>>, vector<8x1xf32>,
    %217 = tpu.concatenate %190, %206 in 1 : vector<8x128xf32>, vector<8x128xf32> -> vector<8x256xf32>
    %c0_60 = arith.constant 0 : index
    %c0_61 = arith.constant 0 : index
    %218 = vector.load %arg4[%c0_60, %c0_61] : memref<256x1024xf32, #tpu.memory_space<vmem>>, vector<256x1024xf32>
    %cst_62 = arith.constant dense<0.000000e+00> : vector<8x1024xf32>
    %219 = tpu.matmul %217, %218, %cst_62 {dimension_numbers = #tpu.dot_dimension_numbers<[1], [0], [0], [1], [0, 0, 1, 1], [], []>} : vector<8x256xf32>, vector<256x1024xf32>, vector<8x1024xf32> -> vector<8x1024xf32>
    %c32_63 = arith.constant 32 : index
    %c0_64 = arith.constant 0 : index
    %220 = vector.load %arg9[%c32_63, %c0_64] : memref<64x1024xf32, #tpu.memory_space<vmem>>, vector<8x512xf32>
    %221 = vector.extract_strided_slice %219 {offsets = [0, 0], sizes = [8, 512], strides = [1, 1]} : vector<8x1024xf32> to vector<8x512xf32>
    %222 = arith.addf %220, %221 : vector<8x512xf32>
    %c24_65 = arith.constant 24 : index
    %c512_66 = arith.constant 512 : index
    %223 = vector.load %arg9[%c24_65, %c512_66] : memref<64x1024xf32, #tpu.memory_space<vmem>>, vector<8x512xf32>
    %224 = vector.extract_strided_slice %219 {offsets = [0, 512], sizes = [8, 512], strides = [1, 1]} : vector<8x1024xf32> to vector<8x512xf32>
    %225 = arith.addf %223, %224 : vector<8x512xf32>
    %226 = vector.extract_strided_slice %222 {offsets = [0, 0], sizes = [8, 384], strides = [1, 1]} : vector<8x512xf32> to vector<8x384xf32>
    %227 = arith.negf %226 : vector<8x384xf32>
    %228 = math.exp %227 : vector<8x384xf32>
    %cst_67 = arith.constant 1.000000e+00 : f32
    %229 = vector.broadcast %cst_67 : f32 to vector<8x384xf32>
    %230 = arith.addf %229, %228 : vector<8x384xf32>
    %231 = arith.divf %229, %230 : vector<8x384xf32>
    %232 = vector.extract_strided_slice %231 {offsets = [0, 0], sizes = [8, 128], strides = [1, 1]} : vector<8x384xf32> to vector<8x128xf32>
    %233 = vector.extract_strided_slice %231 {offsets = [0, 128], sizes = [8, 128], strides = [1, 1]} : vector<8x384xf32> to vector<8x128xf32>
    %234 = vector.extract_strided_slice %231 {offsets = [0, 256], sizes = [8, 128], strides = [1, 1]} : vector<8x384xf32> to vector<8x128xf32>
    %235 = vector.extract_strided_slice %222 {offsets = [0, 384], sizes = [8, 128], strides = [1, 1]} : vector<8x512xf32> to vector<8x128xf32>
    %236 = math.tanh %235 : vector<8x128xf32>
    %237 = arith.mulf %233, %188 : vector<8x128xf32>
    %238 = arith.mulf %232, %236 : vector<8x128xf32>
    %239 = arith.addf %237, %238 : vector<8x128xf32>
    %240 = math.tanh %239 : vector<8x128xf32>
    %241 = arith.mulf %234, %240 : vector<8x128xf32>
    %242 = vector.extract_strided_slice %225 {offsets = [0, 0], sizes = [8, 384], strides = [1, 1]} : vector<8x512xf32> to vector<8x384xf32>
    %243 = arith.negf %242 : vector<8x384xf32>
    %244 = math.exp %243 : vector<8x384xf32>
    %cst_68 = arith.constant 1.000000e+00 : f32
    %245 = vector.broadcast %cst_68 : f32 to vector<8x384xf32>
    %246 = arith.addf %245, %244 : vector<8x384xf32>
    %247 = arith.divf %245, %246 : vector<8x384xf32>
    %248 = vector.extract_strided_slice %247 {offsets = [0, 0], sizes = [8, 128], strides = [1, 1]} : vector<8x384xf32> to vector<8x128xf32>
    %249 = vector.extract_strided_slice %247 {offsets = [0, 128], sizes = [8, 128], strides = [1, 1]} : vector<8x384xf32> to vector<8x128xf32>
    %250 = vector.extract_strided_slice %247 {offsets = [0, 256], sizes = [8, 128], strides = [1, 1]} : vector<8x384xf32> to vector<8x128xf32>
    %251 = vector.extract_strided_slice %225 {offsets = [0, 384], sizes = [8, 128], strides = [1, 1]} : vector<8x512xf32> to vector<8x128xf32>
    %252 = math.tanh %251 : vector<8x128xf32>
    %253 = arith.mulf %249, %204 : vector<8x128xf32>
    %254 = arith.mulf %248, %252 : vector<8x128xf32>
    %255 = arith.addf %253, %254 : vector<8x128xf32>
    %256 = math.tanh %255 : vector<8x128xf32>
    %257 = arith.mulf %250, %256 : vector<8x128xf32>
    %258 = vector.broadcast %7 : vector<1x128xf32> to vector<8x128xf32>
    %259 = arith.mulf %241, %258 : vector<8x128xf32>
    %cst_69 = arith.constant dense<0.000000e+00> : vector<8xf32>
    %260 = vector.multi_reduction <add>, %259, %cst_69 [1] : vector<8x128xf32> to vector<8xf32>
    %261 = vector.shape_cast %260 : vector<8xf32> to vector<8x1xf32>
    %c0_70 = arith.constant 0 : index
    %c4_71 = arith.constant 4 : index
    %262 = vector.load %arg10[%c0_70, %c4_71] : memref<8x8xf32, #tpu.memory_space<vmem>>, vector<8x1xf32>
    tpu.vector_store %arg10[%c0_70, %c4_71], %261 {strides = array<i32>} : memref<8x8xf32, #tpu.memory_space<vmem>>, vector<8x1xf32>,
    %263 = vector.broadcast %8 : vector<1x128xf32> to vector<8x128xf32>
    %264 = arith.mulf %257, %263 : vector<8x128xf32>
    %cst_72 = arith.constant dense<0.000000e+00> : vector<8xf32>
    %265 = vector.multi_reduction <add>, %264, %cst_72 [1] : vector<8x128xf32> to vector<8xf32>
    %266 = vector.shape_cast %265 : vector<8xf32> to vector<8x1xf32>
    %c0_73 = arith.constant 0 : index
    %c3_74 = arith.constant 3 : index
    %267 = vector.load %arg11[%c0_73, %c3_74] : memref<8x8xf32, #tpu.memory_space<vmem>>, vector<8x1xf32>
    tpu.vector_store %arg11[%c0_73, %c3_74], %266 {strides = array<i32>} : memref<8x8xf32, #tpu.memory_space<vmem>>, vector<8x1xf32>,
    %268 = tpu.concatenate %241, %257 in 1 : vector<8x128xf32>, vector<8x128xf32> -> vector<8x256xf32>
    %c0_75 = arith.constant 0 : index
    %c0_76 = arith.constant 0 : index
    %269 = vector.load %arg4[%c0_75, %c0_76] : memref<256x1024xf32, #tpu.memory_space<vmem>>, vector<256x1024xf32>
    %cst_77 = arith.constant dense<0.000000e+00> : vector<8x1024xf32>
    %270 = tpu.matmul %268, %269, %cst_77 {dimension_numbers = #tpu.dot_dimension_numbers<[1], [0], [0], [1], [0, 0, 1, 1], [], []>} : vector<8x256xf32>, vector<256x1024xf32>, vector<8x1024xf32> -> vector<8x1024xf32>
    %c40_78 = arith.constant 40 : index
    %c0_79 = arith.constant 0 : index
    %271 = vector.load %arg9[%c40_78, %c0_79] : memref<64x1024xf32, #tpu.memory_space<vmem>>, vector<8x512xf32>
    %272 = vector.extract_strided_slice %270 {offsets = [0, 0], sizes = [8, 512], strides = [1, 1]} : vector<8x1024xf32> to vector<8x512xf32>
    %273 = arith.addf %271, %272 : vector<8x512xf32>
    %c16_80 = arith.constant 16 : index
    %c512_81 = arith.constant 512 : index
    %274 = vector.load %arg9[%c16_80, %c512_81] : memref<64x1024xf32, #tpu.memory_space<vmem>>, vector<8x512xf32>
    %275 = vector.extract_strided_slice %270 {offsets = [0, 512], sizes = [8, 512], strides = [1, 1]} : vector<8x1024xf32> to vector<8x512xf32>
    %276 = arith.addf %274, %275 : vector<8x512xf32>
    %277 = vector.extract_strided_slice %273 {offsets = [0, 0], sizes = [8, 384], strides = [1, 1]} : vector<8x512xf32> to vector<8x384xf32>
    %278 = arith.negf %277 : vector<8x384xf32>
    %279 = math.exp %278 : vector<8x384xf32>
    %cst_82 = arith.constant 1.000000e+00 : f32
    %280 = vector.broadcast %cst_82 : f32 to vector<8x384xf32>
    %281 = arith.addf %280, %279 : vector<8x384xf32>
    %282 = arith.divf %280, %281 : vector<8x384xf32>
    %283 = vector.extract_strided_slice %282 {offsets = [0, 0], sizes = [8, 128], strides = [1, 1]} : vector<8x384xf32> to vector<8x128xf32>
    %284 = vector.extract_strided_slice %282 {offsets = [0, 128], sizes = [8, 128], strides = [1, 1]} : vector<8x384xf32> to vector<8x128xf32>
    %285 = vector.extract_strided_slice %282 {offsets = [0, 256], sizes = [8, 128], strides = [1, 1]} : vector<8x384xf32> to vector<8x128xf32>
    %286 = vector.extract_strided_slice %273 {offsets = [0, 384], sizes = [8, 128], strides = [1, 1]} : vector<8x512xf32> to vector<8x128xf32>
    %287 = math.tanh %286 : vector<8x128xf32>
    %288 = arith.mulf %284, %239 : vector<8x128xf32>
    %289 = arith.mulf %283, %287 : vector<8x128xf32>
    %290 = arith.addf %288, %289 : vector<8x128xf32>
    %291 = math.tanh %290 : vector<8x128xf32>
    %292 = arith.mulf %285, %291 : vector<8x128xf32>
    %293 = vector.extract_strided_slice %276 {offsets = [0, 0], sizes = [8, 384], strides = [1, 1]} : vector<8x512xf32> to vector<8x384xf32>
    %294 = arith.negf %293 : vector<8x384xf32>
    %295 = math.exp %294 : vector<8x384xf32>
    %cst_83 = arith.constant 1.000000e+00 : f32
    %296 = vector.broadcast %cst_83 : f32 to vector<8x384xf32>
    %297 = arith.addf %296, %295 : vector<8x384xf32>
    %298 = arith.divf %296, %297 : vector<8x384xf32>
    %299 = vector.extract_strided_slice %298 {offsets = [0, 0], sizes = [8, 128], strides = [1, 1]} : vector<8x384xf32> to vector<8x128xf32>
    %300 = vector.extract_strided_slice %298 {offsets = [0, 128], sizes = [8, 128], strides = [1, 1]} : vector<8x384xf32> to vector<8x128xf32>
    %301 = vector.extract_strided_slice %298 {offsets = [0, 256], sizes = [8, 128], strides = [1, 1]} : vector<8x384xf32> to vector<8x128xf32>
    %302 = vector.extract_strided_slice %276 {offsets = [0, 384], sizes = [8, 128], strides = [1, 1]} : vector<8x512xf32> to vector<8x128xf32>
    %303 = math.tanh %302 : vector<8x128xf32>
    %304 = arith.mulf %300, %255 : vector<8x128xf32>
    %305 = arith.mulf %299, %303 : vector<8x128xf32>
    %306 = arith.addf %304, %305 : vector<8x128xf32>
    %307 = math.tanh %306 : vector<8x128xf32>
    %308 = arith.mulf %301, %307 : vector<8x128xf32>
    %309 = vector.broadcast %7 : vector<1x128xf32> to vector<8x128xf32>
    %310 = arith.mulf %292, %309 : vector<8x128xf32>
    %cst_84 = arith.constant dense<0.000000e+00> : vector<8xf32>
    %311 = vector.multi_reduction <add>, %310, %cst_84 [1] : vector<8x128xf32> to vector<8xf32>
    %312 = vector.shape_cast %311 : vector<8xf32> to vector<8x1xf32>
    %c0_85 = arith.constant 0 : index
    %c5_86 = arith.constant 5 : index
    %313 = vector.load %arg10[%c0_85, %c5_86] : memref<8x8xf32, #tpu.memory_space<vmem>>, vector<8x1xf32>
    tpu.vector_store %arg10[%c0_85, %c5_86], %312 {strides = array<i32>} : memref<8x8xf32, #tpu.memory_space<vmem>>, vector<8x1xf32>,
    %314 = vector.broadcast %8 : vector<1x128xf32> to vector<8x128xf32>
    %315 = arith.mulf %308, %314 : vector<8x128xf32>
    %cst_87 = arith.constant dense<0.000000e+00> : vector<8xf32>
    %316 = vector.multi_reduction <add>, %315, %cst_87 [1] : vector<8x128xf32> to vector<8xf32>
    %317 = vector.shape_cast %316 : vector<8xf32> to vector<8x1xf32>
    %c0_88 = arith.constant 0 : index
    %c2_89 = arith.constant 2 : index
    %318 = vector.load %arg11[%c0_88, %c2_89] : memref<8x8xf32, #tpu.memory_space<vmem>>, vector<8x1xf32>
    tpu.vector_store %arg11[%c0_88, %c2_89], %317 {strides = array<i32>} : memref<8x8xf32, #tpu.memory_space<vmem>>, vector<8x1xf32>,
    %319 = tpu.concatenate %292, %308 in 1 : vector<8x128xf32>, vector<8x128xf32> -> vector<8x256xf32>
    %c0_90 = arith.constant 0 : index
    %c0_91 = arith.constant 0 : index
    %320 = vector.load %arg4[%c0_90, %c0_91] : memref<256x1024xf32, #tpu.memory_space<vmem>>, vector<256x1024xf32>
    %cst_92 = arith.constant dense<0.000000e+00> : vector<8x1024xf32>
    %321 = tpu.matmul %319, %320, %cst_92 {dimension_numbers = #tpu.dot_dimension_numbers<[1], [0], [0], [1], [0, 0, 1, 1], [], []>} : vector<8x256xf32>, vector<256x1024xf32>, vector<8x1024xf32> -> vector<8x1024xf32>
    %c48_93 = arith.constant 48 : index
    %c0_94 = arith.constant 0 : index
    %322 = vector.load %arg9[%c48_93, %c0_94] : memref<64x1024xf32, #tpu.memory_space<vmem>>, vector<8x512xf32>
    %323 = vector.extract_strided_slice %321 {offsets = [0, 0], sizes = [8, 512], strides = [1, 1]} : vector<8x1024xf32> to vector<8x512xf32>
    %324 = arith.addf %322, %323 : vector<8x512xf32>
    %c8_95 = arith.constant 8 : index
    %c512_96 = arith.constant 512 : index
    %325 = vector.load %arg9[%c8_95, %c512_96] : memref<64x1024xf32, #tpu.memory_space<vmem>>, vector<8x512xf32>
    %326 = vector.extract_strided_slice %321 {offsets = [0, 512], sizes = [8, 512], strides = [1, 1]} : vector<8x1024xf32> to vector<8x512xf32>
    %327 = arith.addf %325, %326 : vector<8x512xf32>
    %328 = vector.extract_strided_slice %324 {offsets = [0, 0], sizes = [8, 384], strides = [1, 1]} : vector<8x512xf32> to vector<8x384xf32>
    %329 = arith.negf %328 : vector<8x384xf32>
    %330 = math.exp %329 : vector<8x384xf32>
    %cst_97 = arith.constant 1.000000e+00 : f32
    %331 = vector.broadcast %cst_97 : f32 to vector<8x384xf32>
    %332 = arith.addf %331, %330 : vector<8x384xf32>
    %333 = arith.divf %331, %332 : vector<8x384xf32>
    %334 = vector.extract_strided_slice %333 {offsets = [0, 0], sizes = [8, 128], strides = [1, 1]} : vector<8x384xf32> to vector<8x128xf32>
    %335 = vector.extract_strided_slice %333 {offsets = [0, 128], sizes = [8, 128], strides = [1, 1]} : vector<8x384xf32> to vector<8x128xf32>
    %336 = vector.extract_strided_slice %333 {offsets = [0, 256], sizes = [8, 128], strides = [1, 1]} : vector<8x384xf32> to vector<8x128xf32>
    %337 = vector.extract_strided_slice %324 {offsets = [0, 384], sizes = [8, 128], strides = [1, 1]} : vector<8x512xf32> to vector<8x128xf32>
    %338 = math.tanh %337 : vector<8x128xf32>
    %339 = arith.mulf %335, %290 : vector<8x128xf32>
    %340 = arith.mulf %334, %338 : vector<8x128xf32>
    %341 = arith.addf %339, %340 : vector<8x128xf32>
    %342 = math.tanh %341 : vector<8x128xf32>
    %343 = arith.mulf %336, %342 : vector<8x128xf32>
    %344 = vector.extract_strided_slice %327 {offsets = [0, 0], sizes = [8, 384], strides = [1, 1]} : vector<8x512xf32> to vector<8x384xf32>
    %345 = arith.negf %344 : vector<8x384xf32>
    %346 = math.exp %345 : vector<8x384xf32>
    %cst_98 = arith.constant 1.000000e+00 : f32
    %347 = vector.broadcast %cst_98 : f32 to vector<8x384xf32>
    %348 = arith.addf %347, %346 : vector<8x384xf32>
    %349 = arith.divf %347, %348 : vector<8x384xf32>
    %350 = vector.extract_strided_slice %349 {offsets = [0, 0], sizes = [8, 128], strides = [1, 1]} : vector<8x384xf32> to vector<8x128xf32>
    %351 = vector.extract_strided_slice %349 {offsets = [0, 128], sizes = [8, 128], strides = [1, 1]} : vector<8x384xf32> to vector<8x128xf32>
    %352 = vector.extract_strided_slice %349 {offsets = [0, 256], sizes = [8, 128], strides = [1, 1]} : vector<8x384xf32> to vector<8x128xf32>
    %353 = vector.extract_strided_slice %327 {offsets = [0, 384], sizes = [8, 128], strides = [1, 1]} : vector<8x512xf32> to vector<8x128xf32>
    %354 = math.tanh %353 : vector<8x128xf32>
    %355 = arith.mulf %351, %306 : vector<8x128xf32>
    %356 = arith.mulf %350, %354 : vector<8x128xf32>
    %357 = arith.addf %355, %356 : vector<8x128xf32>
    %358 = math.tanh %357 : vector<8x128xf32>
    %359 = arith.mulf %352, %358 : vector<8x128xf32>
    %360 = vector.broadcast %7 : vector<1x128xf32> to vector<8x128xf32>
    %361 = arith.mulf %343, %360 : vector<8x128xf32>
    %cst_99 = arith.constant dense<0.000000e+00> : vector<8xf32>
    %362 = vector.multi_reduction <add>, %361, %cst_99 [1] : vector<8x128xf32> to vector<8xf32>
    %363 = vector.shape_cast %362 : vector<8xf32> to vector<8x1xf32>
    %c0_100 = arith.constant 0 : index
    %c6_101 = arith.constant 6 : index
    %364 = vector.load %arg10[%c0_100, %c6_101] : memref<8x8xf32, #tpu.memory_space<vmem>>, vector<8x1xf32>
    tpu.vector_store %arg10[%c0_100, %c6_101], %363 {strides = array<i32>} : memref<8x8xf32, #tpu.memory_space<vmem>>, vector<8x1xf32>,
    %365 = vector.broadcast %8 : vector<1x128xf32> to vector<8x128xf32>
    %366 = arith.mulf %359, %365 : vector<8x128xf32>
    %cst_102 = arith.constant dense<0.000000e+00> : vector<8xf32>
    %367 = vector.multi_reduction <add>, %366, %cst_102 [1] : vector<8x128xf32> to vector<8xf32>
    %368 = vector.shape_cast %367 : vector<8xf32> to vector<8x1xf32>
    %c0_103 = arith.constant 0 : index
    %c1_104 = arith.constant 1 : index
    %369 = vector.load %arg11[%c0_103, %c1_104] : memref<8x8xf32, #tpu.memory_space<vmem>>, vector<8x1xf32>
    tpu.vector_store %arg11[%c0_103, %c1_104], %368 {strides = array<i32>} : memref<8x8xf32, #tpu.memory_space<vmem>>, vector<8x1xf32>,
    %370 = tpu.concatenate %343, %359 in 1 : vector<8x128xf32>, vector<8x128xf32> -> vector<8x256xf32>
    %c0_105 = arith.constant 0 : index
    %c0_106 = arith.constant 0 : index
    %371 = vector.load %arg4[%c0_105, %c0_106] : memref<256x1024xf32, #tpu.memory_space<vmem>>, vector<256x1024xf32>
    %cst_107 = arith.constant dense<0.000000e+00> : vector<8x1024xf32>
    %372 = tpu.matmul %370, %371, %cst_107 {dimension_numbers = #tpu.dot_dimension_numbers<[1], [0], [0], [1], [0, 0, 1, 1], [], []>} : vector<8x256xf32>, vector<256x1024xf32>, vector<8x1024xf32> -> vector<8x1024xf32>
    %c56_108 = arith.constant 56 : index
    %c0_109 = arith.constant 0 : index
    %373 = vector.load %arg9[%c56_108, %c0_109] : memref<64x1024xf32, #tpu.memory_space<vmem>>, vector<8x512xf32>
    %374 = vector.extract_strided_slice %372 {offsets = [0, 0], sizes = [8, 512], strides = [1, 1]} : vector<8x1024xf32> to vector<8x512xf32>
    %375 = arith.addf %373, %374 : vector<8x512xf32>
    %c0_110 = arith.constant 0 : index
    %c512_111 = arith.constant 512 : index
    %376 = vector.load %arg9[%c0_110, %c512_111] : memref<64x1024xf32, #tpu.memory_space<vmem>>, vector<8x512xf32>
    %377 = vector.extract_strided_slice %372 {offsets = [0, 512], sizes = [8, 512], strides = [1, 1]} : vector<8x1024xf32> to vector<8x512xf32>
    %378 = arith.addf %376, %377 : vector<8x512xf32>
    %379 = vector.extract_strided_slice %375 {offsets = [0, 0], sizes = [8, 384], strides = [1, 1]} : vector<8x512xf32> to vector<8x384xf32>
    %380 = arith.negf %379 : vector<8x384xf32>
    %381 = math.exp %380 : vector<8x384xf32>
    %cst_112 = arith.constant 1.000000e+00 : f32
    %382 = vector.broadcast %cst_112 : f32 to vector<8x384xf32>
    %383 = arith.addf %382, %381 : vector<8x384xf32>
    %384 = arith.divf %382, %383 : vector<8x384xf32>
    %385 = vector.extract_strided_slice %384 {offsets = [0, 0], sizes = [8, 128], strides = [1, 1]} : vector<8x384xf32> to vector<8x128xf32>
    %386 = vector.extract_strided_slice %384 {offsets = [0, 128], sizes = [8, 128], strides = [1, 1]} : vector<8x384xf32> to vector<8x128xf32>
    %387 = vector.extract_strided_slice %384 {offsets = [0, 256], sizes = [8, 128], strides = [1, 1]} : vector<8x384xf32> to vector<8x128xf32>
    %388 = vector.extract_strided_slice %375 {offsets = [0, 384], sizes = [8, 128], strides = [1, 1]} : vector<8x512xf32> to vector<8x128xf32>
    %389 = math.tanh %388 : vector<8x128xf32>
    %390 = arith.mulf %386, %341 : vector<8x128xf32>
    %391 = arith.mulf %385, %389 : vector<8x128xf32>
    %392 = arith.addf %390, %391 : vector<8x128xf32>
    %393 = math.tanh %392 : vector<8x128xf32>
    %394 = arith.mulf %387, %393 : vector<8x128xf32>
    %395 = vector.extract_strided_slice %378 {offsets = [0, 0], sizes = [8, 384], strides = [1, 1]} : vector<8x512xf32> to vector<8x384xf32>
    %396 = arith.negf %395 : vector<8x384xf32>
    %397 = math.exp %396 : vector<8x384xf32>
    %cst_113 = arith.constant 1.000000e+00 : f32
    %398 = vector.broadcast %cst_113 : f32 to vector<8x384xf32>
    %399 = arith.addf %398, %397 : vector<8x384xf32>
    %400 = arith.divf %398, %399 : vector<8x384xf32>
    %401 = vector.extract_strided_slice %400 {offsets = [0, 0], sizes = [8, 128], strides = [1, 1]} : vector<8x384xf32> to vector<8x128xf32>
    %402 = vector.extract_strided_slice %400 {offsets = [0, 128], sizes = [8, 128], strides = [1, 1]} : vector<8x384xf32> to vector<8x128xf32>
    %403 = vector.extract_strided_slice %400 {offsets = [0, 256], sizes = [8, 128], strides = [1, 1]} : vector<8x384xf32> to vector<8x128xf32>
    %404 = vector.extract_strided_slice %378 {offsets = [0, 384], sizes = [8, 128], strides = [1, 1]} : vector<8x512xf32> to vector<8x128xf32>
    %405 = math.tanh %404 : vector<8x128xf32>
    %406 = arith.mulf %402, %357 : vector<8x128xf32>
    %407 = arith.mulf %401, %405 : vector<8x128xf32>
    %408 = arith.addf %406, %407 : vector<8x128xf32>
    %409 = math.tanh %408 : vector<8x128xf32>
    %410 = arith.mulf %403, %409 : vector<8x128xf32>
    %411 = vector.broadcast %7 : vector<1x128xf32> to vector<8x128xf32>
    %412 = arith.mulf %394, %411 : vector<8x128xf32>
    %cst_114 = arith.constant dense<0.000000e+00> : vector<8xf32>
    %413 = vector.multi_reduction <add>, %412, %cst_114 [1] : vector<8x128xf32> to vector<8xf32>
    %414 = vector.shape_cast %413 : vector<8xf32> to vector<8x1xf32>
    %c0_115 = arith.constant 0 : index
    %c7_116 = arith.constant 7 : index
    %415 = vector.load %arg10[%c0_115, %c7_116] : memref<8x8xf32, #tpu.memory_space<vmem>>, vector<8x1xf32>
    tpu.vector_store %arg10[%c0_115, %c7_116], %414 {strides = array<i32>} : memref<8x8xf32, #tpu.memory_space<vmem>>, vector<8x1xf32>,
    %416 = vector.broadcast %8 : vector<1x128xf32> to vector<8x128xf32>
    %417 = arith.mulf %410, %416 : vector<8x128xf32>
    %cst_117 = arith.constant dense<0.000000e+00> : vector<8xf32>
    %418 = vector.multi_reduction <add>, %417, %cst_117 [1] : vector<8x128xf32> to vector<8xf32>
    %419 = vector.shape_cast %418 : vector<8xf32> to vector<8x1xf32>
    %c0_118 = arith.constant 0 : index
    %c0_119 = arith.constant 0 : index
    %420 = vector.load %arg11[%c0_118, %c0_119] : memref<8x8xf32, #tpu.memory_space<vmem>>, vector<8x1xf32>
    tpu.vector_store %arg11[%c0_118, %c0_119], %419 {strides = array<i32>} : memref<8x8xf32, #tpu.memory_space<vmem>>, vector<8x1xf32>,
    %c0_120 = arith.constant 0 : index
    %c0_121 = arith.constant 0 : index
    %421 = vector.load %arg10[%c0_120, %c0_121] : memref<8x8xf32, #tpu.memory_space<vmem>>, vector<8x8xf32>
    %c0_122 = arith.constant 0 : index
    %c0_123 = arith.constant 0 : index
    %422 = vector.load %arg11[%c0_122, %c0_123] : memref<8x8xf32, #tpu.memory_space<vmem>>, vector<8x8xf32>
    %423 = arith.addf %421, %422 : vector<8x8xf32>
    %c0_124 = arith.constant 0 : index
    %c0_125 = arith.constant 0 : index
    %424 = memref.load %arg7[%c0_124, %c0_125] : memref<1x1xf32, #tpu.memory_space<smem>>
    %425 = vector.broadcast %424 : f32 to vector<8x8xf32>
    %426 = arith.addf %423, %425 : vector<8x8xf32>
    %427 = arith.negf %426 : vector<8x8xf32>
    %428 = math.exp %427 : vector<8x8xf32>
    %cst_126 = arith.constant 1.000000e+00 : f32
    %429 = vector.broadcast %cst_126 : f32 to vector<8x8xf32>
    %430 = arith.addf %429, %428 : vector<8x8xf32>
    %431 = arith.divf %429, %430 : vector<8x8xf32>
    %c0_127 = arith.constant 0 : index
    %c0_128 = arith.constant 0 : index
    %432 = vector.load %arg8[%c0_127, %c0_128] : memref<8x8xf32, #tpu.memory_space<vmem>>, vector<8x8xf32>
    tpu.vector_store %arg8[%c0_127, %c0_128], %431 {strides = array<i32>} : memref<8x8xf32, #tpu.memory_space<vmem>>, vector<8x8xf32>,
    return
  }
  func.func @transform_0(%arg0: i32) -> (i32, i32) {
    %c0_i32 = arith.constant 0 : i32
    %c0_i32_0 = arith.constant 0 : i32
    return %arg0, %c0_i32 : i32, i32
  }
  func.func @transform_1(%arg0: i32) -> (i32, i32) {
    %c0_i32 = arith.constant 0 : i32
    %c0_i32_0 = arith.constant 0 : i32
    %c0_i32_1 = arith.constant 0 : i32
    return %c0_i32, %c0_i32_0 : i32, i32
  }
  func.func @transform_2(%arg0: i32) -> (i32, i32) {
    %c0_i32 = arith.constant 0 : i32
    %c0_i32_0 = arith.constant 0 : i32
    %c0_i32_1 = arith.constant 0 : i32
    return %c0_i32, %c0_i32_0 : i32, i32
  }
  func.func @transform_3(%arg0: i32) -> (i32, i32) {
    %c0_i32 = arith.constant 0 : i32
    %c0_i32_0 = arith.constant 0 : i32
    %c0_i32_1 = arith.constant 0 : i32
    return %c0_i32, %c0_i32_0 : i32, i32
  }
  func.func @transform_4(%arg0: i32) -> (i32, i32) {
    %c0_i32 = arith.constant 0 : i32
    %c0_i32_0 = arith.constant 0 : i32
    %c0_i32_1 = arith.constant 0 : i32
    return %c0_i32, %c0_i32_0 : i32, i32
  }
  func.func @transform_5(%arg0: i32) -> (i32, i32) {
    %c0_i32 = arith.constant 0 : i32
    %c0_i32_0 = arith.constant 0 : i32
    %c0_i32_1 = arith.constant 0 : i32
    return %c0_i32, %c0_i32_0 : i32, i32
  }
  func.func @transform_6(%arg0: i32) -> (i32, i32) {
    %c0_i32 = arith.constant 0 : i32
    %c0_i32_0 = arith.constant 0 : i32
    %c0_i32_1 = arith.constant 0 : i32
    return %c0_i32, %c0_i32_0 : i32, i32
  }
  func.func @transform_7(%arg0: i32) -> (i32, i32) {
    %c0_i32 = arith.constant 0 : i32
    %c0_i32_0 = arith.constant 0 : i32
    return %arg0, %c0_i32 : i32, i32
  }
}

</mosaic_0001>

<bundles_post_ra>
// kernel: net_forward.1
= control target key start
LH: loop header
LB: loop body
LE: loop exit
PB: predicated region body
PF: predicated region fallthrough
CT: control target
= control target key end

     0   :  { %13 = vsyncpa [#allocation7], 0  ;;  %s8192_s24 = smov [#allocation6]   ;;  %s8768_s0 = inlined_call_operand.vmem [shape: f32[64,32], index: 0, kind: input, shape index: {}]   ;;  %s8769_s1 = inlined_call_operand.vmem [shape: f32[32,1024], index: 1, kind: input, shape index: {}]   ;;  %s8770_s2 = inlined_call_operand.vmem [shape: f32[1,1024], index: 2, kind: input, shape index: {}]   ;;  %s8771_s3 = inlined_call_operand.hbm [shape: f32[256,1024], index: 3, kind: input, shape index: {}]   ;;  %s8772_s4 = inlined_call_operand.vmem [shape: f32[1,128], index: 4, kind: input, shape index: {}]   ;;  %s8773_s5 = inlined_call_operand.vmem [shape: f32[1,128], index: 5, kind: input, shape index: {}]   ;;  %s8774_s6 = inlined_call_operand.<no memory space> [shape: f32[1,1], index: 6, kind: input, shape index: {}]   ;;  %s8775_s7 = inlined_call_operand.vmem [shape: f32[8,8], index: 7, kind: output, shape index: {}]  }
   0x1   :  { %s25_s25 = sshll.u32 %s8192_s24, 4  ;;  %s8168_s28 = scalar_lea.hbm %s8771_s3, 32768  ;;  %s26_s25 = int_to_ptr.vmem [resolvable:$true] %s25_s25 }
   0x2   :  { %p8169_p0 = scmp.ne.s32.totalorder %s8771_s3, %s8168_s28  ;;  %p8172_p1 = scmp.lt.u32.totalorder %s8168_s28, %s8771_s3 }
   0x4   :  { %p8174_p2 = pnand %p8172_p1, %p8169_p0 }
   0x6   :  { %8177 = shalt.err (!%p8174_p2)
}
   0x7   :  { %s8178_s10 = scalar_lea.vmem %s26_s25, 32768  ;;  %p8183_p4 = scmp.lt.s32.totalorder %s26_s25, %s26_s25 }
   0x8   :  { %p8179_p3 = scmp.ne.s32.totalorder %s26_s25, %s8178_s10  ;;  %p8184_p5 = scmp.lt.s32.totalorder %s8178_s10, %s8178_s10 }
   0xa   :  { %p8185_p6 = por %p8184_p5, %p8183_p4 }
   0xc   :  { %p8186_p7 = pnand %p8185_p6, %p8179_p3 }
   0xe   :  { %8189 = shalt.err (!%p8186_p7)
}
   0xf   :  { %s8193_s11 = smov 1024   ;;  %s8194_s12 = smov 64  }
  0x10   :  { %31 = dma.hbm_to_vmem [thread:$0]  %s8771_s3, 32768, %s26_s25, [#allocation7], %s8193_s11, %s8193_s11, %s8194_s12  }
  0x11   :  { %8190 = dma.done.wait [#allocation7], 32768  }
  0x12   :  { %8191 = vsyncadd [#allocation7], 4294934528  ;;  %v8195_v0 = vmov 0.0   ;;  %v50_v1 = vld [vmem:[%s8769_s1 + $0x8] sm:$0xff]  ;;  %v52_v3 = vld [vmem:[%s8769_s1 + $0x18] sm:$0xff]  ;;  %vm123_vm0 = vcmask 261120  }
  0x13   :  { %212 = vmatprep.mubr.f32.mxu0 %v8195_v0  ;;  %325 = vmatprep.mubr.f32.mxu1 %v8195_v0  ;;  %v58_v2 = vld [vmem:[%s8769_s1 + $0x48] sm:$0xff]  ;;  %v60_v5 = vld [vmem:[%s8769_s1 + $0x58] sm:$0xff]  ;;  %v49_v6 = vld [vmem:[%s8769_s1] sm:$0xff]  ;;  %vm1279_vm1 = vcmask 7168   ;;  %vm1290_vm2 = vcmask 64568   ;;  %vm1899_vm3 = vcmask 15368  }
  0x14   :  { %v5684_v4 = vpack.c.bf16 %v58_v2, %v50_v1  ;;  %v57_v7 = vld [vmem:[%s8769_s1 + $0x40] sm:$0xff]  ;;  %v5692_v8 = vpack.c.bf16 %v60_v5, %v52_v3  ;;  %v51_v10 = vld [vmem:[%s8769_s1 + $0x10] sm:$0xff]  ;;  %v66_v12 = vld [vmem:[%s8769_s1 + $0x88] sm:$0xff]  ;;  %vm1904_vm4 = vcmask 56368   ;;  %vm2513_vm5 = vcmask 23568  }
  0x15   :  { %v5686_v9 = vpack.c.bf16 %v57_v7, %v49_v6  ;;  %v59_v11 = vld [vmem:[%s8769_s1 + $0x50] sm:$0xff]  ;;  %v74_v14 = vld [vmem:[%s8769_s1 + $0xc8] sm:$0xff]  ;;  %v68_v15 = vld [vmem:[%s8769_s1 + $0x98] sm:$0xff]  ;;  %vm2518_vm6 = vcmask 48168   ;;  %vm3127_vm7 = vcmask 31768   ;;  %vm3132_vm8 = vcmask 39968  }
  0x16   :  { %5685 = vmatprep.subr.bf16.mxu0 %v5684_v4  ;;  %v5694_v13 = vpack.c.bf16 %v59_v11, %v51_v10  ;;  %v76_v16 = vld [vmem:[%s8769_s1 + $0xd8] sm:$0xff]  ;;  %5693 = vmatprep.subr.bf16.mxu1 %v5692_v8  ;;  %v5688_v17 = vpack.c.bf16 %v74_v14, %v66_v12  ;;  %v65_v19 = vld [vmem:[%s8769_s1 + $0x80] sm:$0xff]  ;;  %v67_v21 = vld [vmem:[%s8769_s1 + $0x90] sm:$0xff]  ;;  %vm5594_vm9 = vcmask 64512  }
  0x17   :  { %5687 = vmatpush1.bf16.msra.mxu0 %v5686_v9  ;;  %v5696_v18 = vpack.c.bf16 %v76_v16, %v68_v15  ;;  %v73_v20 = vld [vmem:[%s8769_s1 + $0xc0] sm:$0xff]  ;;  %v75_v23 = vld [vmem:[%s8769_s1 + $0xd0] sm:$0xff]  ;;  %v54_v24 = vld [vmem:[%s8769_s1 + $0x28] sm:$0xff] }
  0x18   :  { %5695 = vmatpush1.bf16.msra.mxu1 %v5694_v13  ;;  %v5690_v22 = vpack.c.bf16 %v73_v20, %v65_v19  ;;  %5689 = vmatprep.subr.bf16.mxu0 %v5688_v17  ;;  %v5698_v25 = vpack.c.bf16 %v75_v23, %v67_v21  ;;  %v62_v26 = vld [vmem:[%s8769_s1 + $0x68] sm:$0xff]  ;;  %v53_v27 = vld [vmem:[%s8769_s1 + $0x20] sm:$0xff]  ;;  %v56_v32 = vld [vmem:[%s8769_s1 + $0x38] sm:$0xff] }
  0x19   :  { %5697 = vmatprep.subr.bf16.mxu1 %v5696_v18  ;;  %v61_v28 = vld [vmem:[%s8769_s1 + $0x60] sm:$0xff]  ;;  %v5700_v29 = vpack.c.bf16 %v62_v26, %v54_v24  ;;  %v64_v33 = vld [vmem:[%s8769_s1 + $0x78] sm:$0xff]  ;;  %v70_v35 = vld [vmem:[%s8769_s1 + $0xa8] sm:$0xff] }
  0x1a   :  { %v8313_v30 = vld [vmem:[%s8768_s0] sm:$0xff]  ;;  %v5702_v31 = vpack.c.bf16 %v61_v28, %v53_v27  ;;  %v5708_v34 = vpack.c.bf16 %v64_v33, %v56_v32  ;;  %v78_v36 = vld [vmem:[%s8769_s1 + $0xe8] sm:$0xff]  ;;  %v55_v37 = vld [vmem:[%s8769_s1 + $0x30] sm:$0xff] }
  0x1b   :  { %5691 = vmatpush1.bf16.msra.mxu0 %v5690_v22  ;;  %v5704_v38 = vpack.c.bf16 %v78_v36, %v70_v35  ;;  %v63_v39 = vld [vmem:[%s8769_s1 + $0x70] sm:$0xff]  ;;  %v69_v40 = vld [vmem:[%s8769_s1 + $0xa0] sm:$0xff]  ;;  %v72_v43 = vld [vmem:[%s8769_s1 + $0xb8] sm:$0xff] }
  0x1c   :  { %5699 = vmatpush1.bf16.msra.mxu1 %v5698_v25  ;;  %5701 = vmatprep.subr.bf16.mxu0 %v5700_v29  ;;  %v77_v41 = vld [vmem:[%s8769_s1 + $0xe0] sm:$0xff]  ;;  %v5710_v42 = vpack.c.bf16 %v63_v39, %v55_v37  ;;  %v8349_v44 = vld [vmem:[%s8768_s0 + $0x8] sm:$0xff]  ;;  %v80_v45 = vld [vmem:[%s8769_s1 + $0xf8] sm:$0xff] }
  0x1d   :  { %5709 = vmatprep.subr.bf16.mxu1 %v5708_v34  ;;  %v71_v46 = vld [vmem:[%s8769_s1 + $0xb0] sm:$0xff]  ;;  %v5706_v47 = vpack.c.bf16 %v77_v41, %v69_v40  ;;  %v5712_v48 = vpack.c.bf16 %v80_v45, %v72_v43  ;;  %v667_v50 = vld [vmem:[#allocation6 + $0x8] sm:$0xff]  ;;  %v669_v54 = vld [vmem:[#allocation6 + $0x18] sm:$0xff] }
  0x1e   :  { %5601 = vmatmul.mubr.msk.f32.vlgmr.msra.gmra.mrb[0].mxu0 %vm123_vm0, %v8313_v30  ;;  %v79_v49 = vld [vmem:[%s8769_s1 + $0xf0] sm:$0xff]  ;;  %v675_v51 = vld [vmem:[#allocation6 + $0x48] sm:$0xff]  ;;  %v677_v55 = vld [vmem:[#allocation6 + $0x58] sm:$0xff] }
  0x1f   :  { %5609 = vmatmul.mubr.msk.f32.vlgmr.msra.gmra.mrb[0].mxu1 %vm123_vm0, %v8313_v30  ;;  %5703 = vmatpush1.bf16.msra.mxu0 %v5702_v31  ;;  %v5714_v52 = vpack.c.bf16 %v79_v49, %v71_v46  ;;  %v5716_v53 = vpack.c.bf16 %v675_v51, %v667_v50  ;;  %v5780_v56 = vpack.c.bf16 %v677_v55, %v669_v54  ;;  %v8370_v57 = vld [vmem:[%s8768_s0 + $0x10] sm:$0xff]  ;;  %v8381_v58 = vld [vmem:[%s8768_s0 + $0x18] sm:$0xff]  ;;  %v8392_v59 = vld [vmem:[%s8768_s0 + $0x20] sm:$0xff] }
  0x20   :  { %218 = vmatprep.mubr.f32.mxu0 %v8195_v0  ;;  %331 = vmatprep.mubr.f32.mxu1 %v8195_v0  ;;  %v8403_v60 = vld [vmem:[%s8768_s0 + $0x28] sm:$0xff]  ;;  %v8414_v61 = vld [vmem:[%s8768_s0 + $0x30] sm:$0xff]  ;;  %v8425_v62 = vld [vmem:[%s8768_s0 + $0x38] sm:$0xff] }
  0x21   :  { %5705 = vmatprep.subr.bf16.mxu0 %v5704_v38  ;;  %5711 = vmatpush1.bf16.msra.mxu1 %v5710_v42  ;;  %v666_v63 = vld [vmem:[#allocation6] sm:$0xff]  ;;  %v668_v2 = vld [vmem:[#allocation6 + $0x10] sm:$0xff]  ;;  %v683_v4 = vld [vmem:[#allocation6 + $0x88] sm:$0xff] }
  0x22   :  { %5602 = vmatmul.mubr.msk.f32.gmra.mrb[2].mxu0 %vm123_vm0, %v8349_v44  ;;  %5713 = vmatprep.subr.bf16.mxu1 %v5712_v48  ;;  %v674_v1 = vld [vmem:[#allocation6 + $0x40] sm:$0xff]  ;;  %v676_v3 = vld [vmem:[#allocation6 + $0x50] sm:$0xff]  ;;  %v691_v5 = vld [vmem:[#allocation6 + $0xc8] sm:$0xff] }
  0x23   :  { %5610 = vmatmul.mubr.msk.f32.gmra.mrb[2].mxu1 %vm123_vm0, %v8349_v44  ;;  %224 = vmatprep.mubr.f32.mxu0 %v8195_v0  ;;  %v685_v6 = vld [vmem:[#allocation6 + $0x98] sm:$0xff]  ;;  %v5718_v8 = vpack.c.bf16 %v674_v1, %v666_v63  ;;  %v5782_v9 = vpack.c.bf16 %v676_v3, %v668_v2  ;;  %v5720_v10 = vpack.c.bf16 %v691_v5, %v683_v4  ;;  %v682_v11 = vld [vmem:[#allocation6 + $0x80] sm:$0xff]  ;;  %v684_v13 = vld [vmem:[#allocation6 + $0x90] sm:$0xff] }
  0x24   :  { %337 = vmatprep.mubr.f32.mxu1 %v8195_v0  ;;  %5707 = vmatpush1.bf16.msra.mxu0 %v5706_v47  ;;  %v693_v7 = vld [vmem:[#allocation6 + $0xd8] sm:$0xff]  ;;  %v690_v12 = vld [vmem:[#allocation6 + $0xc0] sm:$0xff]  ;;  %v692_v15 = vld [vmem:[#allocation6 + $0xd0] sm:$0xff] }
  0x25   :  { %5715 = vmatpush1.bf16.msra.mxu1 %v5714_v52  ;;  %5717 = vmatprep.subr.bf16.mxu0 %v5716_v53  ;;  %v5784_v14 = vpack.c.bf16 %v693_v7, %v685_v6  ;;  %v699_v16 = vld [vmem:[#allocation6 + $0x108] sm:$0xff]  ;;  %v701_v18 = vld [vmem:[#allocation6 + $0x118] sm:$0xff]  ;;  %v5722_v20 = vpack.c.bf16 %v690_v12, %v682_v11  ;;  %v5786_v21 = vpack.c.bf16 %v692_v15, %v684_v13  ;;  %v698_v23 = vld [vmem:[#allocation6 + $0x100] sm:$0xff] }
  0x26   :  { %5603 = vmatmul.mubr.msk.f32.gmra.mrb[4].mxu0 %vm123_vm0, %v8370_v57  ;;  %5781 = vmatprep.subr.bf16.mxu1 %v5780_v56  ;;  %v707_v17 = vld [vmem:[#allocation6 + $0x148] sm:$0xff]  ;;  %v709_v19 = vld [vmem:[#allocation6 + $0x158] sm:$0xff]  ;;  %v706_v24 = vld [vmem:[#allocation6 + $0x140] sm:$0xff] }
  0x27   :  { %5611 = vmatmul.mubr.msk.f32.gmra.mrb[4].mxu1 %vm123_vm0, %v8370_v57  ;;  %230 = vmatprep.mubr.f32.mxu0 %v8195_v0  ;;  %v5724_v22 = vpack.c.bf16 %v707_v17, %v699_v16  ;;  %v700_v25 = vld [vmem:[#allocation6 + $0x110] sm:$0xff]  ;;  %v5788_v26 = vpack.c.bf16 %v709_v19, %v701_v18  ;;  %v715_v28 = vld [vmem:[#allocation6 + $0x188] sm:$0xff]  ;;  %v717_v31 = vld [vmem:[#allocation6 + $0x198] sm:$0xff] }
  0x28   :  { %343 = vmatprep.mubr.f32.mxu1 %v8195_v0  ;;  %v708_v27 = vld [vmem:[#allocation6 + $0x150] sm:$0xff]  ;;  %v723_v29 = vld [vmem:[#allocation6 + $0x1c8] sm:$0xff]  ;;  %v725_v32 = vld [vmem:[#allocation6 + $0x1d8] sm:$0xff] }
  0x29   :  { %v5790_v33 = vpack.c.bf16 %v708_v27, %v700_v25  ;;  %v5728_v34 = vpack.c.bf16 %v723_v29, %v715_v28  ;;  %v714_v35 = vld [vmem:[#allocation6 + $0x180] sm:$0xff]  ;;  %v716_v37 = vld [vmem:[#allocation6 + $0x190] sm:$0xff]  ;;  %v5792_v38 = vpack.c.bf16 %v725_v32, %v717_v31  ;;  %v731_v40 = vld [vmem:[#allocation6 + $0x208] sm:$0xff] }
  0x2a   :  { %5604 = vmatmul.mubr.msk.f32.gmra.mrb[6].mxu0 %vm123_vm0, %v8381_v58  ;;  %v722_v36 = vld [vmem:[#allocation6 + $0x1c0] sm:$0xff]  ;;  %v724_v39 = vld [vmem:[#allocation6 + $0x1d0] sm:$0xff]  ;;  %v739_v41 = vld [vmem:[#allocation6 + $0x248] sm:$0xff] }
  0x2b   :  { %5612 = vmatmul.mubr.msk.f32.gmra.mrb[6].mxu1 %vm123_vm0, %v8381_v58  ;;  %236 = vmatprep.mubr.f32.mxu0 %v8195_v0  ;;  %v733_v42 = vld [vmem:[#allocation6 + $0x218] sm:$0xff]  ;;  %v5794_v45 = vpack.c.bf16 %v724_v39, %v716_v37  ;;  %v5732_v46 = vpack.c.bf16 %v739_v41, %v731_v40  ;;  %v730_v47 = vld [vmem:[#allocation6 + $0x200] sm:$0xff]  ;;  %v732_v49 = vld [vmem:[#allocation6 + $0x210] sm:$0xff] }
  0x2c   :  { %349 = vmatprep.mubr.f32.mxu1 %v8195_v0  ;;  %v741_v43 = vld [vmem:[#allocation6 + $0x258] sm:$0xff]  ;;  %v738_v48 = vld [vmem:[#allocation6 + $0x240] sm:$0xff]  ;;  %v740_v51 = vld [vmem:[#allocation6 + $0x250] sm:$0xff] }
  0x2d   :  { %v5796_v50 = vpack.c.bf16 %v741_v43, %v733_v42  ;;  %v747_v52 = vld [vmem:[#allocation6 + $0x288] sm:$0xff]  ;;  %v749_v54 = vld [vmem:[#allocation6 + $0x298] sm:$0xff]  ;;  %v5734_v56 = vpack.c.bf16 %v738_v48, %v730_v47  ;;  %v746_v1 = vld [vmem:[#allocation6 + $0x280] sm:$0xff] }
  0x2e   :  { %5605 = vmatmul.mubr.msk.f32.gmra.mrb[8].mxu0 %vm123_vm0, %v8392_v59  ;;  %v755_v53 = vld [vmem:[#allocation6 + $0x2c8] sm:$0xff]  ;;  %v757_v55 = vld [vmem:[#allocation6 + $0x2d8] sm:$0xff]  ;;  %v754_v2 = vld [vmem:[#allocation6 + $0x2c0] sm:$0xff] }
  0x2f   :  { %5613 = vmatmul.mubr.msk.f32.gmra.mrb[8].mxu1 %vm123_vm0, %v8392_v59  ;;  %242 = vmatprep.mubr.f32.mxu0 %v8195_v0  ;;  %v5736_v63 = vpack.c.bf16 %v755_v53, %v747_v52  ;;  %v748_v3 = vld [vmem:[#allocation6 + $0x290] sm:$0xff]  ;;  %v5800_v4 = vpack.c.bf16 %v757_v55, %v749_v54  ;;  %v763_v6 = vld [vmem:[#allocation6 + $0x308] sm:$0xff]  ;;  %v762_v12 = vld [vmem:[#allocation6 + $0x300] sm:$0xff] }
  0x30   :  { %355 = vmatprep.mubr.f32.mxu1 %v8195_v0  ;;  %v756_v5 = vld [vmem:[#allocation6 + $0x2d0] sm:$0xff]  ;;  %v771_v7 = vld [vmem:[#allocation6 + $0x348] sm:$0xff]  ;;  %v770_v13 = vld [vmem:[#allocation6 + $0x340] sm:$0xff] }
  0x31   :  { %v5740_v11 = vpack.c.bf16 %v771_v7, %v763_v6  ;;  %v772_v16 = vld [vmem:[#allocation6 + $0x350] sm:$0xff]  ;;  %v779_v17 = vld [vmem:[#allocation6 + $0x388] sm:$0xff]  ;;  %v781_v19 = vld [vmem:[#allocation6 + $0x398] sm:$0xff] }
  0x32   :  { %5606 = vmatmul.mubr.msk.f32.gmra.mrb[10].mxu0 %vm123_vm0, %v8403_v60  ;;  %v787_v18 = vld [vmem:[#allocation6 + $0x3c8] sm:$0xff]  ;;  %v780_v25 = vld [vmem:[#allocation6 + $0x390] sm:$0xff]  ;;  %v797_v31 = vld [vmem:[#allocation6 + $0x418] sm:$0xff] }
  0x33   :  { %5614 = vmatmul.mubr.msk.f32.gmra.mrb[10].mxu1 %vm123_vm0, %v8403_v60  ;;  %248 = vmatprep.mubr.f32.mxu0 %v8195_v0  ;;  %v788_v27 = vld [vmem:[#allocation6 + $0x3d0] sm:$0xff]  ;;  %v795_v28 = vld [vmem:[#allocation6 + $0x408] sm:$0xff]  ;;  %v805_v32 = vld [vmem:[#allocation6 + $0x458] sm:$0xff] }
  0x34   :  { %361 = vmatprep.mubr.f32.mxu1 %v8195_v0  ;;  %v803_v29 = vld [vmem:[#allocation6 + $0x448] sm:$0xff]  ;;  %v5812_v37 = vpack.c.bf16 %v805_v32, %v797_v31  ;;  %v813_v41 = vld [vmem:[#allocation6 + $0x498] sm:$0xff]  ;;  %v812_v47 = vld [vmem:[#allocation6 + $0x490] sm:$0xff] }
  0x35   :  { %v811_v39 = vld [vmem:[#allocation6 + $0x488] sm:$0xff]  ;;  %v821_v42 = vld [vmem:[#allocation6 + $0x4d8] sm:$0xff] }
  0x36   :  { %5607 = vmatmul.mubr.msk.f32.gmra.mrb[12].mxu0 %vm123_vm0, %v8414_v61  ;;  %v819_v40 = vld [vmem:[#allocation6 + $0x4c8] sm:$0xff]  ;;  %v5816_v48 = vpack.c.bf16 %v821_v42, %v813_v41  ;;  %v829_v52 = vld [vmem:[#allocation6 + $0x518] sm:$0xff] }
  0x37   :  { %5615 = vmatmul.mubr.msk.f32.gmra.mrb[12].mxu1 %vm123_vm0, %v8414_v61  ;;  %254 = vmatprep.mubr.f32.mxu0 %v8195_v0  ;;  %v837_v53 = vld [vmem:[#allocation6 + $0x558] sm:$0xff] }
  0x38   :  { %367 = vmatprep.mubr.f32.mxu1 %v8195_v0  ;;  %v853_v6 = vld [vmem:[#allocation6 + $0x5d8] sm:$0xff] }
  0x3a   :  { %5608 = vmatmul.mubr.msk.f32.gmra.mrb[14].mxu0 %vm123_vm0, %v8425_v62 }
  0x3b   :  { %5616 = vmatmul.mubr.msk.f32.gmra.mrb[14].mxu1 %vm123_vm0, %v8425_v62  ;;  %438 = vmatprep.mubr.f32.mxu0 %v8195_v0 }
  0x3c   :  { %551 = vmatprep.mubr.f32.mxu1 %v8195_v0 }
  0x3e   :  { %5617 = vmatmul.mubr.msk.f32.vlgmr.msra.gmra.mrb[16].mxu0 %vm123_vm0, %v8313_v30 }
  0x3f   :  { %5625 = vmatmul.mubr.msk.f32.vlgmr.msra.gmra.mrb[16].mxu1 %vm123_vm0, %v8313_v30  ;;  %5719 = vmatpush1.bf16.msra.mxu0 %v5718_v8  ;;  %v5726_v30 = vpack.c.bf16 %v706_v24, %v698_v23  ;;  %v765_v8 = vld [vmem:[#allocation6 + $0x318] sm:$0xff]  ;;  %v778_v23 = vld [vmem:[#allocation6 + $0x380] sm:$0xff] }
  0x40   :  { %5783 = vmatpush1.bf16.msra.mxu1 %v5782_v9  ;;  %5721 = vmatprep.subr.bf16.mxu0 %v5720_v10  ;;  %v773_v9 = vld [vmem:[#allocation6 + $0x358] sm:$0xff]  ;;  %v5802_v10 = vpack.c.bf16 %v756_v5, %v748_v3  ;;  %v786_v24 = vld [vmem:[#allocation6 + $0x3c0] sm:$0xff]  ;;  %v843_v3 = vld [vmem:[#allocation6 + $0x588] sm:$0xff] }
  0x41   :  { %5785 = vmatprep.subr.bf16.mxu1 %v5784_v14  ;;  %444 = vmatprep.mubr.f32.mxu0 %v8195_v0  ;;  %v764_v14 = vld [vmem:[#allocation6 + $0x310] sm:$0xff]  ;;  %v5804_v15 = vpack.c.bf16 %v773_v9, %v765_v8  ;;  %v845_v5 = vld [vmem:[#allocation6 + $0x598] sm:$0xff] }
  0x42   :  { %557 = vmatprep.mubr.f32.mxu1 %v8195_v0  ;;  %5618 = vmatmul.mubr.msk.f32.gmra.mrb[18].mxu0 %vm123_vm0, %v8349_v44 }
  0x43   :  { %5723 = vmatpush1.bf16.msra.mxu0 %v5722_v20  ;;  %5626 = vmatmul.mubr.msk.f32.gmra.mrb[18].mxu1 %vm123_vm0, %v8349_v44  ;;  %v5730_v44 = vpack.c.bf16 %v722_v36, %v714_v35  ;;  %v789_v20 = vld [vmem:[#allocation6 + $0x3d8] sm:$0xff]  ;;  %v802_v35 = vld [vmem:[#allocation6 + $0x440] sm:$0xff]  ;;  %v796_v36 = vld [vmem:[#allocation6 + $0x410] sm:$0xff] }
  0x44   :  { %5787 = vmatpush1.bf16.msra.mxu1 %v5786_v21  ;;  %5725 = vmatprep.subr.bf16.mxu0 %v5724_v22  ;;  %v5806_v21 = vpack.c.bf16 %v772_v16, %v764_v14  ;;  %v5744_v22 = vpack.c.bf16 %v787_v18, %v779_v17  ;;  %v859_v14 = vld [vmem:[#allocation6 + $0x608] sm:$0xff]  ;;  %v861_v16 = vld [vmem:[#allocation6 + $0x618] sm:$0xff] }
  0x45   :  { %5789 = vmatprep.subr.bf16.mxu1 %v5788_v26  ;;  %450 = vmatprep.mubr.f32.mxu0 %v8195_v0  ;;  %v5808_v26 = vpack.c.bf16 %v789_v20, %v781_v19  ;;  %v869_v17 = vld [vmem:[#allocation6 + $0x658] sm:$0xff] }
  0x46   :  { %563 = vmatprep.mubr.f32.mxu1 %v8195_v0  ;;  %5619 = vmatmul.mubr.msk.f32.gmra.mrb[20].mxu0 %vm123_vm0, %v8370_v57 }
  0x47   :  { %5727 = vmatpush1.bf16.msra.mxu0 %v5726_v30  ;;  %5627 = vmatmul.mubr.msk.f32.gmra.mrb[20].mxu1 %vm123_vm0, %v8370_v57  ;;  %v5798_v57 = vpack.c.bf16 %v740_v51, %v732_v49  ;;  %v5810_v30 = vpack.c.bf16 %v788_v27, %v780_v25  ;;  %v820_v49 = vld [vmem:[#allocation6 + $0x4d0] sm:$0xff]  ;;  %v835_v51 = vld [vmem:[#allocation6 + $0x548] sm:$0xff]  ;;  %v877_v27 = vld [vmem:[#allocation6 + $0x698] sm:$0xff] }
  0x48   :  { %5791 = vmatpush1.bf16.msra.mxu1 %v5790_v33  ;;  %5729 = vmatprep.subr.bf16.mxu0 %v5728_v34  ;;  %v5748_v33 = vpack.c.bf16 %v803_v29, %v795_v28  ;;  %v794_v34 = vld [vmem:[#allocation6 + $0x400] sm:$0xff]  ;;  %v5818_v54 = vpack.c.bf16 %v820_v49, %v812_v47  ;;  %v875_v25 = vld [vmem:[#allocation6 + $0x688] sm:$0xff]  ;;  %v885_v28 = vld [vmem:[#allocation6 + $0x6d8] sm:$0xff] }
  0x49   :  { %5793 = vmatprep.subr.bf16.mxu1 %v5792_v38  ;;  %456 = vmatprep.mubr.f32.mxu0 %v8195_v0  ;;  %v804_v38 = vld [vmem:[#allocation6 + $0x450] sm:$0xff]  ;;  %v907_v47 = vld [vmem:[#allocation6 + $0x788] sm:$0xff]  ;;  %v909_v49 = vld [vmem:[#allocation6 + $0x798] sm:$0xff] }
  0x4a   :  { %569 = vmatprep.mubr.f32.mxu1 %v8195_v0  ;;  %5620 = vmatmul.mubr.msk.f32.gmra.mrb[22].mxu0 %vm123_vm0, %v8381_v58  ;;  %v5814_v43 = vpack.c.bf16 %v804_v38, %v796_v36  ;;  %v891_v36 = vld [vmem:[#allocation6 + $0x708] sm:$0xff]  ;;  %v893_v38 = vld [vmem:[#allocation6 + $0x718] sm:$0xff] }
  0x4b   :  { %5731 = vmatpush1.bf16.msra.mxu0 %v5730_v44  ;;  %5628 = vmatmul.mubr.msk.f32.gmra.mrb[22].mxu1 %vm123_vm0, %v8381_v58  ;;  %v5738_v58 = vpack.c.bf16 %v754_v2, %v746_v1  ;;  %v5752_v44 = vpack.c.bf16 %v819_v40, %v811_v39  ;;  %v5820_v1 = vpack.c.bf16 %v837_v53, %v829_v52  ;;  %v836_v2 = vld [vmem:[#allocation6 + $0x550] sm:$0xff]  ;;  %v901_v39 = vld [vmem:[#allocation6 + $0x758] sm:$0xff] }
  0x4c   :  { %5795 = vmatpush1.bf16.msra.mxu1 %v5794_v45  ;;  %5733 = vmatprep.subr.bf16.mxu0 %v5732_v46  ;;  %v810_v45 = vld [vmem:[#allocation6 + $0x480] sm:$0xff] }
  0x4d   :  { %5797 = vmatprep.subr.bf16.mxu1 %v5796_v50  ;;  %462 = vmatprep.mubr.f32.mxu0 %v8195_v0  ;;  %v818_v46 = vld [vmem:[#allocation6 + $0x4c0] sm:$0xff]  ;;  %v827_v50 = vld [vmem:[#allocation6 + $0x508] sm:$0xff] }
  0x4e   :  { %575 = vmatprep.mubr.f32.mxu1 %v8195_v0  ;;  %5621 = vmatmul.mubr.msk.f32.gmra.mrb[24].mxu0 %vm123_vm0, %v8392_v59  ;;  %v5756_v55 = vpack.c.bf16 %v835_v51, %v827_v50  ;;  %v917_v50 = vld [vmem:[#allocation6 + $0x7d8] sm:$0xff] }
  0x4f   :  { %5735 = vmatpush1.bf16.msra.mxu0 %v5734_v56  ;;  %5629 = vmatmul.mubr.msk.f32.gmra.mrb[24].mxu1 %vm123_vm0, %v8392_v59  ;;  %v5742_v59 = vpack.c.bf16 %v770_v13, %v762_v12  ;;  %v826_v56 = vld [vmem:[#allocation6 + $0x500] sm:$0xff]  ;;  %v5824_v12 = vpack.c.bf16 %v853_v6, %v845_v5  ;;  %v852_v13 = vld [vmem:[#allocation6 + $0x5d0] sm:$0xff] }
  0x50   :  { %5799 = vmatpush1.bf16.msra.mxu1 %v5798_v57  ;;  %5737 = vmatprep.subr.bf16.mxu0 %v5736_v63  ;;  %v834_v57 = vld [vmem:[#allocation6 + $0x540] sm:$0xff]  ;;  %v828_v63 = vld [vmem:[#allocation6 + $0x510] sm:$0xff] }
  0x51   :  { %5801 = vmatprep.subr.bf16.mxu1 %v5800_v4  ;;  %468 = vmatprep.mubr.f32.mxu0 %v8195_v0  ;;  %v851_v4 = vld [vmem:[#allocation6 + $0x5c8] sm:$0xff]  ;;  %v5758_v7 = vpack.c.bf16 %v834_v57, %v826_v56  ;;  %v5822_v8 = vpack.c.bf16 %v836_v2, %v828_v63  ;;  %v5840_v56 = vpack.c.bf16 %v917_v50, %v909_v49  ;;  %v916_v57 = vld [vmem:[#allocation6 + $0x7d0] sm:$0xff]  ;;  %v673_v2 = vld [vmem:[#allocation6 + $0x38] sm:$0xff] }
  0x52   :  { %581 = vmatprep.mubr.f32.mxu1 %v8195_v0  ;;  %5622 = vmatmul.mubr.msk.f32.gmra.mrb[26].mxu0 %vm123_vm0, %v8403_v60  ;;  %v5760_v9 = vpack.c.bf16 %v851_v4, %v843_v3  ;;  %v671_v63 = vld [vmem:[#allocation6 + $0x28] sm:$0xff]  ;;  %v681_v3 = vld [vmem:[#allocation6 + $0x78] sm:$0xff] }
  0x53   :  { %5739 = vmatpush1.bf16.msra.mxu0 %v5738_v58  ;;  %5630 = vmatmul.mubr.msk.f32.gmra.mrb[26].mxu1 %vm123_vm0, %v8403_v60  ;;  %v5746_v60 = vpack.c.bf16 %v786_v24, %v778_v23  ;;  %v842_v58 = vld [vmem:[#allocation6 + $0x580] sm:$0xff]  ;;  %v5828_v23 = vpack.c.bf16 %v869_v17, %v861_v16  ;;  %v868_v24 = vld [vmem:[#allocation6 + $0x650] sm:$0xff] }
  0x54   :  { %5803 = vmatpush1.bf16.msra.mxu1 %v5802_v10  ;;  %5741 = vmatprep.subr.bf16.mxu0 %v5740_v11  ;;  %v850_v10 = vld [vmem:[#allocation6 + $0x5c0] sm:$0xff]  ;;  %v844_v11 = vld [vmem:[#allocation6 + $0x590] sm:$0xff] }
  0x55   :  { %5805 = vmatprep.subr.bf16.mxu1 %v5804_v15  ;;  %474 = vmatprep.mubr.f32.mxu0 %v8195_v0  ;;  %v867_v15 = vld [vmem:[#allocation6 + $0x648] sm:$0xff]  ;;  %v5762_v18 = vpack.c.bf16 %v850_v10, %v842_v58  ;;  %v5826_v19 = vpack.c.bf16 %v852_v13, %v844_v11  ;;  %v5908_v58 = vpack.c.bf16 %v681_v3, %v673_v2  ;;  %v680_v10 = vld [vmem:[#allocation6 + $0x70] sm:$0xff]  ;;  %v689_v13 = vld [vmem:[#allocation6 + $0xb8] sm:$0xff] }
  0x56   :  { %587 = vmatprep.mubr.f32.mxu1 %v8195_v0  ;;  %5623 = vmatmul.mubr.msk.f32.gmra.mrb[28].mxu0 %vm123_vm0, %v8414_v61  ;;  %v5764_v20 = vpack.c.bf16 %v867_v15, %v859_v14  ;;  %v687_v11 = vld [vmem:[#allocation6 + $0xa8] sm:$0xff]  ;;  %v697_v14 = vld [vmem:[#allocation6 + $0xf8] sm:$0xff] }
  0x57   :  { %5743 = vmatpush1.bf16.msra.mxu0 %v5742_v59  ;;  %5631 = vmatmul.mubr.msk.f32.gmra.mrb[28].mxu1 %vm123_vm0, %v8414_v61  ;;  %v5750_v61 = vpack.c.bf16 %v802_v35, %v794_v34  ;;  %v858_v59 = vld [vmem:[#allocation6 + $0x600] sm:$0xff]  ;;  %v5832_v34 = vpack.c.bf16 %v885_v28, %v877_v27  ;;  %v884_v35 = vld [vmem:[#allocation6 + $0x6d0] sm:$0xff] }
  0x58   :  { %5807 = vmatpush1.bf16.msra.mxu1 %v5806_v21  ;;  %5745 = vmatprep.subr.bf16.mxu0 %v5744_v22  ;;  %v866_v21 = vld [vmem:[#allocation6 + $0x640] sm:$0xff]  ;;  %v860_v22 = vld [vmem:[#allocation6 + $0x610] sm:$0xff] }
  0x59   :  { %5809 = vmatprep.subr.bf16.mxu1 %v5808_v26  ;;  %480 = vmatprep.mubr.f32.mxu0 %v8195_v0  ;;  %v883_v26 = vld [vmem:[#allocation6 + $0x6c8] sm:$0xff]  ;;  %v5766_v29 = vpack.c.bf16 %v866_v21, %v858_v59  ;;  %v5830_v31 = vpack.c.bf16 %v868_v24, %v860_v22  ;;  %v5912_v59 = vpack.c.bf16 %v697_v14, %v689_v13  ;;  %v696_v21 = vld [vmem:[#allocation6 + $0xf0] sm:$0xff]  ;;  %v705_v24 = vld [vmem:[#allocation6 + $0x138] sm:$0xff] }
  0x5a   :  { %593 = vmatprep.mubr.f32.mxu1 %v8195_v0  ;;  %5624 = vmatmul.mubr.msk.f32.gmra.mrb[30].mxu0 %vm123_vm0, %v8425_v62  ;;  %v5768_v32 = vpack.c.bf16 %v883_v26, %v875_v25  ;;  %v703_v22 = vld [vmem:[#allocation6 + $0x128] sm:$0xff]  ;;  %v713_v25 = vld [vmem:[#allocation6 + $0x178] sm:$0xff] }
  0x5b   :  { %5747 = vmatpush1.bf16.msra.mxu0 %v5746_v60  ;;  %5632 = vmatmul.mubr.msk.f32.gmra.mrb[30].mxu1 %vm123_vm0, %v8425_v62  ;;  %v5754_v62 = vpack.c.bf16 %v818_v46, %v810_v45  ;;  %v874_v60 = vld [vmem:[#allocation6 + $0x680] sm:$0xff]  ;;  %v5836_v45 = vpack.c.bf16 %v901_v39, %v893_v38  ;;  %v900_v46 = vld [vmem:[#allocation6 + $0x750] sm:$0xff] }
  0x5c   :  { %5811 = vmatpush1.bf16.msra.mxu1 %v5810_v30  ;;  %5749 = vmatprep.subr.bf16.mxu0 %v5748_v33  ;;  %v882_v30 = vld [vmem:[#allocation6 + $0x6c0] sm:$0xff]  ;;  %v876_v33 = vld [vmem:[#allocation6 + $0x690] sm:$0xff] }
  0x5d   :  { %5813 = vmatprep.subr.bf16.mxu1 %v5812_v37  ;;  %986 = vmatprep.mubr.f32.mxu0 %v8195_v0  ;;  %v899_v37 = vld [vmem:[#allocation6 + $0x748] sm:$0xff]  ;;  %v5770_v40 = vpack.c.bf16 %v882_v30, %v874_v60  ;;  %v5834_v41 = vpack.c.bf16 %v884_v35, %v876_v33  ;;  %v5916_v60 = vpack.c.bf16 %v713_v25, %v705_v24  ;;  %v712_v30 = vld [vmem:[#allocation6 + $0x170] sm:$0xff]  ;;  %v721_v35 = vld [vmem:[#allocation6 + $0x1b8] sm:$0xff] }
  0x5e   :  { %1057 = vmatprep.mubr.f32.mxu1 %v8195_v0  ;;  %v5772_v42 = vpack.c.bf16 %v899_v37, %v891_v36  ;;  %v719_v33 = vld [vmem:[#allocation6 + $0x1a8] sm:$0xff]  ;;  %v729_v36 = vld [vmem:[#allocation6 + $0x1f8] sm:$0xff] }
  0x5f   :  { %5751 = vmatpush1.bf16.msra.mxu0 %v5750_v61  ;;  %v890_v61 = vld [vmem:[#allocation6 + $0x700] sm:$0xff] }
  0x60   :  { %5815 = vmatpush1.bf16.msra.mxu1 %v5814_v43  ;;  %5753 = vmatprep.subr.bf16.mxu0 %v5752_v44  ;;  %v898_v43 = vld [vmem:[#allocation6 + $0x740] sm:$0xff]  ;;  %v892_v44 = vld [vmem:[#allocation6 + $0x710] sm:$0xff] }
  0x61   :  { %5817 = vmatprep.subr.bf16.mxu1 %v5816_v48  ;;  %v915_v48 = vld [vmem:[#allocation6 + $0x7c8] sm:$0xff]  ;;  %v5774_v51 = vpack.c.bf16 %v898_v43, %v890_v61  ;;  %v5838_v52 = vpack.c.bf16 %v900_v46, %v892_v44  ;;  %v5920_v61 = vpack.c.bf16 %v729_v36, %v721_v35  ;;  %v728_v43 = vld [vmem:[#allocation6 + $0x1f0] sm:$0xff]  ;;  %v737_v46 = vld [vmem:[#allocation6 + $0x238] sm:$0xff] }
  0x62   :  { %v5776_v53 = vpack.c.bf16 %v915_v48, %v907_v47  ;;  %v735_v44 = vld [vmem:[#allocation6 + $0x228] sm:$0xff]  ;;  %v745_v47 = vld [vmem:[#allocation6 + $0x278] sm:$0xff] }
  0x63   :  { %5755 = vmatpush1.bf16.msra.mxu0 %v5754_v62  ;;  %v906_v62 = vld [vmem:[#allocation6 + $0x780] sm:$0xff] }
  0x64   :  { %5819 = vmatpush1.bf16.msra.mxu1 %v5818_v54  ;;  %5757 = vmatprep.subr.bf16.mxu0 %v5756_v55  ;;  %v914_v54 = vld [vmem:[#allocation6 + $0x7c0] sm:$0xff]  ;;  %v908_v55 = vld [vmem:[#allocation6 + $0x790] sm:$0xff] }
  0x65   :  { %5821 = vmatprep.subr.bf16.mxu1 %v5820_v1  ;;  %v679_v1 = vld [vmem:[#allocation6 + $0x68] sm:$0xff]  ;;  %v5778_v4 = vpack.c.bf16 %v914_v54, %v906_v62  ;;  %v5842_v5 = vpack.c.bf16 %v916_v57, %v908_v55  ;;  %v5924_v62 = vpack.c.bf16 %v745_v47, %v737_v46  ;;  %v744_v54 = vld [vmem:[#allocation6 + $0x270] sm:$0xff]  ;;  %v753_v57 = vld [vmem:[#allocation6 + $0x2b8] sm:$0xff] }
  0x66   :  { %v5844_v6 = vpack.c.bf16 %v679_v1, %v671_v63  ;;  %v751_v55 = vld [vmem:[#allocation6 + $0x2a8] sm:$0xff]  ;;  %v761_v63 = vld [vmem:[#allocation6 + $0x2f8] sm:$0xff] }
  0x67   :  { %5759 = vmatpush1.bf16.msra.mxu0 %v5758_v7  ;;  %v670_v7 = vld [vmem:[#allocation6 + $0x20] sm:$0xff] }
  0x68   :  { %5823 = vmatpush1.bf16.msra.mxu1 %v5822_v8  ;;  %5761 = vmatprep.subr.bf16.mxu0 %v5760_v9  ;;  %v678_v8 = vld [vmem:[#allocation6 + $0x60] sm:$0xff]  ;;  %v672_v9 = vld [vmem:[#allocation6 + $0x30] sm:$0xff] }
  0x69   :  { %5825 = vmatprep.subr.bf16.mxu1 %v5824_v12  ;;  %v695_v12 = vld [vmem:[#allocation6 + $0xe8] sm:$0xff]  ;;  %v5846_v15 = vpack.c.bf16 %v678_v8, %v670_v7  ;;  %v5910_v16 = vpack.c.bf16 %v680_v10, %v672_v9  ;;  %v5928_v7 = vpack.c.bf16 %v761_v63, %v753_v57  ;;  %v760_v8 = vld [vmem:[#allocation6 + $0x2f0] sm:$0xff]  ;;  %v769_v10 = vld [vmem:[#allocation6 + $0x338] sm:$0xff] }
  0x6a   :  { %v5848_v17 = vpack.c.bf16 %v695_v12, %v687_v11  ;;  %v767_v9 = vld [vmem:[#allocation6 + $0x328] sm:$0xff]  ;;  %v777_v11 = vld [vmem:[#allocation6 + $0x378] sm:$0xff] }
  0x6b   :  { %5763 = vmatpush1.bf16.msra.mxu0 %v5762_v18  ;;  %v686_v18 = vld [vmem:[#allocation6 + $0xa0] sm:$0xff] }
  0x6c   :  { %5827 = vmatpush1.bf16.msra.mxu1 %v5826_v19  ;;  %5765 = vmatprep.subr.bf16.mxu0 %v5764_v20  ;;  %v694_v19 = vld [vmem:[#allocation6 + $0xe0] sm:$0xff]  ;;  %v688_v20 = vld [vmem:[#allocation6 + $0xb0] sm:$0xff] }
  0x6d   :  { %5829 = vmatprep.subr.bf16.mxu1 %v5828_v23  ;;  %v711_v23 = vld [vmem:[#allocation6 + $0x168] sm:$0xff]  ;;  %v5850_v26 = vpack.c.bf16 %v694_v19, %v686_v18  ;;  %v5914_v27 = vpack.c.bf16 %v696_v21, %v688_v20  ;;  %v5932_v18 = vpack.c.bf16 %v777_v11, %v769_v10  ;;  %v776_v19 = vld [vmem:[#allocation6 + $0x370] sm:$0xff]  ;;  %v785_v21 = vld [vmem:[#allocation6 + $0x3b8] sm:$0xff] }
  0x6e   :  { %v5852_v28 = vpack.c.bf16 %v711_v23, %v703_v22  ;;  %v783_v20 = vld [vmem:[#allocation6 + $0x3a8] sm:$0xff]  ;;  %v793_v22 = vld [vmem:[#allocation6 + $0x3f8] sm:$0xff] }
  0x6f   :  { %5767 = vmatpush1.bf16.msra.mxu0 %v5766_v29  ;;  %v702_v29 = vld [vmem:[#allocation6 + $0x120] sm:$0xff] }
  0x70   :  { %5831 = vmatpush1.bf16.msra.mxu1 %v5830_v31  ;;  %5769 = vmatprep.subr.bf16.mxu0 %v5768_v32  ;;  %v710_v31 = vld [vmem:[#allocation6 + $0x160] sm:$0xff]  ;;  %v704_v32 = vld [vmem:[#allocation6 + $0x130] sm:$0xff] }
  0x71   :  { %5833 = vmatprep.subr.bf16.mxu1 %v5832_v34  ;;  %v727_v34 = vld [vmem:[#allocation6 + $0x1e8] sm:$0xff]  ;;  %v5854_v37 = vpack.c.bf16 %v710_v31, %v702_v29  ;;  %v5918_v38 = vpack.c.bf16 %v712_v30, %v704_v32  ;;  %v5936_v29 = vpack.c.bf16 %v793_v22, %v785_v21  ;;  %v792_v31 = vld [vmem:[#allocation6 + $0x3f0] sm:$0xff]  ;;  %v801_v30 = vld [vmem:[#allocation6 + $0x438] sm:$0xff] }
  0x72   :  { %v5856_v39 = vpack.c.bf16 %v727_v34, %v719_v33  ;;  %v799_v32 = vld [vmem:[#allocation6 + $0x428] sm:$0xff]  ;;  %v809_v33 = vld [vmem:[#allocation6 + $0x478] sm:$0xff] }
  0x73   :  { %5771 = vmatpush1.bf16.msra.mxu0 %v5770_v40  ;;  %v718_v40 = vld [vmem:[#allocation6 + $0x1a0] sm:$0xff] }
  0x74   :  { %5835 = vmatpush1.bf16.msra.mxu1 %v5834_v41  ;;  %5773 = vmatprep.subr.bf16.mxu0 %v5772_v42  ;;  %v726_v41 = vld [vmem:[#allocation6 + $0x1e0] sm:$0xff]  ;;  %v720_v42 = vld [vmem:[#allocation6 + $0x1b0] sm:$0xff] }
  0x75   :  { %5837 = vmatprep.subr.bf16.mxu1 %v5836_v45  ;;  %v743_v45 = vld [vmem:[#allocation6 + $0x268] sm:$0xff]  ;;  %v5858_v48 = vpack.c.bf16 %v726_v41, %v718_v40  ;;  %v5922_v49 = vpack.c.bf16 %v728_v43, %v720_v42  ;;  %v5940_v40 = vpack.c.bf16 %v809_v33, %v801_v30  ;;  %v808_v41 = vld [vmem:[#allocation6 + $0x470] sm:$0xff]  ;;  %v817_v43 = vld [vmem:[#allocation6 + $0x4b8] sm:$0xff] }
  0x76   :  { %v5860_v50 = vpack.c.bf16 %v743_v45, %v735_v44  ;;  %v815_v42 = vld [vmem:[#allocation6 + $0x4a8] sm:$0xff]  ;;  %v825_v44 = vld [vmem:[#allocation6 + $0x4f8] sm:$0xff] }
  0x77   :  { %5775 = vmatpush1.bf16.msra.mxu0 %v5774_v51  ;;  %v734_v51 = vld [vmem:[#allocation6 + $0x220] sm:$0xff] }
  0x78   :  { %5839 = vmatpush1.bf16.msra.mxu1 %v5838_v52  ;;  %5777 = vmatprep.subr.bf16.mxu0 %v5776_v53  ;;  %v742_v52 = vld [vmem:[#allocation6 + $0x260] sm:$0xff]  ;;  %v736_v53 = vld [vmem:[#allocation6 + $0x230] sm:$0xff] }
  0x79   :  { %5841 = vmatprep.subr.bf16.mxu1 %v5840_v56  ;;  %v759_v56 = vld [vmem:[#allocation6 + $0x2e8] sm:$0xff]  ;;  %v5862_v1 = vpack.c.bf16 %v742_v52, %v734_v51  ;;  %v5926_v2 = vpack.c.bf16 %v744_v54, %v736_v53  ;;  %v5944_v51 = vpack.c.bf16 %v825_v44, %v817_v43  ;;  %v824_v52 = vld [vmem:[#allocation6 + $0x4f0] sm:$0xff]  ;;  %v833_v54 = vld [vmem:[#allocation6 + $0x538] sm:$0xff] }
  0x7a   :  { %v5864_v3 = vpack.c.bf16 %v759_v56, %v751_v55  ;;  %v831_v53 = vld [vmem:[#allocation6 + $0x528] sm:$0xff]  ;;  %v841_v55 = vld [vmem:[#allocation6 + $0x578] sm:$0xff] }
  0x7b   :  { %5779 = vmatpush1.bf16.msra.mxu0 %v5778_v4  ;;  %v750_v4 = vld [vmem:[#allocation6 + $0x2a0] sm:$0xff] }
  0x7c   :  { %5843 = vmatpush1.bf16.msra.mxu1 %v5842_v5  ;;  %5845 = vmatprep.subr.bf16.mxu0 %v5844_v6  ;;  %v758_v5 = vld [vmem:[#allocation6 + $0x2e0] sm:$0xff]  ;;  %v752_v6 = vld [vmem:[#allocation6 + $0x2b0] sm:$0xff] }
  0x7d   :  { %5909 = vmatprep.subr.bf16.mxu1 %v5908_v58  ;;  %v775_v58 = vld [vmem:[#allocation6 + $0x368] sm:$0xff]  ;;  %v5866_v12 = vpack.c.bf16 %v758_v5, %v750_v4  ;;  %v5930_v13 = vpack.c.bf16 %v760_v8, %v752_v6  ;;  %v5948_v4 = vpack.c.bf16 %v841_v55, %v833_v54  ;;  %v840_v5 = vld [vmem:[#allocation6 + $0x570] sm:$0xff]  ;;  %v849_v8 = vld [vmem:[#allocation6 + $0x5b8] sm:$0xff] }
  0x7e   :  { %987 = vmatmul.mubr.f32.vlgmr.msra.gmra.mrb[0].mxu0 %v8195_v0  ;;  %v5868_v14 = vpack.c.bf16 %v775_v58, %v767_v9  ;;  %v847_v6 = vld [vmem:[#allocation6 + $0x5a8] sm:$0xff]  ;;  %v857_v9 = vld [vmem:[#allocation6 + $0x5f8] sm:$0xff] }
  0x7f   :  { %1058 = vmatmul.mubr.f32.vlgmr.msra.gmra.mrb[0].mxu1 %v8195_v0  ;;  %5847 = vmatpush1.bf16.msra.mxu0 %v5846_v15  ;;  %v766_v15 = vld [vmem:[#allocation6 + $0x320] sm:$0xff] }
  0x80   :  { %5911 = vmatpush1.bf16.msra.mxu1 %v5910_v16  ;;  %5849 = vmatprep.subr.bf16.mxu0 %v5848_v17  ;;  %v774_v16 = vld [vmem:[#allocation6 + $0x360] sm:$0xff]  ;;  %v768_v17 = vld [vmem:[#allocation6 + $0x330] sm:$0xff] }
  0x81   :  { %5913 = vmatprep.subr.bf16.mxu1 %v5912_v59  ;;  %1128 = vmatprep.mubr.f32.mxu0 %v8195_v0  ;;  %v791_v59 = vld [vmem:[#allocation6 + $0x3e8] sm:$0xff]  ;;  %v5870_v23 = vpack.c.bf16 %v774_v16, %v766_v15  ;;  %v5934_v24 = vpack.c.bf16 %v776_v19, %v768_v17  ;;  %v5952_v15 = vpack.c.bf16 %v857_v9, %v849_v8  ;;  %v856_v16 = vld [vmem:[#allocation6 + $0x5f0] sm:$0xff]  ;;  %v865_v19 = vld [vmem:[#allocation6 + $0x638] sm:$0xff] }
  0x82   :  { %1199 = vmatprep.mubr.f32.mxu1 %v8195_v0  ;;  %v5872_v25 = vpack.c.bf16 %v791_v59, %v783_v20  ;;  %v863_v17 = vld [vmem:[#allocation6 + $0x628] sm:$0xff]  ;;  %v873_v20 = vld [vmem:[#allocation6 + $0x678] sm:$0xff] }
  0x83   :  { %5851 = vmatpush1.bf16.msra.mxu0 %v5850_v26  ;;  %v782_v26 = vld [vmem:[#allocation6 + $0x3a0] sm:$0xff]  ;;  %v1303_v9 = vld [vmem:[#allocation6 + $0x58] sm:$0xff] }
  0x84   :  { %5915 = vmatpush1.bf16.msra.mxu1 %v5914_v27  ;;  %5853 = vmatprep.subr.bf16.mxu0 %v5852_v28  ;;  %v790_v27 = vld [vmem:[#allocation6 + $0x3e0] sm:$0xff]  ;;  %v784_v28 = vld [vmem:[#allocation6 + $0x3b0] sm:$0xff] }
  0x85   :  { %5917 = vmatprep.subr.bf16.mxu1 %v5916_v60  ;;  %v807_v60 = vld [vmem:[#allocation6 + $0x468] sm:$0xff]  ;;  %v5874_v34 = vpack.c.bf16 %v790_v27, %v782_v26  ;;  %v5938_v35 = vpack.c.bf16 %v792_v31, %v784_v28  ;;  %v5956_v26 = vpack.c.bf16 %v873_v20, %v865_v19  ;;  %v872_v27 = vld [vmem:[#allocation6 + $0x670] sm:$0xff]  ;;  %v881_v31 = vld [vmem:[#allocation6 + $0x6b8] sm:$0xff] }
  0x86   :  { %v5876_v36 = vpack.c.bf16 %v807_v60, %v799_v32  ;;  %v879_v28 = vld [vmem:[#allocation6 + $0x6a8] sm:$0xff]  ;;  %v889_v32 = vld [vmem:[#allocation6 + $0x6f8] sm:$0xff]  ;;  %v1308_v20 = vld [vmem:[#allocation6 + $0x80] sm:$0xff] }
  0x87   :  { %5855 = vmatpush1.bf16.msra.mxu0 %v5854_v37  ;;  %v798_v37 = vld [vmem:[#allocation6 + $0x420] sm:$0xff]  ;;  %v1319_v19 = vld [vmem:[#allocation6 + $0xd8] sm:$0xff] }
  0x88   :  { %5919 = vmatpush1.bf16.msra.mxu1 %v5918_v38  ;;  %5857 = vmatprep.subr.bf16.mxu0 %v5856_v39  ;;  %v806_v38 = vld [vmem:[#allocation6 + $0x460] sm:$0xff]  ;;  %v800_v39 = vld [vmem:[#allocation6 + $0x430] sm:$0xff] }
  0x89   :  { %5921 = vmatprep.subr.bf16.mxu1 %v5920_v61  ;;  %v823_v61 = vld [vmem:[#allocation6 + $0x4e8] sm:$0xff]  ;;  %v5878_v45 = vpack.c.bf16 %v806_v38, %v798_v37  ;;  %v5942_v46 = vpack.c.bf16 %v808_v41, %v800_v39  ;;  %v5960_v37 = vpack.c.bf16 %v889_v32, %v881_v31  ;;  %v888_v38 = vld [vmem:[#allocation6 + $0x6f0] sm:$0xff]  ;;  %v897_v41 = vld [vmem:[#allocation6 + $0x738] sm:$0xff] }
  0x8a   :  { %v5880_v47 = vpack.c.bf16 %v823_v61, %v815_v42  ;;  %v895_v39 = vld [vmem:[#allocation6 + $0x728] sm:$0xff]  ;;  %v905_v42 = vld [vmem:[#allocation6 + $0x778] sm:$0xff] }
  0x8b   :  { %5859 = vmatpush1.bf16.msra.mxu0 %v5858_v48  ;;  %v814_v48 = vld [vmem:[#allocation6 + $0x4a0] sm:$0xff] }
  0x8c   :  { %5923 = vmatpush1.bf16.msra.mxu1 %v5922_v49  ;;  %5861 = vmatprep.subr.bf16.mxu0 %v5860_v50  ;;  %v822_v49 = vld [vmem:[#allocation6 + $0x4e0] sm:$0xff]  ;;  %v816_v50 = vld [vmem:[#allocation6 + $0x4b0] sm:$0xff] }
  0x8d   :  { %5925 = vmatprep.subr.bf16.mxu1 %v5924_v62  ;;  %v839_v62 = vld [vmem:[#allocation6 + $0x568] sm:$0xff]  ;;  %v5882_v56 = vpack.c.bf16 %v822_v49, %v814_v48  ;;  %v5946_v57 = vpack.c.bf16 %v824_v52, %v816_v50  ;;  %v5964_v48 = vpack.c.bf16 %v905_v42, %v897_v41  ;;  %v904_v49 = vld [vmem:[#allocation6 + $0x770] sm:$0xff]  ;;  %v913_v52 = vld [vmem:[#allocation6 + $0x7b8] sm:$0xff] }
  0x8e   :  { %v5884_v63 = vpack.c.bf16 %v839_v62, %v831_v53  ;;  %v911_v50 = vld [vmem:[#allocation6 + $0x7a8] sm:$0xff]  ;;  %v921_v53 = vld [vmem:[#allocation6 + $0x7f8] sm:$0xff]  ;;  %v1340_v42 = vld [vmem:[#allocation6 + $0x180] sm:$0xff] }
  0x8f   :  { %5863 = vmatpush1.bf16.msra.mxu0 %v5862_v1  ;;  %v830_v1 = vld [vmem:[#allocation6 + $0x520] sm:$0xff]  ;;  %v1351_v41 = vld [vmem:[#allocation6 + $0x1d8] sm:$0xff] }
  0x90   :  { %5927 = vmatpush1.bf16.msra.mxu1 %v5926_v2  ;;  %5865 = vmatprep.subr.bf16.mxu0 %v5864_v3  ;;  %v838_v2 = vld [vmem:[#allocation6 + $0x560] sm:$0xff]  ;;  %v832_v3 = vld [vmem:[#allocation6 + $0x530] sm:$0xff] }
  0x91   :  { %5929 = vmatprep.subr.bf16.mxu1 %v5928_v7  ;;  %v855_v7 = vld [vmem:[#allocation6 + $0x5e8] sm:$0xff]  ;;  %v5886_v58 = vpack.c.bf16 %v838_v2, %v830_v1  ;;  %v5950_v10 = vpack.c.bf16 %v840_v5, %v832_v3  ;;  %v912_v1 = vld [vmem:[#allocation6 + $0x7b0] sm:$0xff] }
  0x92   :  { %v5888_v11 = vpack.c.bf16 %v855_v7, %v847_v6  ;;  %v920_v2 = vld [vmem:[#allocation6 + $0x7f0] sm:$0xff]  ;;  %v1293_v5 = vld [vmem:[#allocation6 + $0x8] sm:$0xff]  ;;  %v1295_v7 = vld [vmem:[#allocation6 + $0x18] sm:$0xff] }
  0x93   :  { %5867 = vmatpush1.bf16.msra.mxu0 %v5866_v12  ;;  %v846_v12 = vld [vmem:[#allocation6 + $0x5a0] sm:$0xff]  ;;  %v1301_v6 = vld [vmem:[#allocation6 + $0x48] sm:$0xff] }
  0x94   :  { %5931 = vmatpush1.bf16.msra.mxu1 %v5930_v13  ;;  %5869 = vmatprep.subr.bf16.mxu0 %v5868_v14  ;;  %v854_v13 = vld [vmem:[#allocation6 + $0x5e0] sm:$0xff]  ;;  %v848_v14 = vld [vmem:[#allocation6 + $0x5b0] sm:$0xff]  ;;  %v5972_v8 = vpack.c.bf16 %v1301_v6, %v1293_v5  ;;  %v1383_v5 = vld [vmem:[#allocation6 + $0x2d8] sm:$0xff] }
  0x95   :  { %5933 = vmatprep.subr.bf16.mxu1 %v5932_v18  ;;  %v871_v18 = vld [vmem:[#allocation6 + $0x668] sm:$0xff]  ;;  %v5890_v59 = vpack.c.bf16 %v854_v13, %v846_v12  ;;  %v5954_v21 = vpack.c.bf16 %v856_v16, %v848_v14  ;;  %v1294_v13 = vld [vmem:[#allocation6 + $0x10] sm:$0xff]  ;;  %v1372_v6 = vld [vmem:[#allocation6 + $0x280] sm:$0xff] }
  0x96   :  { %v5892_v22 = vpack.c.bf16 %v871_v18, %v863_v17  ;;  %v1302_v14 = vld [vmem:[#allocation6 + $0x50] sm:$0xff]  ;;  %v1309_v16 = vld [vmem:[#allocation6 + $0x88] sm:$0xff]  ;;  %v1311_v18 = vld [vmem:[#allocation6 + $0x98] sm:$0xff] }
  0x97   :  { %5871 = vmatpush1.bf16.msra.mxu0 %v5870_v23  ;;  %v862_v23 = vld [vmem:[#allocation6 + $0x620] sm:$0xff]  ;;  %v1317_v17 = vld [vmem:[#allocation6 + $0xc8] sm:$0xff] }
  0x98   :  { %5935 = vmatpush1.bf16.msra.mxu1 %v5934_v24  ;;  %5873 = vmatprep.subr.bf16.mxu0 %v5872_v25  ;;  %v870_v24 = vld [vmem:[#allocation6 + $0x660] sm:$0xff]  ;;  %v864_v25 = vld [vmem:[#allocation6 + $0x630] sm:$0xff] }
  0x99   :  { %5937 = vmatprep.subr.bf16.mxu1 %v5936_v29  ;;  %v887_v29 = vld [vmem:[#allocation6 + $0x6e8] sm:$0xff]  ;;  %v5894_v60 = vpack.c.bf16 %v870_v24, %v862_v23  ;;  %v5958_v30 = vpack.c.bf16 %v872_v27, %v864_v25  ;;  %v1310_v23 = vld [vmem:[#allocation6 + $0x90] sm:$0xff] }
  0x9a   :  { %v5896_v33 = vpack.c.bf16 %v887_v29, %v879_v28  ;;  %v1318_v24 = vld [vmem:[#allocation6 + $0xd0] sm:$0xff]  ;;  %v1325_v25 = vld [vmem:[#allocation6 + $0x108] sm:$0xff]  ;;  %v1327_v28 = vld [vmem:[#allocation6 + $0x118] sm:$0xff] }
  0x9b   :  { %5875 = vmatpush1.bf16.msra.mxu0 %v5874_v34  ;;  %v878_v34 = vld [vmem:[#allocation6 + $0x6a0] sm:$0xff]  ;;  %v1333_v27 = vld [vmem:[#allocation6 + $0x148] sm:$0xff]  ;;  %v1335_v29 = vld [vmem:[#allocation6 + $0x158] sm:$0xff] }
  0x9c   :  { %5939 = vmatpush1.bf16.msra.mxu1 %v5938_v35  ;;  %5877 = vmatprep.subr.bf16.mxu0 %v5876_v36  ;;  %v886_v35 = vld [vmem:[#allocation6 + $0x6e0] sm:$0xff]  ;;  %v880_v36 = vld [vmem:[#allocation6 + $0x6b0] sm:$0xff]  ;;  %v5980_v31 = vpack.c.bf16 %v1333_v27, %v1325_v25  ;;  %v6044_v32 = vpack.c.bf16 %v1335_v29, %v1327_v28 }
  0x9d   :  { %5941 = vmatprep.subr.bf16.mxu1 %v5940_v40  ;;  %v903_v40 = vld [vmem:[#allocation6 + $0x768] sm:$0xff]  ;;  %v5898_v61 = vpack.c.bf16 %v886_v35, %v878_v34  ;;  %v5962_v43 = vpack.c.bf16 %v888_v38, %v880_v36  ;;  %v1334_v35 = vld [vmem:[#allocation6 + $0x150] sm:$0xff]  ;;  %v1404_v27 = vld [vmem:[#allocation6 + $0x380] sm:$0xff] }
  0x9e   :  { %v5900_v44 = vpack.c.bf16 %v903_v40, %v895_v39  ;;  %v1341_v36 = vld [vmem:[#allocation6 + $0x188] sm:$0xff]  ;;  %v1343_v40 = vld [vmem:[#allocation6 + $0x198] sm:$0xff]  ;;  %v1412_v28 = vld [vmem:[#allocation6 + $0x3c0] sm:$0xff] }
  0x9f   :  { %5879 = vmatpush1.bf16.msra.mxu0 %v5878_v45  ;;  %v894_v45 = vld [vmem:[#allocation6 + $0x720] sm:$0xff] }
  0xa0   :  { %5943 = vmatpush1.bf16.msra.mxu1 %v5942_v46  ;;  %5881 = vmatprep.subr.bf16.mxu0 %v5880_v47  ;;  %v902_v46 = vld [vmem:[#allocation6 + $0x760] sm:$0xff]  ;;  %v896_v47 = vld [vmem:[#allocation6 + $0x730] sm:$0xff] }
  0xa1   :  { %5945 = vmatprep.subr.bf16.mxu1 %v5944_v51  ;;  %v919_v51 = vld [vmem:[#allocation6 + $0x7e8] sm:$0xff]  ;;  %v5902_v62 = vpack.c.bf16 %v902_v46, %v894_v45  ;;  %v5966_v54 = vpack.c.bf16 %v904_v49, %v896_v47  ;;  %v1350_v45 = vld [vmem:[#allocation6 + $0x1d0] sm:$0xff]  ;;  %v1359_v49 = vld [vmem:[#allocation6 + $0x218] sm:$0xff] }
  0xa2   :  { %v5904_v55 = vpack.c.bf16 %v919_v51, %v911_v50  ;;  %v1357_v47 = vld [vmem:[#allocation6 + $0x208] sm:$0xff] }
  0xa3   :  { %5883 = vmatpush1.bf16.msra.mxu0 %v5882_v56  ;;  %v910_v56 = vld [vmem:[#allocation6 + $0x7a0] sm:$0xff] }
  0xa4   :  { %5947 = vmatpush1.bf16.msra.mxu1 %v5946_v57  ;;  %5885 = vmatprep.subr.bf16.mxu0 %v5884_v63  ;;  %v918_v57 = vld [vmem:[#allocation6 + $0x7e0] sm:$0xff]  ;;  %v5968_v63 = vpack.c.bf16 %v921_v53, %v913_v52  ;;  %v1367_v52 = vld [vmem:[#allocation6 + $0x258] sm:$0xff] }
  0xa5   :  { %5949 = vmatprep.subr.bf16.mxu1 %v5948_v4  ;;  %v5906_v3 = vpack.c.bf16 %v918_v57, %v910_v56  ;;  %v5970_v4 = vpack.c.bf16 %v920_v2, %v912_v1  ;;  %v6052_v53 = vpack.c.bf16 %v1367_v52, %v1359_v49  ;;  %v1366_v57 = vld [vmem:[#allocation6 + $0x250] sm:$0xff]  ;;  %v1373_v1 = vld [vmem:[#allocation6 + $0x288] sm:$0xff]  ;;  %v1436_v49 = vld [vmem:[#allocation6 + $0x480] sm:$0xff] }
  0xa6   :  { %v1381_v2 = vld [vmem:[#allocation6 + $0x2c8] sm:$0xff] }
  0xa7   :  { %5887 = vmatpush1.bf16.msra.mxu0 %v5886_v58  ;;  %v1292_v58 = vld [vmem:[#allocation6] sm:$0xff] }
  0xa8   :  { %5951 = vmatpush1.bf16.msra.mxu1 %v5950_v10  ;;  %5889 = vmatprep.subr.bf16.mxu0 %v5888_v11  ;;  %v1300_v10 = vld [vmem:[#allocation6 + $0x40] sm:$0xff]  ;;  %v6036_v11 = vpack.c.bf16 %v1303_v9, %v1295_v7 }
  0xa9   :  { %5953 = vmatprep.subr.bf16.mxu1 %v5952_v15  ;;  %v5974_v12 = vpack.c.bf16 %v1300_v10, %v1292_v58  ;;  %v6038_v15 = vpack.c.bf16 %v1302_v14, %v1294_v13  ;;  %v1380_v7 = vld [vmem:[#allocation6 + $0x2c0] sm:$0xff]  ;;  %v1374_v58 = vld [vmem:[#allocation6 + $0x290] sm:$0xff]  ;;  %v1397_v13 = vld [vmem:[#allocation6 + $0x348] sm:$0xff] }
  0xaa   :  { %v5994_v9 = vpack.c.bf16 %v1380_v7, %v1372_v6  ;;  %v1382_v10 = vld [vmem:[#allocation6 + $0x2d0] sm:$0xff]  ;;  %v1391_v14 = vld [vmem:[#allocation6 + $0x318] sm:$0xff] }
  0xab   :  { %5891 = vmatpush1.bf16.msra.mxu0 %v5890_v59  ;;  %v1316_v59 = vld [vmem:[#allocation6 + $0xc0] sm:$0xff]  ;;  %v1454_v6 = vld [vmem:[#allocation6 + $0x510] sm:$0xff] }
  0xac   :  { %5955 = vmatpush1.bf16.msra.mxu1 %v5954_v21  ;;  %5893 = vmatprep.subr.bf16.mxu0 %v5892_v22  ;;  %v6040_v21 = vpack.c.bf16 %v1319_v19, %v1311_v18  ;;  %v5978_v22 = vpack.c.bf16 %v1316_v59, %v1308_v20  ;;  %v1396_v18 = vld [vmem:[#allocation6 + $0x340] sm:$0xff]  ;;  %v1390_v20 = vld [vmem:[#allocation6 + $0x310] sm:$0xff] }
  0xad   :  { %5957 = vmatprep.subr.bf16.mxu1 %v5956_v26  ;;  %v6042_v26 = vpack.c.bf16 %v1318_v24, %v1310_v23  ;;  %v1398_v59 = vld [vmem:[#allocation6 + $0x350] sm:$0xff]  ;;  %v1413_v23 = vld [vmem:[#allocation6 + $0x3c8] sm:$0xff]  ;;  %v1407_v24 = vld [vmem:[#allocation6 + $0x398] sm:$0xff] }
  0xae   :  { %v1462_v7 = vld [vmem:[#allocation6 + $0x550] sm:$0xff] }
  0xaf   :  { %5895 = vmatpush1.bf16.msra.mxu0 %v5894_v60  ;;  %v1324_v60 = vld [vmem:[#allocation6 + $0x100] sm:$0xff] }
  0xb0   :  { %5959 = vmatpush1.bf16.msra.mxu1 %v5958_v30  ;;  %5897 = vmatprep.subr.bf16.mxu0 %v5896_v33  ;;  %v1332_v30 = vld [vmem:[#allocation6 + $0x140] sm:$0xff]  ;;  %v1326_v33 = vld [vmem:[#allocation6 + $0x110] sm:$0xff] }
  0xb1   :  { %5961 = vmatprep.subr.bf16.mxu1 %v5960_v37  ;;  %v5982_v34 = vpack.c.bf16 %v1332_v30, %v1324_v60  ;;  %v1349_v37 = vld [vmem:[#allocation6 + $0x1c8] sm:$0xff]  ;;  %v6046_v38 = vpack.c.bf16 %v1334_v35, %v1326_v33  ;;  %v1414_v60 = vld [vmem:[#allocation6 + $0x3d0] sm:$0xff]  ;;  %v1423_v35 = vld [vmem:[#allocation6 + $0x418] sm:$0xff] }
  0xb2   :  { %v5984_v39 = vpack.c.bf16 %v1349_v37, %v1341_v36  ;;  %v1421_v33 = vld [vmem:[#allocation6 + $0x408] sm:$0xff]  ;;  %v1431_v37 = vld [vmem:[#allocation6 + $0x458] sm:$0xff] }
  0xb3   :  { %5899 = vmatpush1.bf16.msra.mxu0 %v5898_v61  ;;  %v6048_v61 = vpack.c.bf16 %v1351_v41, %v1343_v40  ;;  %v6068_v40 = vpack.c.bf16 %v1431_v37, %v1423_v35  ;;  %v1508_v35 = vld [vmem:[#allocation6 + $0x6c0] sm:$0xff] }
  0xb4   :  { %5963 = vmatpush1.bf16.msra.mxu1 %v5962_v43  ;;  %5901 = vmatprep.subr.bf16.mxu0 %v5900_v44  ;;  %v1348_v43 = vld [vmem:[#allocation6 + $0x1c0] sm:$0xff]  ;;  %v1342_v44 = vld [vmem:[#allocation6 + $0x190] sm:$0xff] }
  0xb5   :  { %5965 = vmatprep.subr.bf16.mxu1 %v5964_v48  ;;  %v5986_v46 = vpack.c.bf16 %v1348_v43, %v1340_v42  ;;  %v1365_v48 = vld [vmem:[#allocation6 + $0x248] sm:$0xff]  ;;  %v6050_v50 = vpack.c.bf16 %v1350_v45, %v1342_v44  ;;  %v1422_v42 = vld [vmem:[#allocation6 + $0x410] sm:$0xff] }
  0xb6   :  { %v5988_v51 = vpack.c.bf16 %v1365_v48, %v1357_v47  ;;  %v1437_v44 = vld [vmem:[#allocation6 + $0x488] sm:$0xff]  ;;  %v1447_v48 = vld [vmem:[#allocation6 + $0x4d8] sm:$0xff] }
  0xb7   :  { %5903 = vmatpush1.bf16.msra.mxu0 %v5902_v62  ;;  %v1356_v62 = vld [vmem:[#allocation6 + $0x200] sm:$0xff]  ;;  %v1445_v45 = vld [vmem:[#allocation6 + $0x4c8] sm:$0xff] }
  0xb8   :  { %5967 = vmatpush1.bf16.msra.mxu1 %v5966_v54  ;;  %5905 = vmatprep.subr.bf16.mxu0 %v5904_v55  ;;  %v1364_v54 = vld [vmem:[#allocation6 + $0x240] sm:$0xff]  ;;  %v1358_v55 = vld [vmem:[#allocation6 + $0x210] sm:$0xff]  ;;  %v6008_v47 = vpack.c.bf16 %v1445_v45, %v1437_v44 }
  0xb9   :  { %5969 = vmatprep.subr.bf16.mxu1 %v5968_v63  ;;  %v5990_v56 = vpack.c.bf16 %v1364_v54, %v1356_v62  ;;  %v6054_v63 = vpack.c.bf16 %v1366_v57, %v1358_v55  ;;  %v1446_v62 = vld [vmem:[#allocation6 + $0x4d0] sm:$0xff]  ;;  %v1453_v55 = vld [vmem:[#allocation6 + $0x508] sm:$0xff]  ;;  %v1455_v57 = vld [vmem:[#allocation6 + $0x518] sm:$0xff] }
  0xbb   :  { %5907 = vmatpush1.bf16.msra.mxu0 %v5906_v3  ;;  %v1375_v3 = vld [vmem:[#allocation6 + $0x298] sm:$0xff] }
  0xbc   :  { %5971 = vmatpush1.bf16.msra.mxu1 %v5970_v4  ;;  %5973 = vmatprep.subr.bf16.mxu0 %v5972_v8  ;;  %v5992_v4 = vpack.c.bf16 %v1381_v2, %v1373_v1  ;;  %v6056_v8 = vpack.c.bf16 %v1383_v5, %v1375_v3  ;;  %v1463_v1 = vld [vmem:[#allocation6 + $0x558] sm:$0xff]  ;;  %v1452_v2 = vld [vmem:[#allocation6 + $0x500] sm:$0xff] }
  0xbd   :  { %6037 = vmatprep.subr.bf16.mxu1 %v6036_v11  ;;  %v6058_v11 = vpack.c.bf16 %v1382_v10, %v1374_v58  ;;  %v1460_v3 = vld [vmem:[#allocation6 + $0x540] sm:$0xff]  ;;  %v1477_v58 = vld [vmem:[#allocation6 + $0x5c8] sm:$0xff]  ;;  %v1471_v10 = vld [vmem:[#allocation6 + $0x598] sm:$0xff] }
  0xbe   :  { %1129 = vmatmul.mubr.f32.vlgmr.msra.gmra.mrb[30].mxu0 %v8195_v0  ;;  %v6014_v5 = vpack.c.bf16 %v1460_v3, %v1452_v2  ;;  %v1542_v2 = vld [vmem:[#allocation6 + $0x7d0] sm:$0xff] }
  0xbf   :  { %1200 = vmatmul.mubr.f32.vlgmr.msra.gmra.mrb[30].mxu1 %v8195_v0  ;;  %5975 = vmatpush1.bf16.msra.mxu0 %v5974_v12  ;;  %v5976_v0 = vpack.c.bf16 %v1317_v17, %v1309_v16  ;;  %v1389_v12 = vld [vmem:[#allocation6 + $0x308] sm:$0xff]  ;;  %v1399_v16 = vld [vmem:[#allocation6 + $0x358] sm:$0xff]  ;;  %v1388_v17 = vld [vmem:[#allocation6 + $0x300] sm:$0xff] }
  0xc0   :  { %6039 = vmatpush1.bf16.msra.mxu1 %v6038_v15  ;;  %v5996_v15 = vpack.c.bf16 %v1397_v13, %v1389_v12  ;;  %v5998_v19 = vpack.c.bf16 %v1396_v18, %v1388_v17  ;;  %v1479_v12 = vld [vmem:[#allocation6 + $0x5d8] sm:$0xff]  ;;  %v1468_v13 = vld [vmem:[#allocation6 + $0x580] sm:$0xff]  ;;  %v1470_v17 = vld [vmem:[#allocation6 + $0x590] sm:$0xff] }
  0xc1   :  { %5977 = vmatprep.subr.bf16.mxu0 %v5976_v0  ;;  %6041 = vmatprep.subr.bf16.mxu1 %v6040_v21  ;;  %v6060_v0 = vpack.c.bf16 %v1399_v16, %v1391_v14  ;;  %v6062_v21 = vpack.c.bf16 %v1398_v59, %v1390_v20  ;;  %v1476_v14 = vld [vmem:[#allocation6 + $0x5c0] sm:$0xff]  ;;  %v1478_v18 = vld [vmem:[#allocation6 + $0x5d0] sm:$0xff]  ;;  %v1493_v20 = vld [vmem:[#allocation6 + $0x648] sm:$0xff] }
  0xc2   :  { %v6018_v16 = vpack.c.bf16 %v1476_v14, %v1468_v13  ;;  %v1487_v59 = vld [vmem:[#allocation6 + $0x618] sm:$0xff]  ;;  %v8494_v13 = vld [vmem:[%s8770_s2] sm:$0xff] }
  0xc3   :  { %5979 = vmatpush1.bf16.msra.mxu0 %v5978_v22  ;;  %v1405_v22 = vld [vmem:[#allocation6 + $0x388] sm:$0xff] }
  0xc4   :  { %6043 = vmatpush1.bf16.msra.mxu1 %v6042_v26  ;;  %5981 = vmatprep.subr.bf16.mxu0 %v5980_v31  ;;  %v6000_v25 = vpack.c.bf16 %v1413_v23, %v1405_v22  ;;  %v1415_v26 = vld [vmem:[#allocation6 + $0x3d8] sm:$0xff]  ;;  %v6002_v31 = vpack.c.bf16 %v1412_v28, %v1404_v27  ;;  %v1484_v23 = vld [vmem:[#allocation6 + $0x600] sm:$0xff]  ;;  %v1486_v27 = vld [vmem:[#allocation6 + $0x610] sm:$0xff] }
  0xc5   :  { %6045 = vmatprep.subr.bf16.mxu1 %v6044_v32  ;;  %v6064_v29 = vpack.c.bf16 %v1415_v26, %v1407_v24  ;;  %v1406_v32 = vld [vmem:[#allocation6 + $0x390] sm:$0xff]  ;;  %v1495_v22 = vld [vmem:[#allocation6 + $0x658] sm:$0xff]  ;;  %v1492_v24 = vld [vmem:[#allocation6 + $0x640] sm:$0xff] }
  0xc6   :  { %v6066_v30 = vpack.c.bf16 %v1414_v60, %v1406_v32  ;;  %v6022_v26 = vpack.c.bf16 %v1492_v24, %v1484_v23  ;;  %v1494_v28 = vld [vmem:[#allocation6 + $0x650] sm:$0xff]  ;;  %v1509_v32 = vld [vmem:[#allocation6 + $0x6c8] sm:$0xff]  ;;  %v1503_v60 = vld [vmem:[#allocation6 + $0x698] sm:$0xff] }
  0xc7   :  { %5983 = vmatpush1.bf16.msra.mxu0 %v5982_v34  ;;  %v1429_v34 = vld [vmem:[#allocation6 + $0x448] sm:$0xff] }
  0xc8   :  { %6047 = vmatpush1.bf16.msra.mxu1 %v6046_v38  ;;  %5985 = vmatprep.subr.bf16.mxu0 %v5984_v39  ;;  %v6004_v36 = vpack.c.bf16 %v1429_v34, %v1421_v33  ;;  %v1420_v38 = vld [vmem:[#allocation6 + $0x400] sm:$0xff]  ;;  %v1511_v33 = vld [vmem:[#allocation6 + $0x6d8] sm:$0xff] }
  0xc9   :  { %6049 = vmatprep.subr.bf16.mxu1 %v6048_v61  ;;  %v1428_v39 = vld [vmem:[#allocation6 + $0x440] sm:$0xff]  ;;  %v1430_v61 = vld [vmem:[#allocation6 + $0x450] sm:$0xff] }
  0xca   :  { %v6006_v41 = vpack.c.bf16 %v1428_v39, %v1420_v38  ;;  %v6070_v43 = vpack.c.bf16 %v1430_v61, %v1422_v42  ;;  %v1500_v34 = vld [vmem:[#allocation6 + $0x680] sm:$0xff]  ;;  %v1502_v38 = vld [vmem:[#allocation6 + $0x690] sm:$0xff]  ;;  %v1525_v42 = vld [vmem:[#allocation6 + $0x748] sm:$0xff] }
  0xcb   :  { %5987 = vmatpush1.bf16.msra.mxu0 %v5986_v46  ;;  %v1439_v46 = vld [vmem:[#allocation6 + $0x498] sm:$0xff]  ;;  %v6026_v37 = vpack.c.bf16 %v1508_v35, %v1500_v34  ;;  %v1510_v39 = vld [vmem:[#allocation6 + $0x6d0] sm:$0xff] }
  0xcc   :  { %6051 = vmatpush1.bf16.msra.mxu1 %v6050_v50  ;;  %5989 = vmatprep.subr.bf16.mxu0 %v5988_v51  ;;  %v1444_v50 = vld [vmem:[#allocation6 + $0x4c0] sm:$0xff]  ;;  %v6072_v51 = vpack.c.bf16 %v1447_v48, %v1439_v46  ;;  %v1519_v61 = vld [vmem:[#allocation6 + $0x718] sm:$0xff]  ;;  %v1518_v48 = vld [vmem:[#allocation6 + $0x710] sm:$0xff] }
  0xcd   :  { %6053 = vmatprep.subr.bf16.mxu1 %v6052_v53  ;;  %v6010_v52 = vpack.c.bf16 %v1444_v50, %v1436_v49  ;;  %v1438_v53 = vld [vmem:[#allocation6 + $0x490] sm:$0xff]  ;;  %v1516_v46 = vld [vmem:[#allocation6 + $0x700] sm:$0xff] }
  0xce   :  { %v6074_v54 = vpack.c.bf16 %v1446_v62, %v1438_v53  ;;  %v1526_v50 = vld [vmem:[#allocation6 + $0x750] sm:$0xff] }
  0xcf   :  { %5991 = vmatpush1.bf16.msra.mxu0 %v5990_v56  ;;  %v1461_v56 = vld [vmem:[#allocation6 + $0x548] sm:$0xff]  ;;  %v6094_v53 = vpack.c.bf16 %v1526_v50, %v1518_v48 }
  0xd0   :  { %6055 = vmatpush1.bf16.msra.mxu1 %v6054_v63  ;;  %5993 = vmatprep.subr.bf16.mxu0 %v5992_v4  ;;  %v6012_v63 = vpack.c.bf16 %v1461_v56, %v1453_v55  ;;  %v6076_v4 = vpack.c.bf16 %v1463_v1, %v1455_v57  ;;  %v1543_v55 = vld [vmem:[#allocation6 + $0x7d8] sm:$0xff]  ;;  %v1532_v56 = vld [vmem:[#allocation6 + $0x780] sm:$0xff]  ;;  %v1534_v1 = vld [vmem:[#allocation6 + $0x790] sm:$0xff] }
  0xd1   :  { %6057 = vmatprep.subr.bf16.mxu1 %v6056_v8  ;;  %v6078_v8 = vpack.c.bf16 %v1462_v7, %v1454_v6  ;;  %v1305_v6 = vld [vmem:[#allocation6 + $0x68] sm:$0xff]  ;;  %v1299_v7 = vld [vmem:[#allocation6 + $0x38] sm:$0xff] }
  0xd3   :  { %5995 = vmatpush1.bf16.msra.mxu0 %v5994_v9  ;;  %v1469_v9 = vld [vmem:[#allocation6 + $0x588] sm:$0xff] }
  0xd4   :  { %6059 = vmatpush1.bf16.msra.mxu1 %v6058_v11  ;;  %5997 = vmatprep.subr.bf16.mxu0 %v5996_v15  ;;  %v6016_v11 = vpack.c.bf16 %v1477_v58, %v1469_v9  ;;  %v6080_v15 = vpack.c.bf16 %v1479_v12, %v1471_v10  ;;  %v1307_v58 = vld [vmem:[#allocation6 + $0x78] sm:$0xff] }
  0xd5   :  { %6061 = vmatprep.subr.bf16.mxu1 %v6060_v0  ;;  %v6082_v0 = vpack.c.bf16 %v1478_v18, %v1470_v17  ;;  %v6164_v10 = vpack.c.bf16 %v1307_v58, %v1299_v7 }
  0xd7   :  { %5999 = vmatpush1.bf16.msra.mxu0 %v5998_v19  ;;  %v1485_v19 = vld [vmem:[#allocation6 + $0x608] sm:$0xff] }
  0xd8   :  { %6063 = vmatpush1.bf16.msra.mxu1 %v6062_v21  ;;  %6001 = vmatprep.subr.bf16.mxu0 %v6000_v25  ;;  %v6020_v21 = vpack.c.bf16 %v1493_v20, %v1485_v19  ;;  %v6084_v25 = vpack.c.bf16 %v1495_v22, %v1487_v59 }
  0xd9   :  { %6065 = vmatprep.subr.bf16.mxu1 %v6064_v29  ;;  %v6086_v29 = vpack.c.bf16 %v1494_v28, %v1486_v27 }
  0xdb   :  { %6003 = vmatpush1.bf16.msra.mxu0 %v6002_v31  ;;  %v1501_v31 = vld [vmem:[#allocation6 + $0x688] sm:$0xff] }
  0xdc   :  { %6067 = vmatpush1.bf16.msra.mxu1 %v6066_v30  ;;  %6005 = vmatprep.subr.bf16.mxu0 %v6004_v36  ;;  %v6024_v30 = vpack.c.bf16 %v1509_v32, %v1501_v31  ;;  %v6088_v36 = vpack.c.bf16 %v1511_v33, %v1503_v60 }
  0xdd   :  { %6069 = vmatprep.subr.bf16.mxu1 %v6068_v40  ;;  %v1517_v40 = vld [vmem:[#allocation6 + $0x708] sm:$0xff] }
  0xde   :  { %v6028_v44 = vpack.c.bf16 %v1525_v42, %v1517_v40 }
  0xdf   :  { %6007 = vmatpush1.bf16.msra.mxu0 %v6006_v41  ;;  %v6090_v41 = vpack.c.bf16 %v1510_v39, %v1502_v38 }
  0xe0   :  { %6071 = vmatpush1.bf16.msra.mxu1 %v6070_v43  ;;  %6009 = vmatprep.subr.bf16.mxu0 %v6008_v47  ;;  %v1527_v43 = vld [vmem:[#allocation6 + $0x758] sm:$0xff]  ;;  %v1524_v47 = vld [vmem:[#allocation6 + $0x740] sm:$0xff] }
  0xe1   :  { %6073 = vmatprep.subr.bf16.mxu1 %v6072_v51  ;;  %v6092_v45 = vpack.c.bf16 %v1527_v43, %v1519_v61  ;;  %v6030_v49 = vpack.c.bf16 %v1524_v47, %v1516_v46  ;;  %v1533_v51 = vld [vmem:[#allocation6 + $0x788] sm:$0xff]  ;;  %v5639_v61 = vld [vmem:[%s8772_s4] ss:$0 sm:$0xff] }
  0xe3   :  { %6011 = vmatpush1.bf16.msra.mxu0 %v6010_v52  ;;  %v1541_v52 = vld [vmem:[#allocation6 + $0x7c8] sm:$0xff] }
  0xe4   :  { %6075 = vmatpush1.bf16.msra.mxu1 %v6074_v54  ;;  %6013 = vmatprep.subr.bf16.mxu0 %v6012_v63  ;;  %v6032_v62 = vpack.c.bf16 %v1541_v52, %v1533_v51  ;;  %v1535_v54 = vld [vmem:[#allocation6 + $0x798] sm:$0xff]  ;;  %v1540_v63 = vld [vmem:[#allocation6 + $0x7c0] sm:$0xff] }
  0xe5   :  { %6077 = vmatprep.subr.bf16.mxu1 %v6076_v4  ;;  %v6096_v57 = vpack.c.bf16 %v1543_v55, %v1535_v54  ;;  %v6034_v3 = vpack.c.bf16 %v1540_v63, %v1532_v56  ;;  %v6098_v4 = vpack.c.bf16 %v1542_v2, %v1534_v1 }
  0xe7   :  { %6015 = vmatpush1.bf16.msra.mxu0 %v6014_v5  ;;  %v1297_v5 = vld [vmem:[#allocation6 + $0x28] sm:$0xff] }
  0xe8   :  { %6079 = vmatpush1.bf16.msra.mxu1 %v6078_v8  ;;  %6017 = vmatprep.subr.bf16.mxu0 %v6016_v11  ;;  %v83_v8 = vlaneseq  ;;  %v6100_v9 = vpack.c.bf16 %v1305_v6, %v1297_v5 }
  0xe9   :  { %6081 = vmatprep.subr.bf16.mxu1 %v6080_v15 }
  0xea   :  { %v8488_v11 = vshrl.u32 %v83_v8, 7 }
  0xeb   :  { %6019 = vmatpush1.bf16.msra.mxu0 %v6018_v16 }
  0xec   :  { %6083 = vmatpush1.bf16.msra.mxu1 %v6082_v0  ;;  %6021 = vmatprep.subr.bf16.mxu0 %v6020_v21  ;;  %v85_v12 = vsub.s32 0, %v8488_v11  ;;  %v89_v14 = vsub.s32 1, %v8488_v11  ;;  %v93_v18 = vsub.s32 2, %v8488_v11  ;;  %v105_v46 = vsub.s32 5, %v8488_v11 }
  0xed   :  { %6085 = vmatprep.subr.bf16.mxu1 %v6084_v25  ;;  %v97_v25 = vsub.s32 3, %v8488_v11  ;;  %v109_v50 = vsub.s32 6, %v8488_v11  ;;  %v113_v63 = vsub.s32 7, %v8488_v11 }
  0xee   :  { %v8498_v15 = vrot.slane %v8494_v13, %v85_v12  ;;  %v8501_v16 = vrot.slane %v8494_v13, %v89_v14  ;;  %v8507_v23 = vrot.slane %v8494_v13, %v93_v18  ;;  %v8530_v48 = vrot.slane %v8494_v13, %v105_v46  ;;  %v1296_v18 = vld [vmem:[#allocation6 + $0x20] sm:$0xff] }
  0xef   :  { %6023 = vmatpush1.bf16.msra.mxu0 %v6022_v26  ;;  %v8512_v27 = vrot.slane %v8494_v13, %v97_v25  ;;  %v8536_v56 = vrot.slane %v8494_v13, %v109_v50  ;;  %v8541_v2 = vrot.slane %v8494_v13, %v113_v63  ;;  %v1321_v25 = vld [vmem:[#allocation6 + $0xe8] sm:$0xff]  ;;  %v1336_v46 = vld [vmem:[#allocation6 + $0x160] sm:$0xff] }
  0xf0   :  { %6087 = vmatpush1.bf16.msra.mxu1 %v6086_v29  ;;  %6025 = vmatprep.subr.bf16.mxu0 %v6024_v30 }
  0xf1   :  { %6089 = vmatprep.subr.bf16.mxu1 %v6088_v36 }
  0xf3   :  { %6027 = vmatpush1.bf16.msra.mxu0 %v6026_v37 }
  0xf4   :  { %6091 = vmatpush1.bf16.msra.mxu1 %v6090_v41  ;;  %6029 = vmatprep.subr.bf16.mxu0 %v6028_v44 }
  0xf5   :  { %6093 = vmatprep.subr.bf16.mxu1 %v6092_v45  ;;  %v101_v45 = vsub.s32 4, %v8488_v11 }
  0xf7   :  { %6031 = vmatpush1.bf16.msra.mxu0 %v6030_v49  ;;  %v8527_v47 = vrot.slane %v8494_v13, %v101_v45  ;;  %v1328_v45 = vld [vmem:[#allocation6 + $0x120] sm:$0xff] }
  0xf8   :  { %6095 = vmatpush1.bf16.msra.mxu1 %v6094_v53  ;;  %6033 = vmatprep.subr.bf16.mxu0 %v6032_v62 }
  0xf9   :  { %6097 = vmatprep.subr.bf16.mxu1 %v6096_v57 }
  0xfb   :  { %6035 = vmatpush1.bf16.msra.mxu0 %v6034_v3 }
  0xfc   :  { %6099 = vmatpush1.bf16.msra.mxu1 %v6098_v4  ;;  %6101 = vmatprep.subr.bf16.mxu0 %v6100_v9 }
  0xfd   :  { %6165 = vmatprep.subr.bf16.mxu1 %v6164_v10 }
 0x151   :  { %v988_v17 = vpop.f32.mrb[0].mxu0 }
 0x152   :  { %v7764_v0 = vadd.f32 %v988_v17, %v8498_v15  ;;  %v1059_v19 = vpop.f32.mrb[0].mxu1  ;;  %v990_v20 = vpop.f32.mrb[1].mxu0 }
 0x153   :  { %v7765_v59 = vadd.f32 %v990_v20, %v8501_v16  ;;  %v1061_v21 = vpop.f32.mrb[1].mxu1  ;;  %v7780_v26 = vadd.f32 %v1059_v19, %v8507_v23  ;;  %v1298_v19 = vld [vmem:[#allocation6 + $0x30] sm:$0xff] }
 0x154   :  { %v5633_v22 = vmul.f32 -1.442695, %v7764_v0  ;;  %v7781_v29 = vadd.f32 %v1061_v21, %v8512_v27  ;;  %v1304_v0 = vld [vmem:[#allocation6 + $0x60] sm:$0xff]  ;;  %v1306_v20 = vld [vmem:[#allocation6 + $0x70] sm:$0xff] }
 0x155   :  { %v5634_v24 = vmul.f32 -1.442695, %v7765_v59  ;;  %v5635_v28 = vmul.f32 -1.442695, %v7780_v26  ;;  %v5640_v21 = vld [vmem:[%s8773_s5] ss:$0 sm:$0xff] }
 0x156   :  { %7896 = vpow2.f32 %v5633_v22  ;;  %v1315_v26 = vld [vmem:[#allocation6 + $0xb8] sm:$0xff] }
 0x157   :  { %7898 = vpow2.f32 %v5634_v24  ;;  %v1313_v24 = vld [vmem:[#allocation6 + $0xa8] sm:$0xff] }
 0x158   :  { %7900 = vpow2.f32 %v5635_v28 }
 0x159   :  { %7902 = vtanh.f32 %v7781_v29  ;;  %v6102_v29 = vpack.c.bf16 %v1304_v0, %v1296_v18 }
 0x160   :  { %v7897_v31 = vpop.eup %7896 }
 0x161   :  { %v1231_v32 = vadd.f32 1.0, %v7897_v31  ;;  %v7899_v60 = vpop.eup %7898  ;;  %v6166_v31 = vpack.c.bf16 %v1306_v20, %v1298_v19  ;;  %v1362_v19 = vld [vmem:[#allocation6 + $0x230] sm:$0xff] }
 0x162   :  { %v1232_v30 = vadd.f32 1.0, %v7899_v60  ;;  %v7901_v33 = vpop.eup %7900  ;;  %v1312_v60 = vld [vmem:[#allocation6 + $0xa0] sm:$0xff]  ;;  %v1370_v20 = vld [vmem:[#allocation6 + $0x270] sm:$0xff] }
 0x163   :  { %7904 = vrcp.f32 %v1231_v32  ;;  %v7903_v34 = vpop.eup %7902  ;;  %v1233_v38 = vadd.f32 1.0, %v7901_v33  ;;  %v1323_v32 = vld [vmem:[#allocation6 + $0xf8] sm:$0xff]  ;;  %v1314_v33 = vld [vmem:[#allocation6 + $0xb0] sm:$0xff] }
 0x164   :  { %7906 = vrcp.f32 %v1232_v30  ;;  %v1320_v30 = vld [vmem:[#allocation6 + $0xe0] sm:$0xff] }
 0x165   :  { %7908 = vrcp.f32 %v1233_v38  ;;  %v1337_v38 = vld [vmem:[#allocation6 + $0x168] sm:$0xff] }
 0x16d   :  { %v7905_v35 = vpop.eup %7904 }
 0x16e   :  { %v1242_v36 = vmul.f32 %v7905_v35, %v7903_v34  ;;  %v7907_v37 = vpop.eup %7906  ;;  %v1322_v34 = vld [vmem:[#allocation6 + $0xf0] sm:$0xff]  ;;  %v1329_v35 = vld [vmem:[#allocation6 + $0x128] sm:$0xff] }
 0x16f   :  { %v1241_v39 = vmul.f32 0.0, %v7907_v37  ;;  %v7909_v41 = vpop.eup %7908  ;;  %v6104_v37 = vpack.c.bf16 %v1321_v25, %v1313_v24  ;;  %v1387_v24 = vld [vmem:[#allocation6 + $0x2f8] sm:$0xff] }
 0x171   :  { %v8515_v40 = vadd.f32 %v1242_v36, %v1241_v39  ;;  %v1331_v39 = vld [vmem:[#allocation6 + $0x138] sm:$0xff] }
 0x173   :  { %7910 = vtanh.f32 %v8515_v40 }
 0x17d   :  { %v7911_v42 = vpop.eup %7910 }
 0x17e   :  { %v8521_v43 = vmul.f32 %v7911_v42, %v7909_v41  ;;  %v1339_v41 = vld [vmem:[#allocation6 + $0x178] sm:$0xff]  ;;  %v6168_v42 = vpack.c.bf16 %v1323_v32, %v1315_v26  ;;  %v6182_v26 = vpack.c.bf16 %v1370_v20, %v1362_v19 }
 0x17f   :  { %v6172_v50 = vpack.c.bf16 %v1339_v41, %v1331_v39  ;;  %v1392_v39 = vld [vmem:[#allocation6 + $0x320] sm:$0xff]  ;;  %v1451_v19 = vld [vmem:[#allocation6 + $0x4f8] sm:$0xff] }
 0x180   :  { %v1276_v44 = vmul.f32 %v5639_v61, %v8521_v43  ;;  %v6106_v61 = vpack.c.bf16 %v1320_v30, %v1312_v60  ;;  %v1378_v60 = vld [vmem:[#allocation6 + $0x2b0] sm:$0xff]  ;;  %v1400_v41 = vld [vmem:[#allocation6 + $0x360] sm:$0xff] }
 0x181   :  { %v1386_v30 = vld [vmem:[#allocation6 + $0x2f0] sm:$0xff] }
 0x182   :  { %1277 = vadd.xlane.f32.xlu0 %v1276_v44  ;;  %v6170_v44 = vpack.c.bf16 %v1322_v34, %v1314_v33  ;;  %v1393_v33 = vld [vmem:[#allocation6 + $0x328] sm:$0xff] }
 0x183   :  { %v1401_v34 = vld [vmem:[#allocation6 + $0x368] sm:$0xff] }
 0x191   :  { %v1130_v49 = vpop.f32.mrb[30].mxu0 }
 0x192   :  { %v7810_v51 = vadd.f32 %v1130_v49, %v8527_v47  ;;  %v1201_v52 = vpop.f32.mrb[30].mxu1  ;;  %v1132_v53 = vpop.f32.mrb[31].mxu0  ;;  %v6108_v49 = vpack.c.bf16 %v1337_v38, %v1329_v35  ;;  %v1395_v35 = vld [vmem:[#allocation6 + $0x338] sm:$0xff]  ;;  %v6186_v38 = vpack.c.bf16 %v1386_v30, %v1378_v60 }
 0x193   :  { %v7811_v62 = vadd.f32 %v1132_v53, %v8530_v48  ;;  %v1203_v54 = vpop.f32.mrb[31].mxu1  ;;  %v7826_v1 = vadd.f32 %v1201_v52, %v8536_v56  ;;  %v1338_v52 = vld [vmem:[#allocation6 + $0x170] sm:$0xff]  ;;  %v1345_v53 = vld [vmem:[#allocation6 + $0x1a8] sm:$0xff]  ;;  %v1467_v60 = vld [vmem:[#allocation6 + $0x578] sm:$0xff] }
 0x194   :  { %v5636_v55 = vmul.f32 -1.442695, %v7810_v51  ;;  %v7827_v4 = vadd.f32 %v1203_v54, %v8541_v2  ;;  %v1330_v51 = vld [vmem:[#allocation6 + $0x130] sm:$0xff]  ;;  %v1347_v54 = vld [vmem:[#allocation6 + $0x1b8] sm:$0xff] }
 0x195   :  { %v5637_v57 = vmul.f32 -1.442695, %v7811_v62  ;;  %v5638_v3 = vmul.f32 -1.442695, %v7826_v1  ;;  %v1353_v62 = vld [vmem:[#allocation6 + $0x1e8] sm:$0xff]  ;;  %v6174_v63 = vpack.c.bf16 %v1338_v52, %v1330_v51  ;;  %v1344_v1 = vld [vmem:[#allocation6 + $0x1a0] sm:$0xff]  ;;  %v6126_v52 = vpack.c.bf16 %v1400_v41, %v1392_v39 }
 0x196   :  { %7912 = vpow2.f32 %v5636_v55  ;;  %v1355_v55 = vld [vmem:[#allocation6 + $0x1f8] sm:$0xff]  ;;  %v1466_v39 = vld [vmem:[#allocation6 + $0x570] sm:$0xff]  ;;  %v1473_v41 = vld [vmem:[#allocation6 + $0x5a8] sm:$0xff] }
 0x197   :  { %7914 = vpow2.f32 %v5637_v57  ;;  %v6110_v57 = vpack.c.bf16 %v1336_v46, %v1328_v45  ;;  %v1402_v45 = vld [vmem:[#allocation6 + $0x370] sm:$0xff]  ;;  %v1409_v46 = vld [vmem:[#allocation6 + $0x3a8] sm:$0xff]  ;;  %v1419_v51 = vld [vmem:[#allocation6 + $0x3f8] sm:$0xff] }
 0x198   :  { %7916 = vpow2.f32 %v5638_v3  ;;  %v1352_v3 = vld [vmem:[#allocation6 + $0x1e0] sm:$0xff] }
 0x199   :  { %7918 = vtanh.f32 %v7827_v4  ;;  %v6112_v4 = vpack.c.bf16 %v1353_v62, %v1345_v53  ;;  %v1408_v62 = vld [vmem:[#allocation6 + $0x3a0] sm:$0xff] }
 0x1a0   :  { %v7913_v5 = vpop.eup %7912 }
 0x1a1   :  { %v1255_v6 = vadd.f32 1.0, %v7913_v5  ;;  %v7915_v7 = vpop.eup %7914  ;;  %v6176_v5 = vpack.c.bf16 %v1355_v55, %v1347_v54  ;;  %v1416_v54 = vld [vmem:[#allocation6 + $0x3e0] sm:$0xff] }
 0x1a2   :  { %v1256_v8 = vadd.f32 1.0, %v7915_v7  ;;  %v7917_v9 = vpop.eup %7916  ;;  %v1354_v7 = vld [vmem:[#allocation6 + $0x1f0] sm:$0xff] }
 0x1a3   :  { %7920 = vrcp.f32 %v1255_v6  ;;  %v7919_v58 = vpop.eup %7918  ;;  %v1257_v14 = vadd.f32 1.0, %v7917_v9  ;;  %v1346_v6 = vld [vmem:[#allocation6 + $0x1b0] sm:$0xff]  ;;  %v1369_v9 = vld [vmem:[#allocation6 + $0x268] sm:$0xff] }
 0x1a4   :  { %7922 = vrcp.f32 %v1256_v8  ;;  %v1361_v8 = vld [vmem:[#allocation6 + $0x228] sm:$0xff] }
 0x1a5   :  { %7924 = vrcp.f32 %v1257_v14  ;;  %v1360_v14 = vld [vmem:[#allocation6 + $0x220] sm:$0xff]  ;;  %v6116_v18 = vpack.c.bf16 %v1369_v9, %v1361_v8 }
 0x1a6   :  { %v1424_v9 = vld [vmem:[#allocation6 + $0x420] sm:$0xff] }
 0x1ad   :  { %v7921_v10 = vpop.eup %7920 }
 0x1ae   :  { %v1266_v11 = vmul.f32 %v7921_v10, %v7919_v58  ;;  %v7923_v12 = vpop.eup %7922  ;;  %v1363_v58 = vld [vmem:[#allocation6 + $0x238] sm:$0xff] }
 0x1af   :  { %v1265_v17 = vmul.f32 0.0, %v7923_v12  ;;  %v7925_v59 = vpop.eup %7924  ;;  %v1371_v10 = vld [vmem:[#allocation6 + $0x278] sm:$0xff]  ;;  %v6178_v12 = vpack.c.bf16 %v1354_v7, %v1346_v6  ;;  %v6130_v7 = vpack.c.bf16 %v1416_v54, %v1408_v62  ;;  %v1482_v62 = vld [vmem:[#allocation6 + $0x5f0] sm:$0xff]  ;;  %v1489_v54 = vld [vmem:[#allocation6 + $0x628] sm:$0xff] }
 0x1b0   :  { %v6180_v0 = vpack.c.bf16 %v1371_v10, %v1363_v58  ;;  %v1435_v6 = vld [vmem:[#allocation6 + $0x478] sm:$0xff]  ;;  %v1432_v58 = vld [vmem:[#allocation6 + $0x460] sm:$0xff] }
 0x1b1   :  { %v8544_v13 = vadd.f32 %v1266_v11, %v1265_v17  ;;  %v6114_v11 = vpack.c.bf16 %v1352_v3, %v1344_v1  ;;  %v1368_v17 = vld [vmem:[#allocation6 + $0x260] sm:$0xff]  ;;  %v1418_v1 = vld [vmem:[#allocation6 + $0x3f0] sm:$0xff]  ;;  %v1425_v3 = vld [vmem:[#allocation6 + $0x428] sm:$0xff]  ;;  %v6134_v20 = vpack.c.bf16 %v1432_v58, %v1424_v9 }
 0x1b2   :  { %v6118_v25 = vpack.c.bf16 %v1368_v17, %v1360_v14  ;;  %v1434_v14 = vld [vmem:[#allocation6 + $0x470] sm:$0xff]  ;;  %v1441_v17 = vld [vmem:[#allocation6 + $0x4a8] sm:$0xff] }
 0x1b3   :  { %7926 = vtanh.f32 %v8544_v13  ;;  %v1498_v9 = vld [vmem:[#allocation6 + $0x670] sm:$0xff]  ;;  %v1505_v58 = vld [vmem:[#allocation6 + $0x6a8] sm:$0xff] }
 0x1bd   :  { %v7927_v22 = vpop.eup %7926 }
 0x1be   :  { %v1269_v28 = vmul.f32 %v7927_v22, %v7925_v59  ;;  %v1377_v59 = vld [vmem:[#allocation6 + $0x2a8] sm:$0xff]  ;;  %v1379_v22 = vld [vmem:[#allocation6 + $0x2b8] sm:$0xff] }
 0x1bf   :  { %v6184_v32 = vpack.c.bf16 %v1387_v24, %v1379_v22  ;;  %v1448_v22 = vld [vmem:[#allocation6 + $0x4e0] sm:$0xff] }
 0x1c0   :  { %1612 = vmatprep.mubr.f32.mxu0 %v1269_v28  ;;  %1683 = vmatprep.mubr.f32.mxu1 %v1269_v28  ;;  %v1287_v36 = vmul.f32 %v5640_v21, %v1269_v28  ;;  %v1385_v21 = vld [vmem:[#allocation6 + $0x2e8] sm:$0xff] }
 0x1c1   :  { %1613 = vmatmul.mubr.f32.vlgmr.msra.gmra.mrb[2].mxu0 %v8521_v43  ;;  %1684 = vmatmul.mubr.f32.vlgmr.msra.gmra.mrb[2].mxu1 %v8521_v43 }
 0x1c2   :  { %6103 = vmatpush1.bf16.msra.mxu0 %v6102_v29  ;;  %6167 = vmatpush1.bf16.msra.mxu1 %v6166_v31  ;;  %v1384_v29 = vld [vmem:[#allocation6 + $0x2e0] sm:$0xff]  ;;  %v6120_v31 = vpack.c.bf16 %v1385_v21, %v1377_v59 }
 0x1c3   :  { %1754 = vmatprep.mubr.f32.mxu0 %v1269_v28  ;;  %1825 = vmatprep.mubr.f32.mxu1 %v1269_v28  ;;  %v1376_v28 = vld [vmem:[#allocation6 + $0x2a0] sm:$0xff] }
 0x1c4   :  { %1288 = vadd.xlane.f32.xlu0 %v1287_v36  ;;  %6105 = vmatprep.subr.bf16.mxu0 %v6104_v37  ;;  %v1403_v36 = vld [vmem:[#allocation6 + $0x378] sm:$0xff]  ;;  %v6122_v37 = vpack.c.bf16 %v1384_v29, %v1376_v28  ;;  %v1440_v21 = vld [vmem:[#allocation6 + $0x4a0] sm:$0xff]  ;;  %v1450_v28 = vld [vmem:[#allocation6 + $0x4f0] sm:$0xff] }
 0x1c5   :  { %6169 = vmatprep.subr.bf16.mxu1 %v6168_v42  ;;  %v6124_v42 = vpack.c.bf16 %v1401_v34, %v1393_v33  ;;  %v1457_v29 = vld [vmem:[#allocation6 + $0x528] sm:$0xff]  ;;  %v6138_v30 = vpack.c.bf16 %v1448_v22, %v1440_v21  ;;  %v1456_v34 = vld [vmem:[#allocation6 + $0x520] sm:$0xff]  ;;  %v1514_v21 = vld [vmem:[#allocation6 + $0x6f0] sm:$0xff] }
 0x1c6   :  { %6107 = vmatpush1.bf16.msra.mxu0 %v6106_v61  ;;  %6171 = vmatpush1.bf16.msra.mxu1 %v6170_v44  ;;  %v6188_v61 = vpack.c.bf16 %v1403_v36, %v1395_v35  ;;  %v1394_v44 = vld [vmem:[#allocation6 + $0x330] sm:$0xff]  ;;  %v1464_v35 = vld [vmem:[#allocation6 + $0x560] sm:$0xff]  ;;  %v1521_v22 = vld [vmem:[#allocation6 + $0x728] sm:$0xff] }
 0x1c7   :  { %6109 = vmatprep.subr.bf16.mxu0 %v6108_v49  ;;  %6173 = vmatprep.subr.bf16.mxu1 %v6172_v50  ;;  %v1417_v49 = vld [vmem:[#allocation6 + $0x3e8] sm:$0xff]  ;;  %v1411_v50 = vld [vmem:[#allocation6 + $0x3b8] sm:$0xff]  ;;  %v6190_v53 = vpack.c.bf16 %v1402_v45, %v1394_v44  ;;  %v6142_v45 = vpack.c.bf16 %v1464_v35, %v1456_v34  ;;  %v1530_v34 = vld [vmem:[#allocation6 + $0x770] sm:$0xff] }
 0x1c8   :  { %v6128_v55 = vpack.c.bf16 %v1417_v49, %v1409_v46  ;;  %v1483_v44 = vld [vmem:[#allocation6 + $0x5f8] sm:$0xff]  ;;  %v1472_v49 = vld [vmem:[#allocation6 + $0x5a0] sm:$0xff]  ;;  %v1537_v35 = vld [vmem:[#allocation6 + $0x7a8] sm:$0xff] }
 0x1ca   :  { %6111 = vmatpush1.bf16.msra.mxu0 %v6110_v57  ;;  %6175 = vmatpush1.bf16.msra.mxu1 %v6174_v63  ;;  %v6192_v57 = vpack.c.bf16 %v1419_v51, %v1411_v50  ;;  %v1410_v63 = vld [vmem:[#allocation6 + $0x3b0] sm:$0xff]  ;;  %v1480_v50 = vld [vmem:[#allocation6 + $0x5e0] sm:$0xff] }
 0x1cb   :  { %6113 = vmatprep.subr.bf16.mxu0 %v6112_v4  ;;  %6177 = vmatprep.subr.bf16.mxu1 %v6176_v5  ;;  %v1433_v4 = vld [vmem:[#allocation6 + $0x468] sm:$0xff]  ;;  %v1427_v5 = vld [vmem:[#allocation6 + $0x438] sm:$0xff]  ;;  %v6194_v8 = vpack.c.bf16 %v1418_v1, %v1410_v63  ;;  %v6146_v1 = vpack.c.bf16 %v1480_v50, %v1472_v49  ;;  %v1546_v49 = vld [vmem:[#allocation6 + $0x7f0] sm:$0xff] }
 0x1cc   :  { %v6132_v10 = vpack.c.bf16 %v1433_v4, %v1425_v3  ;;  %v1499_v63 = vld [vmem:[#allocation6 + $0x678] sm:$0xff]  ;;  %v1488_v4 = vld [vmem:[#allocation6 + $0x620] sm:$0xff] }
 0x1ce   :  { %6115 = vmatpush1.bf16.msra.mxu0 %v6114_v11  ;;  %6179 = vmatpush1.bf16.msra.mxu1 %v6178_v12  ;;  %v6196_v11 = vpack.c.bf16 %v1435_v6, %v1427_v5  ;;  %v1426_v12 = vld [vmem:[#allocation6 + $0x430] sm:$0xff]  ;;  %v1496_v5 = vld [vmem:[#allocation6 + $0x660] sm:$0xff] }
 0x1cf   :  { %6117 = vmatprep.subr.bf16.mxu0 %v6116_v18  ;;  %6181 = vmatprep.subr.bf16.mxu1 %v6180_v0  ;;  %v1449_v18 = vld [vmem:[#allocation6 + $0x4e8] sm:$0xff]  ;;  %v1443_v0 = vld [vmem:[#allocation6 + $0x4b8] sm:$0xff]  ;;  %v6198_v59 = vpack.c.bf16 %v1434_v14, %v1426_v12  ;;  %v6150_v14 = vpack.c.bf16 %v1496_v5, %v1488_v4  ;;  %v1908_v5 = vld [vmem:[#allocation6 + $0x10] sm:$0xff] }
 0x1d0   :  { %v6136_v24 = vpack.c.bf16 %v1449_v18, %v1441_v17  ;;  %v1515_v12 = vld [vmem:[#allocation6 + $0x6f8] sm:$0xff]  ;;  %v1504_v18 = vld [vmem:[#allocation6 + $0x6a0] sm:$0xff] }
 0x1d2   :  { %6119 = vmatpush1.bf16.msra.mxu0 %v6118_v25  ;;  %6183 = vmatpush1.bf16.msra.mxu1 %v6182_v26  ;;  %v6200_v25 = vpack.c.bf16 %v1451_v19, %v1443_v0  ;;  %v1442_v26 = vld [vmem:[#allocation6 + $0x4b0] sm:$0xff]  ;;  %v1512_v0 = vld [vmem:[#allocation6 + $0x6e0] sm:$0xff] }
 0x1d3   :  { %6121 = vmatprep.subr.bf16.mxu0 %v6120_v31  ;;  %6185 = vmatprep.subr.bf16.mxu1 %v6184_v32  ;;  %v1465_v31 = vld [vmem:[#allocation6 + $0x568] sm:$0xff]  ;;  %v1459_v32 = vld [vmem:[#allocation6 + $0x538] sm:$0xff]  ;;  %v6202_v33 = vpack.c.bf16 %v1450_v28, %v1442_v26  ;;  %v6154_v28 = vpack.c.bf16 %v1512_v0, %v1504_v18  ;;  %v1924_v18 = vld [vmem:[#allocation6 + $0x90] sm:$0xff] }
 0x1d4   :  { %v6140_v36 = vpack.c.bf16 %v1465_v31, %v1457_v29  ;;  %v1531_v26 = vld [vmem:[#allocation6 + $0x778] sm:$0xff]  ;;  %v1520_v31 = vld [vmem:[#allocation6 + $0x720] sm:$0xff]  ;;  %v1932_v0 = vld [vmem:[#allocation6 + $0xd0] sm:$0xff] }
 0x1d6   :  { %6123 = vmatpush1.bf16.msra.mxu0 %v6122_v37  ;;  %6187 = vmatpush1.bf16.msra.mxu1 %v6186_v38  ;;  %v6204_v37 = vpack.c.bf16 %v1467_v60, %v1459_v32  ;;  %v1458_v38 = vld [vmem:[#allocation6 + $0x530] sm:$0xff]  ;;  %v1528_v32 = vld [vmem:[#allocation6 + $0x760] sm:$0xff] }
 0x1d7   :  { %6125 = vmatprep.subr.bf16.mxu0 %v6124_v42  ;;  %6189 = vmatprep.subr.bf16.mxu1 %v6188_v61  ;;  %v1481_v42 = vld [vmem:[#allocation6 + $0x5e8] sm:$0xff]  ;;  %v1475_v61 = vld [vmem:[#allocation6 + $0x5b8] sm:$0xff]  ;;  %v6206_v46 = vpack.c.bf16 %v1466_v39, %v1458_v38  ;;  %v6158_v39 = vpack.c.bf16 %v1528_v32, %v1520_v31  ;;  %v1948_v32 = vld [vmem:[#allocation6 + $0x150] sm:$0xff] }
 0x1d8   :  { %v6144_v51 = vpack.c.bf16 %v1481_v42, %v1473_v41  ;;  %v1547_v38 = vld [vmem:[#allocation6 + $0x7f8] sm:$0xff]  ;;  %v1536_v42 = vld [vmem:[#allocation6 + $0x7a0] sm:$0xff] }
 0x1da   :  { %6127 = vmatpush1.bf16.msra.mxu0 %v6126_v52  ;;  %6191 = vmatpush1.bf16.msra.mxu1 %v6190_v53  ;;  %v6208_v52 = vpack.c.bf16 %v1483_v44, %v1475_v61  ;;  %v1474_v53 = vld [vmem:[#allocation6 + $0x5b0] sm:$0xff] }
 0x1db   :  { %6129 = vmatprep.subr.bf16.mxu0 %v6128_v55  ;;  %6193 = vmatprep.subr.bf16.mxu1 %v6192_v57  ;;  %v1497_v55 = vld [vmem:[#allocation6 + $0x668] sm:$0xff]  ;;  %v1491_v57 = vld [vmem:[#allocation6 + $0x638] sm:$0xff]  ;;  %v6210_v3 = vpack.c.bf16 %v1482_v62, %v1474_v53 }
 0x1dc   :  { %v6148_v6 = vpack.c.bf16 %v1497_v55, %v1489_v54  ;;  %v1907_v53 = vld [vmem:[#allocation6 + $0x8] sm:$0xff]  ;;  %v1909_v54 = vld [vmem:[#allocation6 + $0x18] sm:$0xff] }
 0x1dd   :  { %v1915_v62 = vld [vmem:[#allocation6 + $0x48] sm:$0xff] }
 0x1de   :  { %6131 = vmatpush1.bf16.msra.mxu0 %v6130_v7  ;;  %6195 = vmatpush1.bf16.msra.mxu1 %v6194_v8  ;;  %v6212_v7 = vpack.c.bf16 %v1499_v63, %v1491_v57  ;;  %v1490_v8 = vld [vmem:[#allocation6 + $0x630] sm:$0xff]  ;;  %v6228_v55 = vpack.c.bf16 %v1915_v62, %v1907_v53  ;;  %v1917_v57 = vld [vmem:[#allocation6 + $0x58] sm:$0xff]  ;;  %v1906_v63 = vld [vmem:[#allocation6] sm:$0xff] }
 0x1df   :  { %6133 = vmatprep.subr.bf16.mxu0 %v6132_v10  ;;  %6197 = vmatprep.subr.bf16.mxu1 %v6196_v11  ;;  %v1513_v10 = vld [vmem:[#allocation6 + $0x6e8] sm:$0xff]  ;;  %v1507_v11 = vld [vmem:[#allocation6 + $0x6b8] sm:$0xff]  ;;  %v6214_v17 = vpack.c.bf16 %v1498_v9, %v1490_v8  ;;  %v1970_v62 = vld [vmem:[#allocation6 + $0x200] sm:$0xff] }
 0x1e0   :  { %v6152_v19 = vpack.c.bf16 %v1513_v10, %v1505_v58  ;;  %v1931_v8 = vld [vmem:[#allocation6 + $0xc8] sm:$0xff]  ;;  %v1925_v9 = vld [vmem:[#allocation6 + $0x98] sm:$0xff] }
 0x1e1   :  { %v1933_v10 = vld [vmem:[#allocation6 + $0xd8] sm:$0xff] }
 0x1e2   :  { %6135 = vmatpush1.bf16.msra.mxu0 %v6134_v20  ;;  %6199 = vmatpush1.bf16.msra.mxu1 %v6198_v59  ;;  %v6216_v20 = vpack.c.bf16 %v1515_v12, %v1507_v11  ;;  %v1506_v59 = vld [vmem:[#allocation6 + $0x6b0] sm:$0xff]  ;;  %v1922_v11 = vld [vmem:[#allocation6 + $0x80] sm:$0xff] }
 0x1e3   :  { %6137 = vmatprep.subr.bf16.mxu0 %v6136_v24  ;;  %6201 = vmatprep.subr.bf16.mxu1 %v6200_v25  ;;  %v1529_v24 = vld [vmem:[#allocation6 + $0x768] sm:$0xff]  ;;  %v1523_v25 = vld [vmem:[#allocation6 + $0x738] sm:$0xff]  ;;  %v6218_v29 = vpack.c.bf16 %v1514_v21, %v1506_v59  ;;  %v1930_v12 = vld [vmem:[#allocation6 + $0xc0] sm:$0xff] }
 0x1e4   :  { %v6156_v60 = vpack.c.bf16 %v1529_v24, %v1521_v22  ;;  %v1947_v59 = vld [vmem:[#allocation6 + $0x148] sm:$0xff]  ;;  %v1941_v21 = vld [vmem:[#allocation6 + $0x118] sm:$0xff] }
 0x1e5   :  { %v1949_v22 = vld [vmem:[#allocation6 + $0x158] sm:$0xff] }
 0x1e6   :  { %6139 = vmatpush1.bf16.msra.mxu0 %v6138_v30  ;;  %6203 = vmatpush1.bf16.msra.mxu1 %v6202_v33  ;;  %v6220_v30 = vpack.c.bf16 %v1531_v26, %v1523_v25  ;;  %v1522_v33 = vld [vmem:[#allocation6 + $0x730] sm:$0xff]  ;;  %v6300_v25 = vpack.c.bf16 %v1949_v22, %v1941_v21  ;;  %v1938_v26 = vld [vmem:[#allocation6 + $0x100] sm:$0xff] }
 0x1e7   :  { %6141 = vmatprep.subr.bf16.mxu0 %v6140_v36  ;;  %6205 = vmatprep.subr.bf16.mxu1 %v6204_v37  ;;  %v1545_v36 = vld [vmem:[#allocation6 + $0x7e8] sm:$0xff]  ;;  %v1539_v37 = vld [vmem:[#allocation6 + $0x7b8] sm:$0xff]  ;;  %v6222_v41 = vpack.c.bf16 %v1530_v34, %v1522_v33 }
 0x1e8   :  { %v6160_v61 = vpack.c.bf16 %v1545_v36, %v1537_v35  ;;  %v6224_v44 = vpack.c.bf16 %v1547_v38, %v1539_v37  ;;  %v1957_v35 = vld [vmem:[#allocation6 + $0x198] sm:$0xff]  ;;  %v1954_v37 = vld [vmem:[#allocation6 + $0x180] sm:$0xff] }
 0x1e9   :  { %v1965_v36 = vld [vmem:[#allocation6 + $0x1d8] sm:$0xff] }
 0x1ea   :  { %6143 = vmatpush1.bf16.msra.mxu0 %v6142_v45  ;;  %6207 = vmatpush1.bf16.msra.mxu1 %v6206_v46  ;;  %v1544_v45 = vld [vmem:[#allocation6 + $0x7e0] sm:$0xff]  ;;  %v1538_v46 = vld [vmem:[#allocation6 + $0x7b0] sm:$0xff]  ;;  %v6304_v38 = vpack.c.bf16 %v1965_v36, %v1957_v35 }
 0x1eb   :  { %6145 = vmatprep.subr.bf16.mxu0 %v6144_v51  ;;  %6209 = vmatprep.subr.bf16.mxu1 %v6208_v52  ;;  %v6162_v50 = vpack.c.bf16 %v1544_v45, %v1536_v42  ;;  %v6226_v51 = vpack.c.bf16 %v1546_v49, %v1538_v46  ;;  %v1964_v42 = vld [vmem:[#allocation6 + $0x1d0] sm:$0xff]  ;;  %v1979_v45 = vld [vmem:[#allocation6 + $0x248] sm:$0xff]  ;;  %v1973_v46 = vld [vmem:[#allocation6 + $0x218] sm:$0xff] }
 0x1ec   :  { %v2020_v36 = vld [vmem:[#allocation6 + $0x390] sm:$0xff] }
 0x1ee   :  { %6147 = vmatpush1.bf16.msra.mxu0 %v6146_v1  ;;  %6211 = vmatpush1.bf16.msra.mxu1 %v6210_v3  ;;  %v1914_v1 = vld [vmem:[#allocation6 + $0x40] sm:$0xff]  ;;  %v6292_v3 = vpack.c.bf16 %v1917_v57, %v1909_v54 }
 0x1ef   :  { %6149 = vmatprep.subr.bf16.mxu0 %v6148_v6  ;;  %6213 = vmatprep.subr.bf16.mxu1 %v6212_v7  ;;  %v6230_v4 = vpack.c.bf16 %v1914_v1, %v1906_v63  ;;  %v1916_v6 = vld [vmem:[#allocation6 + $0x50] sm:$0xff]  ;;  %v1978_v54 = vld [vmem:[#allocation6 + $0x240] sm:$0xff] }
 0x1f0   :  { %v6294_v7 = vpack.c.bf16 %v1916_v6, %v1908_v5  ;;  %v6246_v57 = vpack.c.bf16 %v1978_v54, %v1970_v62  ;;  %v1980_v63 = vld [vmem:[#allocation6 + $0x250] sm:$0xff]  ;;  %v1989_v5 = vld [vmem:[#allocation6 + $0x298] sm:$0xff]  ;;  %v2051_v62 = vld [vmem:[#allocation6 + $0x488] sm:$0xff] }
 0x1f1   :  { %v2059_v54 = vld [vmem:[#allocation6 + $0x4c8] sm:$0xff] }
 0x1f2   :  { %6151 = vmatpush1.bf16.msra.mxu0 %v6150_v14  ;;  %6215 = vmatpush1.bf16.msra.mxu1 %v6214_v17  ;;  %v6296_v14 = vpack.c.bf16 %v1933_v10, %v1925_v9  ;;  %v6234_v17 = vpack.c.bf16 %v1930_v12, %v1922_v11  ;;  %v1988_v10 = vld [vmem:[#allocation6 + $0x290] sm:$0xff] }
 0x1f3   :  { %6153 = vmatprep.subr.bf16.mxu0 %v6152_v19  ;;  %6217 = vmatprep.subr.bf16.mxu1 %v6216_v20  ;;  %v1939_v19 = vld [vmem:[#allocation6 + $0x108] sm:$0xff]  ;;  %v6298_v20 = vpack.c.bf16 %v1932_v0, %v1924_v18  ;;  %v1996_v11 = vld [vmem:[#allocation6 + $0x2d0] sm:$0xff]  ;;  %v2005_v18 = vld [vmem:[#allocation6 + $0x318] sm:$0xff] }
 0x1f4   :  { %v6236_v24 = vpack.c.bf16 %v1947_v59, %v1939_v19  ;;  %v6314_v12 = vpack.c.bf16 %v1996_v11, %v1988_v10  ;;  %v2013_v19 = vld [vmem:[#allocation6 + $0x358] sm:$0xff]  ;;  %v2010_v59 = vld [vmem:[#allocation6 + $0x340] sm:$0xff] }
 0x1f5   :  { %v6316_v21 = vpack.c.bf16 %v2013_v19, %v2005_v18  ;;  %v2077_v11 = vld [vmem:[#allocation6 + $0x558] sm:$0xff]  ;;  %v2076_v19 = vld [vmem:[#allocation6 + $0x550] sm:$0xff] }
 0x1f6   :  { %6155 = vmatpush1.bf16.msra.mxu0 %v6154_v28  ;;  %6219 = vmatpush1.bf16.msra.mxu1 %v6218_v29  ;;  %v1946_v28 = vld [vmem:[#allocation6 + $0x140] sm:$0xff]  ;;  %v1940_v29 = vld [vmem:[#allocation6 + $0x110] sm:$0xff] }
 0x1f7   :  { %6157 = vmatprep.subr.bf16.mxu0 %v6156_v60  ;;  %6221 = vmatprep.subr.bf16.mxu1 %v6220_v30  ;;  %v6238_v31 = vpack.c.bf16 %v1946_v28, %v1938_v26  ;;  %v1955_v60 = vld [vmem:[#allocation6 + $0x188] sm:$0xff]  ;;  %v6302_v33 = vpack.c.bf16 %v1948_v32, %v1940_v29 }
 0x1f8   :  { %v1963_v30 = vld [vmem:[#allocation6 + $0x1c8] sm:$0xff] }
 0x1f9   :  { %v6240_v34 = vpack.c.bf16 %v1963_v30, %v1955_v60  ;;  %v2019_v28 = vld [vmem:[#allocation6 + $0x388] sm:$0xff]  ;;  %v2029_v60 = vld [vmem:[#allocation6 + $0x3d8] sm:$0xff]  ;;  %v2018_v30 = vld [vmem:[#allocation6 + $0x380] sm:$0xff] }
 0x1fa   :  { %6159 = vmatpush1.bf16.msra.mxu0 %v6158_v39  ;;  %6223 = vmatpush1.bf16.msra.mxu1 %v6222_v41  ;;  %v1962_v39 = vld [vmem:[#allocation6 + $0x1c0] sm:$0xff]  ;;  %v1956_v41 = vld [vmem:[#allocation6 + $0x190] sm:$0xff]  ;;  %v2027_v29 = vld [vmem:[#allocation6 + $0x3c8] sm:$0xff] }
 0x1fb   :  { %6161 = vmatprep.subr.bf16.mxu0 %v6160_v61  ;;  %6225 = vmatprep.subr.bf16.mxu1 %v6224_v44  ;;  %v6242_v61 = vpack.c.bf16 %v1962_v39, %v1954_v37  ;;  %v1971_v44 = vld [vmem:[#allocation6 + $0x208] sm:$0xff]  ;;  %v6306_v49 = vpack.c.bf16 %v1964_v42, %v1956_v41  ;;  %v6256_v32 = vpack.c.bf16 %v2027_v29, %v2019_v28  ;;  %v2028_v37 = vld [vmem:[#allocation6 + $0x3d0] sm:$0xff]  ;;  %v2037_v42 = vld [vmem:[#allocation6 + $0x418] sm:$0xff] }
 0x1fc   :  { %v2035_v39 = vld [vmem:[#allocation6 + $0x408] sm:$0xff]  ;;  %v2090_v28 = vld [vmem:[#allocation6 + $0x5c0] sm:$0xff] }
 0x1fd   :  { %v2043_v41 = vld [vmem:[#allocation6 + $0x448] sm:$0xff] }
 0x1fe   :  { %6163 = vmatpush1.bf16.msra.mxu0 %v6162_v50  ;;  %6227 = vmatpush1.bf16.msra.mxu1 %v6226_v51  ;;  %v6244_v50 = vpack.c.bf16 %v1979_v45, %v1971_v44  ;;  %v1981_v51 = vld [vmem:[#allocation6 + $0x258] sm:$0xff]  ;;  %v2034_v45 = vld [vmem:[#allocation6 + $0x400] sm:$0xff] }
 0x1ff   :  { %6229 = vmatprep.subr.bf16.mxu0 %v6228_v55  ;;  %6293 = vmatprep.subr.bf16.mxu1 %v6292_v3  ;;  %v1972_v55 = vld [vmem:[#allocation6 + $0x210] sm:$0xff]  ;;  %v1987_v3 = vld [vmem:[#allocation6 + $0x288] sm:$0xff]  ;;  %v2045_v44 = vld [vmem:[#allocation6 + $0x458] sm:$0xff] }
 0x200   :  { %v6310_v1 = vpack.c.bf16 %v1980_v63, %v1972_v55  ;;  %v2053_v55 = vld [vmem:[#allocation6 + $0x498] sm:$0xff] }
 0x201   :  { %1755 = vmatmul.mubr.f32.vlgmr.msra.gmra.mrb[28].mxu0 %v8521_v43  ;;  %1826 = vmatmul.mubr.f32.vlgmr.msra.gmra.mrb[28].mxu1 %v8521_v43  ;;  %v1923_v43 = vld [vmem:[#allocation6 + $0x88] sm:$0xff]  ;;  %v2061_v63 = vld [vmem:[#allocation6 + $0x4d8] sm:$0xff] }
 0x202   :  { %6231 = vmatpush1.bf16.msra.mxu0 %v6230_v4  ;;  %6295 = vmatpush1.bf16.msra.mxu1 %v6294_v7  ;;  %v6232_v58 = vpack.c.bf16 %v1931_v8, %v1923_v43  ;;  %v1995_v4 = vld [vmem:[#allocation6 + $0x2c8] sm:$0xff]  ;;  %v1997_v7 = vld [vmem:[#allocation6 + $0x2d8] sm:$0xff]  ;;  %v1986_v43 = vld [vmem:[#allocation6 + $0x280] sm:$0xff] }
 0x203   :  { %6297 = vmatprep.subr.bf16.mxu1 %v6296_v14  ;;  %v6248_v6 = vpack.c.bf16 %v1995_v4, %v1987_v3  ;;  %v1994_v8 = vld [vmem:[#allocation6 + $0x2c0] sm:$0xff]  ;;  %v6312_v9 = vpack.c.bf16 %v1997_v7, %v1989_v5  ;;  %v2003_v14 = vld [vmem:[#allocation6 + $0x308] sm:$0xff]  ;;  %v6328_v4 = vpack.c.bf16 %v2061_v63, %v2053_v55  ;;  %v2060_v7 = vld [vmem:[#allocation6 + $0x4d0] sm:$0xff] }
 0x204   :  { %6233 = vmatprep.subr.bf16.mxu0 %v6232_v58  ;;  %v6250_v58 = vpack.c.bf16 %v1994_v8, %v1986_v43  ;;  %v2058_v3 = vld [vmem:[#allocation6 + $0x4c0] sm:$0xff]  ;;  %v2067_v8 = vld [vmem:[#allocation6 + $0x508] sm:$0xff]  ;;  %v2124_v63 = vld [vmem:[#allocation6 + $0x6d0] sm:$0xff] }
 0x206   :  { %6235 = vmatpush1.bf16.msra.mxu0 %v6234_v17  ;;  %6299 = vmatpush1.bf16.msra.mxu1 %v6298_v20  ;;  %v2011_v17 = vld [vmem:[#allocation6 + $0x348] sm:$0xff]  ;;  %v2002_v20 = vld [vmem:[#allocation6 + $0x300] sm:$0xff] }
 0x207   :  { %6237 = vmatprep.subr.bf16.mxu0 %v6236_v24  ;;  %6301 = vmatprep.subr.bf16.mxu1 %v6300_v25  ;;  %v6252_v0 = vpack.c.bf16 %v2011_v17, %v2003_v14  ;;  %v6254_v22 = vpack.c.bf16 %v2010_v59, %v2002_v20  ;;  %v2004_v24 = vld [vmem:[#allocation6 + $0x310] sm:$0xff]  ;;  %v2074_v14 = vld [vmem:[#allocation6 + $0x540] sm:$0xff]  ;;  %v2083_v59 = vld [vmem:[#allocation6 + $0x588] sm:$0xff] }
 0x208   :  { %v2012_v25 = vld [vmem:[#allocation6 + $0x350] sm:$0xff] }
 0x209   :  { %v6318_v26 = vpack.c.bf16 %v2012_v25, %v2004_v24  ;;  %v2093_v25 = vld [vmem:[#allocation6 + $0x5d8] sm:$0xff] }
 0x20a   :  { %6239 = vmatpush1.bf16.msra.mxu0 %v6238_v31  ;;  %6303 = vmatpush1.bf16.msra.mxu1 %v6302_v33  ;;  %v2021_v31 = vld [vmem:[#allocation6 + $0x398] sm:$0xff]  ;;  %v2026_v33 = vld [vmem:[#allocation6 + $0x3c0] sm:$0xff] }
 0x20b   :  { %6241 = vmatprep.subr.bf16.mxu0 %v6240_v34  ;;  %6305 = vmatprep.subr.bf16.mxu1 %v6304_v38  ;;  %v6320_v34 = vpack.c.bf16 %v2029_v60, %v2021_v31  ;;  %v6258_v35 = vpack.c.bf16 %v2026_v33, %v2018_v30  ;;  %v6322_v38 = vpack.c.bf16 %v2028_v37, %v2020_v36  ;;  %v2092_v60 = vld [vmem:[#allocation6 + $0x5d0] sm:$0xff]  ;;  %v2099_v33 = vld [vmem:[#allocation6 + $0x608] sm:$0xff]  ;;  %v2109_v37 = vld [vmem:[#allocation6 + $0x658] sm:$0xff] }
 0x20e   :  { %6243 = vmatpush1.bf16.msra.mxu0 %v6242_v61  ;;  %6307 = vmatpush1.bf16.msra.mxu1 %v6306_v49  ;;  %v6260_v61 = vpack.c.bf16 %v2043_v41, %v2035_v39  ;;  %v6324_v49 = vpack.c.bf16 %v2045_v44, %v2037_v42  ;;  %v2106_v39 = vld [vmem:[#allocation6 + $0x640] sm:$0xff]  ;;  %v2108_v44 = vld [vmem:[#allocation6 + $0x650] sm:$0xff] }
 0x20f   :  { %v1278_v52 = vpop.xlane.xlu0 %1277  ;;  %6245 = vmatprep.subr.bf16.mxu0 %v6244_v50 }
 0x210   :  { %1280 = vst.msk [vmem:[#allocation3] sm:$0xff] %vm1279_vm1, %v1278_v52  ;;  %v6308_v52 = vpack.c.bf16 %v1981_v51, %v1973_v46  ;;  %v2042_v46 = vld [vmem:[#allocation6 + $0x440] sm:$0xff]  ;;  %v2036_v51 = vld [vmem:[#allocation6 + $0x410] sm:$0xff] }
 0x211   :  { %v6262_v50 = vpack.c.bf16 %v2042_v46, %v2034_v45  ;;  %v2115_v46 = vld [vmem:[#allocation6 + $0x688] sm:$0xff] }
 0x212   :  { %6309 = vmatprep.subr.bf16.mxu1 %v6308_v52  ;;  %6247 = vmatpush1.bf16.msra.mxu0 %v6246_v57  ;;  %v2044_v52 = vld [vmem:[#allocation6 + $0x450] sm:$0xff]  ;;  %v6264_v57 = vpack.c.bf16 %v2059_v54, %v2051_v62  ;;  %v2122_v62 = vld [vmem:[#allocation6 + $0x6c0] sm:$0xff] }
 0x213   :  { %6311 = vmatpush1.bf16.msra.mxu1 %v6310_v1  ;;  %6249 = vmatprep.subr.bf16.mxu0 %v6248_v6  ;;  %v2050_v1 = vld [vmem:[#allocation6 + $0x480] sm:$0xff]  ;;  %v2052_v6 = vld [vmem:[#allocation6 + $0x490] sm:$0xff] }
 0x214   :  { %6313 = vmatprep.subr.bf16.mxu1 %v6312_v9  ;;  %v6266_v5 = vpack.c.bf16 %v2058_v3, %v2050_v1  ;;  %v6330_v43 = vpack.c.bf16 %v2060_v7, %v2052_v6  ;;  %v2075_v9 = vld [vmem:[#allocation6 + $0x548] sm:$0xff]  ;;  %v2141_v6 = vld [vmem:[#allocation6 + $0x758] sm:$0xff] }
 0x215   :  { %v6268_v10 = vpack.c.bf16 %v2075_v9, %v2067_v8  ;;  %v2131_v1 = vld [vmem:[#allocation6 + $0x708] sm:$0xff]  ;;  %v2130_v8 = vld [vmem:[#allocation6 + $0x700] sm:$0xff] }
 0x216   :  { %6251 = vmatpush1.bf16.msra.mxu0 %v6250_v58  ;;  %v2069_v58 = vld [vmem:[#allocation6 + $0x518] sm:$0xff]  ;;  %v2138_v9 = vld [vmem:[#allocation6 + $0x740] sm:$0xff] }
 0x217   :  { %6315 = vmatpush1.bf16.msra.mxu1 %v6314_v12  ;;  %6253 = vmatprep.subr.bf16.mxu0 %v6252_v0  ;;  %v2066_v12 = vld [vmem:[#allocation6 + $0x500] sm:$0xff]  ;;  %v6332_v17 = vpack.c.bf16 %v2077_v11, %v2069_v58  ;;  %v2068_v0 = vld [vmem:[#allocation6 + $0x510] sm:$0xff] }
 0x218   :  { %6317 = vmatprep.subr.bf16.mxu1 %v6316_v21  ;;  %v6270_v18 = vpack.c.bf16 %v2074_v14, %v2066_v12  ;;  %v6334_v20 = vpack.c.bf16 %v2076_v19, %v2068_v0  ;;  %v2091_v21 = vld [vmem:[#allocation6 + $0x5c8] sm:$0xff]  ;;  %v2132_v58 = vld [vmem:[#allocation6 + $0x710] sm:$0xff]  ;;  %v2149_v0 = vld [vmem:[#allocation6 + $0x798] sm:$0xff] }
 0x219   :  { %v6272_v24 = vpack.c.bf16 %v2091_v21, %v2083_v59  ;;  %v2140_v11 = vld [vmem:[#allocation6 + $0x750] sm:$0xff]  ;;  %v2147_v12 = vld [vmem:[#allocation6 + $0x788] sm:$0xff]  ;;  %v2157_v19 = vld [vmem:[#allocation6 + $0x7d8] sm:$0xff] }
 0x21a   :  { %6255 = vmatpush1.bf16.msra.mxu0 %v6254_v22  ;;  %v2085_v22 = vld [vmem:[#allocation6 + $0x598] sm:$0xff]  ;;  %v2155_v14 = vld [vmem:[#allocation6 + $0x7c8] sm:$0xff]  ;;  %v6352_v59 = vpack.c.bf16 %v2157_v19, %v2149_v0  ;;  %v2154_v21 = vld [vmem:[#allocation6 + $0x7c0] sm:$0xff] }
 0x21b   :  { %6319 = vmatpush1.bf16.msra.mxu1 %v6318_v26  ;;  %6257 = vmatprep.subr.bf16.mxu0 %v6256_v32  ;;  %v2082_v26 = vld [vmem:[#allocation6 + $0x580] sm:$0xff]  ;;  %v6336_v29 = vpack.c.bf16 %v2093_v25, %v2085_v22  ;;  %v2084_v32 = vld [vmem:[#allocation6 + $0x590] sm:$0xff] }
 0x21c   :  { %6321 = vmatprep.subr.bf16.mxu1 %v6320_v34  ;;  %v6274_v31 = vpack.c.bf16 %v2090_v28, %v2082_v26  ;;  %v6338_v30 = vpack.c.bf16 %v2092_v60, %v2084_v32  ;;  %v2107_v34 = vld [vmem:[#allocation6 + $0x648] sm:$0xff]  ;;  %v2148_v22 = vld [vmem:[#allocation6 + $0x790] sm:$0xff]  ;;  %v1921_v60 = vld [vmem:[#allocation6 + $0x78] sm:$0xff] }
 0x21d   :  { %v6276_v36 = vpack.c.bf16 %v2107_v34, %v2099_v33  ;;  %v1911_v28 = vld [vmem:[#allocation6 + $0x28] sm:$0xff] }
 0x21e   :  { %6259 = vmatpush1.bf16.msra.mxu0 %v6258_v35  ;;  %v2101_v35 = vld [vmem:[#allocation6 + $0x618] sm:$0xff] }
 0x21f   :  { %6323 = vmatpush1.bf16.msra.mxu1 %v6322_v38  ;;  %6261 = vmatprep.subr.bf16.mxu0 %v6260_v61  ;;  %v2098_v38 = vld [vmem:[#allocation6 + $0x600] sm:$0xff]  ;;  %v6340_v41 = vpack.c.bf16 %v2109_v37, %v2101_v35  ;;  %v2100_v61 = vld [vmem:[#allocation6 + $0x610] sm:$0xff] }
 0x220   :  { %6325 = vmatprep.subr.bf16.mxu1 %v6324_v49  ;;  %v6278_v42 = vpack.c.bf16 %v2106_v39, %v2098_v38  ;;  %v6342_v45 = vpack.c.bf16 %v2108_v44, %v2100_v61  ;;  %v2123_v49 = vld [vmem:[#allocation6 + $0x6c8] sm:$0xff] }
 0x222   :  { %6263 = vmatpush1.bf16.msra.mxu0 %v6262_v50  ;;  %v2117_v50 = vld [vmem:[#allocation6 + $0x698] sm:$0xff] }
 0x223   :  { %6265 = vmatprep.subr.bf16.mxu0 %v6264_v57  ;;  %v2116_v57 = vld [vmem:[#allocation6 + $0x690] sm:$0xff] }
 0x224   :  { %v6346_v3 = vpack.c.bf16 %v2124_v63, %v2116_v57 }
 0x226   :  { %6267 = vmatpush1.bf16.msra.mxu0 %v6266_v5  ;;  %v2133_v5 = vld [vmem:[#allocation6 + $0x718] sm:$0xff] }
 0x227   :  { %6269 = vmatprep.subr.bf16.mxu0 %v6268_v10  ;;  %v6286_v10 = vpack.c.bf16 %v2138_v9, %v2130_v8 }
 0x22a   :  { %6271 = vmatpush1.bf16.msra.mxu0 %v6270_v18  ;;  %v6288_v18 = vpack.c.bf16 %v2155_v14, %v2147_v12 }
 0x22b   :  { %6273 = vmatprep.subr.bf16.mxu0 %v6272_v24  ;;  %v2156_v24 = vld [vmem:[#allocation6 + $0x7d0] sm:$0xff] }
 0x22c   :  { %v6354_v26 = vpack.c.bf16 %v2156_v24, %v2148_v22 }
 0x22e   :  { %6275 = vmatpush1.bf16.msra.mxu0 %v6274_v31  ;;  %v1913_v31 = vld [vmem:[#allocation6 + $0x38] sm:$0xff] }
 0x22f   :  { %6277 = vmatprep.subr.bf16.mxu0 %v6276_v36 }
 0x232   :  { %6279 = vmatpush1.bf16.msra.mxu0 %v6278_v42 }
 0x251   :  { %v1289_v53 = vpop.xlane.xlu0 %1288 }
 0x252   :  { %1291 = vst.msk [vmem:[#allocation4] sm:$0xff] %vm1290_vm2, %v1289_v53  ;;  %v6326_v53 = vpack.c.bf16 %v2044_v52, %v2036_v51  ;;  %v6280_v51 = vpack.c.bf16 %v2123_v49, %v2115_v46  ;;  %v2125_v52 = vld [vmem:[#allocation6 + $0x6d8] sm:$0xff] }
 0x253   :  { %v6344_v54 = vpack.c.bf16 %v2125_v52, %v2117_v50 }
 0x254   :  { %6327 = vmatpush1.bf16.msra.mxu1 %v6326_v53  ;;  %v2114_v53 = vld [vmem:[#allocation6 + $0x680] sm:$0xff]  ;;  %6281 = vmatprep.subr.bf16.mxu0 %v6280_v51 }
 0x255   :  { %6329 = vmatprep.subr.bf16.mxu1 %v6328_v4  ;;  %v6282_v55 = vpack.c.bf16 %v2122_v62, %v2114_v53  ;;  %v2139_v4 = vld [vmem:[#allocation6 + $0x748] sm:$0xff] }
 0x256   :  { %v6284_v7 = vpack.c.bf16 %v2139_v4, %v2131_v1 }
 0x257   :  { %6283 = vmatpush1.bf16.msra.mxu0 %v6282_v55 }
 0x258   :  { %6331 = vmatpush1.bf16.msra.mxu1 %v6330_v43  ;;  %v6348_v43 = vpack.c.bf16 %v2141_v6, %v2133_v5  ;;  %6285 = vmatprep.subr.bf16.mxu0 %v6284_v7  ;;  %v8156_v5 = vld [vmem:[%s8772_s4] ss:$0 sm:$0xff] }
 0x259   :  { %6333 = vmatprep.subr.bf16.mxu1 %v6332_v17  ;;  %v6350_v17 = vpack.c.bf16 %v2140_v11, %v2132_v58 }
 0x25b   :  { %6287 = vmatpush1.bf16.msra.mxu0 %v6286_v10 }
 0x25c   :  { %6335 = vmatpush1.bf16.msra.mxu1 %v6334_v20  ;;  %v2146_v20 = vld [vmem:[#allocation6 + $0x780] sm:$0xff]  ;;  %6289 = vmatprep.subr.bf16.mxu0 %v6288_v18 }
 0x25d   :  { %6337 = vmatprep.subr.bf16.mxu1 %v6336_v29  ;;  %v6290_v25 = vpack.c.bf16 %v2154_v21, %v2146_v20  ;;  %v1919_v29 = vld [vmem:[#allocation6 + $0x68] sm:$0xff] }
 0x25e   :  { %v6356_v32 = vpack.c.bf16 %v1919_v29, %v1911_v28 }
 0x25f   :  { %6291 = vmatpush1.bf16.msra.mxu0 %v6290_v25 }
 0x260   :  { %6339 = vmatpush1.bf16.msra.mxu1 %v6338_v30  ;;  %v6420_v30 = vpack.c.bf16 %v1921_v60, %v1913_v31  ;;  %6357 = vmatprep.subr.bf16.mxu0 %v6356_v32  ;;  %v1910_v31 = vld [vmem:[#allocation6 + $0x20] sm:$0xff]  ;;  %v1912_v60 = vld [vmem:[#allocation6 + $0x30] sm:$0xff] }
 0x261   :  { %6341 = vmatprep.subr.bf16.mxu1 %v6340_v41  ;;  %v1918_v32 = vld [vmem:[#allocation6 + $0x60] sm:$0xff] }
 0x264   :  { %6343 = vmatpush1.bf16.msra.mxu1 %v6342_v45 }
 0x265   :  { %6345 = vmatprep.subr.bf16.mxu1 %v6344_v54 }
 0x268   :  { %6347 = vmatpush1.bf16.msra.mxu1 %v6346_v3 }
 0x269   :  { %6349 = vmatprep.subr.bf16.mxu1 %v6348_v43 }
 0x26c   :  { %6351 = vmatpush1.bf16.msra.mxu1 %v6350_v17 }
 0x26d   :  { %6353 = vmatprep.subr.bf16.mxu1 %v6352_v59 }
 0x270   :  { %6355 = vmatpush1.bf16.msra.mxu1 %v6354_v26 }
 0x271   :  { %6421 = vmatprep.subr.bf16.mxu1 %v6420_v30  ;;  %v1920_v30 = vld [vmem:[#allocation6 + $0x70] sm:$0xff] }
 0x294   :  { %v1614_v33 = vpop.f32.mrb[2].mxu0  ;;  %v1685_v34 = vpop.f32.mrb[2].mxu1 }
 0x295   :  { %v7766_v35 = vadd.f32 %v1614_v33, %v8498_v15  ;;  %v1616_v36 = vpop.f32.mrb[3].mxu0  ;;  %v1687_v37 = vpop.f32.mrb[3].mxu1  ;;  %v7782_v42 = vadd.f32 %v1685_v34, %v8507_v23 }
 0x296   :  { %v7767_v38 = vadd.f32 %v1616_v36, %v8501_v16  ;;  %v7783_v61 = vadd.f32 %v1687_v37, %v8512_v27  ;;  %v1935_v36 = vld [vmem:[#allocation6 + $0xe8] sm:$0xff]  ;;  %v1929_v37 = vld [vmem:[#allocation6 + $0xb8] sm:$0xff] }
 0x297   :  { %v5641_v39 = vmul.f32 -1.442695, %v7766_v35  ;;  %v5643_v44 = vmul.f32 -1.442695, %v7782_v42  ;;  %v1927_v35 = vld [vmem:[#allocation6 + $0xa8] sm:$0xff]  ;;  %v1937_v42 = vld [vmem:[#allocation6 + $0xf8] sm:$0xff] }
 0x298   :  { %v5642_v41 = vmul.f32 -1.442695, %v7767_v38 }
 0x299   :  { %7928 = vpow2.f32 %v5641_v39  ;;  %v6358_v39 = vpack.c.bf16 %v1918_v32, %v1910_v31 }
 0x29a   :  { %7930 = vpow2.f32 %v5642_v41  ;;  %v6422_v41 = vpack.c.bf16 %v1920_v30, %v1912_v60  ;;  %v1976_v60 = vld [vmem:[#allocation6 + $0x230] sm:$0xff] }
 0x29b   :  { %7932 = vtanh.f32 %v7783_v61  ;;  %v1926_v61 = vld [vmem:[#allocation6 + $0xa0] sm:$0xff]  ;;  %v1984_v30 = vld [vmem:[#allocation6 + $0x270] sm:$0xff] }
 0x29c   :  { %7934 = vpow2.f32 %v5643_v44  ;;  %v1928_v44 = vld [vmem:[#allocation6 + $0xb0] sm:$0xff] }
 0x2a3   :  { %v7929_v45 = vpop.eup %7928 }
 0x2a4   :  { %v1857_v46 = vadd.f32 1.0, %v7929_v45  ;;  %v7931_v49 = vpop.eup %7930  ;;  %v1936_v45 = vld [vmem:[#allocation6 + $0xf0] sm:$0xff] }
 0x2a5   :  { %v1858_v50 = vadd.f32 1.0, %v7931_v49  ;;  %v7933_v51 = vpop.eup %7932  ;;  %v8157_v49 = vld [vmem:[%s8773_s5] ss:$0 sm:$0xff] }
 0x2a6   :  { %7936 = vrcp.f32 %v1857_v46  ;;  %v7935_v52 = vpop.eup %7934  ;;  %v1943_v46 = vld [vmem:[#allocation6 + $0x128] sm:$0xff] }
 0x2a7   :  { %7938 = vrcp.f32 %v1858_v50  ;;  %v1859_v55 = vadd.f32 1.0, %v7935_v52  ;;  %v1951_v52 = vld [vmem:[#allocation6 + $0x168] sm:$0xff] }
 0x2a9   :  { %7940 = vrcp.f32 %v1859_v55 }
 0x2b0   :  { %v7937_v53 = vpop.eup %7936 }
 0x2b1   :  { %v1868_v62 = vmul.f32 %v7937_v53, %v7933_v51  ;;  %v7939_v54 = vpop.eup %7938  ;;  %v6360_v51 = vpack.c.bf16 %v1935_v36, %v1927_v35  ;;  %v1945_v53 = vld [vmem:[#allocation6 + $0x138] sm:$0xff] }
 0x2b2   :  { %v1867_v57 = vmul.f32 %v7939_v54, %v8515_v40  ;;  %v6424_v54 = vpack.c.bf16 %v1937_v42, %v1929_v37  ;;  %v1993_v35 = vld [vmem:[#allocation6 + $0x2b8] sm:$0xff] }
 0x2b3   :  { %v7941_v1 = vpop.eup %7940  ;;  %v2001_v36 = vld [vmem:[#allocation6 + $0x2f8] sm:$0xff] }
 0x2b4   :  { %v8561_v63 = vadd.f32 %v1868_v62, %v1867_v57  ;;  %v1953_v62 = vld [vmem:[#allocation6 + $0x178] sm:$0xff]  ;;  %v6426_v57 = vpack.c.bf16 %v1936_v45, %v1928_v44  ;;  %v2000_v44 = vld [vmem:[#allocation6 + $0x2f0] sm:$0xff]  ;;  %v2007_v45 = vld [vmem:[#allocation6 + $0x328] sm:$0xff] }
 0x2b6   :  { %7942 = vtanh.f32 %v8561_v63 }
 0x2c0   :  { %v7943_v3 = vpop.eup %7942 }
 0x2c1   :  { %v8564_v4 = vmul.f32 %v7943_v3, %v7941_v1  ;;  %v1942_v1 = vld [vmem:[#allocation6 + $0x120] sm:$0xff] }
 0x2c2   :  { %v1950_v3 = vld [vmem:[#allocation6 + $0x160] sm:$0xff] }
 0x2c3   :  { %v1896_v6 = vmul.f32 %v8156_v5, %v8564_v4  ;;  %v6364_v5 = vpack.c.bf16 %v1951_v52, %v1943_v46  ;;  %v2015_v46 = vld [vmem:[#allocation6 + $0x368] sm:$0xff] }
 0x2c5   :  { %1897 = vadd.xlane.f32.xlu1 %v1896_v6  ;;  %v6428_v6 = vpack.c.bf16 %v1953_v62, %v1945_v53  ;;  %v2006_v53 = vld [vmem:[#allocation6 + $0x320] sm:$0xff] }
 0x2c6   :  { %v2014_v62 = vld [vmem:[#allocation6 + $0x360] sm:$0xff] }
 0x2d4   :  { %v1756_v7 = vpop.f32.mrb[28].mxu0  ;;  %v1827_v43 = vpop.f32.mrb[28].mxu1 }
 0x2d5   :  { %v7808_v40 = vadd.f32 %v1756_v7, %v8527_v47  ;;  %v1758_v8 = vpop.f32.mrb[29].mxu0  ;;  %v1829_v9 = vpop.f32.mrb[29].mxu1  ;;  %v7824_v12 = vadd.f32 %v1827_v43, %v8536_v56  ;;  %v1944_v7 = vld [vmem:[#allocation6 + $0x130] sm:$0xff] }
 0x2d6   :  { %v7809_v58 = vadd.f32 %v1758_v8, %v8530_v48  ;;  %v7825_v14 = vadd.f32 %v1829_v9, %v8541_v2  ;;  %v1952_v43 = vld [vmem:[#allocation6 + $0x170] sm:$0xff]  ;;  %v1967_v8 = vld [vmem:[#allocation6 + $0x1e8] sm:$0xff]  ;;  %v1961_v9 = vld [vmem:[#allocation6 + $0x1b8] sm:$0xff] }
 0x2d7   :  { %v5644_v10 = vmul.f32 -1.442695, %v7808_v40  ;;  %v5646_v17 = vmul.f32 -1.442695, %v7824_v12  ;;  %v1959_v40 = vld [vmem:[#allocation6 + $0x1a8] sm:$0xff]  ;;  %v1958_v12 = vld [vmem:[#allocation6 + $0x1a0] sm:$0xff] }
 0x2d8   :  { %v5645_v11 = vmul.f32 -1.442695, %v7809_v58  ;;  %v1969_v58 = vld [vmem:[#allocation6 + $0x1f8] sm:$0xff] }
 0x2d9   :  { %7944 = vpow2.f32 %v5644_v10  ;;  %v6366_v10 = vpack.c.bf16 %v1950_v3, %v1942_v1  ;;  %v2016_v1 = vld [vmem:[#allocation6 + $0x370] sm:$0xff]  ;;  %v2023_v3 = vld [vmem:[#allocation6 + $0x3a8] sm:$0xff] }
 0x2da   :  { %7946 = vpow2.f32 %v5645_v11  ;;  %v6430_v11 = vpack.c.bf16 %v1952_v43, %v1944_v7  ;;  %v2033_v7 = vld [vmem:[#allocation6 + $0x3f8] sm:$0xff]  ;;  %v6382_v43 = vpack.c.bf16 %v2014_v62, %v2006_v53  ;;  %v2080_v53 = vld [vmem:[#allocation6 + $0x570] sm:$0xff]  ;;  %v2087_v62 = vld [vmem:[#allocation6 + $0x5a8] sm:$0xff] }
 0x2db   :  { %7948 = vtanh.f32 %v7825_v14  ;;  %v1966_v14 = vld [vmem:[#allocation6 + $0x1e0] sm:$0xff] }
 0x2dc   :  { %7950 = vpow2.f32 %v5646_v17  ;;  %v6368_v17 = vpack.c.bf16 %v1967_v8, %v1959_v40  ;;  %v2022_v8 = vld [vmem:[#allocation6 + $0x3a0] sm:$0xff] }
 0x2e3   :  { %v7945_v18 = vpop.eup %7944 }
 0x2e4   :  { %v1881_v0 = vadd.f32 1.0, %v7945_v18  ;;  %v7947_v19 = vpop.eup %7946  ;;  %v6432_v18 = vpack.c.bf16 %v1969_v58, %v1961_v9  ;;  %v2030_v9 = vld [vmem:[#allocation6 + $0x3e0] sm:$0xff] }
 0x2e5   :  { %v1882_v20 = vadd.f32 1.0, %v7947_v19  ;;  %v7949_v59 = vpop.eup %7948  ;;  %v1968_v19 = vld [vmem:[#allocation6 + $0x1f0] sm:$0xff] }
 0x2e6   :  { %7952 = vrcp.f32 %v1881_v0  ;;  %v7951_v21 = vpop.eup %7950  ;;  %v1960_v0 = vld [vmem:[#allocation6 + $0x1b0] sm:$0xff] }
 0x2e7   :  { %7954 = vrcp.f32 %v1882_v20  ;;  %v1883_v26 = vadd.f32 1.0, %v7951_v21  ;;  %v1975_v20 = vld [vmem:[#allocation6 + $0x228] sm:$0xff]  ;;  %v1977_v21 = vld [vmem:[#allocation6 + $0x238] sm:$0xff] }
 0x2e9   :  { %7956 = vrcp.f32 %v1883_v26  ;;  %v1974_v26 = vld [vmem:[#allocation6 + $0x220] sm:$0xff] }
 0x2f0   :  { %v7953_v22 = vpop.eup %7952 }
 0x2f1   :  { %v1892_v24 = vmul.f32 %v7953_v22, %v7949_v59  ;;  %v7955_v25 = vpop.eup %7954  ;;  %v1983_v59 = vld [vmem:[#allocation6 + $0x268] sm:$0xff]  ;;  %v1985_v22 = vld [vmem:[#allocation6 + $0x278] sm:$0xff] }
 0x2f2   :  { %v1891_v28 = vmul.f32 %v7955_v25, %v8544_v13  ;;  %v1934_v13 = vld [vmem:[#allocation6 + $0xe0] sm:$0xff]  ;;  %v6434_v25 = vpack.c.bf16 %v1968_v19, %v1960_v0  ;;  %v6372_v31 = vpack.c.bf16 %v1983_v59, %v1975_v20  ;;  %v6436_v32 = vpack.c.bf16 %v1985_v22, %v1977_v21  ;;  %v2049_v0 = vld [vmem:[#allocation6 + $0x478] sm:$0xff] }
 0x2f3   :  { %v7957_v33 = vpop.eup %7956  ;;  %v6362_v55 = vpack.c.bf16 %v1934_v13, %v1926_v61  ;;  %v6440_v61 = vpack.c.bf16 %v2001_v36, %v1993_v35  ;;  %v1992_v13 = vld [vmem:[#allocation6 + $0x2b0] sm:$0xff]  ;;  %v6386_v19 = vpack.c.bf16 %v2030_v9, %v2022_v8  ;;  %v2038_v59 = vld [vmem:[#allocation6 + $0x420] sm:$0xff]  ;;  %v2103_v9 = vld [vmem:[#allocation6 + $0x628] sm:$0xff] }
 0x2f4   :  { %v8575_v29 = vadd.f32 %v1892_v24, %v1891_v28  ;;  %v6370_v24 = vpack.c.bf16 %v1966_v14, %v1958_v12  ;;  %v1982_v28 = vld [vmem:[#allocation6 + $0x260] sm:$0xff]  ;;  %v6442_v52 = vpack.c.bf16 %v2000_v44, %v1992_v13  ;;  %v2032_v12 = vld [vmem:[#allocation6 + $0x3f0] sm:$0xff]  ;;  %v2039_v14 = vld [vmem:[#allocation6 + $0x428] sm:$0xff] }
 0x2f5   :  { %v6374_v37 = vpack.c.bf16 %v1982_v28, %v1974_v26  ;;  %v2046_v21 = vld [vmem:[#allocation6 + $0x460] sm:$0xff]  ;;  %v2048_v26 = vld [vmem:[#allocation6 + $0x470] sm:$0xff]  ;;  %v2055_v28 = vld [vmem:[#allocation6 + $0x4a8] sm:$0xff] }
 0x2f6   :  { %7958 = vtanh.f32 %v8575_v29  ;;  %v2062_v35 = vld [vmem:[#allocation6 + $0x4e0] sm:$0xff]  ;;  %v2081_v13 = vld [vmem:[#allocation6 + $0x578] sm:$0xff]  ;;  %v2096_v8 = vld [vmem:[#allocation6 + $0x5f0] sm:$0xff] }
 0x300   :  { %v7959_v34 = vpop.eup %7958 }
 0x301   :  { %v1895_v38 = vmul.f32 %v7959_v34, %v7957_v33  ;;  %v1991_v33 = vld [vmem:[#allocation6 + $0x2a8] sm:$0xff] }
 0x302   :  { %v1999_v34 = vld [vmem:[#allocation6 + $0x2e8] sm:$0xff] }
 0x303   :  { %2226 = vmatprep.mubr.f32.mxu0 %v1895_v38  ;;  %2297 = vmatprep.mubr.f32.mxu1 %v1895_v38  ;;  %v1901_v50 = vmul.f32 %v8157_v49, %v1895_v38  ;;  %v6376_v42 = vpack.c.bf16 %v1999_v34, %v1991_v33  ;;  %v2009_v49 = vld [vmem:[#allocation6 + $0x338] sm:$0xff]  ;;  %v2054_v34 = vld [vmem:[#allocation6 + $0x4a0] sm:$0xff] }
 0x304   :  { %2227 = vmatmul.mubr.f32.vlgmr.msra.gmra.mrb[4].mxu0 %v8564_v4  ;;  %2298 = vmatmul.mubr.f32.vlgmr.msra.gmra.mrb[4].mxu1 %v8564_v4  ;;  %v6394_v44 = vpack.c.bf16 %v2062_v35, %v2054_v34  ;;  %v2128_v34 = vld [vmem:[#allocation6 + $0x6f0] sm:$0xff]  ;;  %v2135_v35 = vld [vmem:[#allocation6 + $0x728] sm:$0xff] }
 0x305   :  { %6359 = vmatpush1.bf16.msra.mxu0 %v6358_v39  ;;  %6423 = vmatpush1.bf16.msra.mxu1 %v6422_v41  ;;  %v1990_v39 = vld [vmem:[#allocation6 + $0x2a0] sm:$0xff] }
 0x306   :  { %2368 = vmatprep.mubr.f32.mxu0 %v1895_v38  ;;  %2439 = vmatprep.mubr.f32.mxu1 %v1895_v38  ;;  %v6438_v38 = vpack.c.bf16 %v1984_v30, %v1976_v60  ;;  %v1998_v41 = vld [vmem:[#allocation6 + $0x2e0] sm:$0xff]  ;;  %v2065_v60 = vld [vmem:[#allocation6 + $0x4f8] sm:$0xff]  ;;  %v6390_v30 = vpack.c.bf16 %v2046_v21, %v2038_v59  ;;  %v2112_v59 = vld [vmem:[#allocation6 + $0x670] sm:$0xff] }
 0x307   :  { %1902 = vadd.xlane.f32.xlu1 %v1901_v50  ;;  %6361 = vmatprep.subr.bf16.mxu0 %v6360_v51  ;;  %v2017_v50 = vld [vmem:[#allocation6 + $0x378] sm:$0xff]  ;;  %v6378_v51 = vpack.c.bf16 %v1998_v41, %v1990_v39  ;;  %v2064_v39 = vld [vmem:[#allocation6 + $0x4f0] sm:$0xff]  ;;  %v2071_v41 = vld [vmem:[#allocation6 + $0x528] sm:$0xff] }
 0x308   :  { %6425 = vmatprep.subr.bf16.mxu1 %v6424_v54  ;;  %v6380_v54 = vpack.c.bf16 %v2015_v46, %v2007_v45  ;;  %v2070_v46 = vld [vmem:[#allocation6 + $0x520] sm:$0xff]  ;;  %v2119_v21 = vld [vmem:[#allocation6 + $0x6a8] sm:$0xff] }
 0x309   :  { %6363 = vmatpush1.bf16.msra.mxu0 %v6362_v55  ;;  %6427 = vmatpush1.bf16.msra.mxu1 %v6426_v57  ;;  %v6444_v55 = vpack.c.bf16 %v2017_v50, %v2009_v49  ;;  %v2008_v57 = vld [vmem:[#allocation6 + $0x330] sm:$0xff]  ;;  %v2078_v49 = vld [vmem:[#allocation6 + $0x560] sm:$0xff] }
 0x30a   :  { %6365 = vmatprep.subr.bf16.mxu0 %v6364_v5  ;;  %6429 = vmatprep.subr.bf16.mxu1 %v6428_v6  ;;  %v2031_v5 = vld [vmem:[#allocation6 + $0x3e8] sm:$0xff]  ;;  %v2025_v6 = vld [vmem:[#allocation6 + $0x3b8] sm:$0xff]  ;;  %v6446_v40 = vpack.c.bf16 %v2016_v1, %v2008_v57  ;;  %v6398_v1 = vpack.c.bf16 %v2078_v49, %v2070_v46  ;;  %v2144_v46 = vld [vmem:[#allocation6 + $0x770] sm:$0xff] }
 0x30b   :  { %v6384_v58 = vpack.c.bf16 %v2031_v5, %v2023_v3  ;;  %v2097_v57 = vld [vmem:[#allocation6 + $0x5f8] sm:$0xff]  ;;  %v2086_v5 = vld [vmem:[#allocation6 + $0x5a0] sm:$0xff]  ;;  %v2151_v49 = vld [vmem:[#allocation6 + $0x7a8] sm:$0xff] }
 0x30d   :  { %6367 = vmatpush1.bf16.msra.mxu0 %v6366_v10  ;;  %6431 = vmatpush1.bf16.msra.mxu1 %v6430_v11  ;;  %v6448_v10 = vpack.c.bf16 %v2033_v7, %v2025_v6  ;;  %v2024_v11 = vld [vmem:[#allocation6 + $0x3b0] sm:$0xff]  ;;  %v2094_v6 = vld [vmem:[#allocation6 + $0x5e0] sm:$0xff] }
 0x30e   :  { %6369 = vmatprep.subr.bf16.mxu0 %v6368_v17  ;;  %6433 = vmatprep.subr.bf16.mxu1 %v6432_v18  ;;  %v2047_v17 = vld [vmem:[#allocation6 + $0x468] sm:$0xff]  ;;  %v2041_v18 = vld [vmem:[#allocation6 + $0x438] sm:$0xff]  ;;  %v6450_v20 = vpack.c.bf16 %v2032_v12, %v2024_v11  ;;  %v6402_v12 = vpack.c.bf16 %v2094_v6, %v2086_v5  ;;  %v2160_v5 = vld [vmem:[#allocation6 + $0x7f0] sm:$0xff] }
 0x30f   :  { %v6388_v22 = vpack.c.bf16 %v2047_v17, %v2039_v14  ;;  %v2113_v11 = vld [vmem:[#allocation6 + $0x678] sm:$0xff]  ;;  %v2102_v17 = vld [vmem:[#allocation6 + $0x620] sm:$0xff] }
 0x311   :  { %6371 = vmatpush1.bf16.msra.mxu0 %v6370_v24  ;;  %6435 = vmatpush1.bf16.msra.mxu1 %v6434_v25  ;;  %v6452_v24 = vpack.c.bf16 %v2049_v0, %v2041_v18  ;;  %v2040_v25 = vld [vmem:[#allocation6 + $0x430] sm:$0xff]  ;;  %v2110_v18 = vld [vmem:[#allocation6 + $0x660] sm:$0xff] }
 0x312   :  { %6373 = vmatprep.subr.bf16.mxu0 %v6372_v31  ;;  %6437 = vmatprep.subr.bf16.mxu1 %v6436_v32  ;;  %v2063_v31 = vld [vmem:[#allocation6 + $0x4e8] sm:$0xff]  ;;  %v2057_v32 = vld [vmem:[#allocation6 + $0x4b8] sm:$0xff]  ;;  %v6454_v33 = vpack.c.bf16 %v2048_v26, %v2040_v25  ;;  %v6406_v26 = vpack.c.bf16 %v2110_v18, %v2102_v17  ;;  %v2522_v18 = vld [vmem:[#allocation6 + $0x10] sm:$0xff] }
 0x313   :  { %v6392_v36 = vpack.c.bf16 %v2063_v31, %v2055_v28  ;;  %v2129_v25 = vld [vmem:[#allocation6 + $0x6f8] sm:$0xff]  ;;  %v2118_v31 = vld [vmem:[#allocation6 + $0x6a0] sm:$0xff] }
 0x315   :  { %6375 = vmatpush1.bf16.msra.mxu0 %v6374_v37  ;;  %6439 = vmatpush1.bf16.msra.mxu1 %v6438_v38  ;;  %v6456_v37 = vpack.c.bf16 %v2065_v60, %v2057_v32  ;;  %v2056_v38 = vld [vmem:[#allocation6 + $0x4b0] sm:$0xff]  ;;  %v2126_v32 = vld [vmem:[#allocation6 + $0x6e0] sm:$0xff] }
 0x316   :  { %6377 = vmatprep.subr.bf16.mxu0 %v6376_v42  ;;  %6441 = vmatprep.subr.bf16.mxu1 %v6440_v61  ;;  %v2079_v42 = vld [vmem:[#allocation6 + $0x568] sm:$0xff]  ;;  %v2073_v61 = vld [vmem:[#allocation6 + $0x538] sm:$0xff]  ;;  %v6458_v45 = vpack.c.bf16 %v2064_v39, %v2056_v38  ;;  %v6410_v39 = vpack.c.bf16 %v2126_v32, %v2118_v31  ;;  %v2538_v31 = vld [vmem:[#allocation6 + $0x90] sm:$0xff] }
 0x317   :  { %v6396_v50 = vpack.c.bf16 %v2079_v42, %v2071_v41  ;;  %v2145_v38 = vld [vmem:[#allocation6 + $0x778] sm:$0xff]  ;;  %v2134_v42 = vld [vmem:[#allocation6 + $0x720] sm:$0xff]  ;;  %v2546_v32 = vld [vmem:[#allocation6 + $0xd0] sm:$0xff] }
 0x319   :  { %6379 = vmatpush1.bf16.msra.mxu0 %v6378_v51  ;;  %6443 = vmatpush1.bf16.msra.mxu1 %v6442_v52  ;;  %v6460_v51 = vpack.c.bf16 %v2081_v13, %v2073_v61  ;;  %v2072_v52 = vld [vmem:[#allocation6 + $0x530] sm:$0xff]  ;;  %v2142_v61 = vld [vmem:[#allocation6 + $0x760] sm:$0xff] }
 0x31a   :  { %6381 = vmatprep.subr.bf16.mxu0 %v6380_v54  ;;  %6445 = vmatprep.subr.bf16.mxu1 %v6444_v55  ;;  %v2095_v54 = vld [vmem:[#allocation6 + $0x5e8] sm:$0xff]  ;;  %v2089_v55 = vld [vmem:[#allocation6 + $0x5b8] sm:$0xff]  ;;  %v6462_v3 = vpack.c.bf16 %v2080_v53, %v2072_v52  ;;  %v6414_v53 = vpack.c.bf16 %v2142_v61, %v2134_v42  ;;  %v2562_v61 = vld [vmem:[#allocation6 + $0x150] sm:$0xff] }
 0x31b   :  { %v6400_v7 = vpack.c.bf16 %v2095_v54, %v2087_v62  ;;  %v2161_v52 = vld [vmem:[#allocation6 + $0x7f8] sm:$0xff]  ;;  %v2150_v54 = vld [vmem:[#allocation6 + $0x7a0] sm:$0xff] }
 0x31d   :  { %6383 = vmatpush1.bf16.msra.mxu0 %v6382_v43  ;;  %6447 = vmatpush1.bf16.msra.mxu1 %v6446_v40  ;;  %v6464_v43 = vpack.c.bf16 %v2097_v57, %v2089_v55  ;;  %v2088_v40 = vld [vmem:[#allocation6 + $0x5b0] sm:$0xff] }
 0x31e   :  { %6385 = vmatprep.subr.bf16.mxu0 %v6384_v58  ;;  %6449 = vmatprep.subr.bf16.mxu1 %v6448_v10  ;;  %v2111_v58 = vld [vmem:[#allocation6 + $0x668] sm:$0xff]  ;;  %v2105_v10 = vld [vmem:[#allocation6 + $0x638] sm:$0xff]  ;;  %v6466_v14 = vpack.c.bf16 %v2096_v8, %v2088_v40 }
 0x31f   :  { %v6404_v0 = vpack.c.bf16 %v2111_v58, %v2103_v9  ;;  %v2521_v40 = vld [vmem:[#allocation6 + $0x8] sm:$0xff]  ;;  %v2523_v9 = vld [vmem:[#allocation6 + $0x18] sm:$0xff] }
 0x320   :  { %v2529_v8 = vld [vmem:[#allocation6 + $0x48] sm:$0xff] }
 0x321   :  { %6387 = vmatpush1.bf16.msra.mxu0 %v6386_v19  ;;  %6451 = vmatpush1.bf16.msra.mxu1 %v6450_v20  ;;  %v6468_v19 = vpack.c.bf16 %v2113_v11, %v2105_v10  ;;  %v2104_v20 = vld [vmem:[#allocation6 + $0x630] sm:$0xff]  ;;  %v6484_v58 = vpack.c.bf16 %v2529_v8, %v2521_v40  ;;  %v2531_v10 = vld [vmem:[#allocation6 + $0x58] sm:$0xff]  ;;  %v2520_v11 = vld [vmem:[#allocation6] sm:$0xff] }
 0x322   :  { %6389 = vmatprep.subr.bf16.mxu0 %v6388_v22  ;;  %6453 = vmatprep.subr.bf16.mxu1 %v6452_v24  ;;  %v2127_v22 = vld [vmem:[#allocation6 + $0x6e8] sm:$0xff]  ;;  %v2121_v24 = vld [vmem:[#allocation6 + $0x6b8] sm:$0xff]  ;;  %v6470_v28 = vpack.c.bf16 %v2112_v59, %v2104_v20  ;;  %v2584_v8 = vld [vmem:[#allocation6 + $0x200] sm:$0xff] }
 0x323   :  { %v6408_v60 = vpack.c.bf16 %v2127_v22, %v2119_v21  ;;  %v2545_v20 = vld [vmem:[#allocation6 + $0xc8] sm:$0xff]  ;;  %v2539_v59 = vld [vmem:[#allocation6 + $0x98] sm:$0xff] }
 0x324   :  { %v2547_v22 = vld [vmem:[#allocation6 + $0xd8] sm:$0xff] }
 0x325   :  { %6391 = vmatpush1.bf16.msra.mxu0 %v6390_v30  ;;  %6455 = vmatpush1.bf16.msra.mxu1 %v6454_v33  ;;  %v6472_v30 = vpack.c.bf16 %v2129_v25, %v2121_v24  ;;  %v2120_v33 = vld [vmem:[#allocation6 + $0x6b0] sm:$0xff]  ;;  %v2536_v24 = vld [vmem:[#allocation6 + $0x80] sm:$0xff] }
 0x326   :  { %6393 = vmatprep.subr.bf16.mxu0 %v6392_v36  ;;  %6457 = vmatprep.subr.bf16.mxu1 %v6456_v37  ;;  %v2143_v36 = vld [vmem:[#allocation6 + $0x768] sm:$0xff]  ;;  %v2137_v37 = vld [vmem:[#allocation6 + $0x738] sm:$0xff]  ;;  %v6474_v41 = vpack.c.bf16 %v2128_v34, %v2120_v33  ;;  %v2544_v25 = vld [vmem:[#allocation6 + $0xc0] sm:$0xff] }
 0x327   :  { %v6412_v13 = vpack.c.bf16 %v2143_v36, %v2135_v35  ;;  %v2561_v33 = vld [vmem:[#allocation6 + $0x148] sm:$0xff]  ;;  %v2555_v34 = vld [vmem:[#allocation6 + $0x118] sm:$0xff] }
 0x328   :  { %v2563_v35 = vld [vmem:[#allocation6 + $0x158] sm:$0xff] }
 0x329   :  { %6395 = vmatpush1.bf16.msra.mxu0 %v6394_v44  ;;  %6459 = vmatpush1.bf16.msra.mxu1 %v6458_v45  ;;  %v6476_v44 = vpack.c.bf16 %v2145_v38, %v2137_v37  ;;  %v2136_v45 = vld [vmem:[#allocation6 + $0x730] sm:$0xff]  ;;  %v6556_v37 = vpack.c.bf16 %v2563_v35, %v2555_v34  ;;  %v2552_v38 = vld [vmem:[#allocation6 + $0x100] sm:$0xff] }
 0x32a   :  { %6397 = vmatprep.subr.bf16.mxu0 %v6396_v50  ;;  %6461 = vmatprep.subr.bf16.mxu1 %v6460_v51  ;;  %v2159_v50 = vld [vmem:[#allocation6 + $0x7e8] sm:$0xff]  ;;  %v2153_v51 = vld [vmem:[#allocation6 + $0x7b8] sm:$0xff]  ;;  %v6478_v62 = vpack.c.bf16 %v2144_v46, %v2136_v45 }
 0x32b   :  { %v6416_v55 = vpack.c.bf16 %v2159_v50, %v2151_v49  ;;  %v6480_v57 = vpack.c.bf16 %v2161_v52, %v2153_v51  ;;  %v2571_v49 = vld [vmem:[#allocation6 + $0x198] sm:$0xff]  ;;  %v2568_v51 = vld [vmem:[#allocation6 + $0x180] sm:$0xff] }
 0x32c   :  { %v2579_v50 = vld [vmem:[#allocation6 + $0x1d8] sm:$0xff] }
 0x32d   :  { %6399 = vmatpush1.bf16.msra.mxu0 %v6398_v1  ;;  %6463 = vmatpush1.bf16.msra.mxu1 %v6462_v3  ;;  %v2158_v1 = vld [vmem:[#allocation6 + $0x7e0] sm:$0xff]  ;;  %v2152_v3 = vld [vmem:[#allocation6 + $0x7b0] sm:$0xff]  ;;  %v6560_v52 = vpack.c.bf16 %v2579_v50, %v2571_v49 }
 0x32e   :  { %6401 = vmatprep.subr.bf16.mxu0 %v6400_v7  ;;  %6465 = vmatprep.subr.bf16.mxu1 %v6464_v43  ;;  %v6418_v6 = vpack.c.bf16 %v2158_v1, %v2150_v54  ;;  %v6482_v7 = vpack.c.bf16 %v2160_v5, %v2152_v3  ;;  %v2578_v54 = vld [vmem:[#allocation6 + $0x1d0] sm:$0xff]  ;;  %v2593_v1 = vld [vmem:[#allocation6 + $0x248] sm:$0xff]  ;;  %v2587_v3 = vld [vmem:[#allocation6 + $0x218] sm:$0xff] }
 0x32f   :  { %v2634_v50 = vld [vmem:[#allocation6 + $0x390] sm:$0xff] }
 0x331   :  { %6403 = vmatpush1.bf16.msra.mxu0 %v6402_v12  ;;  %6467 = vmatpush1.bf16.msra.mxu1 %v6466_v14  ;;  %v2528_v12 = vld [vmem:[#allocation6 + $0x40] sm:$0xff]  ;;  %v6548_v14 = vpack.c.bf16 %v2531_v10, %v2523_v9 }
 0x332   :  { %6405 = vmatprep.subr.bf16.mxu0 %v6404_v0  ;;  %6469 = vmatprep.subr.bf16.mxu1 %v6468_v19  ;;  %v6486_v17 = vpack.c.bf16 %v2528_v12, %v2520_v11  ;;  %v2530_v0 = vld [vmem:[#allocation6 + $0x50] sm:$0xff]  ;;  %v2592_v9 = vld [vmem:[#allocation6 + $0x240] sm:$0xff] }
 0x333   :  { %v6550_v19 = vpack.c.bf16 %v2530_v0, %v2522_v18  ;;  %v6502_v10 = vpack.c.bf16 %v2592_v9, %v2584_v8  ;;  %v2594_v11 = vld [vmem:[#allocation6 + $0x250] sm:$0xff]  ;;  %v2603_v18 = vld [vmem:[#allocation6 + $0x298] sm:$0xff]  ;;  %v2665_v8 = vld [vmem:[#allocation6 + $0x488] sm:$0xff] }
 0x334   :  { %v2673_v9 = vld [vmem:[#allocation6 + $0x4c8] sm:$0xff] }
 0x335   :  { %6407 = vmatpush1.bf16.msra.mxu0 %v6406_v26  ;;  %6471 = vmatpush1.bf16.msra.mxu1 %v6470_v28  ;;  %v6552_v26 = vpack.c.bf16 %v2547_v22, %v2539_v59  ;;  %v6490_v28 = vpack.c.bf16 %v2544_v25, %v2536_v24  ;;  %v2602_v22 = vld [vmem:[#allocation6 + $0x290] sm:$0xff] }
 0x336   :  { %6409 = vmatprep.subr.bf16.mxu0 %v6408_v60  ;;  %6473 = vmatprep.subr.bf16.mxu1 %v6472_v30  ;;  %v2553_v60 = vld [vmem:[#allocation6 + $0x108] sm:$0xff]  ;;  %v6554_v30 = vpack.c.bf16 %v2546_v32, %v2538_v31  ;;  %v2610_v24 = vld [vmem:[#allocation6 + $0x2d0] sm:$0xff]  ;;  %v2619_v31 = vld [vmem:[#allocation6 + $0x318] sm:$0xff] }
 0x337   :  { %v6492_v36 = vpack.c.bf16 %v2561_v33, %v2553_v60  ;;  %v6570_v25 = vpack.c.bf16 %v2610_v24, %v2602_v22  ;;  %v2627_v60 = vld [vmem:[#allocation6 + $0x358] sm:$0xff]  ;;  %v2624_v33 = vld [vmem:[#allocation6 + $0x340] sm:$0xff] }
 0x338   :  { %v6572_v34 = vpack.c.bf16 %v2627_v60, %v2619_v31  ;;  %v2691_v24 = vld [vmem:[#allocation6 + $0x558] sm:$0xff]  ;;  %v2690_v60 = vld [vmem:[#allocation6 + $0x550] sm:$0xff] }
 0x339   :  { %6411 = vmatpush1.bf16.msra.mxu0 %v6410_v39  ;;  %6475 = vmatpush1.bf16.msra.mxu1 %v6474_v41  ;;  %v2560_v39 = vld [vmem:[#allocation6 + $0x140] sm:$0xff]  ;;  %v2554_v41 = vld [vmem:[#allocation6 + $0x110] sm:$0xff] }
 0x33a   :  { %6413 = vmatprep.subr.bf16.mxu0 %v6412_v13  ;;  %6477 = vmatprep.subr.bf16.mxu1 %v6476_v44  ;;  %v6494_v42 = vpack.c.bf16 %v2560_v39, %v2552_v38  ;;  %v2569_v13 = vld [vmem:[#allocation6 + $0x188] sm:$0xff]  ;;  %v6558_v45 = vpack.c.bf16 %v2562_v61, %v2554_v41 }
 0x33b   :  { %v2577_v44 = vld [vmem:[#allocation6 + $0x1c8] sm:$0xff] }
 0x33c   :  { %v6496_v46 = vpack.c.bf16 %v2577_v44, %v2569_v13  ;;  %v2633_v39 = vld [vmem:[#allocation6 + $0x388] sm:$0xff]  ;;  %v2643_v13 = vld [vmem:[#allocation6 + $0x3d8] sm:$0xff]  ;;  %v2632_v44 = vld [vmem:[#allocation6 + $0x380] sm:$0xff] }
 0x33d   :  { %6415 = vmatpush1.bf16.msra.mxu0 %v6414_v53  ;;  %6479 = vmatpush1.bf16.msra.mxu1 %v6478_v62  ;;  %v2576_v53 = vld [vmem:[#allocation6 + $0x1c0] sm:$0xff]  ;;  %v2570_v62 = vld [vmem:[#allocation6 + $0x190] sm:$0xff]  ;;  %v2641_v41 = vld [vmem:[#allocation6 + $0x3c8] sm:$0xff] }
 0x33e   :  { %6417 = vmatprep.subr.bf16.mxu0 %v6416_v55  ;;  %6481 = vmatprep.subr.bf16.mxu1 %v6480_v57  ;;  %v6498_v55 = vpack.c.bf16 %v2576_v53, %v2568_v51  ;;  %v2585_v57 = vld [vmem:[#allocation6 + $0x208] sm:$0xff]  ;;  %v6562_v5 = vpack.c.bf16 %v2578_v54, %v2570_v62  ;;  %v6512_v61 = vpack.c.bf16 %v2641_v41, %v2633_v39  ;;  %v2642_v51 = vld [vmem:[#allocation6 + $0x3d0] sm:$0xff]  ;;  %v2651_v54 = vld [vmem:[#allocation6 + $0x418] sm:$0xff] }
 0x33f   :  { %v2649_v53 = vld [vmem:[#allocation6 + $0x408] sm:$0xff]  ;;  %v2704_v39 = vld [vmem:[#allocation6 + $0x5c0] sm:$0xff] }
 0x340   :  { %v2657_v62 = vld [vmem:[#allocation6 + $0x448] sm:$0xff] }
 0x341   :  { %6419 = vmatpush1.bf16.msra.mxu0 %v6418_v6  ;;  %6483 = vmatpush1.bf16.msra.mxu1 %v6482_v7  ;;  %v6500_v6 = vpack.c.bf16 %v2593_v1, %v2585_v57  ;;  %v2595_v7 = vld [vmem:[#allocation6 + $0x258] sm:$0xff]  ;;  %v2648_v1 = vld [vmem:[#allocation6 + $0x400] sm:$0xff] }
 0x342   :  { %6485 = vmatprep.subr.bf16.mxu0 %v6484_v58  ;;  %6549 = vmatprep.subr.bf16.mxu1 %v6548_v14  ;;  %v2586_v58 = vld [vmem:[#allocation6 + $0x210] sm:$0xff]  ;;  %v2601_v14 = vld [vmem:[#allocation6 + $0x288] sm:$0xff]  ;;  %v2659_v57 = vld [vmem:[#allocation6 + $0x458] sm:$0xff] }
 0x343   :  { %v6566_v12 = vpack.c.bf16 %v2594_v11, %v2586_v58  ;;  %v2667_v58 = vld [vmem:[#allocation6 + $0x498] sm:$0xff] }
 0x344   :  { %2369 = vmatmul.mubr.f32.vlgmr.msra.gmra.mrb[26].mxu0 %v8564_v4  ;;  %2440 = vmatmul.mubr.f32.vlgmr.msra.gmra.mrb[26].mxu1 %v8564_v4  ;;  %v2537_v4 = vld [vmem:[#allocation6 + $0x88] sm:$0xff]  ;;  %v2675_v11 = vld [vmem:[#allocation6 + $0x4d8] sm:$0xff] }
 0x345   :  { %6487 = vmatpush1.bf16.msra.mxu0 %v6486_v17  ;;  %6551 = vmatpush1.bf16.msra.mxu1 %v6550_v19  ;;  %v6488_v21 = vpack.c.bf16 %v2545_v20, %v2537_v4  ;;  %v2609_v17 = vld [vmem:[#allocation6 + $0x2c8] sm:$0xff]  ;;  %v2611_v19 = vld [vmem:[#allocation6 + $0x2d8] sm:$0xff]  ;;  %v2600_v4 = vld [vmem:[#allocation6 + $0x280] sm:$0xff] }
 0x346   :  { %6553 = vmatprep.subr.bf16.mxu1 %v6552_v26  ;;  %v6504_v0 = vpack.c.bf16 %v2609_v17, %v2601_v14  ;;  %v2608_v20 = vld [vmem:[#allocation6 + $0x2c0] sm:$0xff]  ;;  %v6568_v59 = vpack.c.bf16 %v2611_v19, %v2603_v18  ;;  %v2617_v26 = vld [vmem:[#allocation6 + $0x308] sm:$0xff]  ;;  %v6584_v17 = vpack.c.bf16 %v2675_v11, %v2667_v58  ;;  %v2674_v19 = vld [vmem:[#allocation6 + $0x4d0] sm:$0xff] }
 0x347   :  { %6489 = vmatprep.subr.bf16.mxu0 %v6488_v21  ;;  %v6506_v21 = vpack.c.bf16 %v2608_v20, %v2600_v4  ;;  %v2672_v14 = vld [vmem:[#allocation6 + $0x4c0] sm:$0xff]  ;;  %v2681_v20 = vld [vmem:[#allocation6 + $0x508] sm:$0xff]  ;;  %v2738_v11 = vld [vmem:[#allocation6 + $0x6d0] sm:$0xff] }
 0x349   :  { %6491 = vmatpush1.bf16.msra.mxu0 %v6490_v28  ;;  %6555 = vmatpush1.bf16.msra.mxu1 %v6554_v30  ;;  %v2625_v28 = vld [vmem:[#allocation6 + $0x348] sm:$0xff]  ;;  %v2616_v30 = vld [vmem:[#allocation6 + $0x300] sm:$0xff] }
 0x34a   :  { %6493 = vmatprep.subr.bf16.mxu0 %v6492_v36  ;;  %6557 = vmatprep.subr.bf16.mxu1 %v6556_v37  ;;  %v6508_v32 = vpack.c.bf16 %v2625_v28, %v2617_v26  ;;  %v6510_v35 = vpack.c.bf16 %v2624_v33, %v2616_v30  ;;  %v2618_v36 = vld [vmem:[#allocation6 + $0x310] sm:$0xff]  ;;  %v2688_v26 = vld [vmem:[#allocation6 + $0x540] sm:$0xff]  ;;  %v2697_v33 = vld [vmem:[#allocation6 + $0x588] sm:$0xff] }
 0x34b   :  { %v2626_v37 = vld [vmem:[#allocation6 + $0x350] sm:$0xff] }
 0x34c   :  { %v6574_v38 = vpack.c.bf16 %v2626_v37, %v2618_v36  ;;  %v2707_v37 = vld [vmem:[#allocation6 + $0x5d8] sm:$0xff] }
 0x34d   :  { %6495 = vmatpush1.bf16.msra.mxu0 %v6494_v42  ;;  %6559 = vmatpush1.bf16.msra.mxu1 %v6558_v45  ;;  %v2635_v42 = vld [vmem:[#allocation6 + $0x398] sm:$0xff]  ;;  %v2640_v45 = vld [vmem:[#allocation6 + $0x3c0] sm:$0xff] }
 0x34e   :  { %6497 = vmatprep.subr.bf16.mxu0 %v6496_v46  ;;  %6561 = vmatprep.subr.bf16.mxu1 %v6560_v52  ;;  %v6576_v46 = vpack.c.bf16 %v2643_v13, %v2635_v42  ;;  %v6514_v49 = vpack.c.bf16 %v2640_v45, %v2632_v44  ;;  %v6578_v52 = vpack.c.bf16 %v2642_v51, %v2634_v50  ;;  %v2706_v13 = vld [vmem:[#allocation6 + $0x5d0] sm:$0xff]  ;;  %v2713_v45 = vld [vmem:[#allocation6 + $0x608] sm:$0xff]  ;;  %v2723_v51 = vld [vmem:[#allocation6 + $0x658] sm:$0xff] }
 0x351   :  { %6499 = vmatpush1.bf16.msra.mxu0 %v6498_v55  ;;  %6563 = vmatpush1.bf16.msra.mxu1 %v6562_v5  ;;  %v6516_v55 = vpack.c.bf16 %v2657_v62, %v2649_v53  ;;  %v6580_v5 = vpack.c.bf16 %v2659_v57, %v2651_v54  ;;  %v2720_v53 = vld [vmem:[#allocation6 + $0x640] sm:$0xff]  ;;  %v2722_v57 = vld [vmem:[#allocation6 + $0x650] sm:$0xff] }
 0x352   :  { %v1898_v43 = vpop.xlane.xlu1 %1897  ;;  %6501 = vmatprep.subr.bf16.mxu0 %v6500_v6 }
 0x353   :  { %1900 = vst.msk [vmem:[#allocation3] sm:$0xff] %vm1899_vm3, %v1898_v43  ;;  %v6564_v43 = vpack.c.bf16 %v2595_v7, %v2587_v3  ;;  %v2656_v3 = vld [vmem:[#allocation6 + $0x440] sm:$0xff]  ;;  %v2650_v7 = vld [vmem:[#allocation6 + $0x410] sm:$0xff] }
 0x354   :  { %v6518_v6 = vpack.c.bf16 %v2656_v3, %v2648_v1  ;;  %v2729_v3 = vld [vmem:[#allocation6 + $0x688] sm:$0xff] }
 0x355   :  { %6565 = vmatprep.subr.bf16.mxu1 %v6564_v43  ;;  %6503 = vmatpush1.bf16.msra.mxu0 %v6502_v10  ;;  %v2658_v43 = vld [vmem:[#allocation6 + $0x450] sm:$0xff]  ;;  %v6520_v10 = vpack.c.bf16 %v2673_v9, %v2665_v8  ;;  %v2736_v8 = vld [vmem:[#allocation6 + $0x6c0] sm:$0xff] }
 0x356   :  { %6567 = vmatpush1.bf16.msra.mxu1 %v6566_v12  ;;  %6505 = vmatprep.subr.bf16.mxu0 %v6504_v0  ;;  %v2664_v12 = vld [vmem:[#allocation6 + $0x480] sm:$0xff]  ;;  %v2666_v0 = vld [vmem:[#allocation6 + $0x490] sm:$0xff] }
 0x357   :  { %6569 = vmatprep.subr.bf16.mxu1 %v6568_v59  ;;  %v6522_v18 = vpack.c.bf16 %v2672_v14, %v2664_v12  ;;  %v6586_v4 = vpack.c.bf16 %v2674_v19, %v2666_v0  ;;  %v2689_v59 = vld [vmem:[#allocation6 + $0x548] sm:$0xff]  ;;  %v2755_v0 = vld [vmem:[#allocation6 + $0x758] sm:$0xff] }
 0x358   :  { %v6524_v22 = vpack.c.bf16 %v2689_v59, %v2681_v20  ;;  %v2745_v12 = vld [vmem:[#allocation6 + $0x708] sm:$0xff]  ;;  %v2744_v20 = vld [vmem:[#allocation6 + $0x700] sm:$0xff] }
 0x359   :  { %6507 = vmatpush1.bf16.msra.mxu0 %v6506_v21  ;;  %v2683_v21 = vld [vmem:[#allocation6 + $0x518] sm:$0xff]  ;;  %v2752_v59 = vld [vmem:[#allocation6 + $0x740] sm:$0xff] }
 0x35a   :  { %6571 = vmatpush1.bf16.msra.mxu1 %v6570_v25  ;;  %6509 = vmatprep.subr.bf16.mxu0 %v6508_v32  ;;  %v2680_v25 = vld [vmem:[#allocation6 + $0x500] sm:$0xff]  ;;  %v6588_v28 = vpack.c.bf16 %v2691_v24, %v2683_v21  ;;  %v2682_v32 = vld [vmem:[#allocation6 + $0x510] sm:$0xff] }
 0x35b   :  { %6573 = vmatprep.subr.bf16.mxu1 %v6572_v34  ;;  %v6526_v31 = vpack.c.bf16 %v2688_v26, %v2680_v25  ;;  %v6590_v30 = vpack.c.bf16 %v2690_v60, %v2682_v32  ;;  %v2705_v34 = vld [vmem:[#allocation6 + $0x5c8] sm:$0xff]  ;;  %v2746_v21 = vld [vmem:[#allocation6 + $0x710] sm:$0xff]  ;;  %v2763_v32 = vld [vmem:[#allocation6 + $0x798] sm:$0xff] }
 0x35c   :  { %v6528_v36 = vpack.c.bf16 %v2705_v34, %v2697_v33  ;;  %v2754_v24 = vld [vmem:[#allocation6 + $0x750] sm:$0xff]  ;;  %v2761_v25 = vld [vmem:[#allocation6 + $0x788] sm:$0xff]  ;;  %v2771_v60 = vld [vmem:[#allocation6 + $0x7d8] sm:$0xff] }
 0x35d   :  { %6511 = vmatpush1.bf16.msra.mxu0 %v6510_v35  ;;  %v2699_v35 = vld [vmem:[#allocation6 + $0x598] sm:$0xff]  ;;  %v2769_v26 = vld [vmem:[#allocation6 + $0x7c8] sm:$0xff]  ;;  %v6608_v33 = vpack.c.bf16 %v2771_v60, %v2763_v32  ;;  %v2768_v34 = vld [vmem:[#allocation6 + $0x7c0] sm:$0xff] }
 0x35e   :  { %6575 = vmatpush1.bf16.msra.mxu1 %v6574_v38  ;;  %6513 = vmatprep.subr.bf16.mxu0 %v6512_v61  ;;  %v2696_v38 = vld [vmem:[#allocation6 + $0x580] sm:$0xff]  ;;  %v6592_v41 = vpack.c.bf16 %v2707_v37, %v2699_v35  ;;  %v2698_v61 = vld [vmem:[#allocation6 + $0x590] sm:$0xff] }
 0x35f   :  { %6577 = vmatprep.subr.bf16.mxu1 %v6576_v46  ;;  %v6530_v42 = vpack.c.bf16 %v2704_v39, %v2696_v38  ;;  %v6594_v44 = vpack.c.bf16 %v2706_v13, %v2698_v61  ;;  %v2721_v46 = vld [vmem:[#allocation6 + $0x648] sm:$0xff]  ;;  %v2762_v35 = vld [vmem:[#allocation6 + $0x790] sm:$0xff]  ;;  %v2535_v13 = vld [vmem:[#allocation6 + $0x78] sm:$0xff] }
 0x360   :  { %v6532_v50 = vpack.c.bf16 %v2721_v46, %v2713_v45  ;;  %v2525_v39 = vld [vmem:[#allocation6 + $0x28] sm:$0xff] }
 0x361   :  { %6515 = vmatpush1.bf16.msra.mxu0 %v6514_v49  ;;  %v2715_v49 = vld [vmem:[#allocation6 + $0x618] sm:$0xff] }
 0x362   :  { %6579 = vmatpush1.bf16.msra.mxu1 %v6578_v52  ;;  %6517 = vmatprep.subr.bf16.mxu0 %v6516_v55  ;;  %v2712_v52 = vld [vmem:[#allocation6 + $0x600] sm:$0xff]  ;;  %v6596_v62 = vpack.c.bf16 %v2723_v51, %v2715_v49  ;;  %v2714_v55 = vld [vmem:[#allocation6 + $0x610] sm:$0xff] }
 0x363   :  { %6581 = vmatprep.subr.bf16.mxu1 %v6580_v5  ;;  %v6534_v54 = vpack.c.bf16 %v2720_v53, %v2712_v52  ;;  %v6598_v1 = vpack.c.bf16 %v2722_v57, %v2714_v55  ;;  %v2737_v5 = vld [vmem:[#allocation6 + $0x6c8] sm:$0xff] }
 0x365   :  { %6519 = vmatpush1.bf16.msra.mxu0 %v6518_v6  ;;  %v2731_v6 = vld [vmem:[#allocation6 + $0x698] sm:$0xff] }
 0x366   :  { %6521 = vmatprep.subr.bf16.mxu0 %v6520_v10  ;;  %v2730_v10 = vld [vmem:[#allocation6 + $0x690] sm:$0xff] }
 0x367   :  { %v6602_v14 = vpack.c.bf16 %v2738_v11, %v2730_v10 }
 0x369   :  { %6523 = vmatpush1.bf16.msra.mxu0 %v6522_v18  ;;  %v2747_v18 = vld [vmem:[#allocation6 + $0x718] sm:$0xff] }
 0x36a   :  { %6525 = vmatprep.subr.bf16.mxu0 %v6524_v22  ;;  %v6542_v22 = vpack.c.bf16 %v2752_v59, %v2744_v20 }
 0x36d   :  { %6527 = vmatpush1.bf16.msra.mxu0 %v6526_v31  ;;  %v6544_v31 = vpack.c.bf16 %v2769_v26, %v2761_v25 }
 0x36e   :  { %6529 = vmatprep.subr.bf16.mxu0 %v6528_v36  ;;  %v2770_v36 = vld [vmem:[#allocation6 + $0x7d0] sm:$0xff] }
 0x36f   :  { %v6610_v38 = vpack.c.bf16 %v2770_v36, %v2762_v35 }
 0x371   :  { %6531 = vmatpush1.bf16.msra.mxu0 %v6530_v42  ;;  %v2527_v42 = vld [vmem:[#allocation6 + $0x38] sm:$0xff] }
 0x372   :  { %6533 = vmatprep.subr.bf16.mxu0 %v6532_v50 }
 0x375   :  { %6535 = vmatpush1.bf16.msra.mxu0 %v6534_v54 }
 0x394   :  { %v1903_v40 = vpop.xlane.xlu1 %1902 }
 0x395   :  { %1905 = vst.msk [vmem:[#allocation4] sm:$0xff] %vm1904_vm4, %v1903_v40  ;;  %v6582_v40 = vpack.c.bf16 %v2658_v43, %v2650_v7  ;;  %v6536_v7 = vpack.c.bf16 %v2737_v5, %v2729_v3  ;;  %v2739_v43 = vld [vmem:[#allocation6 + $0x6d8] sm:$0xff] }
 0x396   :  { %v6600_v9 = vpack.c.bf16 %v2739_v43, %v2731_v6 }
 0x397   :  { %6583 = vmatpush1.bf16.msra.mxu1 %v6582_v40  ;;  %v2728_v40 = vld [vmem:[#allocation6 + $0x680] sm:$0xff]  ;;  %6537 = vmatprep.subr.bf16.mxu0 %v6536_v7 }
 0x398   :  { %6585 = vmatprep.subr.bf16.mxu1 %v6584_v17  ;;  %v6538_v58 = vpack.c.bf16 %v2736_v8, %v2728_v40  ;;  %v2753_v17 = vld [vmem:[#allocation6 + $0x748] sm:$0xff] }
 0x399   :  { %v6540_v19 = vpack.c.bf16 %v2753_v17, %v2745_v12 }
 0x39a   :  { %6539 = vmatpush1.bf16.msra.mxu0 %v6538_v58 }
 0x39b   :  { %6587 = vmatpush1.bf16.msra.mxu1 %v6586_v4  ;;  %v6604_v4 = vpack.c.bf16 %v2755_v0, %v2747_v18  ;;  %6541 = vmatprep.subr.bf16.mxu0 %v6540_v19  ;;  %v8158_v18 = vld [vmem:[%s8772_s4] ss:$0 sm:$0xff] }
 0x39c   :  { %6589 = vmatprep.subr.bf16.mxu1 %v6588_v28  ;;  %v6606_v28 = vpack.c.bf16 %v2754_v24, %v2746_v21 }
 0x39e   :  { %6543 = vmatpush1.bf16.msra.mxu0 %v6542_v22 }
 0x39f   :  { %6591 = vmatpush1.bf16.msra.mxu1 %v6590_v30  ;;  %v2760_v30 = vld [vmem:[#allocation6 + $0x780] sm:$0xff]  ;;  %6545 = vmatprep.subr.bf16.mxu0 %v6544_v31 }
 0x3a0   :  { %6593 = vmatprep.subr.bf16.mxu1 %v6592_v41  ;;  %v6546_v37 = vpack.c.bf16 %v2768_v34, %v2760_v30  ;;  %v2533_v41 = vld [vmem:[#allocation6 + $0x68] sm:$0xff] }
 0x3a1   :  { %v6612_v61 = vpack.c.bf16 %v2533_v41, %v2525_v39 }
 0x3a2   :  { %6547 = vmatpush1.bf16.msra.mxu0 %v6546_v37 }
 0x3a3   :  { %6595 = vmatpush1.bf16.msra.mxu1 %v6594_v44  ;;  %v6676_v44 = vpack.c.bf16 %v2535_v13, %v2527_v42  ;;  %6613 = vmatprep.subr.bf16.mxu0 %v6612_v61  ;;  %v2524_v42 = vld [vmem:[#allocation6 + $0x20] sm:$0xff]  ;;  %v2526_v13 = vld [vmem:[#allocation6 + $0x30] sm:$0xff] }
 0x3a4   :  { %6597 = vmatprep.subr.bf16.mxu1 %v6596_v62  ;;  %v2532_v61 = vld [vmem:[#allocation6 + $0x60] sm:$0xff] }
 0x3a7   :  { %6599 = vmatpush1.bf16.msra.mxu1 %v6598_v1 }
 0x3a8   :  { %6601 = vmatprep.subr.bf16.mxu1 %v6600_v9 }
 0x3ab   :  { %6603 = vmatpush1.bf16.msra.mxu1 %v6602_v14 }
 0x3ac   :  { %6605 = vmatprep.subr.bf16.mxu1 %v6604_v4 }
 0x3af   :  { %6607 = vmatpush1.bf16.msra.mxu1 %v6606_v28 }
 0x3b0   :  { %6609 = vmatprep.subr.bf16.mxu1 %v6608_v33 }
 0x3b3   :  { %6611 = vmatpush1.bf16.msra.mxu1 %v6610_v38 }
 0x3b4   :  { %6677 = vmatprep.subr.bf16.mxu1 %v6676_v44  ;;  %v2534_v44 = vld [vmem:[#allocation6 + $0x70] sm:$0xff] }
 0x3d7   :  { %v2228_v45 = vpop.f32.mrb[4].mxu0  ;;  %v2299_v46 = vpop.f32.mrb[4].mxu1 }
 0x3d8   :  { %v7768_v49 = vadd.f32 %v2228_v45, %v8498_v15  ;;  %v2230_v50 = vpop.f32.mrb[5].mxu0  ;;  %v2301_v51 = vpop.f32.mrb[5].mxu1  ;;  %v7784_v54 = vadd.f32 %v2299_v46, %v8507_v23 }
 0x3d9   :  { %v7769_v52 = vadd.f32 %v2230_v50, %v8501_v16  ;;  %v7785_v55 = vadd.f32 %v2301_v51, %v8512_v27  ;;  %v2549_v50 = vld [vmem:[#allocation6 + $0xe8] sm:$0xff]  ;;  %v2543_v51 = vld [vmem:[#allocation6 + $0xb8] sm:$0xff] }
 0x3da   :  { %v5647_v53 = vmul.f32 -1.442695, %v7768_v49  ;;  %v5649_v57 = vmul.f32 -1.442695, %v7784_v54  ;;  %v2541_v49 = vld [vmem:[#allocation6 + $0xa8] sm:$0xff]  ;;  %v2551_v54 = vld [vmem:[#allocation6 + $0xf8] sm:$0xff] }
 0x3db   :  { %v5648_v62 = vmul.f32 -1.442695, %v7769_v52 }
 0x3dc   :  { %7960 = vpow2.f32 %v5647_v53  ;;  %v6614_v53 = vpack.c.bf16 %v2532_v61, %v2524_v42 }
 0x3dd   :  { %7962 = vpow2.f32 %v5648_v62  ;;  %v6678_v62 = vpack.c.bf16 %v2534_v44, %v2526_v13  ;;  %v2590_v13 = vld [vmem:[#allocation6 + $0x230] sm:$0xff] }
 0x3de   :  { %7964 = vtanh.f32 %v7785_v55  ;;  %v2540_v55 = vld [vmem:[#allocation6 + $0xa0] sm:$0xff]  ;;  %v2598_v44 = vld [vmem:[#allocation6 + $0x270] sm:$0xff] }
 0x3df   :  { %7966 = vpow2.f32 %v5649_v57  ;;  %v2542_v57 = vld [vmem:[#allocation6 + $0xb0] sm:$0xff] }
 0x3e6   :  { %v7961_v1 = vpop.eup %7960 }
 0x3e7   :  { %v2471_v3 = vadd.f32 1.0, %v7961_v1  ;;  %v7963_v5 = vpop.eup %7962  ;;  %v2550_v1 = vld [vmem:[#allocation6 + $0xf0] sm:$0xff] }
 0x3e8   :  { %v2472_v6 = vadd.f32 1.0, %v7963_v5  ;;  %v7965_v7 = vpop.eup %7964  ;;  %v8159_v5 = vld [vmem:[%s8773_s5] ss:$0 sm:$0xff] }
 0x3e9   :  { %7968 = vrcp.f32 %v2471_v3  ;;  %v7967_v43 = vpop.eup %7966  ;;  %v2557_v3 = vld [vmem:[#allocation6 + $0x128] sm:$0xff] }
 0x3ea   :  { %7970 = vrcp.f32 %v2472_v6  ;;  %v2473_v58 = vadd.f32 1.0, %v7967_v43  ;;  %v2565_v43 = vld [vmem:[#allocation6 + $0x168] sm:$0xff] }
 0x3ec   :  { %7972 = vrcp.f32 %v2473_v58 }
 0x3f3   :  { %v7969_v40 = vpop.eup %7968 }
 0x3f4   :  { %v2482_v8 = vmul.f32 %v7969_v40, %v7965_v7  ;;  %v7971_v9 = vpop.eup %7970  ;;  %v6616_v7 = vpack.c.bf16 %v2549_v50, %v2541_v49  ;;  %v2559_v40 = vld [vmem:[#allocation6 + $0x138] sm:$0xff] }
 0x3f5   :  { %v2481_v10 = vmul.f32 %v7971_v9, %v8561_v63  ;;  %v6680_v9 = vpack.c.bf16 %v2551_v54, %v2543_v51  ;;  %v2607_v49 = vld [vmem:[#allocation6 + $0x2b8] sm:$0xff] }
 0x3f6   :  { %v7973_v12 = vpop.eup %7972  ;;  %v2615_v50 = vld [vmem:[#allocation6 + $0x2f8] sm:$0xff] }
 0x3f7   :  { %v8592_v11 = vadd.f32 %v2482_v8, %v2481_v10  ;;  %v2567_v8 = vld [vmem:[#allocation6 + $0x178] sm:$0xff]  ;;  %v6682_v10 = vpack.c.bf16 %v2550_v1, %v2542_v57  ;;  %v2614_v57 = vld [vmem:[#allocation6 + $0x2f0] sm:$0xff]  ;;  %v2621_v1 = vld [vmem:[#allocation6 + $0x328] sm:$0xff] }
 0x3f9   :  { %7974 = vtanh.f32 %v8592_v11 }
 0x403   :  { %v7975_v14 = vpop.eup %7974 }
 0x404   :  { %v8595_v17 = vmul.f32 %v7975_v14, %v7973_v12  ;;  %v2556_v12 = vld [vmem:[#allocation6 + $0x120] sm:$0xff] }
 0x405   :  { %v2564_v14 = vld [vmem:[#allocation6 + $0x160] sm:$0xff] }
 0x406   :  { %v2510_v0 = vmul.f32 %v8158_v18, %v8595_v17  ;;  %v6620_v18 = vpack.c.bf16 %v2565_v43, %v2557_v3  ;;  %v2629_v3 = vld [vmem:[#allocation6 + $0x368] sm:$0xff] }
 0x408   :  { %2511 = vadd.xlane.f32.xlu0 %v2510_v0  ;;  %v6684_v0 = vpack.c.bf16 %v2567_v8, %v2559_v40  ;;  %v2620_v40 = vld [vmem:[#allocation6 + $0x320] sm:$0xff] }
 0x409   :  { %v2628_v8 = vld [vmem:[#allocation6 + $0x360] sm:$0xff] }
 0x417   :  { %v2370_v19 = vpop.f32.mrb[26].mxu0  ;;  %v2441_v4 = vpop.f32.mrb[26].mxu1 }
 0x418   :  { %v7806_v63 = vadd.f32 %v2370_v19, %v8527_v47  ;;  %v2372_v20 = vpop.f32.mrb[27].mxu0  ;;  %v2443_v59 = vpop.f32.mrb[27].mxu1  ;;  %v7822_v25 = vadd.f32 %v2441_v4, %v8536_v56  ;;  %v2558_v19 = vld [vmem:[#allocation6 + $0x130] sm:$0xff] }
 0x419   :  { %v7807_v21 = vadd.f32 %v2372_v20, %v8530_v48  ;;  %v7823_v26 = vadd.f32 %v2443_v59, %v8541_v2  ;;  %v2566_v4 = vld [vmem:[#allocation6 + $0x170] sm:$0xff]  ;;  %v2581_v20 = vld [vmem:[#allocation6 + $0x1e8] sm:$0xff]  ;;  %v2575_v59 = vld [vmem:[#allocation6 + $0x1b8] sm:$0xff] }
 0x41a   :  { %v5650_v22 = vmul.f32 -1.442695, %v7806_v63  ;;  %v5652_v28 = vmul.f32 -1.442695, %v7822_v25  ;;  %v2573_v63 = vld [vmem:[#allocation6 + $0x1a8] sm:$0xff]  ;;  %v2572_v25 = vld [vmem:[#allocation6 + $0x1a0] sm:$0xff] }
 0x41b   :  { %v5651_v24 = vmul.f32 -1.442695, %v7807_v21  ;;  %v2583_v21 = vld [vmem:[#allocation6 + $0x1f8] sm:$0xff] }
 0x41c   :  { %7976 = vpow2.f32 %v5650_v22  ;;  %v6622_v22 = vpack.c.bf16 %v2564_v14, %v2556_v12  ;;  %v2630_v12 = vld [vmem:[#allocation6 + $0x370] sm:$0xff]  ;;  %v2637_v14 = vld [vmem:[#allocation6 + $0x3a8] sm:$0xff] }
 0x41d   :  { %7978 = vpow2.f32 %v5651_v24  ;;  %v6686_v24 = vpack.c.bf16 %v2566_v4, %v2558_v19  ;;  %v2647_v19 = vld [vmem:[#allocation6 + $0x3f8] sm:$0xff]  ;;  %v6638_v4 = vpack.c.bf16 %v2628_v8, %v2620_v40  ;;  %v2694_v40 = vld [vmem:[#allocation6 + $0x570] sm:$0xff]  ;;  %v2701_v8 = vld [vmem:[#allocation6 + $0x5a8] sm:$0xff] }
 0x41e   :  { %7980 = vtanh.f32 %v7823_v26  ;;  %v2580_v26 = vld [vmem:[#allocation6 + $0x1e0] sm:$0xff] }
 0x41f   :  { %7982 = vpow2.f32 %v5652_v28  ;;  %v6624_v28 = vpack.c.bf16 %v2581_v20, %v2573_v63  ;;  %v2636_v20 = vld [vmem:[#allocation6 + $0x3a0] sm:$0xff] }
 0x426   :  { %v7977_v31 = vpop.eup %7976 }
 0x427   :  { %v2495_v32 = vadd.f32 1.0, %v7977_v31  ;;  %v7979_v60 = vpop.eup %7978  ;;  %v6688_v31 = vpack.c.bf16 %v2583_v21, %v2575_v59  ;;  %v2644_v59 = vld [vmem:[#allocation6 + $0x3e0] sm:$0xff] }
 0x428   :  { %v2496_v30 = vadd.f32 1.0, %v7979_v60  ;;  %v7981_v33 = vpop.eup %7980  ;;  %v2582_v60 = vld [vmem:[#allocation6 + $0x1f0] sm:$0xff] }
 0x429   :  { %7984 = vrcp.f32 %v2495_v32  ;;  %v7983_v34 = vpop.eup %7982  ;;  %v2574_v32 = vld [vmem:[#allocation6 + $0x1b0] sm:$0xff] }
 0x42a   :  { %7986 = vrcp.f32 %v2496_v30  ;;  %v2497_v38 = vadd.f32 1.0, %v7983_v34  ;;  %v2589_v30 = vld [vmem:[#allocation6 + $0x228] sm:$0xff]  ;;  %v2591_v34 = vld [vmem:[#allocation6 + $0x238] sm:$0xff] }
 0x42c   :  { %7988 = vrcp.f32 %v2497_v38  ;;  %v2588_v38 = vld [vmem:[#allocation6 + $0x220] sm:$0xff] }
 0x433   :  { %v7985_v35 = vpop.eup %7984 }
 0x434   :  { %v2506_v36 = vmul.f32 %v7985_v35, %v7981_v33  ;;  %v7987_v37 = vpop.eup %7986  ;;  %v2597_v33 = vld [vmem:[#allocation6 + $0x268] sm:$0xff]  ;;  %v2599_v35 = vld [vmem:[#allocation6 + $0x278] sm:$0xff] }
 0x435   :  { %v2505_v39 = vmul.f32 %v7987_v37, %v8575_v29  ;;  %v2548_v29 = vld [vmem:[#allocation6 + $0xe0] sm:$0xff]  ;;  %v6690_v37 = vpack.c.bf16 %v2582_v60, %v2574_v32  ;;  %v6628_v42 = vpack.c.bf16 %v2597_v33, %v2589_v30  ;;  %v6692_v61 = vpack.c.bf16 %v2599_v35, %v2591_v34  ;;  %v2663_v32 = vld [vmem:[#allocation6 + $0x478] sm:$0xff] }
 0x436   :  { %v7989_v45 = vpop.eup %7988  ;;  %v6618_v58 = vpack.c.bf16 %v2548_v29, %v2540_v55  ;;  %v6696_v55 = vpack.c.bf16 %v2615_v50, %v2607_v49  ;;  %v2606_v29 = vld [vmem:[#allocation6 + $0x2b0] sm:$0xff]  ;;  %v6642_v60 = vpack.c.bf16 %v2644_v59, %v2636_v20  ;;  %v2652_v33 = vld [vmem:[#allocation6 + $0x420] sm:$0xff]  ;;  %v2717_v59 = vld [vmem:[#allocation6 + $0x628] sm:$0xff] }
 0x437   :  { %v8606_v41 = vadd.f32 %v2506_v36, %v2505_v39  ;;  %v6626_v36 = vpack.c.bf16 %v2580_v26, %v2572_v25  ;;  %v2596_v39 = vld [vmem:[#allocation6 + $0x260] sm:$0xff]  ;;  %v6698_v43 = vpack.c.bf16 %v2614_v57, %v2606_v29  ;;  %v2646_v25 = vld [vmem:[#allocation6 + $0x3f0] sm:$0xff]  ;;  %v2653_v26 = vld [vmem:[#allocation6 + $0x428] sm:$0xff] }
 0x438   :  { %v6630_v51 = vpack.c.bf16 %v2596_v39, %v2588_v38  ;;  %v2660_v34 = vld [vmem:[#allocation6 + $0x460] sm:$0xff]  ;;  %v2662_v38 = vld [vmem:[#allocation6 + $0x470] sm:$0xff]  ;;  %v2669_v39 = vld [vmem:[#allocation6 + $0x4a8] sm:$0xff] }
 0x439   :  { %7990 = vtanh.f32 %v8606_v41  ;;  %v2676_v49 = vld [vmem:[#allocation6 + $0x4e0] sm:$0xff]  ;;  %v2695_v29 = vld [vmem:[#allocation6 + $0x578] sm:$0xff]  ;;  %v2710_v20 = vld [vmem:[#allocation6 + $0x5f0] sm:$0xff] }
 0x443   :  { %v7991_v46 = vpop.eup %7990 }
 0x444   :  { %v2509_v52 = vmul.f32 %v7991_v46, %v7989_v45  ;;  %v2605_v45 = vld [vmem:[#allocation6 + $0x2a8] sm:$0xff] }
 0x445   :  { %v2613_v46 = vld [vmem:[#allocation6 + $0x2e8] sm:$0xff] }
 0x446   :  { %2840 = vmatprep.mubr.f32.mxu0 %v2509_v52  ;;  %2911 = vmatprep.mubr.f32.mxu1 %v2509_v52  ;;  %v2515_v6 = vmul.f32 %v8159_v5, %v2509_v52  ;;  %v6632_v54 = vpack.c.bf16 %v2613_v46, %v2605_v45  ;;  %v2623_v5 = vld [vmem:[#allocation6 + $0x338] sm:$0xff]  ;;  %v2668_v46 = vld [vmem:[#allocation6 + $0x4a0] sm:$0xff] }
 0x447   :  { %2841 = vmatmul.mubr.f32.vlgmr.msra.gmra.mrb[6].mxu0 %v8595_v17  ;;  %2912 = vmatmul.mubr.f32.vlgmr.msra.gmra.mrb[6].mxu1 %v8595_v17  ;;  %v6650_v57 = vpack.c.bf16 %v2676_v49, %v2668_v46  ;;  %v2742_v46 = vld [vmem:[#allocation6 + $0x6f0] sm:$0xff]  ;;  %v2749_v49 = vld [vmem:[#allocation6 + $0x728] sm:$0xff] }
 0x448   :  { %6615 = vmatpush1.bf16.msra.mxu0 %v6614_v53  ;;  %6679 = vmatpush1.bf16.msra.mxu1 %v6678_v62  ;;  %v2604_v53 = vld [vmem:[#allocation6 + $0x2a0] sm:$0xff] }
 0x449   :  { %2982 = vmatprep.mubr.f32.mxu0 %v2509_v52  ;;  %3053 = vmatprep.mubr.f32.mxu1 %v2509_v52  ;;  %v6694_v52 = vpack.c.bf16 %v2598_v44, %v2590_v13  ;;  %v2612_v62 = vld [vmem:[#allocation6 + $0x2e0] sm:$0xff]  ;;  %v2679_v13 = vld [vmem:[#allocation6 + $0x4f8] sm:$0xff]  ;;  %v6646_v44 = vpack.c.bf16 %v2660_v34, %v2652_v33  ;;  %v2726_v33 = vld [vmem:[#allocation6 + $0x670] sm:$0xff] }
 0x44a   :  { %2516 = vadd.xlane.f32.xlu1 %v2515_v6  ;;  %6617 = vmatprep.subr.bf16.mxu0 %v6616_v7  ;;  %v2631_v6 = vld [vmem:[#allocation6 + $0x378] sm:$0xff]  ;;  %v6634_v7 = vpack.c.bf16 %v2612_v62, %v2604_v53  ;;  %v2678_v53 = vld [vmem:[#allocation6 + $0x4f0] sm:$0xff]  ;;  %v2685_v62 = vld [vmem:[#allocation6 + $0x528] sm:$0xff] }
 0x44b   :  { %6681 = vmatprep.subr.bf16.mxu1 %v6680_v9  ;;  %v6636_v9 = vpack.c.bf16 %v2629_v3, %v2621_v1  ;;  %v2684_v3 = vld [vmem:[#allocation6 + $0x520] sm:$0xff]  ;;  %v2733_v34 = vld [vmem:[#allocation6 + $0x6a8] sm:$0xff] }
 0x44c   :  { %6619 = vmatpush1.bf16.msra.mxu0 %v6618_v58  ;;  %6683 = vmatpush1.bf16.msra.mxu1 %v6682_v10  ;;  %v6700_v58 = vpack.c.bf16 %v2631_v6, %v2623_v5  ;;  %v2622_v10 = vld [vmem:[#allocation6 + $0x330] sm:$0xff]  ;;  %v2692_v5 = vld [vmem:[#allocation6 + $0x560] sm:$0xff] }
 0x44d   :  { %6621 = vmatprep.subr.bf16.mxu0 %v6620_v18  ;;  %6685 = vmatprep.subr.bf16.mxu1 %v6684_v0  ;;  %v2645_v18 = vld [vmem:[#allocation6 + $0x3e8] sm:$0xff]  ;;  %v2639_v0 = vld [vmem:[#allocation6 + $0x3b8] sm:$0xff]  ;;  %v6702_v63 = vpack.c.bf16 %v2630_v12, %v2622_v10  ;;  %v6654_v12 = vpack.c.bf16 %v2692_v5, %v2684_v3  ;;  %v2758_v3 = vld [vmem:[#allocation6 + $0x770] sm:$0xff] }
 0x44e   :  { %v6640_v21 = vpack.c.bf16 %v2645_v18, %v2637_v14  ;;  %v2711_v10 = vld [vmem:[#allocation6 + $0x5f8] sm:$0xff]  ;;  %v2700_v18 = vld [vmem:[#allocation6 + $0x5a0] sm:$0xff]  ;;  %v2765_v5 = vld [vmem:[#allocation6 + $0x7a8] sm:$0xff] }
 0x450   :  { %6623 = vmatpush1.bf16.msra.mxu0 %v6622_v22  ;;  %6687 = vmatpush1.bf16.msra.mxu1 %v6686_v24  ;;  %v6704_v22 = vpack.c.bf16 %v2647_v19, %v2639_v0  ;;  %v2638_v24 = vld [vmem:[#allocation6 + $0x3b0] sm:$0xff]  ;;  %v2708_v0 = vld [vmem:[#allocation6 + $0x5e0] sm:$0xff] }
 0x451   :  { %6625 = vmatprep.subr.bf16.mxu0 %v6624_v28  ;;  %6689 = vmatprep.subr.bf16.mxu1 %v6688_v31  ;;  %v2661_v28 = vld [vmem:[#allocation6 + $0x468] sm:$0xff]  ;;  %v2655_v31 = vld [vmem:[#allocation6 + $0x438] sm:$0xff]  ;;  %v6706_v30 = vpack.c.bf16 %v2646_v25, %v2638_v24  ;;  %v6658_v25 = vpack.c.bf16 %v2708_v0, %v2700_v18  ;;  %v2774_v18 = vld [vmem:[#allocation6 + $0x7f0] sm:$0xff] }
 0x452   :  { %v6644_v35 = vpack.c.bf16 %v2661_v28, %v2653_v26  ;;  %v2727_v24 = vld [vmem:[#allocation6 + $0x678] sm:$0xff]  ;;  %v2716_v28 = vld [vmem:[#allocation6 + $0x620] sm:$0xff] }
 0x454   :  { %6627 = vmatpush1.bf16.msra.mxu0 %v6626_v36  ;;  %6691 = vmatpush1.bf16.msra.mxu1 %v6690_v37  ;;  %v6708_v36 = vpack.c.bf16 %v2663_v32, %v2655_v31  ;;  %v2654_v37 = vld [vmem:[#allocation6 + $0x430] sm:$0xff]  ;;  %v2724_v31 = vld [vmem:[#allocation6 + $0x660] sm:$0xff] }
 0x455   :  { %6629 = vmatprep.subr.bf16.mxu0 %v6628_v42  ;;  %6693 = vmatprep.subr.bf16.mxu1 %v6692_v61  ;;  %v2677_v42 = vld [vmem:[#allocation6 + $0x4e8] sm:$0xff]  ;;  %v2671_v61 = vld [vmem:[#allocation6 + $0x4b8] sm:$0xff]  ;;  %v6710_v45 = vpack.c.bf16 %v2662_v38, %v2654_v37  ;;  %v6662_v38 = vpack.c.bf16 %v2724_v31, %v2716_v28  ;;  %v3136_v31 = vld [vmem:[#allocation6 + $0x10] sm:$0xff] }
 0x456   :  { %v6648_v50 = vpack.c.bf16 %v2677_v42, %v2669_v39  ;;  %v2743_v37 = vld [vmem:[#allocation6 + $0x6f8] sm:$0xff]  ;;  %v2732_v42 = vld [vmem:[#allocation6 + $0x6a0] sm:$0xff] }
 0x458   :  { %6631 = vmatpush1.bf16.msra.mxu0 %v6630_v51  ;;  %6695 = vmatpush1.bf16.msra.mxu1 %v6694_v52  ;;  %v6712_v51 = vpack.c.bf16 %v2679_v13, %v2671_v61  ;;  %v2670_v52 = vld [vmem:[#allocation6 + $0x4b0] sm:$0xff]  ;;  %v2740_v61 = vld [vmem:[#allocation6 + $0x6e0] sm:$0xff] }
 0x459   :  { %6633 = vmatprep.subr.bf16.mxu0 %v6632_v54  ;;  %6697 = vmatprep.subr.bf16.mxu1 %v6696_v55  ;;  %v2693_v54 = vld [vmem:[#allocation6 + $0x568] sm:$0xff]  ;;  %v2687_v55 = vld [vmem:[#allocation6 + $0x538] sm:$0xff]  ;;  %v6714_v1 = vpack.c.bf16 %v2678_v53, %v2670_v52  ;;  %v6666_v53 = vpack.c.bf16 %v2740_v61, %v2732_v42  ;;  %v3152_v42 = vld [vmem:[#allocation6 + $0x90] sm:$0xff] }
 0x45a   :  { %v6652_v6 = vpack.c.bf16 %v2693_v54, %v2685_v62  ;;  %v2759_v52 = vld [vmem:[#allocation6 + $0x778] sm:$0xff]  ;;  %v2748_v54 = vld [vmem:[#allocation6 + $0x720] sm:$0xff]  ;;  %v3160_v61 = vld [vmem:[#allocation6 + $0xd0] sm:$0xff] }
 0x45c   :  { %6635 = vmatpush1.bf16.msra.mxu0 %v6634_v7  ;;  %6699 = vmatpush1.bf16.msra.mxu1 %v6698_v43  ;;  %v6716_v7 = vpack.c.bf16 %v2695_v29, %v2687_v55  ;;  %v2686_v43 = vld [vmem:[#allocation6 + $0x530] sm:$0xff]  ;;  %v2756_v55 = vld [vmem:[#allocation6 + $0x760] sm:$0xff] }
 0x45d   :  { %6637 = vmatprep.subr.bf16.mxu0 %v6636_v9  ;;  %6701 = vmatprep.subr.bf16.mxu1 %v6700_v58  ;;  %v2709_v9 = vld [vmem:[#allocation6 + $0x5e8] sm:$0xff]  ;;  %v2703_v58 = vld [vmem:[#allocation6 + $0x5b8] sm:$0xff]  ;;  %v6718_v14 = vpack.c.bf16 %v2694_v40, %v2686_v43  ;;  %v6670_v40 = vpack.c.bf16 %v2756_v55, %v2748_v54  ;;  %v3176_v55 = vld [vmem:[#allocation6 + $0x150] sm:$0xff] }
 0x45e   :  { %v6656_v19 = vpack.c.bf16 %v2709_v9, %v2701_v8  ;;  %v2775_v43 = vld [vmem:[#allocation6 + $0x7f8] sm:$0xff]  ;;  %v2764_v9 = vld [vmem:[#allocation6 + $0x7a0] sm:$0xff] }
 0x460   :  { %6639 = vmatpush1.bf16.msra.mxu0 %v6638_v4  ;;  %6703 = vmatpush1.bf16.msra.mxu1 %v6702_v63  ;;  %v6720_v4 = vpack.c.bf16 %v2711_v10, %v2703_v58  ;;  %v2702_v63 = vld [vmem:[#allocation6 + $0x5b0] sm:$0xff] }
 0x461   :  { %6641 = vmatprep.subr.bf16.mxu0 %v6640_v21  ;;  %6705 = vmatprep.subr.bf16.mxu1 %v6704_v22  ;;  %v2725_v21 = vld [vmem:[#allocation6 + $0x668] sm:$0xff]  ;;  %v2719_v22 = vld [vmem:[#allocation6 + $0x638] sm:$0xff]  ;;  %v6722_v26 = vpack.c.bf16 %v2710_v20, %v2702_v63 }
 0x462   :  { %v6660_v32 = vpack.c.bf16 %v2725_v21, %v2717_v59  ;;  %v3135_v63 = vld [vmem:[#allocation6 + $0x8] sm:$0xff]  ;;  %v3137_v59 = vld [vmem:[#allocation6 + $0x18] sm:$0xff] }
 0x463   :  { %v3143_v20 = vld [vmem:[#allocation6 + $0x48] sm:$0xff] }
 0x464   :  { %6643 = vmatpush1.bf16.msra.mxu0 %v6642_v60  ;;  %6707 = vmatpush1.bf16.msra.mxu1 %v6706_v30  ;;  %v6724_v60 = vpack.c.bf16 %v2727_v24, %v2719_v22  ;;  %v2718_v30 = vld [vmem:[#allocation6 + $0x630] sm:$0xff]  ;;  %v6740_v21 = vpack.c.bf16 %v3143_v20, %v3135_v63  ;;  %v3145_v22 = vld [vmem:[#allocation6 + $0x58] sm:$0xff]  ;;  %v3134_v24 = vld [vmem:[#allocation6] sm:$0xff] }
 0x465   :  { %6645 = vmatprep.subr.bf16.mxu0 %v6644_v35  ;;  %6709 = vmatprep.subr.bf16.mxu1 %v6708_v36  ;;  %v2741_v35 = vld [vmem:[#allocation6 + $0x6e8] sm:$0xff]  ;;  %v2735_v36 = vld [vmem:[#allocation6 + $0x6b8] sm:$0xff]  ;;  %v6726_v39 = vpack.c.bf16 %v2726_v33, %v2718_v30  ;;  %v3198_v20 = vld [vmem:[#allocation6 + $0x200] sm:$0xff] }
 0x466   :  { %v6664_v13 = vpack.c.bf16 %v2741_v35, %v2733_v34  ;;  %v3159_v30 = vld [vmem:[#allocation6 + $0xc8] sm:$0xff]  ;;  %v3153_v33 = vld [vmem:[#allocation6 + $0x98] sm:$0xff] }
 0x467   :  { %v3161_v35 = vld [vmem:[#allocation6 + $0xd8] sm:$0xff] }
 0x468   :  { %6647 = vmatpush1.bf16.msra.mxu0 %v6646_v44  ;;  %6711 = vmatpush1.bf16.msra.mxu1 %v6710_v45  ;;  %v6728_v44 = vpack.c.bf16 %v2743_v37, %v2735_v36  ;;  %v2734_v45 = vld [vmem:[#allocation6 + $0x6b0] sm:$0xff]  ;;  %v3150_v36 = vld [vmem:[#allocation6 + $0x80] sm:$0xff] }
 0x469   :  { %6649 = vmatprep.subr.bf16.mxu0 %v6648_v50  ;;  %6713 = vmatprep.subr.bf16.mxu1 %v6712_v51  ;;  %v2757_v50 = vld [vmem:[#allocation6 + $0x768] sm:$0xff]  ;;  %v2751_v51 = vld [vmem:[#allocation6 + $0x738] sm:$0xff]  ;;  %v6730_v62 = vpack.c.bf16 %v2742_v46, %v2734_v45  ;;  %v3158_v37 = vld [vmem:[#allocation6 + $0xc0] sm:$0xff] }
 0x46a   :  { %v6668_v29 = vpack.c.bf16 %v2757_v50, %v2749_v49  ;;  %v3175_v45 = vld [vmem:[#allocation6 + $0x148] sm:$0xff]  ;;  %v3169_v46 = vld [vmem:[#allocation6 + $0x118] sm:$0xff] }
 0x46b   :  { %v3177_v49 = vld [vmem:[#allocation6 + $0x158] sm:$0xff] }
 0x46c   :  { %6651 = vmatpush1.bf16.msra.mxu0 %v6650_v57  ;;  %6715 = vmatpush1.bf16.msra.mxu1 %v6714_v1  ;;  %v6732_v57 = vpack.c.bf16 %v2759_v52, %v2751_v51  ;;  %v2750_v1 = vld [vmem:[#allocation6 + $0x730] sm:$0xff]  ;;  %v6812_v51 = vpack.c.bf16 %v3177_v49, %v3169_v46  ;;  %v3166_v52 = vld [vmem:[#allocation6 + $0x100] sm:$0xff] }
 0x46d   :  { %6653 = vmatprep.subr.bf16.mxu0 %v6652_v6  ;;  %6717 = vmatprep.subr.bf16.mxu1 %v6716_v7  ;;  %v2773_v6 = vld [vmem:[#allocation6 + $0x7e8] sm:$0xff]  ;;  %v2767_v7 = vld [vmem:[#allocation6 + $0x7b8] sm:$0xff]  ;;  %v6734_v8 = vpack.c.bf16 %v2758_v3, %v2750_v1 }
 0x46e   :  { %v6672_v58 = vpack.c.bf16 %v2773_v6, %v2765_v5  ;;  %v6736_v10 = vpack.c.bf16 %v2775_v43, %v2767_v7  ;;  %v3185_v5 = vld [vmem:[#allocation6 + $0x198] sm:$0xff]  ;;  %v3182_v7 = vld [vmem:[#allocation6 + $0x180] sm:$0xff] }
 0x46f   :  { %v3193_v6 = vld [vmem:[#allocation6 + $0x1d8] sm:$0xff] }
 0x470   :  { %6655 = vmatpush1.bf16.msra.mxu0 %v6654_v12  ;;  %6719 = vmatpush1.bf16.msra.mxu1 %v6718_v14  ;;  %v2772_v12 = vld [vmem:[#allocation6 + $0x7e0] sm:$0xff]  ;;  %v2766_v14 = vld [vmem:[#allocation6 + $0x7b0] sm:$0xff]  ;;  %v6816_v43 = vpack.c.bf16 %v3193_v6, %v3185_v5 }
 0x471   :  { %6657 = vmatprep.subr.bf16.mxu0 %v6656_v19  ;;  %6721 = vmatprep.subr.bf16.mxu1 %v6720_v4  ;;  %v6674_v0 = vpack.c.bf16 %v2772_v12, %v2764_v9  ;;  %v6738_v19 = vpack.c.bf16 %v2774_v18, %v2766_v14  ;;  %v3192_v9 = vld [vmem:[#allocation6 + $0x1d0] sm:$0xff]  ;;  %v3207_v12 = vld [vmem:[#allocation6 + $0x248] sm:$0xff]  ;;  %v3201_v14 = vld [vmem:[#allocation6 + $0x218] sm:$0xff] }
 0x472   :  { %v3248_v6 = vld [vmem:[#allocation6 + $0x390] sm:$0xff] }
 0x474   :  { %6659 = vmatpush1.bf16.msra.mxu0 %v6658_v25  ;;  %6723 = vmatpush1.bf16.msra.mxu1 %v6722_v26  ;;  %v3142_v25 = vld [vmem:[#allocation6 + $0x40] sm:$0xff]  ;;  %v6804_v26 = vpack.c.bf16 %v3145_v22, %v3137_v59 }
 0x475   :  { %6661 = vmatprep.subr.bf16.mxu0 %v6660_v32  ;;  %6725 = vmatprep.subr.bf16.mxu1 %v6724_v60  ;;  %v6742_v28 = vpack.c.bf16 %v3142_v25, %v3134_v24  ;;  %v3144_v32 = vld [vmem:[#allocation6 + $0x50] sm:$0xff]  ;;  %v3206_v59 = vld [vmem:[#allocation6 + $0x240] sm:$0xff] }
 0x476   :  { %v6806_v60 = vpack.c.bf16 %v3144_v32, %v3136_v31  ;;  %v6758_v22 = vpack.c.bf16 %v3206_v59, %v3198_v20  ;;  %v3208_v24 = vld [vmem:[#allocation6 + $0x250] sm:$0xff]  ;;  %v3217_v31 = vld [vmem:[#allocation6 + $0x298] sm:$0xff]  ;;  %v3279_v20 = vld [vmem:[#allocation6 + $0x488] sm:$0xff] }
 0x477   :  { %v3287_v59 = vld [vmem:[#allocation6 + $0x4c8] sm:$0xff] }
 0x478   :  { %6663 = vmatpush1.bf16.msra.mxu0 %v6662_v38  ;;  %6727 = vmatpush1.bf16.msra.mxu1 %v6726_v39  ;;  %v6808_v38 = vpack.c.bf16 %v3161_v35, %v3153_v33  ;;  %v6746_v39 = vpack.c.bf16 %v3158_v37, %v3150_v36  ;;  %v3216_v35 = vld [vmem:[#allocation6 + $0x290] sm:$0xff] }
 0x479   :  { %6665 = vmatprep.subr.bf16.mxu0 %v6664_v13  ;;  %6729 = vmatprep.subr.bf16.mxu1 %v6728_v44  ;;  %v3167_v13 = vld [vmem:[#allocation6 + $0x108] sm:$0xff]  ;;  %v6810_v44 = vpack.c.bf16 %v3160_v61, %v3152_v42  ;;  %v3224_v36 = vld [vmem:[#allocation6 + $0x2d0] sm:$0xff]  ;;  %v3233_v42 = vld [vmem:[#allocation6 + $0x318] sm:$0xff] }
 0x47a   :  { %v6748_v50 = vpack.c.bf16 %v3175_v45, %v3167_v13  ;;  %v6826_v37 = vpack.c.bf16 %v3224_v36, %v3216_v35  ;;  %v3241_v13 = vld [vmem:[#allocation6 + $0x358] sm:$0xff]  ;;  %v3238_v45 = vld [vmem:[#allocation6 + $0x340] sm:$0xff] }
 0x47b   :  { %v6828_v46 = vpack.c.bf16 %v3241_v13, %v3233_v42  ;;  %v3305_v36 = vld [vmem:[#allocation6 + $0x558] sm:$0xff]  ;;  %v3304_v13 = vld [vmem:[#allocation6 + $0x550] sm:$0xff] }
 0x47c   :  { %6667 = vmatpush1.bf16.msra.mxu0 %v6666_v53  ;;  %6731 = vmatpush1.bf16.msra.mxu1 %v6730_v62  ;;  %v3174_v53 = vld [vmem:[#allocation6 + $0x140] sm:$0xff]  ;;  %v3168_v62 = vld [vmem:[#allocation6 + $0x110] sm:$0xff] }
 0x47d   :  { %6669 = vmatprep.subr.bf16.mxu0 %v6668_v29  ;;  %6733 = vmatprep.subr.bf16.mxu1 %v6732_v57  ;;  %v6750_v54 = vpack.c.bf16 %v3174_v53, %v3166_v52  ;;  %v3183_v29 = vld [vmem:[#allocation6 + $0x188] sm:$0xff]  ;;  %v6814_v1 = vpack.c.bf16 %v3176_v55, %v3168_v62 }
 0x47e   :  { %v3191_v57 = vld [vmem:[#allocation6 + $0x1c8] sm:$0xff] }
 0x47f   :  { %v6752_v3 = vpack.c.bf16 %v3191_v57, %v3183_v29  ;;  %v3247_v53 = vld [vmem:[#allocation6 + $0x388] sm:$0xff]  ;;  %v3257_v29 = vld [vmem:[#allocation6 + $0x3d8] sm:$0xff]  ;;  %v3246_v57 = vld [vmem:[#allocation6 + $0x380] sm:$0xff] }
 0x480   :  { %6671 = vmatpush1.bf16.msra.mxu0 %v6670_v40  ;;  %6735 = vmatpush1.bf16.msra.mxu1 %v6734_v8  ;;  %v3190_v40 = vld [vmem:[#allocation6 + $0x1c0] sm:$0xff]  ;;  %v3184_v8 = vld [vmem:[#allocation6 + $0x190] sm:$0xff]  ;;  %v3255_v62 = vld [vmem:[#allocation6 + $0x3c8] sm:$0xff] }
 0x481   :  { %6673 = vmatprep.subr.bf16.mxu0 %v6672_v58  ;;  %6737 = vmatprep.subr.bf16.mxu1 %v6736_v10  ;;  %v6754_v58 = vpack.c.bf16 %v3190_v40, %v3182_v7  ;;  %v3199_v10 = vld [vmem:[#allocation6 + $0x208] sm:$0xff]  ;;  %v6818_v18 = vpack.c.bf16 %v3192_v9, %v3184_v8  ;;  %v6768_v55 = vpack.c.bf16 %v3255_v62, %v3247_v53  ;;  %v3256_v7 = vld [vmem:[#allocation6 + $0x3d0] sm:$0xff]  ;;  %v3265_v9 = vld [vmem:[#allocation6 + $0x418] sm:$0xff] }
 0x482   :  { %v3263_v40 = vld [vmem:[#allocation6 + $0x408] sm:$0xff]  ;;  %v3318_v53 = vld [vmem:[#allocation6 + $0x5c0] sm:$0xff] }
 0x483   :  { %v3271_v8 = vld [vmem:[#allocation6 + $0x448] sm:$0xff] }
 0x484   :  { %6675 = vmatpush1.bf16.msra.mxu0 %v6674_v0  ;;  %6739 = vmatpush1.bf16.msra.mxu1 %v6738_v19  ;;  %v6756_v0 = vpack.c.bf16 %v3207_v12, %v3199_v10  ;;  %v3209_v19 = vld [vmem:[#allocation6 + $0x258] sm:$0xff]  ;;  %v3262_v12 = vld [vmem:[#allocation6 + $0x400] sm:$0xff] }
 0x485   :  { %6741 = vmatprep.subr.bf16.mxu0 %v6740_v21  ;;  %6805 = vmatprep.subr.bf16.mxu1 %v6804_v26  ;;  %v3200_v21 = vld [vmem:[#allocation6 + $0x210] sm:$0xff]  ;;  %v3215_v26 = vld [vmem:[#allocation6 + $0x288] sm:$0xff]  ;;  %v3273_v10 = vld [vmem:[#allocation6 + $0x458] sm:$0xff] }
 0x486   :  { %v6822_v25 = vpack.c.bf16 %v3208_v24, %v3200_v21  ;;  %v3281_v21 = vld [vmem:[#allocation6 + $0x498] sm:$0xff] }
 0x487   :  { %2983 = vmatmul.mubr.f32.vlgmr.msra.gmra.mrb[24].mxu0 %v8595_v17  ;;  %3054 = vmatmul.mubr.f32.vlgmr.msra.gmra.mrb[24].mxu1 %v8595_v17  ;;  %v3151_v17 = vld [vmem:[#allocation6 + $0x88] sm:$0xff]  ;;  %v3289_v24 = vld [vmem:[#allocation6 + $0x4d8] sm:$0xff] }
 0x488   :  { %6743 = vmatpush1.bf16.msra.mxu0 %v6742_v28  ;;  %6807 = vmatpush1.bf16.msra.mxu1 %v6806_v60  ;;  %v6744_v34 = vpack.c.bf16 %v3159_v30, %v3151_v17  ;;  %v3223_v28 = vld [vmem:[#allocation6 + $0x2c8] sm:$0xff]  ;;  %v3225_v60 = vld [vmem:[#allocation6 + $0x2d8] sm:$0xff]  ;;  %v3214_v17 = vld [vmem:[#allocation6 + $0x280] sm:$0xff] }
 0x489   :  { %6809 = vmatprep.subr.bf16.mxu1 %v6808_v38  ;;  %v6760_v32 = vpack.c.bf16 %v3223_v28, %v3215_v26  ;;  %v3222_v30 = vld [vmem:[#allocation6 + $0x2c0] sm:$0xff]  ;;  %v6824_v33 = vpack.c.bf16 %v3225_v60, %v3217_v31  ;;  %v3231_v38 = vld [vmem:[#allocation6 + $0x308] sm:$0xff]  ;;  %v6840_v28 = vpack.c.bf16 %v3289_v24, %v3281_v21  ;;  %v3288_v60 = vld [vmem:[#allocation6 + $0x4d0] sm:$0xff] }
 0x48a   :  { %6745 = vmatprep.subr.bf16.mxu0 %v6744_v34  ;;  %v6762_v34 = vpack.c.bf16 %v3222_v30, %v3214_v17  ;;  %v3286_v26 = vld [vmem:[#allocation6 + $0x4c0] sm:$0xff]  ;;  %v3295_v30 = vld [vmem:[#allocation6 + $0x508] sm:$0xff]  ;;  %v3352_v24 = vld [vmem:[#allocation6 + $0x6d0] sm:$0xff] }
 0x48c   :  { %6747 = vmatpush1.bf16.msra.mxu0 %v6746_v39  ;;  %6811 = vmatpush1.bf16.msra.mxu1 %v6810_v44  ;;  %v3239_v39 = vld [vmem:[#allocation6 + $0x348] sm:$0xff]  ;;  %v3230_v44 = vld [vmem:[#allocation6 + $0x300] sm:$0xff] }
 0x48d   :  { %6749 = vmatprep.subr.bf16.mxu0 %v6748_v50  ;;  %6813 = vmatprep.subr.bf16.mxu1 %v6812_v51  ;;  %v6764_v61 = vpack.c.bf16 %v3239_v39, %v3231_v38  ;;  %v6766_v49 = vpack.c.bf16 %v3238_v45, %v3230_v44  ;;  %v3232_v50 = vld [vmem:[#allocation6 + $0x310] sm:$0xff]  ;;  %v3302_v38 = vld [vmem:[#allocation6 + $0x540] sm:$0xff]  ;;  %v3311_v45 = vld [vmem:[#allocation6 + $0x588] sm:$0xff] }
 0x48e   :  { %v3240_v51 = vld [vmem:[#allocation6 + $0x350] sm:$0xff] }
 0x48f   :  { %v6830_v52 = vpack.c.bf16 %v3240_v51, %v3232_v50  ;;  %v3321_v51 = vld [vmem:[#allocation6 + $0x5d8] sm:$0xff] }
 0x490   :  { %6751 = vmatpush1.bf16.msra.mxu0 %v6750_v54  ;;  %6815 = vmatpush1.bf16.msra.mxu1 %v6814_v1  ;;  %v3249_v54 = vld [vmem:[#allocation6 + $0x398] sm:$0xff]  ;;  %v3254_v1 = vld [vmem:[#allocation6 + $0x3c0] sm:$0xff] }
 0x491   :  { %6753 = vmatprep.subr.bf16.mxu0 %v6752_v3  ;;  %6817 = vmatprep.subr.bf16.mxu1 %v6816_v43  ;;  %v6832_v3 = vpack.c.bf16 %v3257_v29, %v3249_v54  ;;  %v6770_v5 = vpack.c.bf16 %v3254_v1, %v3246_v57  ;;  %v6834_v43 = vpack.c.bf16 %v3256_v7, %v3248_v6  ;;  %v3320_v29 = vld [vmem:[#allocation6 + $0x5d0] sm:$0xff]  ;;  %v3327_v1 = vld [vmem:[#allocation6 + $0x608] sm:$0xff]  ;;  %v3337_v7 = vld [vmem:[#allocation6 + $0x658] sm:$0xff] }
 0x494   :  { %6755 = vmatpush1.bf16.msra.mxu0 %v6754_v58  ;;  %6819 = vmatpush1.bf16.msra.mxu1 %v6818_v18  ;;  %v6772_v58 = vpack.c.bf16 %v3271_v8, %v3263_v40  ;;  %v6836_v18 = vpack.c.bf16 %v3273_v10, %v3265_v9  ;;  %v3334_v40 = vld [vmem:[#allocation6 + $0x640] sm:$0xff]  ;;  %v3336_v10 = vld [vmem:[#allocation6 + $0x650] sm:$0xff] }
 0x495   :  { %v2512_v4 = vpop.xlane.xlu0 %2511  ;;  %6757 = vmatprep.subr.bf16.mxu0 %v6756_v0 }
 0x496   :  { %2514 = vst.msk [vmem:[#allocation3] sm:$0xff] %vm2513_vm5, %v2512_v4  ;;  %v6820_v4 = vpack.c.bf16 %v3209_v19, %v3201_v14  ;;  %v3270_v14 = vld [vmem:[#allocation6 + $0x440] sm:$0xff]  ;;  %v3264_v19 = vld [vmem:[#allocation6 + $0x410] sm:$0xff] }
 0x497   :  { %v6774_v0 = vpack.c.bf16 %v3270_v14, %v3262_v12  ;;  %v3343_v14 = vld [vmem:[#allocation6 + $0x688] sm:$0xff] }
 0x498   :  { %6821 = vmatprep.subr.bf16.mxu1 %v6820_v4  ;;  %6759 = vmatpush1.bf16.msra.mxu0 %v6758_v22  ;;  %v3272_v4 = vld [vmem:[#allocation6 + $0x450] sm:$0xff]  ;;  %v6776_v22 = vpack.c.bf16 %v3287_v59, %v3279_v20  ;;  %v3350_v20 = vld [vmem:[#allocation6 + $0x6c0] sm:$0xff] }
 0x499   :  { %6823 = vmatpush1.bf16.msra.mxu1 %v6822_v25  ;;  %6761 = vmatprep.subr.bf16.mxu0 %v6760_v32  ;;  %v3278_v25 = vld [vmem:[#allocation6 + $0x480] sm:$0xff]  ;;  %v3280_v32 = vld [vmem:[#allocation6 + $0x490] sm:$0xff] }
 0x49a   :  { %6825 = vmatprep.subr.bf16.mxu1 %v6824_v33  ;;  %v6778_v31 = vpack.c.bf16 %v3286_v26, %v3278_v25  ;;  %v6842_v17 = vpack.c.bf16 %v3288_v60, %v3280_v32  ;;  %v3303_v33 = vld [vmem:[#allocation6 + $0x548] sm:$0xff]  ;;  %v3369_v32 = vld [vmem:[#allocation6 + $0x758] sm:$0xff] }
 0x49b   :  { %v6780_v35 = vpack.c.bf16 %v3303_v33, %v3295_v30  ;;  %v3359_v25 = vld [vmem:[#allocation6 + $0x708] sm:$0xff]  ;;  %v3358_v30 = vld [vmem:[#allocation6 + $0x700] sm:$0xff] }
 0x49c   :  { %6763 = vmatpush1.bf16.msra.mxu0 %v6762_v34  ;;  %v3297_v34 = vld [vmem:[#allocation6 + $0x518] sm:$0xff]  ;;  %v3366_v33 = vld [vmem:[#allocation6 + $0x740] sm:$0xff] }
 0x49d   :  { %6827 = vmatpush1.bf16.msra.mxu1 %v6826_v37  ;;  %6765 = vmatprep.subr.bf16.mxu0 %v6764_v61  ;;  %v3294_v37 = vld [vmem:[#allocation6 + $0x500] sm:$0xff]  ;;  %v6844_v39 = vpack.c.bf16 %v3305_v36, %v3297_v34  ;;  %v3296_v61 = vld [vmem:[#allocation6 + $0x510] sm:$0xff] }
 0x49e   :  { %6829 = vmatprep.subr.bf16.mxu1 %v6828_v46  ;;  %v6782_v42 = vpack.c.bf16 %v3302_v38, %v3294_v37  ;;  %v6846_v44 = vpack.c.bf16 %v3304_v13, %v3296_v61  ;;  %v3319_v46 = vld [vmem:[#allocation6 + $0x5c8] sm:$0xff]  ;;  %v3360_v34 = vld [vmem:[#allocation6 + $0x710] sm:$0xff]  ;;  %v3377_v61 = vld [vmem:[#allocation6 + $0x798] sm:$0xff] }
 0x49f   :  { %v6784_v50 = vpack.c.bf16 %v3319_v46, %v3311_v45  ;;  %v3368_v36 = vld [vmem:[#allocation6 + $0x750] sm:$0xff]  ;;  %v3375_v37 = vld [vmem:[#allocation6 + $0x788] sm:$0xff]  ;;  %v3385_v13 = vld [vmem:[#allocation6 + $0x7d8] sm:$0xff] }
 0x4a0   :  { %6767 = vmatpush1.bf16.msra.mxu0 %v6766_v49  ;;  %v3313_v49 = vld [vmem:[#allocation6 + $0x598] sm:$0xff]  ;;  %v3383_v38 = vld [vmem:[#allocation6 + $0x7c8] sm:$0xff]  ;;  %v6864_v45 = vpack.c.bf16 %v3385_v13, %v3377_v61  ;;  %v3382_v46 = vld [vmem:[#allocation6 + $0x7c0] sm:$0xff] }
 0x4a1   :  { %6831 = vmatpush1.bf16.msra.mxu1 %v6830_v52  ;;  %6769 = vmatprep.subr.bf16.mxu0 %v6768_v55  ;;  %v3310_v52 = vld [vmem:[#allocation6 + $0x580] sm:$0xff]  ;;  %v6848_v62 = vpack.c.bf16 %v3321_v51, %v3313_v49  ;;  %v3312_v55 = vld [vmem:[#allocation6 + $0x590] sm:$0xff] }
 0x4a2   :  { %6833 = vmatprep.subr.bf16.mxu1 %v6832_v3  ;;  %v6786_v54 = vpack.c.bf16 %v3318_v53, %v3310_v52  ;;  %v6850_v57 = vpack.c.bf16 %v3320_v29, %v3312_v55  ;;  %v3335_v3 = vld [vmem:[#allocation6 + $0x648] sm:$0xff]  ;;  %v3376_v49 = vld [vmem:[#allocation6 + $0x790] sm:$0xff]  ;;  %v3149_v29 = vld [vmem:[#allocation6 + $0x78] sm:$0xff] }
 0x4a3   :  { %v6788_v6 = vpack.c.bf16 %v3335_v3, %v3327_v1  ;;  %v3139_v53 = vld [vmem:[#allocation6 + $0x28] sm:$0xff] }
 0x4a4   :  { %6771 = vmatpush1.bf16.msra.mxu0 %v6770_v5  ;;  %v3329_v5 = vld [vmem:[#allocation6 + $0x618] sm:$0xff] }
 0x4a5   :  { %6835 = vmatpush1.bf16.msra.mxu1 %v6834_v43  ;;  %6773 = vmatprep.subr.bf16.mxu0 %v6772_v58  ;;  %v3326_v43 = vld [vmem:[#allocation6 + $0x600] sm:$0xff]  ;;  %v6852_v8 = vpack.c.bf16 %v3337_v7, %v3329_v5  ;;  %v3328_v58 = vld [vmem:[#allocation6 + $0x610] sm:$0xff] }
 0x4a6   :  { %6837 = vmatprep.subr.bf16.mxu1 %v6836_v18  ;;  %v6790_v9 = vpack.c.bf16 %v3334_v40, %v3326_v43  ;;  %v6854_v12 = vpack.c.bf16 %v3336_v10, %v3328_v58  ;;  %v3351_v18 = vld [vmem:[#allocation6 + $0x6c8] sm:$0xff] }
 0x4a8   :  { %6775 = vmatpush1.bf16.msra.mxu0 %v6774_v0  ;;  %v3345_v0 = vld [vmem:[#allocation6 + $0x698] sm:$0xff] }
 0x4a9   :  { %6777 = vmatprep.subr.bf16.mxu0 %v6776_v22  ;;  %v3344_v22 = vld [vmem:[#allocation6 + $0x690] sm:$0xff] }
 0x4aa   :  { %v6858_v26 = vpack.c.bf16 %v3352_v24, %v3344_v22 }
 0x4ac   :  { %6779 = vmatpush1.bf16.msra.mxu0 %v6778_v31  ;;  %v3361_v31 = vld [vmem:[#allocation6 + $0x718] sm:$0xff] }
 0x4ad   :  { %6781 = vmatprep.subr.bf16.mxu0 %v6780_v35  ;;  %v6798_v35 = vpack.c.bf16 %v3366_v33, %v3358_v30 }
 0x4b0   :  { %6783 = vmatpush1.bf16.msra.mxu0 %v6782_v42  ;;  %v6800_v42 = vpack.c.bf16 %v3383_v38, %v3375_v37 }
 0x4b1   :  { %6785 = vmatprep.subr.bf16.mxu0 %v6784_v50  ;;  %v3384_v50 = vld [vmem:[#allocation6 + $0x7d0] sm:$0xff] }
 0x4b2   :  { %v6866_v52 = vpack.c.bf16 %v3384_v50, %v3376_v49 }
 0x4b4   :  { %6787 = vmatpush1.bf16.msra.mxu0 %v6786_v54  ;;  %v3141_v54 = vld [vmem:[#allocation6 + $0x38] sm:$0xff] }
 0x4b5   :  { %6789 = vmatprep.subr.bf16.mxu0 %v6788_v6 }
 0x4b8   :  { %6791 = vmatpush1.bf16.msra.mxu0 %v6790_v9 }
 0x4d7   :  { %v2517_v63 = vpop.xlane.xlu1 %2516 }
 0x4d8   :  { %2519 = vst.msk [vmem:[#allocation4] sm:$0xff] %vm2518_vm6, %v2517_v63  ;;  %v6838_v63 = vpack.c.bf16 %v3272_v4, %v3264_v19  ;;  %v6792_v19 = vpack.c.bf16 %v3351_v18, %v3343_v14  ;;  %v3353_v4 = vld [vmem:[#allocation6 + $0x6d8] sm:$0xff] }
 0x4d9   :  { %v6856_v59 = vpack.c.bf16 %v3353_v4, %v3345_v0 }
 0x4da   :  { %6839 = vmatpush1.bf16.msra.mxu1 %v6838_v63  ;;  %v3342_v63 = vld [vmem:[#allocation6 + $0x680] sm:$0xff]  ;;  %6793 = vmatprep.subr.bf16.mxu0 %v6792_v19 }
 0x4db   :  { %6841 = vmatprep.subr.bf16.mxu1 %v6840_v28  ;;  %v6794_v21 = vpack.c.bf16 %v3350_v20, %v3342_v63  ;;  %v3367_v28 = vld [vmem:[#allocation6 + $0x748] sm:$0xff] }
 0x4dc   :  { %v6796_v60 = vpack.c.bf16 %v3367_v28, %v3359_v25 }
 0x4dd   :  { %6795 = vmatpush1.bf16.msra.mxu0 %v6794_v21 }
 0x4de   :  { %6843 = vmatpush1.bf16.msra.mxu1 %v6842_v17  ;;  %v6860_v17 = vpack.c.bf16 %v3369_v32, %v3361_v31  ;;  %6797 = vmatprep.subr.bf16.mxu0 %v6796_v60  ;;  %v8160_v31 = vld [vmem:[%s8772_s4] ss:$0 sm:$0xff] }
 0x4df   :  { %6845 = vmatprep.subr.bf16.mxu1 %v6844_v39  ;;  %v6862_v39 = vpack.c.bf16 %v3368_v36, %v3360_v34 }
 0x4e1   :  { %6799 = vmatpush1.bf16.msra.mxu0 %v6798_v35 }
 0x4e2   :  { %6847 = vmatpush1.bf16.msra.mxu1 %v6846_v44  ;;  %v3374_v44 = vld [vmem:[#allocation6 + $0x780] sm:$0xff]  ;;  %6801 = vmatprep.subr.bf16.mxu0 %v6800_v42 }
 0x4e3   :  { %6849 = vmatprep.subr.bf16.mxu1 %v6848_v62  ;;  %v6802_v51 = vpack.c.bf16 %v3382_v46, %v3374_v44  ;;  %v3147_v62 = vld [vmem:[#allocation6 + $0x68] sm:$0xff] }
 0x4e4   :  { %v6868_v55 = vpack.c.bf16 %v3147_v62, %v3139_v53 }
 0x4e5   :  { %6803 = vmatpush1.bf16.msra.mxu0 %v6802_v51 }
 0x4e6   :  { %6851 = vmatpush1.bf16.msra.mxu1 %v6850_v57  ;;  %v6932_v57 = vpack.c.bf16 %v3149_v29, %v3141_v54  ;;  %6869 = vmatprep.subr.bf16.mxu0 %v6868_v55  ;;  %v3138_v54 = vld [vmem:[#allocation6 + $0x20] sm:$0xff]  ;;  %v3140_v29 = vld [vmem:[#allocation6 + $0x30] sm:$0xff] }
 0x4e7   :  { %6853 = vmatprep.subr.bf16.mxu1 %v6852_v8  ;;  %v3146_v55 = vld [vmem:[#allocation6 + $0x60] sm:$0xff] }
 0x4ea   :  { %6855 = vmatpush1.bf16.msra.mxu1 %v6854_v12 }
 0x4eb   :  { %6857 = vmatprep.subr.bf16.mxu1 %v6856_v59 }
 0x4ee   :  { %6859 = vmatpush1.bf16.msra.mxu1 %v6858_v26 }
 0x4ef   :  { %6861 = vmatprep.subr.bf16.mxu1 %v6860_v17 }
 0x4f2   :  { %6863 = vmatpush1.bf16.msra.mxu1 %v6862_v39 }
 0x4f3   :  { %6865 = vmatprep.subr.bf16.mxu1 %v6864_v45 }
 0x4f6   :  { %6867 = vmatpush1.bf16.msra.mxu1 %v6866_v52 }
 0x4f7   :  { %6933 = vmatprep.subr.bf16.mxu1 %v6932_v57  ;;  %v3148_v57 = vld [vmem:[#allocation6 + $0x70] sm:$0xff] }
 0x51a   :  { %v2842_v1 = vpop.f32.mrb[6].mxu0  ;;  %v2913_v3 = vpop.f32.mrb[6].mxu1 }
 0x51b   :  { %v7770_v5 = vadd.f32 %v2842_v1, %v8498_v15  ;;  %v2844_v6 = vpop.f32.mrb[7].mxu0  ;;  %v2915_v7 = vpop.f32.mrb[7].mxu1  ;;  %v7786_v9 = vadd.f32 %v2913_v3, %v8507_v23 }
 0x51c   :  { %v7771_v43 = vadd.f32 %v2844_v6, %v8501_v16  ;;  %v7787_v58 = vadd.f32 %v2915_v7, %v8512_v27  ;;  %v3163_v6 = vld [vmem:[#allocation6 + $0xe8] sm:$0xff]  ;;  %v3157_v7 = vld [vmem:[#allocation6 + $0xb8] sm:$0xff] }
 0x51d   :  { %v5653_v40 = vmul.f32 -1.442695, %v7770_v5  ;;  %v5655_v10 = vmul.f32 -1.442695, %v7786_v9  ;;  %v3155_v5 = vld [vmem:[#allocation6 + $0xa8] sm:$0xff]  ;;  %v3165_v9 = vld [vmem:[#allocation6 + $0xf8] sm:$0xff] }
 0x51e   :  { %v5654_v8 = vmul.f32 -1.442695, %v7771_v43 }
 0x51f   :  { %7992 = vpow2.f32 %v5653_v40  ;;  %v6870_v40 = vpack.c.bf16 %v3146_v55, %v3138_v54 }
 0x520   :  { %7994 = vpow2.f32 %v5654_v8  ;;  %v6934_v8 = vpack.c.bf16 %v3148_v57, %v3140_v29  ;;  %v3204_v29 = vld [vmem:[#allocation6 + $0x230] sm:$0xff] }
 0x521   :  { %7996 = vtanh.f32 %v7787_v58  ;;  %v3154_v58 = vld [vmem:[#allocation6 + $0xa0] sm:$0xff]  ;;  %v3212_v57 = vld [vmem:[#allocation6 + $0x270] sm:$0xff] }
 0x522   :  { %7998 = vpow2.f32 %v5655_v10  ;;  %v3156_v10 = vld [vmem:[#allocation6 + $0xb0] sm:$0xff] }
 0x529   :  { %v7993_v12 = vpop.eup %7992 }
 0x52a   :  { %v3085_v14 = vadd.f32 1.0, %v7993_v12  ;;  %v7995_v18 = vpop.eup %7994  ;;  %v3164_v12 = vld [vmem:[#allocation6 + $0xf0] sm:$0xff] }
 0x52b   :  { %v3086_v0 = vadd.f32 1.0, %v7995_v18  ;;  %v7997_v19 = vpop.eup %7996  ;;  %v8161_v18 = vld [vmem:[%s8773_s5] ss:$0 sm:$0xff] }
 0x52c   :  { %8000 = vrcp.f32 %v3085_v14  ;;  %v7999_v4 = vpop.eup %7998  ;;  %v3171_v14 = vld [vmem:[#allocation6 + $0x128] sm:$0xff] }
 0x52d   :  { %8002 = vrcp.f32 %v3086_v0  ;;  %v3087_v21 = vadd.f32 1.0, %v7999_v4  ;;  %v3179_v4 = vld [vmem:[#allocation6 + $0x168] sm:$0xff] }
 0x52f   :  { %8004 = vrcp.f32 %v3087_v21 }
 0x536   :  { %v8001_v63 = vpop.eup %8000 }
 0x537   :  { %v3096_v20 = vmul.f32 %v8001_v63, %v7997_v19  ;;  %v8003_v59 = vpop.eup %8002  ;;  %v6872_v19 = vpack.c.bf16 %v3163_v6, %v3155_v5  ;;  %v3173_v63 = vld [vmem:[#allocation6 + $0x138] sm:$0xff] }
 0x538   :  { %v3095_v22 = vmul.f32 %v8003_v59, %v8592_v11  ;;  %v6936_v59 = vpack.c.bf16 %v3165_v9, %v3157_v7  ;;  %v3221_v5 = vld [vmem:[#allocation6 + $0x2b8] sm:$0xff] }
 0x539   :  { %v8005_v25 = vpop.eup %8004  ;;  %v3229_v6 = vld [vmem:[#allocation6 + $0x2f8] sm:$0xff] }
 0x53a   :  { %v8623_v24 = vadd.f32 %v3096_v20, %v3095_v22  ;;  %v3181_v20 = vld [vmem:[#allocation6 + $0x178] sm:$0xff]  ;;  %v6938_v22 = vpack.c.bf16 %v3164_v12, %v3156_v10  ;;  %v3228_v10 = vld [vmem:[#allocation6 + $0x2f0] sm:$0xff]  ;;  %v3235_v12 = vld [vmem:[#allocation6 + $0x328] sm:$0xff] }
 0x53c   :  { %8006 = vtanh.f32 %v8623_v24 }
 0x546   :  { %v8007_v26 = vpop.eup %8006 }
 0x547   :  { %v8626_v28 = vmul.f32 %v8007_v26, %v8005_v25  ;;  %v3170_v25 = vld [vmem:[#allocation6 + $0x120] sm:$0xff] }
 0x548   :  { %v3178_v26 = vld [vmem:[#allocation6 + $0x160] sm:$0xff] }
 0x549   :  { %v3124_v32 = vmul.f32 %v8160_v31, %v8626_v28  ;;  %v6876_v31 = vpack.c.bf16 %v3179_v4, %v3171_v14  ;;  %v3243_v14 = vld [vmem:[#allocation6 + $0x368] sm:$0xff] }
 0x54b   :  { %3125 = vadd.xlane.f32.xlu0 %v3124_v32  ;;  %v6940_v32 = vpack.c.bf16 %v3181_v20, %v3173_v63  ;;  %v3234_v63 = vld [vmem:[#allocation6 + $0x320] sm:$0xff] }
 0x54c   :  { %v3242_v20 = vld [vmem:[#allocation6 + $0x360] sm:$0xff] }
 0x55a   :  { %v2984_v60 = vpop.f32.mrb[24].mxu0  ;;  %v3055_v17 = vpop.f32.mrb[24].mxu1 }
 0x55b   :  { %v7804_v11 = vadd.f32 %v2984_v60, %v8527_v47  ;;  %v2986_v30 = vpop.f32.mrb[25].mxu0  ;;  %v3057_v33 = vpop.f32.mrb[25].mxu1  ;;  %v7820_v37 = vadd.f32 %v3055_v17, %v8536_v56  ;;  %v3172_v60 = vld [vmem:[#allocation6 + $0x130] sm:$0xff] }
 0x55c   :  { %v7805_v34 = vadd.f32 %v2986_v30, %v8530_v48  ;;  %v7821_v38 = vadd.f32 %v3057_v33, %v8541_v2  ;;  %v3180_v17 = vld [vmem:[#allocation6 + $0x170] sm:$0xff]  ;;  %v3195_v30 = vld [vmem:[#allocation6 + $0x1e8] sm:$0xff]  ;;  %v3189_v33 = vld [vmem:[#allocation6 + $0x1b8] sm:$0xff] }
 0x55d   :  { %v5656_v35 = vmul.f32 -1.442695, %v7804_v11  ;;  %v5658_v39 = vmul.f32 -1.442695, %v7820_v37  ;;  %v3187_v11 = vld [vmem:[#allocation6 + $0x1a8] sm:$0xff]  ;;  %v3186_v37 = vld [vmem:[#allocation6 + $0x1a0] sm:$0xff] }
 0x55e   :  { %v5657_v36 = vmul.f32 -1.442695, %v7805_v34  ;;  %v3197_v34 = vld [vmem:[#allocation6 + $0x1f8] sm:$0xff] }
 0x55f   :  { %8008 = vpow2.f32 %v5656_v35  ;;  %v6878_v35 = vpack.c.bf16 %v3178_v26, %v3170_v25  ;;  %v3244_v25 = vld [vmem:[#allocation6 + $0x370] sm:$0xff]  ;;  %v3251_v26 = vld [vmem:[#allocation6 + $0x3a8] sm:$0xff] }
 0x560   :  { %8010 = vpow2.f32 %v5657_v36  ;;  %v6942_v36 = vpack.c.bf16 %v3180_v17, %v3172_v60  ;;  %v3261_v60 = vld [vmem:[#allocation6 + $0x3f8] sm:$0xff]  ;;  %v6894_v17 = vpack.c.bf16 %v3242_v20, %v3234_v63  ;;  %v3308_v63 = vld [vmem:[#allocation6 + $0x570] sm:$0xff]  ;;  %v3315_v20 = vld [vmem:[#allocation6 + $0x5a8] sm:$0xff] }
 0x561   :  { %8012 = vtanh.f32 %v7821_v38  ;;  %v3194_v38 = vld [vmem:[#allocation6 + $0x1e0] sm:$0xff] }
 0x562   :  { %8014 = vpow2.f32 %v5658_v39  ;;  %v6880_v39 = vpack.c.bf16 %v3195_v30, %v3187_v11  ;;  %v3250_v30 = vld [vmem:[#allocation6 + $0x3a0] sm:$0xff] }
 0x569   :  { %v8009_v42 = vpop.eup %8008 }
 0x56a   :  { %v3109_v61 = vadd.f32 1.0, %v8009_v42  ;;  %v8011_v13 = vpop.eup %8010  ;;  %v6944_v42 = vpack.c.bf16 %v3197_v34, %v3189_v33  ;;  %v3258_v33 = vld [vmem:[#allocation6 + $0x3e0] sm:$0xff] }
 0x56b   :  { %v3110_v44 = vadd.f32 1.0, %v8011_v13  ;;  %v8013_v45 = vpop.eup %8012  ;;  %v3196_v13 = vld [vmem:[#allocation6 + $0x1f0] sm:$0xff] }
 0x56c   :  { %8016 = vrcp.f32 %v3109_v61  ;;  %v8015_v46 = vpop.eup %8014  ;;  %v3188_v61 = vld [vmem:[#allocation6 + $0x1b0] sm:$0xff] }
 0x56d   :  { %8018 = vrcp.f32 %v3110_v44  ;;  %v3111_v52 = vadd.f32 1.0, %v8015_v46  ;;  %v3203_v44 = vld [vmem:[#allocation6 + $0x228] sm:$0xff]  ;;  %v3205_v46 = vld [vmem:[#allocation6 + $0x238] sm:$0xff] }
 0x56f   :  { %8020 = vrcp.f32 %v3111_v52  ;;  %v3202_v52 = vld [vmem:[#allocation6 + $0x220] sm:$0xff] }
 0x576   :  { %v8017_v49 = vpop.eup %8016 }
 0x577   :  { %v3120_v50 = vmul.f32 %v8017_v49, %v8013_v45  ;;  %v8019_v51 = vpop.eup %8018  ;;  %v3211_v45 = vld [vmem:[#allocation6 + $0x268] sm:$0xff]  ;;  %v3213_v49 = vld [vmem:[#allocation6 + $0x278] sm:$0xff] }
 0x578   :  { %v3119_v53 = vmul.f32 %v8019_v51, %v8606_v41  ;;  %v3162_v41 = vld [vmem:[#allocation6 + $0xe0] sm:$0xff]  ;;  %v6946_v51 = vpack.c.bf16 %v3196_v13, %v3188_v61  ;;  %v6884_v54 = vpack.c.bf16 %v3211_v45, %v3203_v44  ;;  %v6948_v55 = vpack.c.bf16 %v3213_v49, %v3205_v46  ;;  %v3277_v61 = vld [vmem:[#allocation6 + $0x478] sm:$0xff] }
 0x579   :  { %v8021_v1 = vpop.eup %8020  ;;  %v6874_v21 = vpack.c.bf16 %v3162_v41, %v3154_v58  ;;  %v6952_v58 = vpack.c.bf16 %v3229_v6, %v3221_v5  ;;  %v3220_v41 = vld [vmem:[#allocation6 + $0x2b0] sm:$0xff]  ;;  %v6898_v13 = vpack.c.bf16 %v3258_v33, %v3250_v30  ;;  %v3266_v45 = vld [vmem:[#allocation6 + $0x420] sm:$0xff]  ;;  %v3331_v33 = vld [vmem:[#allocation6 + $0x628] sm:$0xff] }
 0x57a   :  { %v8637_v62 = vadd.f32 %v3120_v50, %v3119_v53  ;;  %v6882_v50 = vpack.c.bf16 %v3194_v38, %v3186_v37  ;;  %v3210_v53 = vld [vmem:[#allocation6 + $0x260] sm:$0xff]  ;;  %v6954_v4 = vpack.c.bf16 %v3228_v10, %v3220_v41  ;;  %v3260_v37 = vld [vmem:[#allocation6 + $0x3f0] sm:$0xff]  ;;  %v3267_v38 = vld [vmem:[#allocation6 + $0x428] sm:$0xff] }
 0x57b   :  { %v6886_v7 = vpack.c.bf16 %v3210_v53, %v3202_v52  ;;  %v3274_v46 = vld [vmem:[#allocation6 + $0x460] sm:$0xff]  ;;  %v3276_v52 = vld [vmem:[#allocation6 + $0x470] sm:$0xff]  ;;  %v3283_v53 = vld [vmem:[#allocation6 + $0x4a8] sm:$0xff] }
 0x57c   :  { %8022 = vtanh.f32 %v8637_v62  ;;  %v3290_v5 = vld [vmem:[#allocation6 + $0x4e0] sm:$0xff]  ;;  %v3309_v41 = vld [vmem:[#allocation6 + $0x578] sm:$0xff]  ;;  %v3324_v30 = vld [vmem:[#allocation6 + $0x5f0] sm:$0xff] }
 0x586   :  { %v8023_v3 = vpop.eup %8022 }
 0x587   :  { %v3123_v43 = vmul.f32 %v8023_v3, %v8021_v1  ;;  %v3219_v1 = vld [vmem:[#allocation6 + $0x2a8] sm:$0xff] }
 0x588   :  { %v3227_v3 = vld [vmem:[#allocation6 + $0x2e8] sm:$0xff] }
 0x589   :  { %3454 = vmatprep.mubr.f32.mxu0 %v3123_v43  ;;  %3525 = vmatprep.mubr.f32.mxu1 %v3123_v43  ;;  %v3129_v0 = vmul.f32 %v8161_v18, %v3123_v43  ;;  %v6888_v9 = vpack.c.bf16 %v3227_v3, %v3219_v1  ;;  %v3237_v18 = vld [vmem:[#allocation6 + $0x338] sm:$0xff]  ;;  %v3282_v3 = vld [vmem:[#allocation6 + $0x4a0] sm:$0xff] }
 0x58a   :  { %3455 = vmatmul.mubr.f32.vlgmr.msra.gmra.mrb[8].mxu0 %v8626_v28  ;;  %3526 = vmatmul.mubr.f32.vlgmr.msra.gmra.mrb[8].mxu1 %v8626_v28  ;;  %v6906_v10 = vpack.c.bf16 %v3290_v5, %v3282_v3  ;;  %v3356_v3 = vld [vmem:[#allocation6 + $0x6f0] sm:$0xff]  ;;  %v3363_v5 = vld [vmem:[#allocation6 + $0x728] sm:$0xff] }
 0x58b   :  { %6871 = vmatpush1.bf16.msra.mxu0 %v6870_v40  ;;  %6935 = vmatpush1.bf16.msra.mxu1 %v6934_v8  ;;  %v3218_v40 = vld [vmem:[#allocation6 + $0x2a0] sm:$0xff] }
 0x58c   :  { %3596 = vmatprep.mubr.f32.mxu0 %v3123_v43  ;;  %3667 = vmatprep.mubr.f32.mxu1 %v3123_v43  ;;  %v6950_v43 = vpack.c.bf16 %v3212_v57, %v3204_v29  ;;  %v3226_v8 = vld [vmem:[#allocation6 + $0x2e0] sm:$0xff]  ;;  %v3293_v29 = vld [vmem:[#allocation6 + $0x4f8] sm:$0xff]  ;;  %v6902_v57 = vpack.c.bf16 %v3274_v46, %v3266_v45  ;;  %v3340_v45 = vld [vmem:[#allocation6 + $0x670] sm:$0xff] }
 0x58d   :  { %3130 = vadd.xlane.f32.xlu1 %v3129_v0  ;;  %6873 = vmatprep.subr.bf16.mxu0 %v6872_v19  ;;  %v3245_v0 = vld [vmem:[#allocation6 + $0x378] sm:$0xff]  ;;  %v6890_v19 = vpack.c.bf16 %v3226_v8, %v3218_v40  ;;  %v3292_v40 = vld [vmem:[#allocation6 + $0x4f0] sm:$0xff]  ;;  %v3299_v8 = vld [vmem:[#allocation6 + $0x528] sm:$0xff] }
 0x58e   :  { %6937 = vmatprep.subr.bf16.mxu1 %v6936_v59  ;;  %v6892_v59 = vpack.c.bf16 %v3243_v14, %v3235_v12  ;;  %v3298_v14 = vld [vmem:[#allocation6 + $0x520] sm:$0xff]  ;;  %v3347_v46 = vld [vmem:[#allocation6 + $0x6a8] sm:$0xff] }
 0x58f   :  { %6875 = vmatpush1.bf16.msra.mxu0 %v6874_v21  ;;  %6939 = vmatpush1.bf16.msra.mxu1 %v6938_v22  ;;  %v6956_v21 = vpack.c.bf16 %v3245_v0, %v3237_v18  ;;  %v3236_v22 = vld [vmem:[#allocation6 + $0x330] sm:$0xff]  ;;  %v3306_v18 = vld [vmem:[#allocation6 + $0x560] sm:$0xff] }
 0x590   :  { %6877 = vmatprep.subr.bf16.mxu0 %v6876_v31  ;;  %6941 = vmatprep.subr.bf16.mxu1 %v6940_v32  ;;  %v3259_v31 = vld [vmem:[#allocation6 + $0x3e8] sm:$0xff]  ;;  %v3253_v32 = vld [vmem:[#allocation6 + $0x3b8] sm:$0xff]  ;;  %v6958_v11 = vpack.c.bf16 %v3244_v25, %v3236_v22  ;;  %v6910_v25 = vpack.c.bf16 %v3306_v18, %v3298_v14  ;;  %v3372_v14 = vld [vmem:[#allocation6 + $0x770] sm:$0xff] }
 0x591   :  { %v6896_v34 = vpack.c.bf16 %v3259_v31, %v3251_v26  ;;  %v3325_v22 = vld [vmem:[#allocation6 + $0x5f8] sm:$0xff]  ;;  %v3314_v31 = vld [vmem:[#allocation6 + $0x5a0] sm:$0xff]  ;;  %v3379_v18 = vld [vmem:[#allocation6 + $0x7a8] sm:$0xff] }
 0x593   :  { %6879 = vmatpush1.bf16.msra.mxu0 %v6878_v35  ;;  %6943 = vmatpush1.bf16.msra.mxu1 %v6942_v36  ;;  %v6960_v35 = vpack.c.bf16 %v3261_v60, %v3253_v32  ;;  %v3252_v36 = vld [vmem:[#allocation6 + $0x3b0] sm:$0xff]  ;;  %v3322_v32 = vld [vmem:[#allocation6 + $0x5e0] sm:$0xff] }
 0x594   :  { %6881 = vmatprep.subr.bf16.mxu0 %v6880_v39  ;;  %6945 = vmatprep.subr.bf16.mxu1 %v6944_v42  ;;  %v3275_v39 = vld [vmem:[#allocation6 + $0x468] sm:$0xff]  ;;  %v3269_v42 = vld [vmem:[#allocation6 + $0x438] sm:$0xff]  ;;  %v6962_v44 = vpack.c.bf16 %v3260_v37, %v3252_v36  ;;  %v6914_v37 = vpack.c.bf16 %v3322_v32, %v3314_v31  ;;  %v3388_v31 = vld [vmem:[#allocation6 + $0x7f0] sm:$0xff] }
 0x595   :  { %v6900_v49 = vpack.c.bf16 %v3275_v39, %v3267_v38  ;;  %v3341_v36 = vld [vmem:[#allocation6 + $0x678] sm:$0xff]  ;;  %v3330_v39 = vld [vmem:[#allocation6 + $0x620] sm:$0xff] }
 0x597   :  { %6883 = vmatpush1.bf16.msra.mxu0 %v6882_v50  ;;  %6947 = vmatpush1.bf16.msra.mxu1 %v6946_v51  ;;  %v6964_v50 = vpack.c.bf16 %v3277_v61, %v3269_v42  ;;  %v3268_v51 = vld [vmem:[#allocation6 + $0x430] sm:$0xff]  ;;  %v3338_v42 = vld [vmem:[#allocation6 + $0x660] sm:$0xff] }
 0x598   :  { %6885 = vmatprep.subr.bf16.mxu0 %v6884_v54  ;;  %6949 = vmatprep.subr.bf16.mxu1 %v6948_v55  ;;  %v3291_v54 = vld [vmem:[#allocation6 + $0x4e8] sm:$0xff]  ;;  %v3285_v55 = vld [vmem:[#allocation6 + $0x4b8] sm:$0xff]  ;;  %v6966_v1 = vpack.c.bf16 %v3276_v52, %v3268_v51  ;;  %v6918_v52 = vpack.c.bf16 %v3338_v42, %v3330_v39  ;;  %v3748_v42 = vld [vmem:[#allocation6 + $0x10] sm:$0xff] }
 0x599   :  { %v6904_v6 = vpack.c.bf16 %v3291_v54, %v3283_v53  ;;  %v3357_v51 = vld [vmem:[#allocation6 + $0x6f8] sm:$0xff]  ;;  %v3346_v54 = vld [vmem:[#allocation6 + $0x6a0] sm:$0xff] }
 0x59b   :  { %6887 = vmatpush1.bf16.msra.mxu0 %v6886_v7  ;;  %6951 = vmatpush1.bf16.msra.mxu1 %v6950_v43  ;;  %v6968_v7 = vpack.c.bf16 %v3293_v29, %v3285_v55  ;;  %v3284_v43 = vld [vmem:[#allocation6 + $0x4b0] sm:$0xff]  ;;  %v3354_v55 = vld [vmem:[#allocation6 + $0x6e0] sm:$0xff] }
 0x59c   :  { %6889 = vmatprep.subr.bf16.mxu0 %v6888_v9  ;;  %6953 = vmatprep.subr.bf16.mxu1 %v6952_v58  ;;  %v3307_v9 = vld [vmem:[#allocation6 + $0x568] sm:$0xff]  ;;  %v3301_v58 = vld [vmem:[#allocation6 + $0x538] sm:$0xff]  ;;  %v6970_v12 = vpack.c.bf16 %v3292_v40, %v3284_v43  ;;  %v6922_v40 = vpack.c.bf16 %v3354_v55, %v3346_v54  ;;  %v3764_v54 = vld [vmem:[#allocation6 + $0x90] sm:$0xff] }
 0x59d   :  { %v6908_v0 = vpack.c.bf16 %v3307_v9, %v3299_v8  ;;  %v3373_v43 = vld [vmem:[#allocation6 + $0x778] sm:$0xff]  ;;  %v3362_v9 = vld [vmem:[#allocation6 + $0x720] sm:$0xff]  ;;  %v3772_v55 = vld [vmem:[#allocation6 + $0xd0] sm:$0xff] }
 0x59f   :  { %6891 = vmatpush1.bf16.msra.mxu0 %v6890_v19  ;;  %6955 = vmatpush1.bf16.msra.mxu1 %v6954_v4  ;;  %v6972_v19 = vpack.c.bf16 %v3309_v41, %v3301_v58  ;;  %v3300_v4 = vld [vmem:[#allocation6 + $0x530] sm:$0xff]  ;;  %v3370_v58 = vld [vmem:[#allocation6 + $0x760] sm:$0xff] }
 0x5a0   :  { %6893 = vmatprep.subr.bf16.mxu0 %v6892_v59  ;;  %6957 = vmatprep.subr.bf16.mxu1 %v6956_v21  ;;  %v3323_v59 = vld [vmem:[#allocation6 + $0x5e8] sm:$0xff]  ;;  %v3317_v21 = vld [vmem:[#allocation6 + $0x5b8] sm:$0xff]  ;;  %v6974_v26 = vpack.c.bf16 %v3308_v63, %v3300_v4  ;;  %v6926_v63 = vpack.c.bf16 %v3370_v58, %v3362_v9  ;;  %v3788_v58 = vld [vmem:[#allocation6 + $0x150] sm:$0xff] }
 0x5a1   :  { %v6912_v60 = vpack.c.bf16 %v3323_v59, %v3315_v20  ;;  %v3389_v4 = vld [vmem:[#allocation6 + $0x7f8] sm:$0xff]  ;;  %v3378_v59 = vld [vmem:[#allocation6 + $0x7a0] sm:$0xff] }
 0x5a3   :  { %6895 = vmatpush1.bf16.msra.mxu0 %v6894_v17  ;;  %6959 = vmatpush1.bf16.msra.mxu1 %v6958_v11  ;;  %v6976_v17 = vpack.c.bf16 %v3325_v22, %v3317_v21  ;;  %v3316_v11 = vld [vmem:[#allocation6 + $0x5b0] sm:$0xff] }
 0x5a4   :  { %6897 = vmatprep.subr.bf16.mxu0 %v6896_v34  ;;  %6961 = vmatprep.subr.bf16.mxu1 %v6960_v35  ;;  %v3339_v34 = vld [vmem:[#allocation6 + $0x668] sm:$0xff]  ;;  %v3333_v35 = vld [vmem:[#allocation6 + $0x638] sm:$0xff]  ;;  %v6978_v38 = vpack.c.bf16 %v3324_v30, %v3316_v11 }
 0x5a5   :  { %v6916_v61 = vpack.c.bf16 %v3339_v34, %v3331_v33  ;;  %v3747_v11 = vld [vmem:[#allocation6 + $0x8] sm:$0xff]  ;;  %v3749_v33 = vld [vmem:[#allocation6 + $0x18] sm:$0xff] }
 0x5a6   :  { %v3755_v30 = vld [vmem:[#allocation6 + $0x48] sm:$0xff] }
 0x5a7   :  { %6899 = vmatpush1.bf16.msra.mxu0 %v6898_v13  ;;  %6963 = vmatpush1.bf16.msra.mxu1 %v6962_v44  ;;  %v6980_v13 = vpack.c.bf16 %v3341_v36, %v3333_v35  ;;  %v3332_v44 = vld [vmem:[#allocation6 + $0x630] sm:$0xff]  ;;  %v6996_v34 = vpack.c.bf16 %v3755_v30, %v3747_v11  ;;  %v3757_v35 = vld [vmem:[#allocation6 + $0x58] sm:$0xff]  ;;  %v3746_v36 = vld [vmem:[#allocation6] sm:$0xff] }
 0x5a8   :  { %6901 = vmatprep.subr.bf16.mxu0 %v6900_v49  ;;  %6965 = vmatprep.subr.bf16.mxu1 %v6964_v50  ;;  %v3355_v49 = vld [vmem:[#allocation6 + $0x6e8] sm:$0xff]  ;;  %v3349_v50 = vld [vmem:[#allocation6 + $0x6b8] sm:$0xff]  ;;  %v6982_v53 = vpack.c.bf16 %v3340_v45, %v3332_v44  ;;  %v3810_v30 = vld [vmem:[#allocation6 + $0x200] sm:$0xff] }
 0x5a9   :  { %v6920_v29 = vpack.c.bf16 %v3355_v49, %v3347_v46  ;;  %v3771_v44 = vld [vmem:[#allocation6 + $0xc8] sm:$0xff]  ;;  %v3765_v45 = vld [vmem:[#allocation6 + $0x98] sm:$0xff] }
 0x5aa   :  { %v3773_v49 = vld [vmem:[#allocation6 + $0xd8] sm:$0xff] }
 0x5ab   :  { %6903 = vmatpush1.bf16.msra.mxu0 %v6902_v57  ;;  %6967 = vmatpush1.bf16.msra.mxu1 %v6966_v1  ;;  %v6984_v57 = vpack.c.bf16 %v3357_v51, %v3349_v50  ;;  %v3348_v1 = vld [vmem:[#allocation6 + $0x6b0] sm:$0xff]  ;;  %v3762_v50 = vld [vmem:[#allocation6 + $0x80] sm:$0xff] }
 0x5ac   :  { %6905 = vmatprep.subr.bf16.mxu0 %v6904_v6  ;;  %6969 = vmatprep.subr.bf16.mxu1 %v6968_v7  ;;  %v3371_v6 = vld [vmem:[#allocation6 + $0x768] sm:$0xff]  ;;  %v3365_v7 = vld [vmem:[#allocation6 + $0x738] sm:$0xff]  ;;  %v6986_v8 = vpack.c.bf16 %v3356_v3, %v3348_v1  ;;  %v3770_v51 = vld [vmem:[#allocation6 + $0xc0] sm:$0xff] }
 0x5ad   :  { %v6924_v41 = vpack.c.bf16 %v3371_v6, %v3363_v5  ;;  %v3787_v1 = vld [vmem:[#allocation6 + $0x148] sm:$0xff]  ;;  %v3781_v3 = vld [vmem:[#allocation6 + $0x118] sm:$0xff] }
 0x5ae   :  { %v3789_v5 = vld [vmem:[#allocation6 + $0x158] sm:$0xff] }
 0x5af   :  { %6907 = vmatpush1.bf16.msra.mxu0 %v6906_v10  ;;  %6971 = vmatpush1.bf16.msra.mxu1 %v6970_v12  ;;  %v6988_v10 = vpack.c.bf16 %v3373_v43, %v3365_v7  ;;  %v3364_v12 = vld [vmem:[#allocation6 + $0x730] sm:$0xff]  ;;  %v7068_v7 = vpack.c.bf16 %v3789_v5, %v3781_v3  ;;  %v3778_v43 = vld [vmem:[#allocation6 + $0x100] sm:$0xff] }
 0x5b0   :  { %6909 = vmatprep.subr.bf16.mxu0 %v6908_v0  ;;  %6973 = vmatprep.subr.bf16.mxu1 %v6972_v19  ;;  %v3387_v0 = vld [vmem:[#allocation6 + $0x7e8] sm:$0xff]  ;;  %v3381_v19 = vld [vmem:[#allocation6 + $0x7b8] sm:$0xff]  ;;  %v6990_v20 = vpack.c.bf16 %v3372_v14, %v3364_v12 }
 0x5b1   :  { %v6928_v21 = vpack.c.bf16 %v3387_v0, %v3379_v18  ;;  %v6992_v22 = vpack.c.bf16 %v3389_v4, %v3381_v19  ;;  %v3797_v18 = vld [vmem:[#allocation6 + $0x198] sm:$0xff]  ;;  %v3794_v19 = vld [vmem:[#allocation6 + $0x180] sm:$0xff] }
 0x5b2   :  { %v3805_v0 = vld [vmem:[#allocation6 + $0x1d8] sm:$0xff] }
 0x5b3   :  { %6911 = vmatpush1.bf16.msra.mxu0 %v6910_v25  ;;  %6975 = vmatpush1.bf16.msra.mxu1 %v6974_v26  ;;  %v3386_v25 = vld [vmem:[#allocation6 + $0x7e0] sm:$0xff]  ;;  %v3380_v26 = vld [vmem:[#allocation6 + $0x7b0] sm:$0xff]  ;;  %v7072_v4 = vpack.c.bf16 %v3805_v0, %v3797_v18 }
 0x5b4   :  { %6913 = vmatprep.subr.bf16.mxu0 %v6912_v60  ;;  %6977 = vmatprep.subr.bf16.mxu1 %v6976_v17  ;;  %v6930_v32 = vpack.c.bf16 %v3386_v25, %v3378_v59  ;;  %v6994_v60 = vpack.c.bf16 %v3388_v31, %v3380_v26  ;;  %v3804_v59 = vld [vmem:[#allocation6 + $0x1d0] sm:$0xff]  ;;  %v3819_v25 = vld [vmem:[#allocation6 + $0x248] sm:$0xff]  ;;  %v3813_v26 = vld [vmem:[#allocation6 + $0x218] sm:$0xff] }
 0x5b5   :  { %v3860_v0 = vld [vmem:[#allocation6 + $0x390] sm:$0xff] }
 0x5b7   :  { %6915 = vmatpush1.bf16.msra.mxu0 %v6914_v37  ;;  %6979 = vmatpush1.bf16.msra.mxu1 %v6978_v38  ;;  %v3754_v37 = vld [vmem:[#allocation6 + $0x40] sm:$0xff]  ;;  %v7060_v38 = vpack.c.bf16 %v3757_v35, %v3749_v33 }
 0x5b8   :  { %6917 = vmatprep.subr.bf16.mxu0 %v6916_v61  ;;  %6981 = vmatprep.subr.bf16.mxu1 %v6980_v13  ;;  %v6998_v39 = vpack.c.bf16 %v3754_v37, %v3746_v36  ;;  %v3756_v61 = vld [vmem:[#allocation6 + $0x50] sm:$0xff]  ;;  %v3818_v33 = vld [vmem:[#allocation6 + $0x240] sm:$0xff] }
 0x5b9   :  { %v7062_v13 = vpack.c.bf16 %v3756_v61, %v3748_v42  ;;  %v7014_v35 = vpack.c.bf16 %v3818_v33, %v3810_v30  ;;  %v3820_v36 = vld [vmem:[#allocation6 + $0x250] sm:$0xff]  ;;  %v3829_v42 = vld [vmem:[#allocation6 + $0x298] sm:$0xff]  ;;  %v3891_v30 = vld [vmem:[#allocation6 + $0x488] sm:$0xff] }
 0x5ba   :  { %v3899_v33 = vld [vmem:[#allocation6 + $0x4c8] sm:$0xff] }
 0x5bb   :  { %6919 = vmatpush1.bf16.msra.mxu0 %v6918_v52  ;;  %6983 = vmatpush1.bf16.msra.mxu1 %v6982_v53  ;;  %v7064_v52 = vpack.c.bf16 %v3773_v49, %v3765_v45  ;;  %v7002_v53 = vpack.c.bf16 %v3770_v51, %v3762_v50  ;;  %v3828_v49 = vld [vmem:[#allocation6 + $0x290] sm:$0xff] }
 0x5bc   :  { %6921 = vmatprep.subr.bf16.mxu0 %v6920_v29  ;;  %6985 = vmatprep.subr.bf16.mxu1 %v6984_v57  ;;  %v3779_v29 = vld [vmem:[#allocation6 + $0x108] sm:$0xff]  ;;  %v7066_v57 = vpack.c.bf16 %v3772_v55, %v3764_v54  ;;  %v3836_v50 = vld [vmem:[#allocation6 + $0x2d0] sm:$0xff]  ;;  %v3845_v54 = vld [vmem:[#allocation6 + $0x318] sm:$0xff] }
 0x5bd   :  { %v7004_v6 = vpack.c.bf16 %v3787_v1, %v3779_v29  ;;  %v7082_v51 = vpack.c.bf16 %v3836_v50, %v3828_v49  ;;  %v3853_v29 = vld [vmem:[#allocation6 + $0x358] sm:$0xff]  ;;  %v3850_v1 = vld [vmem:[#allocation6 + $0x340] sm:$0xff] }
 0x5be   :  { %v7084_v3 = vpack.c.bf16 %v3853_v29, %v3845_v54  ;;  %v3917_v50 = vld [vmem:[#allocation6 + $0x558] sm:$0xff]  ;;  %v3916_v29 = vld [vmem:[#allocation6 + $0x550] sm:$0xff] }
 0x5bf   :  { %6923 = vmatpush1.bf16.msra.mxu0 %v6922_v40  ;;  %6987 = vmatpush1.bf16.msra.mxu1 %v6986_v8  ;;  %v3786_v40 = vld [vmem:[#allocation6 + $0x140] sm:$0xff]  ;;  %v3780_v8 = vld [vmem:[#allocation6 + $0x110] sm:$0xff] }
 0x5c0   :  { %6925 = vmatprep.subr.bf16.mxu0 %v6924_v41  ;;  %6989 = vmatprep.subr.bf16.mxu1 %v6988_v10  ;;  %v7006_v9 = vpack.c.bf16 %v3786_v40, %v3778_v43  ;;  %v3795_v41 = vld [vmem:[#allocation6 + $0x188] sm:$0xff]  ;;  %v7070_v12 = vpack.c.bf16 %v3788_v58, %v3780_v8 }
 0x5c1   :  { %v3803_v10 = vld [vmem:[#allocation6 + $0x1c8] sm:$0xff] }
 0x5c2   :  { %v7008_v14 = vpack.c.bf16 %v3803_v10, %v3795_v41  ;;  %v3859_v40 = vld [vmem:[#allocation6 + $0x388] sm:$0xff]  ;;  %v3869_v41 = vld [vmem:[#allocation6 + $0x3d8] sm:$0xff]  ;;  %v3858_v10 = vld [vmem:[#allocation6 + $0x380] sm:$0xff] }
 0x5c3   :  { %6927 = vmatpush1.bf16.msra.mxu0 %v6926_v63  ;;  %6991 = vmatpush1.bf16.msra.mxu1 %v6990_v20  ;;  %v3802_v63 = vld [vmem:[#allocation6 + $0x1c0] sm:$0xff]  ;;  %v3796_v20 = vld [vmem:[#allocation6 + $0x190] sm:$0xff]  ;;  %v3867_v8 = vld [vmem:[#allocation6 + $0x3c8] sm:$0xff] }
 0x5c4   :  { %6929 = vmatprep.subr.bf16.mxu0 %v6928_v21  ;;  %6993 = vmatprep.subr.bf16.mxu1 %v6992_v22  ;;  %v7010_v21 = vpack.c.bf16 %v3802_v63, %v3794_v19  ;;  %v3811_v22 = vld [vmem:[#allocation6 + $0x208] sm:$0xff]  ;;  %v7074_v31 = vpack.c.bf16 %v3804_v59, %v3796_v20  ;;  %v7024_v58 = vpack.c.bf16 %v3867_v8, %v3859_v40  ;;  %v3868_v19 = vld [vmem:[#allocation6 + $0x3d0] sm:$0xff]  ;;  %v3877_v59 = vld [vmem:[#allocation6 + $0x418] sm:$0xff] }
 0x5c5   :  { %v3875_v63 = vld [vmem:[#allocation6 + $0x408] sm:$0xff]  ;;  %v3930_v40 = vld [vmem:[#allocation6 + $0x5c0] sm:$0xff] }
 0x5c6   :  { %v3883_v20 = vld [vmem:[#allocation6 + $0x448] sm:$0xff] }
 0x5c7   :  { %6931 = vmatpush1.bf16.msra.mxu0 %v6930_v32  ;;  %6995 = vmatpush1.bf16.msra.mxu1 %v6994_v60  ;;  %v7012_v32 = vpack.c.bf16 %v3819_v25, %v3811_v22  ;;  %v3821_v60 = vld [vmem:[#allocation6 + $0x258] sm:$0xff]  ;;  %v3874_v25 = vld [vmem:[#allocation6 + $0x400] sm:$0xff] }
 0x5c8   :  { %6997 = vmatprep.subr.bf16.mxu0 %v6996_v34  ;;  %7061 = vmatprep.subr.bf16.mxu1 %v7060_v38  ;;  %v3812_v34 = vld [vmem:[#allocation6 + $0x210] sm:$0xff]  ;;  %v3827_v38 = vld [vmem:[#allocation6 + $0x288] sm:$0xff]  ;;  %v3885_v22 = vld [vmem:[#allocation6 + $0x458] sm:$0xff] }
 0x5c9   :  { %v7078_v37 = vpack.c.bf16 %v3820_v36, %v3812_v34  ;;  %v3893_v34 = vld [vmem:[#allocation6 + $0x498] sm:$0xff] }
 0x5ca   :  { %3597 = vmatmul.mubr.f32.vlgmr.msra.gmra.mrb[22].mxu0 %v8626_v28  ;;  %3668 = vmatmul.mubr.f32.vlgmr.msra.gmra.mrb[22].mxu1 %v8626_v28  ;;  %v3763_v28 = vld [vmem:[#allocation6 + $0x88] sm:$0xff]  ;;  %v3901_v36 = vld [vmem:[#allocation6 + $0x4d8] sm:$0xff] }
 0x5cb   :  { %6999 = vmatpush1.bf16.msra.mxu0 %v6998_v39  ;;  %7063 = vmatpush1.bf16.msra.mxu1 %v7062_v13  ;;  %v7000_v46 = vpack.c.bf16 %v3771_v44, %v3763_v28  ;;  %v3835_v39 = vld [vmem:[#allocation6 + $0x2c8] sm:$0xff]  ;;  %v3837_v13 = vld [vmem:[#allocation6 + $0x2d8] sm:$0xff]  ;;  %v3826_v28 = vld [vmem:[#allocation6 + $0x280] sm:$0xff] }
 0x5cc   :  { %7065 = vmatprep.subr.bf16.mxu1 %v7064_v52  ;;  %v7016_v61 = vpack.c.bf16 %v3835_v39, %v3827_v38  ;;  %v3834_v44 = vld [vmem:[#allocation6 + $0x2c0] sm:$0xff]  ;;  %v7080_v45 = vpack.c.bf16 %v3837_v13, %v3829_v42  ;;  %v3843_v52 = vld [vmem:[#allocation6 + $0x308] sm:$0xff]  ;;  %v7096_v39 = vpack.c.bf16 %v3901_v36, %v3893_v34  ;;  %v3900_v13 = vld [vmem:[#allocation6 + $0x4d0] sm:$0xff] }
 0x5cd   :  { %7001 = vmatprep.subr.bf16.mxu0 %v7000_v46  ;;  %v7018_v46 = vpack.c.bf16 %v3834_v44, %v3826_v28  ;;  %v3898_v38 = vld [vmem:[#allocation6 + $0x4c0] sm:$0xff]  ;;  %v3907_v44 = vld [vmem:[#allocation6 + $0x508] sm:$0xff]  ;;  %v3964_v36 = vld [vmem:[#allocation6 + $0x6d0] sm:$0xff] }
 0x5cf   :  { %7003 = vmatpush1.bf16.msra.mxu0 %v7002_v53  ;;  %7067 = vmatpush1.bf16.msra.mxu1 %v7066_v57  ;;  %v3851_v53 = vld [vmem:[#allocation6 + $0x348] sm:$0xff]  ;;  %v3842_v57 = vld [vmem:[#allocation6 + $0x300] sm:$0xff] }
 0x5d0   :  { %7005 = vmatprep.subr.bf16.mxu0 %v7004_v6  ;;  %7069 = vmatprep.subr.bf16.mxu1 %v7068_v7  ;;  %v7020_v55 = vpack.c.bf16 %v3851_v53, %v3843_v52  ;;  %v7022_v5 = vpack.c.bf16 %v3850_v1, %v3842_v57  ;;  %v3844_v6 = vld [vmem:[#allocation6 + $0x310] sm:$0xff]  ;;  %v3914_v52 = vld [vmem:[#allocation6 + $0x540] sm:$0xff]  ;;  %v3923_v1 = vld [vmem:[#allocation6 + $0x588] sm:$0xff] }
 0x5d1   :  { %v3852_v7 = vld [vmem:[#allocation6 + $0x350] sm:$0xff] }
 0x5d2   :  { %v7086_v43 = vpack.c.bf16 %v3852_v7, %v3844_v6  ;;  %v3933_v7 = vld [vmem:[#allocation6 + $0x5d8] sm:$0xff] }
 0x5d3   :  { %7007 = vmatpush1.bf16.msra.mxu0 %v7006_v9  ;;  %7071 = vmatpush1.bf16.msra.mxu1 %v7070_v12  ;;  %v3861_v9 = vld [vmem:[#allocation6 + $0x398] sm:$0xff]  ;;  %v3866_v12 = vld [vmem:[#allocation6 + $0x3c0] sm:$0xff] }
 0x5d4   :  { %7009 = vmatprep.subr.bf16.mxu0 %v7008_v14  ;;  %7073 = vmatprep.subr.bf16.mxu1 %v7072_v4  ;;  %v7088_v14 = vpack.c.bf16 %v3869_v41, %v3861_v9  ;;  %v7026_v18 = vpack.c.bf16 %v3866_v12, %v3858_v10  ;;  %v7090_v4 = vpack.c.bf16 %v3868_v19, %v3860_v0  ;;  %v3932_v41 = vld [vmem:[#allocation6 + $0x5d0] sm:$0xff]  ;;  %v3939_v12 = vld [vmem:[#allocation6 + $0x608] sm:$0xff]  ;;  %v3949_v19 = vld [vmem:[#allocation6 + $0x658] sm:$0xff] }
 0x5d7   :  { %7011 = vmatpush1.bf16.msra.mxu0 %v7010_v21  ;;  %7075 = vmatpush1.bf16.msra.mxu1 %v7074_v31  ;;  %v7028_v21 = vpack.c.bf16 %v3883_v20, %v3875_v63  ;;  %v7092_v31 = vpack.c.bf16 %v3885_v22, %v3877_v59  ;;  %v3946_v63 = vld [vmem:[#allocation6 + $0x640] sm:$0xff]  ;;  %v3948_v22 = vld [vmem:[#allocation6 + $0x650] sm:$0xff] }
 0x5d8   :  { %v3126_v17 = vpop.xlane.xlu0 %3125  ;;  %7013 = vmatprep.subr.bf16.mxu0 %v7012_v32 }
 0x5d9   :  { %3128 = vst.msk [vmem:[#allocation3] sm:$0xff] %vm3127_vm7, %v3126_v17  ;;  %v7076_v17 = vpack.c.bf16 %v3821_v60, %v3813_v26  ;;  %v3882_v26 = vld [vmem:[#allocation6 + $0x440] sm:$0xff]  ;;  %v3876_v60 = vld [vmem:[#allocation6 + $0x410] sm:$0xff] }
 0x5da   :  { %v7030_v32 = vpack.c.bf16 %v3882_v26, %v3874_v25  ;;  %v3955_v26 = vld [vmem:[#allocation6 + $0x688] sm:$0xff] }
 0x5db   :  { %7077 = vmatprep.subr.bf16.mxu1 %v7076_v17  ;;  %7015 = vmatpush1.bf16.msra.mxu0 %v7014_v35  ;;  %v3884_v17 = vld [vmem:[#allocation6 + $0x450] sm:$0xff]  ;;  %v7032_v35 = vpack.c.bf16 %v3899_v33, %v3891_v30  ;;  %v3962_v30 = vld [vmem:[#allocation6 + $0x6c0] sm:$0xff] }
 0x5dc   :  { %7079 = vmatpush1.bf16.msra.mxu1 %v7078_v37  ;;  %7017 = vmatprep.subr.bf16.mxu0 %v7016_v61  ;;  %v3890_v37 = vld [vmem:[#allocation6 + $0x480] sm:$0xff]  ;;  %v3892_v61 = vld [vmem:[#allocation6 + $0x490] sm:$0xff] }
 0x5dd   :  { %7081 = vmatprep.subr.bf16.mxu1 %v7080_v45  ;;  %v7034_v42 = vpack.c.bf16 %v3898_v38, %v3890_v37  ;;  %v7098_v28 = vpack.c.bf16 %v3900_v13, %v3892_v61  ;;  %v3915_v45 = vld [vmem:[#allocation6 + $0x548] sm:$0xff]  ;;  %v3981_v61 = vld [vmem:[#allocation6 + $0x758] sm:$0xff] }
 0x5de   :  { %v7036_v49 = vpack.c.bf16 %v3915_v45, %v3907_v44  ;;  %v3971_v37 = vld [vmem:[#allocation6 + $0x708] sm:$0xff]  ;;  %v3970_v44 = vld [vmem:[#allocation6 + $0x700] sm:$0xff] }
 0x5df   :  { %7019 = vmatpush1.bf16.msra.mxu0 %v7018_v46  ;;  %v3909_v46 = vld [vmem:[#allocation6 + $0x518] sm:$0xff]  ;;  %v3978_v45 = vld [vmem:[#allocation6 + $0x740] sm:$0xff] }
 0x5e0   :  { %7083 = vmatpush1.bf16.msra.mxu1 %v7082_v51  ;;  %7021 = vmatprep.subr.bf16.mxu0 %v7020_v55  ;;  %v3906_v51 = vld [vmem:[#allocation6 + $0x500] sm:$0xff]  ;;  %v7100_v53 = vpack.c.bf16 %v3917_v50, %v3909_v46  ;;  %v3908_v55 = vld [vmem:[#allocation6 + $0x510] sm:$0xff] }
 0x5e1   :  { %7085 = vmatprep.subr.bf16.mxu1 %v7084_v3  ;;  %v7038_v54 = vpack.c.bf16 %v3914_v52, %v3906_v51  ;;  %v7102_v57 = vpack.c.bf16 %v3916_v29, %v3908_v55  ;;  %v3931_v3 = vld [vmem:[#allocation6 + $0x5c8] sm:$0xff]  ;;  %v3972_v46 = vld [vmem:[#allocation6 + $0x710] sm:$0xff]  ;;  %v3989_v55 = vld [vmem:[#allocation6 + $0x798] sm:$0xff] }
 0x5e2   :  { %v7040_v6 = vpack.c.bf16 %v3931_v3, %v3923_v1  ;;  %v3980_v50 = vld [vmem:[#allocation6 + $0x750] sm:$0xff]  ;;  %v3987_v51 = vld [vmem:[#allocation6 + $0x788] sm:$0xff]  ;;  %v3997_v29 = vld [vmem:[#allocation6 + $0x7d8] sm:$0xff] }
 0x5e3   :  { %7023 = vmatpush1.bf16.msra.mxu0 %v7022_v5  ;;  %v3925_v5 = vld [vmem:[#allocation6 + $0x598] sm:$0xff]  ;;  %v3995_v52 = vld [vmem:[#allocation6 + $0x7c8] sm:$0xff]  ;;  %v7120_v1 = vpack.c.bf16 %v3997_v29, %v3989_v55  ;;  %v3994_v3 = vld [vmem:[#allocation6 + $0x7c0] sm:$0xff] }
 0x5e4   :  { %7087 = vmatpush1.bf16.msra.mxu1 %v7086_v43  ;;  %7025 = vmatprep.subr.bf16.mxu0 %v7024_v58  ;;  %v3922_v43 = vld [vmem:[#allocation6 + $0x580] sm:$0xff]  ;;  %v7104_v8 = vpack.c.bf16 %v3933_v7, %v3925_v5  ;;  %v3924_v58 = vld [vmem:[#allocation6 + $0x590] sm:$0xff] }
 0x5e5   :  { %7089 = vmatprep.subr.bf16.mxu1 %v7088_v14  ;;  %v7042_v9 = vpack.c.bf16 %v3930_v40, %v3922_v43  ;;  %v7106_v10 = vpack.c.bf16 %v3932_v41, %v3924_v58  ;;  %v3947_v14 = vld [vmem:[#allocation6 + $0x648] sm:$0xff]  ;;  %v3988_v5 = vld [vmem:[#allocation6 + $0x790] sm:$0xff]  ;;  %v3761_v41 = vld [vmem:[#allocation6 + $0x78] sm:$0xff] }
 0x5e6   :  { %v7044_v0 = vpack.c.bf16 %v3947_v14, %v3939_v12  ;;  %v3751_v40 = vld [vmem:[#allocation6 + $0x28] sm:$0xff] }
 0x5e7   :  { %7027 = vmatpush1.bf16.msra.mxu0 %v7026_v18  ;;  %v3941_v18 = vld [vmem:[#allocation6 + $0x618] sm:$0xff] }
 0x5e8   :  { %7091 = vmatpush1.bf16.msra.mxu1 %v7090_v4  ;;  %7029 = vmatprep.subr.bf16.mxu0 %v7028_v21  ;;  %v3938_v4 = vld [vmem:[#allocation6 + $0x600] sm:$0xff]  ;;  %v7108_v20 = vpack.c.bf16 %v3949_v19, %v3941_v18  ;;  %v3940_v21 = vld [vmem:[#allocation6 + $0x610] sm:$0xff] }
 0x5e9   :  { %7093 = vmatprep.subr.bf16.mxu1 %v7092_v31  ;;  %v7046_v59 = vpack.c.bf16 %v3946_v63, %v3938_v4  ;;  %v7110_v25 = vpack.c.bf16 %v3948_v22, %v3940_v21  ;;  %v3963_v31 = vld [vmem:[#allocation6 + $0x6c8] sm:$0xff] }
 0x5eb   :  { %7031 = vmatpush1.bf16.msra.mxu0 %v7030_v32  ;;  %v3957_v32 = vld [vmem:[#allocation6 + $0x698] sm:$0xff] }
 0x5ec   :  { %7033 = vmatprep.subr.bf16.mxu0 %v7032_v35  ;;  %v3956_v35 = vld [vmem:[#allocation6 + $0x690] sm:$0xff] }
 0x5ed   :  { %v7114_v38 = vpack.c.bf16 %v3964_v36, %v3956_v35 }
 0x5ef   :  { %7035 = vmatpush1.bf16.msra.mxu0 %v7034_v42  ;;  %v3973_v42 = vld [vmem:[#allocation6 + $0x718] sm:$0xff] }
 0x5f0   :  { %7037 = vmatprep.subr.bf16.mxu0 %v7036_v49  ;;  %v7054_v49 = vpack.c.bf16 %v3978_v45, %v3970_v44 }
 0x5f3   :  { %7039 = vmatpush1.bf16.msra.mxu0 %v7038_v54  ;;  %v7056_v54 = vpack.c.bf16 %v3995_v52, %v3987_v51 }
 0x5f4   :  { %7041 = vmatprep.subr.bf16.mxu0 %v7040_v6  ;;  %v3996_v6 = vld [vmem:[#allocation6 + $0x7d0] sm:$0xff] }
 0x5f5   :  { %v7122_v43 = vpack.c.bf16 %v3996_v6, %v3988_v5 }
 0x5f7   :  { %7043 = vmatpush1.bf16.msra.mxu0 %v7042_v9  ;;  %v3753_v9 = vld [vmem:[#allocation6 + $0x38] sm:$0xff] }
 0x5f8   :  { %7045 = vmatprep.subr.bf16.mxu0 %v7044_v0 }
 0x5fb   :  { %7047 = vmatpush1.bf16.msra.mxu0 %v7046_v59 }
 0x61a   :  { %v3131_v11 = vpop.xlane.xlu1 %3130 }
 0x61b   :  { %3133 = vst.msk [vmem:[#allocation4] sm:$0xff] %vm3132_vm8, %v3131_v11  ;;  %v7094_v11 = vpack.c.bf16 %v3884_v17, %v3876_v60  ;;  %v7048_v60 = vpack.c.bf16 %v3963_v31, %v3955_v26  ;;  %v3965_v17 = vld [vmem:[#allocation6 + $0x6d8] sm:$0xff] }
 0x61c   :  { %v7112_v33 = vpack.c.bf16 %v3965_v17, %v3957_v32 }
 0x61d   :  { %7095 = vmatpush1.bf16.msra.mxu1 %v7094_v11  ;;  %v3954_v11 = vld [vmem:[#allocation6 + $0x680] sm:$0xff]  ;;  %7049 = vmatprep.subr.bf16.mxu0 %v7048_v60 }
 0x61e   :  { %7097 = vmatprep.subr.bf16.mxu1 %v7096_v39  ;;  %v7050_v34 = vpack.c.bf16 %v3962_v30, %v3954_v11  ;;  %v3979_v39 = vld [vmem:[#allocation6 + $0x748] sm:$0xff] }
 0x61f   :  { %v7052_v13 = vpack.c.bf16 %v3979_v39, %v3971_v37 }
 0x620   :  { %7051 = vmatpush1.bf16.msra.mxu0 %v7050_v34 }
 0x621   :  { %7099 = vmatpush1.bf16.msra.mxu1 %v7098_v28  ;;  %v7116_v28 = vpack.c.bf16 %v3981_v61, %v3973_v42  ;;  %7053 = vmatprep.subr.bf16.mxu0 %v7052_v13  ;;  %v8162_v42 = vld [vmem:[%s8772_s4] ss:$0 sm:$0xff] }
 0x622   :  { %7101 = vmatprep.subr.bf16.mxu1 %v7100_v53  ;;  %v7118_v53 = vpack.c.bf16 %v3980_v50, %v3972_v46 }
 0x624   :  { %7055 = vmatpush1.bf16.msra.mxu0 %v7054_v49 }
 0x625   :  { %7103 = vmatpush1.bf16.msra.mxu1 %v7102_v57  ;;  %v3986_v57 = vld [vmem:[#allocation6 + $0x780] sm:$0xff]  ;;  %7057 = vmatprep.subr.bf16.mxu0 %v7056_v54 }
 0x626   :  { %7105 = vmatprep.subr.bf16.mxu1 %v7104_v8  ;;  %v7058_v7 = vpack.c.bf16 %v3994_v3, %v3986_v57  ;;  %v3759_v8 = vld [vmem:[#allocation6 + $0x68] sm:$0xff] }
 0x627   :  { %v7124_v58 = vpack.c.bf16 %v3759_v8, %v3751_v40 }
 0x628   :  { %7059 = vmatpush1.bf16.msra.mxu0 %v7058_v7 }
 0x629   :  { %7107 = vmatpush1.bf16.msra.mxu1 %v7106_v10  ;;  %v7188_v10 = vpack.c.bf16 %v3761_v41, %v3753_v9  ;;  %7125 = vmatprep.subr.bf16.mxu0 %v7124_v58  ;;  %v3750_v9 = vld [vmem:[#allocation6 + $0x20] sm:$0xff]  ;;  %v3752_v41 = vld [vmem:[#allocation6 + $0x30] sm:$0xff] }
 0x62a   :  { %7109 = vmatprep.subr.bf16.mxu1 %v7108_v20  ;;  %v3758_v58 = vld [vmem:[#allocation6 + $0x60] sm:$0xff] }
 0x62d   :  { %7111 = vmatpush1.bf16.msra.mxu1 %v7110_v25 }
 0x62e   :  { %7113 = vmatprep.subr.bf16.mxu1 %v7112_v33 }
 0x631   :  { %7115 = vmatpush1.bf16.msra.mxu1 %v7114_v38 }
 0x632   :  { %7117 = vmatprep.subr.bf16.mxu1 %v7116_v28 }
 0x635   :  { %7119 = vmatpush1.bf16.msra.mxu1 %v7118_v53 }
 0x636   :  { %7121 = vmatprep.subr.bf16.mxu1 %v7120_v1 }
 0x639   :  { %7123 = vmatpush1.bf16.msra.mxu1 %v7122_v43 }
 0x63a   :  { %7189 = vmatprep.subr.bf16.mxu1 %v7188_v10  ;;  %v3760_v10 = vld [vmem:[#allocation6 + $0x70] sm:$0xff] }
 0x65d   :  { %v3456_v12 = vpop.f32.mrb[8].mxu0  ;;  %v3527_v14 = vpop.f32.mrb[8].mxu1 }
 0x65e   :  { %v7772_v18 = vadd.f32 %v3456_v12, %v8498_v15  ;;  %v3458_v0 = vpop.f32.mrb[9].mxu0  ;;  %v3529_v19 = vpop.f32.mrb[9].mxu1  ;;  %v7788_v59 = vadd.f32 %v3527_v14, %v8507_v23 }
 0x65f   :  { %v7773_v4 = vadd.f32 %v3458_v0, %v8501_v16  ;;  %v7789_v21 = vadd.f32 %v3529_v19, %v8512_v27  ;;  %v3775_v0 = vld [vmem:[#allocation6 + $0xe8] sm:$0xff]  ;;  %v3769_v19 = vld [vmem:[#allocation6 + $0xb8] sm:$0xff] }
 0x660   :  { %v5659_v63 = vmul.f32 -1.442695, %v7772_v18  ;;  %v5661_v22 = vmul.f32 -1.442695, %v7788_v59  ;;  %v3767_v18 = vld [vmem:[#allocation6 + $0xa8] sm:$0xff]  ;;  %v3777_v59 = vld [vmem:[#allocation6 + $0xf8] sm:$0xff] }
 0x661   :  { %v5660_v20 = vmul.f32 -1.442695, %v7773_v4 }
 0x662   :  { %8024 = vpow2.f32 %v5659_v63  ;;  %v7126_v63 = vpack.c.bf16 %v3758_v58, %v3750_v9 }
 0x663   :  { %8026 = vpow2.f32 %v5660_v20  ;;  %v7190_v20 = vpack.c.bf16 %v3760_v10, %v3752_v41  ;;  %v3816_v41 = vld [vmem:[#allocation6 + $0x230] sm:$0xff] }
 0x664   :  { %8028 = vtanh.f32 %v7789_v21  ;;  %v3766_v21 = vld [vmem:[#allocation6 + $0xa0] sm:$0xff]  ;;  %v3824_v10 = vld [vmem:[#allocation6 + $0x270] sm:$0xff] }
 0x665   :  { %8030 = vpow2.f32 %v5661_v22  ;;  %v3768_v22 = vld [vmem:[#allocation6 + $0xb0] sm:$0xff] }
 0x66c   :  { %v8025_v25 = vpop.eup %8024 }
 0x66d   :  { %v3699_v26 = vadd.f32 1.0, %v8025_v25  ;;  %v8027_v31 = vpop.eup %8026  ;;  %v3776_v25 = vld [vmem:[#allocation6 + $0xf0] sm:$0xff] }
 0x66e   :  { %v3700_v32 = vadd.f32 1.0, %v8027_v31  ;;  %v8029_v60 = vpop.eup %8028  ;;  %v8163_v31 = vld [vmem:[%s8773_s5] ss:$0 sm:$0xff] }
 0x66f   :  { %8032 = vrcp.f32 %v3699_v26  ;;  %v8031_v17 = vpop.eup %8030  ;;  %v3783_v26 = vld [vmem:[#allocation6 + $0x128] sm:$0xff] }
 0x670   :  { %8034 = vrcp.f32 %v3700_v32  ;;  %v3701_v34 = vadd.f32 1.0, %v8031_v17  ;;  %v3791_v17 = vld [vmem:[#allocation6 + $0x168] sm:$0xff] }
 0x672   :  { %8036 = vrcp.f32 %v3701_v34 }
 0x679   :  { %v8033_v11 = vpop.eup %8032 }
 0x67a   :  { %v3710_v30 = vmul.f32 %v8033_v11, %v8029_v60  ;;  %v8035_v33 = vpop.eup %8034  ;;  %v7128_v60 = vpack.c.bf16 %v3775_v0, %v3767_v18  ;;  %v3785_v11 = vld [vmem:[#allocation6 + $0x138] sm:$0xff] }
 0x67b   :  { %v3709_v35 = vmul.f32 %v8035_v33, %v8623_v24  ;;  %v7192_v33 = vpack.c.bf16 %v3777_v59, %v3769_v19  ;;  %v3833_v18 = vld [vmem:[#allocation6 + $0x2b8] sm:$0xff] }
 0x67c   :  { %v8037_v37 = vpop.eup %8036  ;;  %v3841_v0 = vld [vmem:[#allocation6 + $0x2f8] sm:$0xff] }
 0x67d   :  { %v8654_v36 = vadd.f32 %v3710_v30, %v3709_v35  ;;  %v3793_v30 = vld [vmem:[#allocation6 + $0x178] sm:$0xff]  ;;  %v7194_v35 = vpack.c.bf16 %v3776_v25, %v3768_v22  ;;  %v3840_v22 = vld [vmem:[#allocation6 + $0x2f0] sm:$0xff]  ;;  %v3847_v25 = vld [vmem:[#allocation6 + $0x328] sm:$0xff] }
 0x67f   :  { %8038 = vtanh.f32 %v8654_v36 }
 0x689   :  { %v8039_v38 = vpop.eup %8038 }
 0x68a   :  { %v8657_v39 = vmul.f32 %v8039_v38, %v8037_v37  ;;  %v3782_v37 = vld [vmem:[#allocation6 + $0x120] sm:$0xff] }
 0x68b   :  { %v3790_v38 = vld [vmem:[#allocation6 + $0x160] sm:$0xff] }
 0x68c   :  { %v3738_v61 = vmul.f32 %v8162_v42, %v8657_v39  ;;  %v7132_v42 = vpack.c.bf16 %v3791_v17, %v3783_v26  ;;  %v3855_v26 = vld [vmem:[#allocation6 + $0x368] sm:$0xff] }
 0x68e   :  { %3739 = vadd.xlane.f32.xlu0 %v3738_v61  ;;  %v7196_v61 = vpack.c.bf16 %v3793_v30, %v3785_v11  ;;  %v3846_v11 = vld [vmem:[#allocation6 + $0x320] sm:$0xff] }
 0x68f   :  { %v3854_v30 = vld [vmem:[#allocation6 + $0x360] sm:$0xff] }
 0x69d   :  { %v3598_v13 = vpop.f32.mrb[22].mxu0  ;;  %v3669_v28 = vpop.f32.mrb[22].mxu1 }
 0x69e   :  { %v7802_v24 = vadd.f32 %v3598_v13, %v8527_v47  ;;  %v3600_v44 = vpop.f32.mrb[23].mxu0  ;;  %v3671_v45 = vpop.f32.mrb[23].mxu1  ;;  %v7818_v51 = vadd.f32 %v3669_v28, %v8536_v56  ;;  %v3784_v13 = vld [vmem:[#allocation6 + $0x130] sm:$0xff] }
 0x69f   :  { %v7803_v46 = vadd.f32 %v3600_v44, %v8530_v48  ;;  %v7819_v52 = vadd.f32 %v3671_v45, %v8541_v2  ;;  %v3792_v28 = vld [vmem:[#allocation6 + $0x170] sm:$0xff]  ;;  %v3807_v44 = vld [vmem:[#allocation6 + $0x1e8] sm:$0xff]  ;;  %v3801_v45 = vld [vmem:[#allocation6 + $0x1b8] sm:$0xff] }
 0x6a0   :  { %v5662_v49 = vmul.f32 -1.442695, %v7802_v24  ;;  %v5664_v53 = vmul.f32 -1.442695, %v7818_v51  ;;  %v3799_v24 = vld [vmem:[#allocation6 + $0x1a8] sm:$0xff]  ;;  %v3798_v51 = vld [vmem:[#allocation6 + $0x1a0] sm:$0xff] }
 0x6a1   :  { %v5663_v50 = vmul.f32 -1.442695, %v7803_v46  ;;  %v3809_v46 = vld [vmem:[#allocation6 + $0x1f8] sm:$0xff] }
 0x6a2   :  { %8040 = vpow2.f32 %v5662_v49  ;;  %v7134_v49 = vpack.c.bf16 %v3790_v38, %v3782_v37  ;;  %v3856_v37 = vld [vmem:[#allocation6 + $0x370] sm:$0xff]  ;;  %v3863_v38 = vld [vmem:[#allocation6 + $0x3a8] sm:$0xff] }
 0x6a3   :  { %8042 = vpow2.f32 %v5663_v50  ;;  %v7198_v50 = vpack.c.bf16 %v3792_v28, %v3784_v13  ;;  %v3873_v13 = vld [vmem:[#allocation6 + $0x3f8] sm:$0xff]  ;;  %v7150_v28 = vpack.c.bf16 %v3854_v30, %v3846_v11  ;;  %v3920_v11 = vld [vmem:[#allocation6 + $0x570] sm:$0xff]  ;;  %v3927_v30 = vld [vmem:[#allocation6 + $0x5a8] sm:$0xff] }
 0x6a4   :  { %8044 = vtanh.f32 %v7819_v52  ;;  %v3806_v52 = vld [vmem:[#allocation6 + $0x1e0] sm:$0xff] }
 0x6a5   :  { %8046 = vpow2.f32 %v5664_v53  ;;  %v7136_v53 = vpack.c.bf16 %v3807_v44, %v3799_v24  ;;  %v3862_v44 = vld [vmem:[#allocation6 + $0x3a0] sm:$0xff] }
 0x6ac   :  { %v8041_v54 = vpop.eup %8040 }
 0x6ad   :  { %v3723_v55 = vadd.f32 1.0, %v8041_v54  ;;  %v8043_v29 = vpop.eup %8042  ;;  %v7200_v54 = vpack.c.bf16 %v3809_v46, %v3801_v45  ;;  %v3870_v45 = vld [vmem:[#allocation6 + $0x3e0] sm:$0xff] }
 0x6ae   :  { %v3724_v57 = vadd.f32 1.0, %v8043_v29  ;;  %v8045_v1 = vpop.eup %8044  ;;  %v3808_v29 = vld [vmem:[#allocation6 + $0x1f0] sm:$0xff] }
 0x6af   :  { %8048 = vrcp.f32 %v3723_v55  ;;  %v8047_v3 = vpop.eup %8046  ;;  %v3800_v55 = vld [vmem:[#allocation6 + $0x1b0] sm:$0xff] }
 0x6b0   :  { %8050 = vrcp.f32 %v3724_v57  ;;  %v3725_v43 = vadd.f32 1.0, %v8047_v3  ;;  %v3815_v57 = vld [vmem:[#allocation6 + $0x228] sm:$0xff]  ;;  %v3817_v3 = vld [vmem:[#allocation6 + $0x238] sm:$0xff] }
 0x6b2   :  { %8052 = vrcp.f32 %v3725_v43  ;;  %v3814_v43 = vld [vmem:[#allocation6 + $0x220] sm:$0xff] }
 0x6b9   :  { %v8049_v5 = vpop.eup %8048 }
 0x6ba   :  { %v3734_v6 = vmul.f32 %v8049_v5, %v8045_v1  ;;  %v8051_v7 = vpop.eup %8050  ;;  %v3823_v1 = vld [vmem:[#allocation6 + $0x268] sm:$0xff]  ;;  %v3825_v5 = vld [vmem:[#allocation6 + $0x278] sm:$0xff] }
 0x6bb   :  { %v3733_v40 = vmul.f32 %v8051_v7, %v8637_v62  ;;  %v3774_v62 = vld [vmem:[#allocation6 + $0xe0] sm:$0xff]  ;;  %v7202_v7 = vpack.c.bf16 %v3808_v29, %v3800_v55  ;;  %v7140_v9 = vpack.c.bf16 %v3823_v1, %v3815_v57  ;;  %v7204_v58 = vpack.c.bf16 %v3825_v5, %v3817_v3  ;;  %v3889_v55 = vld [vmem:[#allocation6 + $0x478] sm:$0xff] }
 0x6bc   :  { %v8053_v12 = vpop.eup %8052  ;;  %v7130_v34 = vpack.c.bf16 %v3774_v62, %v3766_v21  ;;  %v7208_v21 = vpack.c.bf16 %v3841_v0, %v3833_v18  ;;  %v3832_v62 = vld [vmem:[#allocation6 + $0x2b0] sm:$0xff]  ;;  %v7154_v29 = vpack.c.bf16 %v3870_v45, %v3862_v44  ;;  %v3878_v1 = vld [vmem:[#allocation6 + $0x420] sm:$0xff]  ;;  %v3943_v45 = vld [vmem:[#allocation6 + $0x628] sm:$0xff] }
 0x6bd   :  { %v8668_v8 = vadd.f32 %v3734_v6, %v3733_v40  ;;  %v7138_v6 = vpack.c.bf16 %v3806_v52, %v3798_v51  ;;  %v3822_v40 = vld [vmem:[#allocation6 + $0x260] sm:$0xff]  ;;  %v7210_v17 = vpack.c.bf16 %v3840_v22, %v3832_v62  ;;  %v3872_v51 = vld [vmem:[#allocation6 + $0x3f0] sm:$0xff]  ;;  %v3879_v52 = vld [vmem:[#allocation6 + $0x428] sm:$0xff] }
 0x6be   :  { %v7142_v19 = vpack.c.bf16 %v3822_v40, %v3814_v43  ;;  %v3886_v3 = vld [vmem:[#allocation6 + $0x460] sm:$0xff]  ;;  %v3888_v43 = vld [vmem:[#allocation6 + $0x470] sm:$0xff]  ;;  %v3895_v40 = vld [vmem:[#allocation6 + $0x4a8] sm:$0xff] }
 0x6bf   :  { %8054 = vtanh.f32 %v8668_v8  ;;  %v3902_v18 = vld [vmem:[#allocation6 + $0x4e0] sm:$0xff]  ;;  %v3921_v62 = vld [vmem:[#allocation6 + $0x578] sm:$0xff]  ;;  %v3936_v44 = vld [vmem:[#allocation6 + $0x5f0] sm:$0xff] }
 0x6c9   :  { %v8055_v14 = vpop.eup %8054 }
 0x6ca   :  { %v3737_v4 = vmul.f32 %v8055_v14, %v8053_v12  ;;  %v3831_v12 = vld [vmem:[#allocation6 + $0x2a8] sm:$0xff] }
 0x6cb   :  { %v3839_v14 = vld [vmem:[#allocation6 + $0x2e8] sm:$0xff] }
 0x6cc   :  { %4066 = vmatprep.mubr.f32.mxu0 %v3737_v4  ;;  %4137 = vmatprep.mubr.f32.mxu1 %v3737_v4  ;;  %v3742_v32 = vmul.f32 %v8163_v31, %v3737_v4  ;;  %v7144_v59 = vpack.c.bf16 %v3839_v14, %v3831_v12  ;;  %v3849_v31 = vld [vmem:[#allocation6 + $0x338] sm:$0xff]  ;;  %v3894_v14 = vld [vmem:[#allocation6 + $0x4a0] sm:$0xff] }
 0x6cd   :  { %4067 = vmatmul.mubr.f32.vlgmr.msra.gmra.mrb[10].mxu0 %v8657_v39  ;;  %4138 = vmatmul.mubr.f32.vlgmr.msra.gmra.mrb[10].mxu1 %v8657_v39  ;;  %v7162_v22 = vpack.c.bf16 %v3902_v18, %v3894_v14  ;;  %v3968_v14 = vld [vmem:[#allocation6 + $0x6f0] sm:$0xff]  ;;  %v3975_v18 = vld [vmem:[#allocation6 + $0x728] sm:$0xff] }
 0x6ce   :  { %7127 = vmatpush1.bf16.msra.mxu0 %v7126_v63  ;;  %7191 = vmatpush1.bf16.msra.mxu1 %v7190_v20  ;;  %v3830_v63 = vld [vmem:[#allocation6 + $0x2a0] sm:$0xff] }
 0x6cf   :  { %4208 = vmatprep.mubr.f32.mxu0 %v3737_v4  ;;  %4279 = vmatprep.mubr.f32.mxu1 %v3737_v4  ;;  %v7206_v4 = vpack.c.bf16 %v3824_v10, %v3816_v41  ;;  %v3838_v20 = vld [vmem:[#allocation6 + $0x2e0] sm:$0xff]  ;;  %v3905_v41 = vld [vmem:[#allocation6 + $0x4f8] sm:$0xff]  ;;  %v7158_v10 = vpack.c.bf16 %v3886_v3, %v3878_v1  ;;  %v3952_v1 = vld [vmem:[#allocation6 + $0x670] sm:$0xff] }
 0x6d0   :  { %3743 = vadd.xlane.f32.xlu1 %v3742_v32  ;;  %7129 = vmatprep.subr.bf16.mxu0 %v7128_v60  ;;  %v3857_v32 = vld [vmem:[#allocation6 + $0x378] sm:$0xff]  ;;  %v7146_v60 = vpack.c.bf16 %v3838_v20, %v3830_v63  ;;  %v3904_v63 = vld [vmem:[#allocation6 + $0x4f0] sm:$0xff]  ;;  %v3911_v20 = vld [vmem:[#allocation6 + $0x528] sm:$0xff] }
 0x6d1   :  { %7193 = vmatprep.subr.bf16.mxu1 %v7192_v33  ;;  %v7148_v33 = vpack.c.bf16 %v3855_v26, %v3847_v25  ;;  %v3910_v26 = vld [vmem:[#allocation6 + $0x520] sm:$0xff]  ;;  %v3959_v3 = vld [vmem:[#allocation6 + $0x6a8] sm:$0xff] }
 0x6d2   :  { %7131 = vmatpush1.bf16.msra.mxu0 %v7130_v34  ;;  %7195 = vmatpush1.bf16.msra.mxu1 %v7194_v35  ;;  %v7212_v34 = vpack.c.bf16 %v3857_v32, %v3849_v31  ;;  %v3848_v35 = vld [vmem:[#allocation6 + $0x330] sm:$0xff]  ;;  %v3918_v31 = vld [vmem:[#allocation6 + $0x560] sm:$0xff] }
 0x6d3   :  { %7133 = vmatprep.subr.bf16.mxu0 %v7132_v42  ;;  %7197 = vmatprep.subr.bf16.mxu1 %v7196_v61  ;;  %v3871_v42 = vld [vmem:[#allocation6 + $0x3e8] sm:$0xff]  ;;  %v3865_v61 = vld [vmem:[#allocation6 + $0x3b8] sm:$0xff]  ;;  %v7214_v24 = vpack.c.bf16 %v3856_v37, %v3848_v35  ;;  %v7166_v37 = vpack.c.bf16 %v3918_v31, %v3910_v26  ;;  %v3984_v26 = vld [vmem:[#allocation6 + $0x770] sm:$0xff] }
 0x6d4   :  { %v7152_v46 = vpack.c.bf16 %v3871_v42, %v3863_v38  ;;  %v3937_v35 = vld [vmem:[#allocation6 + $0x5f8] sm:$0xff]  ;;  %v3926_v42 = vld [vmem:[#allocation6 + $0x5a0] sm:$0xff]  ;;  %v3991_v31 = vld [vmem:[#allocation6 + $0x7a8] sm:$0xff] }
 0x6d6   :  { %7135 = vmatpush1.bf16.msra.mxu0 %v7134_v49  ;;  %7199 = vmatpush1.bf16.msra.mxu1 %v7198_v50  ;;  %v7216_v49 = vpack.c.bf16 %v3873_v13, %v3865_v61  ;;  %v3864_v50 = vld [vmem:[#allocation6 + $0x3b0] sm:$0xff]  ;;  %v3934_v61 = vld [vmem:[#allocation6 + $0x5e0] sm:$0xff] }
 0x6d7   :  { %7137 = vmatprep.subr.bf16.mxu0 %v7136_v53  ;;  %7201 = vmatprep.subr.bf16.mxu1 %v7200_v54  ;;  %v3887_v53 = vld [vmem:[#allocation6 + $0x468] sm:$0xff]  ;;  %v3881_v54 = vld [vmem:[#allocation6 + $0x438] sm:$0xff]  ;;  %v7218_v57 = vpack.c.bf16 %v3872_v51, %v3864_v50  ;;  %v7170_v51 = vpack.c.bf16 %v3934_v61, %v3926_v42  ;;  %v4000_v42 = vld [vmem:[#allocation6 + $0x7f0] sm:$0xff] }
 0x6d8   :  { %v7156_v5 = vpack.c.bf16 %v3887_v53, %v3879_v52  ;;  %v3953_v50 = vld [vmem:[#allocation6 + $0x678] sm:$0xff]  ;;  %v3942_v53 = vld [vmem:[#allocation6 + $0x620] sm:$0xff] }
 0x6da   :  { %7139 = vmatpush1.bf16.msra.mxu0 %v7138_v6  ;;  %7203 = vmatpush1.bf16.msra.mxu1 %v7202_v7  ;;  %v7220_v6 = vpack.c.bf16 %v3889_v55, %v3881_v54  ;;  %v3880_v7 = vld [vmem:[#allocation6 + $0x430] sm:$0xff]  ;;  %v3950_v54 = vld [vmem:[#allocation6 + $0x660] sm:$0xff] }
 0x6db   :  { %7141 = vmatprep.subr.bf16.mxu0 %v7140_v9  ;;  %7205 = vmatprep.subr.bf16.mxu1 %v7204_v58  ;;  %v3903_v9 = vld [vmem:[#allocation6 + $0x4e8] sm:$0xff]  ;;  %v3897_v58 = vld [vmem:[#allocation6 + $0x4b8] sm:$0xff]  ;;  %v7222_v12 = vpack.c.bf16 %v3888_v43, %v3880_v7  ;;  %v7174_v43 = vpack.c.bf16 %v3950_v54, %v3942_v53  ;;  %v4360_v54 = vld [vmem:[#allocation6 + $0x10] sm:$0xff] }
 0x6dc   :  { %v7160_v0 = vpack.c.bf16 %v3903_v9, %v3895_v40  ;;  %v3969_v7 = vld [vmem:[#allocation6 + $0x6f8] sm:$0xff]  ;;  %v3958_v9 = vld [vmem:[#allocation6 + $0x6a0] sm:$0xff] }
 0x6de   :  { %7143 = vmatpush1.bf16.msra.mxu0 %v7142_v19  ;;  %7207 = vmatpush1.bf16.msra.mxu1 %v7206_v4  ;;  %v7224_v19 = vpack.c.bf16 %v3905_v41, %v3897_v58  ;;  %v3896_v4 = vld [vmem:[#allocation6 + $0x4b0] sm:$0xff]  ;;  %v3966_v58 = vld [vmem:[#allocation6 + $0x6e0] sm:$0xff] }
 0x6df   :  { %7145 = vmatprep.subr.bf16.mxu0 %v7144_v59  ;;  %7209 = vmatprep.subr.bf16.mxu1 %v7208_v21  ;;  %v3919_v59 = vld [vmem:[#allocation6 + $0x568] sm:$0xff]  ;;  %v3913_v21 = vld [vmem:[#allocation6 + $0x538] sm:$0xff]  ;;  %v7226_v25 = vpack.c.bf16 %v3904_v63, %v3896_v4  ;;  %v7178_v63 = vpack.c.bf16 %v3966_v58, %v3958_v9  ;;  %v4376_v9 = vld [vmem:[#allocation6 + $0x90] sm:$0xff] }
 0x6e0   :  { %v7164_v32 = vpack.c.bf16 %v3919_v59, %v3911_v20  ;;  %v3985_v4 = vld [vmem:[#allocation6 + $0x778] sm:$0xff]  ;;  %v3974_v59 = vld [vmem:[#allocation6 + $0x720] sm:$0xff]  ;;  %v4384_v58 = vld [vmem:[#allocation6 + $0xd0] sm:$0xff] }
 0x6e2   :  { %7147 = vmatpush1.bf16.msra.mxu0 %v7146_v60  ;;  %7211 = vmatpush1.bf16.msra.mxu1 %v7210_v17  ;;  %v7228_v60 = vpack.c.bf16 %v3921_v62, %v3913_v21  ;;  %v3912_v17 = vld [vmem:[#allocation6 + $0x530] sm:$0xff]  ;;  %v3982_v21 = vld [vmem:[#allocation6 + $0x760] sm:$0xff] }
 0x6e3   :  { %7149 = vmatprep.subr.bf16.mxu0 %v7148_v33  ;;  %7213 = vmatprep.subr.bf16.mxu1 %v7212_v34  ;;  %v3935_v33 = vld [vmem:[#allocation6 + $0x5e8] sm:$0xff]  ;;  %v3929_v34 = vld [vmem:[#allocation6 + $0x5b8] sm:$0xff]  ;;  %v7230_v38 = vpack.c.bf16 %v3920_v11, %v3912_v17  ;;  %v7182_v11 = vpack.c.bf16 %v3982_v21, %v3974_v59  ;;  %v4400_v21 = vld [vmem:[#allocation6 + $0x150] sm:$0xff] }
 0x6e4   :  { %v7168_v13 = vpack.c.bf16 %v3935_v33, %v3927_v30  ;;  %v4001_v17 = vld [vmem:[#allocation6 + $0x7f8] sm:$0xff]  ;;  %v3990_v33 = vld [vmem:[#allocation6 + $0x7a0] sm:$0xff] }
 0x6e6   :  { %7151 = vmatpush1.bf16.msra.mxu0 %v7150_v28  ;;  %7215 = vmatpush1.bf16.msra.mxu1 %v7214_v24  ;;  %v7232_v28 = vpack.c.bf16 %v3937_v35, %v3929_v34  ;;  %v3928_v24 = vld [vmem:[#allocation6 + $0x5b0] sm:$0xff] }
 0x6e7   :  { %7153 = vmatprep.subr.bf16.mxu0 %v7152_v46  ;;  %7217 = vmatprep.subr.bf16.mxu1 %v7216_v49  ;;  %v3951_v46 = vld [vmem:[#allocation6 + $0x668] sm:$0xff]  ;;  %v3945_v49 = vld [vmem:[#allocation6 + $0x638] sm:$0xff]  ;;  %v7234_v52 = vpack.c.bf16 %v3936_v44, %v3928_v24 }
 0x6e8   :  { %v7172_v55 = vpack.c.bf16 %v3951_v46, %v3943_v45  ;;  %v4359_v24 = vld [vmem:[#allocation6 + $0x8] sm:$0xff]  ;;  %v4361_v45 = vld [vmem:[#allocation6 + $0x18] sm:$0xff] }
 0x6e9   :  { %v4367_v44 = vld [vmem:[#allocation6 + $0x48] sm:$0xff] }
 0x6ea   :  { %7155 = vmatpush1.bf16.msra.mxu0 %v7154_v29  ;;  %7219 = vmatpush1.bf16.msra.mxu1 %v7218_v57  ;;  %v7236_v29 = vpack.c.bf16 %v3953_v50, %v3945_v49  ;;  %v3944_v57 = vld [vmem:[#allocation6 + $0x630] sm:$0xff]  ;;  %v7252_v46 = vpack.c.bf16 %v4367_v44, %v4359_v24  ;;  %v4369_v49 = vld [vmem:[#allocation6 + $0x58] sm:$0xff]  ;;  %v4358_v50 = vld [vmem:[#allocation6] sm:$0xff] }
 0x6eb   :  { %7157 = vmatprep.subr.bf16.mxu0 %v7156_v5  ;;  %7221 = vmatprep.subr.bf16.mxu1 %v7220_v6  ;;  %v3967_v5 = vld [vmem:[#allocation6 + $0x6e8] sm:$0xff]  ;;  %v3961_v6 = vld [vmem:[#allocation6 + $0x6b8] sm:$0xff]  ;;  %v7238_v40 = vpack.c.bf16 %v3952_v1, %v3944_v57  ;;  %v4422_v44 = vld [vmem:[#allocation6 + $0x200] sm:$0xff] }
 0x6ec   :  { %v7176_v41 = vpack.c.bf16 %v3967_v5, %v3959_v3  ;;  %v4383_v57 = vld [vmem:[#allocation6 + $0xc8] sm:$0xff]  ;;  %v4377_v1 = vld [vmem:[#allocation6 + $0x98] sm:$0xff] }
 0x6ed   :  { %v4385_v5 = vld [vmem:[#allocation6 + $0xd8] sm:$0xff] }
 0x6ee   :  { %7159 = vmatpush1.bf16.msra.mxu0 %v7158_v10  ;;  %7223 = vmatpush1.bf16.msra.mxu1 %v7222_v12  ;;  %v7240_v10 = vpack.c.bf16 %v3969_v7, %v3961_v6  ;;  %v3960_v12 = vld [vmem:[#allocation6 + $0x6b0] sm:$0xff]  ;;  %v4374_v6 = vld [vmem:[#allocation6 + $0x80] sm:$0xff] }
 0x6ef   :  { %7161 = vmatprep.subr.bf16.mxu0 %v7160_v0  ;;  %7225 = vmatprep.subr.bf16.mxu1 %v7224_v19  ;;  %v3983_v0 = vld [vmem:[#allocation6 + $0x768] sm:$0xff]  ;;  %v3977_v19 = vld [vmem:[#allocation6 + $0x738] sm:$0xff]  ;;  %v7242_v20 = vpack.c.bf16 %v3968_v14, %v3960_v12  ;;  %v4382_v7 = vld [vmem:[#allocation6 + $0xc0] sm:$0xff] }
 0x6f0   :  { %v7180_v62 = vpack.c.bf16 %v3983_v0, %v3975_v18  ;;  %v4399_v12 = vld [vmem:[#allocation6 + $0x148] sm:$0xff]  ;;  %v4393_v14 = vld [vmem:[#allocation6 + $0x118] sm:$0xff] }
 0x6f1   :  { %v4401_v18 = vld [vmem:[#allocation6 + $0x158] sm:$0xff] }
 0x6f2   :  { %7163 = vmatpush1.bf16.msra.mxu0 %v7162_v22  ;;  %7227 = vmatpush1.bf16.msra.mxu1 %v7226_v25  ;;  %v7244_v22 = vpack.c.bf16 %v3985_v4, %v3977_v19  ;;  %v3976_v25 = vld [vmem:[#allocation6 + $0x730] sm:$0xff]  ;;  %v7324_v19 = vpack.c.bf16 %v4401_v18, %v4393_v14  ;;  %v4390_v4 = vld [vmem:[#allocation6 + $0x100] sm:$0xff] }
 0x6f3   :  { %7165 = vmatprep.subr.bf16.mxu0 %v7164_v32  ;;  %7229 = vmatprep.subr.bf16.mxu1 %v7228_v60  ;;  %v3999_v32 = vld [vmem:[#allocation6 + $0x7e8] sm:$0xff]  ;;  %v3993_v60 = vld [vmem:[#allocation6 + $0x7b8] sm:$0xff]  ;;  %v7246_v30 = vpack.c.bf16 %v3984_v26, %v3976_v25 }
 0x6f4   :  { %v7184_v34 = vpack.c.bf16 %v3999_v32, %v3991_v31  ;;  %v7248_v35 = vpack.c.bf16 %v4001_v17, %v3993_v60  ;;  %v4409_v31 = vld [vmem:[#allocation6 + $0x198] sm:$0xff]  ;;  %v4406_v60 = vld [vmem:[#allocation6 + $0x180] sm:$0xff] }
 0x6f5   :  { %v4417_v32 = vld [vmem:[#allocation6 + $0x1d8] sm:$0xff] }
 0x6f6   :  { %7167 = vmatpush1.bf16.msra.mxu0 %v7166_v37  ;;  %7231 = vmatpush1.bf16.msra.mxu1 %v7230_v38  ;;  %v3998_v37 = vld [vmem:[#allocation6 + $0x7e0] sm:$0xff]  ;;  %v3992_v38 = vld [vmem:[#allocation6 + $0x7b0] sm:$0xff]  ;;  %v7328_v17 = vpack.c.bf16 %v4417_v32, %v4409_v31 }
 0x6f7   :  { %7169 = vmatprep.subr.bf16.mxu0 %v7168_v13  ;;  %7233 = vmatprep.subr.bf16.mxu1 %v7232_v28  ;;  %v7186_v61 = vpack.c.bf16 %v3998_v37, %v3990_v33  ;;  %v7250_v13 = vpack.c.bf16 %v4000_v42, %v3992_v38  ;;  %v4416_v33 = vld [vmem:[#allocation6 + $0x1d0] sm:$0xff]  ;;  %v4431_v37 = vld [vmem:[#allocation6 + $0x248] sm:$0xff]  ;;  %v4425_v38 = vld [vmem:[#allocation6 + $0x218] sm:$0xff] }
 0x6f8   :  { %v4472_v32 = vld [vmem:[#allocation6 + $0x390] sm:$0xff] }
 0x6fa   :  { %7171 = vmatpush1.bf16.msra.mxu0 %v7170_v51  ;;  %7235 = vmatpush1.bf16.msra.mxu1 %v7234_v52  ;;  %v4366_v51 = vld [vmem:[#allocation6 + $0x40] sm:$0xff]  ;;  %v7316_v52 = vpack.c.bf16 %v4369_v49, %v4361_v45 }
 0x6fb   :  { %7173 = vmatprep.subr.bf16.mxu0 %v7172_v55  ;;  %7237 = vmatprep.subr.bf16.mxu1 %v7236_v29  ;;  %v7254_v53 = vpack.c.bf16 %v4366_v51, %v4358_v50  ;;  %v4368_v55 = vld [vmem:[#allocation6 + $0x50] sm:$0xff]  ;;  %v4430_v45 = vld [vmem:[#allocation6 + $0x240] sm:$0xff] }
 0x6fc   :  { %v7318_v29 = vpack.c.bf16 %v4368_v55, %v4360_v54  ;;  %v7270_v49 = vpack.c.bf16 %v4430_v45, %v4422_v44  ;;  %v4432_v50 = vld [vmem:[#allocation6 + $0x250] sm:$0xff]  ;;  %v4441_v54 = vld [vmem:[#allocation6 + $0x298] sm:$0xff]  ;;  %v4503_v44 = vld [vmem:[#allocation6 + $0x488] sm:$0xff] }
 0x6fd   :  { %v4511_v45 = vld [vmem:[#allocation6 + $0x4c8] sm:$0xff] }
 0x6fe   :  { %7175 = vmatpush1.bf16.msra.mxu0 %v7174_v43  ;;  %7239 = vmatpush1.bf16.msra.mxu1 %v7238_v40  ;;  %v7320_v43 = vpack.c.bf16 %v4385_v5, %v4377_v1  ;;  %v7258_v40 = vpack.c.bf16 %v4382_v7, %v4374_v6  ;;  %v4440_v5 = vld [vmem:[#allocation6 + $0x290] sm:$0xff] }
 0x6ff   :  { %7177 = vmatprep.subr.bf16.mxu0 %v7176_v41  ;;  %7241 = vmatprep.subr.bf16.mxu1 %v7240_v10  ;;  %v4391_v41 = vld [vmem:[#allocation6 + $0x108] sm:$0xff]  ;;  %v7322_v10 = vpack.c.bf16 %v4384_v58, %v4376_v9  ;;  %v4448_v6 = vld [vmem:[#allocation6 + $0x2d0] sm:$0xff]  ;;  %v4457_v9 = vld [vmem:[#allocation6 + $0x318] sm:$0xff] }
 0x700   :  { %v7260_v0 = vpack.c.bf16 %v4399_v12, %v4391_v41  ;;  %v7338_v7 = vpack.c.bf16 %v4448_v6, %v4440_v5  ;;  %v4465_v41 = vld [vmem:[#allocation6 + $0x358] sm:$0xff]  ;;  %v4462_v12 = vld [vmem:[#allocation6 + $0x340] sm:$0xff] }
 0x701   :  { %v7340_v14 = vpack.c.bf16 %v4465_v41, %v4457_v9  ;;  %v4529_v6 = vld [vmem:[#allocation6 + $0x558] sm:$0xff]  ;;  %v4528_v41 = vld [vmem:[#allocation6 + $0x550] sm:$0xff] }
 0x702   :  { %7179 = vmatpush1.bf16.msra.mxu0 %v7178_v63  ;;  %7243 = vmatpush1.bf16.msra.mxu1 %v7242_v20  ;;  %v4398_v63 = vld [vmem:[#allocation6 + $0x140] sm:$0xff]  ;;  %v4392_v20 = vld [vmem:[#allocation6 + $0x110] sm:$0xff] }
 0x703   :  { %7181 = vmatprep.subr.bf16.mxu0 %v7180_v62  ;;  %7245 = vmatprep.subr.bf16.mxu1 %v7244_v22  ;;  %v7262_v59 = vpack.c.bf16 %v4398_v63, %v4390_v4  ;;  %v4407_v62 = vld [vmem:[#allocation6 + $0x188] sm:$0xff]  ;;  %v7326_v25 = vpack.c.bf16 %v4400_v21, %v4392_v20 }
 0x704   :  { %v4415_v22 = vld [vmem:[#allocation6 + $0x1c8] sm:$0xff] }
 0x705   :  { %v7264_v26 = vpack.c.bf16 %v4415_v22, %v4407_v62  ;;  %v4471_v63 = vld [vmem:[#allocation6 + $0x388] sm:$0xff]  ;;  %v4481_v62 = vld [vmem:[#allocation6 + $0x3d8] sm:$0xff]  ;;  %v4470_v22 = vld [vmem:[#allocation6 + $0x380] sm:$0xff] }
 0x706   :  { %7183 = vmatpush1.bf16.msra.mxu0 %v7182_v11  ;;  %7247 = vmatpush1.bf16.msra.mxu1 %v7246_v30  ;;  %v4414_v11 = vld [vmem:[#allocation6 + $0x1c0] sm:$0xff]  ;;  %v4408_v30 = vld [vmem:[#allocation6 + $0x190] sm:$0xff]  ;;  %v4479_v20 = vld [vmem:[#allocation6 + $0x3c8] sm:$0xff] }
 0x707   :  { %7185 = vmatprep.subr.bf16.mxu0 %v7184_v34  ;;  %7249 = vmatprep.subr.bf16.mxu1 %v7248_v35  ;;  %v7266_v34 = vpack.c.bf16 %v4414_v11, %v4406_v60  ;;  %v4423_v35 = vld [vmem:[#allocation6 + $0x208] sm:$0xff]  ;;  %v7330_v42 = vpack.c.bf16 %v4416_v33, %v4408_v30  ;;  %v7280_v21 = vpack.c.bf16 %v4479_v20, %v4471_v63  ;;  %v4480_v60 = vld [vmem:[#allocation6 + $0x3d0] sm:$0xff]  ;;  %v4489_v33 = vld [vmem:[#allocation6 + $0x418] sm:$0xff] }
 0x708   :  { %v4487_v11 = vld [vmem:[#allocation6 + $0x408] sm:$0xff]  ;;  %v4542_v63 = vld [vmem:[#allocation6 + $0x5c0] sm:$0xff] }
 0x709   :  { %v4495_v30 = vld [vmem:[#allocation6 + $0x448] sm:$0xff] }
 0x70a   :  { %7187 = vmatpush1.bf16.msra.mxu0 %v7186_v61  ;;  %7251 = vmatpush1.bf16.msra.mxu1 %v7250_v13  ;;  %v7268_v61 = vpack.c.bf16 %v4431_v37, %v4423_v35  ;;  %v4433_v13 = vld [vmem:[#allocation6 + $0x258] sm:$0xff]  ;;  %v4486_v37 = vld [vmem:[#allocation6 + $0x400] sm:$0xff] }
 0x70b   :  { %7253 = vmatprep.subr.bf16.mxu0 %v7252_v46  ;;  %7317 = vmatprep.subr.bf16.mxu1 %v7316_v52  ;;  %v4424_v46 = vld [vmem:[#allocation6 + $0x210] sm:$0xff]  ;;  %v4439_v52 = vld [vmem:[#allocation6 + $0x288] sm:$0xff]  ;;  %v4497_v35 = vld [vmem:[#allocation6 + $0x458] sm:$0xff] }
 0x70c   :  { %v7334_v51 = vpack.c.bf16 %v4432_v50, %v4424_v46  ;;  %v4505_v46 = vld [vmem:[#allocation6 + $0x498] sm:$0xff] }
 0x70d   :  { %4209 = vmatmul.mubr.f32.vlgmr.msra.gmra.mrb[20].mxu0 %v8657_v39  ;;  %4280 = vmatmul.mubr.f32.vlgmr.msra.gmra.mrb[20].mxu1 %v8657_v39  ;;  %v4375_v39 = vld [vmem:[#allocation6 + $0x88] sm:$0xff]  ;;  %v4513_v50 = vld [vmem:[#allocation6 + $0x4d8] sm:$0xff] }
 0x70e   :  { %7255 = vmatpush1.bf16.msra.mxu0 %v7254_v53  ;;  %7319 = vmatpush1.bf16.msra.mxu1 %v7318_v29  ;;  %v7256_v3 = vpack.c.bf16 %v4383_v57, %v4375_v39  ;;  %v4447_v53 = vld [vmem:[#allocation6 + $0x2c8] sm:$0xff]  ;;  %v4449_v29 = vld [vmem:[#allocation6 + $0x2d8] sm:$0xff]  ;;  %v4438_v39 = vld [vmem:[#allocation6 + $0x280] sm:$0xff] }
 0x70f   :  { %7321 = vmatprep.subr.bf16.mxu1 %v7320_v43  ;;  %v7272_v55 = vpack.c.bf16 %v4447_v53, %v4439_v52  ;;  %v4446_v57 = vld [vmem:[#allocation6 + $0x2c0] sm:$0xff]  ;;  %v7336_v1 = vpack.c.bf16 %v4449_v29, %v4441_v54  ;;  %v4455_v43 = vld [vmem:[#allocation6 + $0x308] sm:$0xff]  ;;  %v7352_v53 = vpack.c.bf16 %v4513_v50, %v4505_v46  ;;  %v4512_v29 = vld [vmem:[#allocation6 + $0x4d0] sm:$0xff] }
 0x710   :  { %7257 = vmatprep.subr.bf16.mxu0 %v7256_v3  ;;  %v7274_v3 = vpack.c.bf16 %v4446_v57, %v4438_v39  ;;  %v4510_v52 = vld [vmem:[#allocation6 + $0x4c0] sm:$0xff]  ;;  %v4519_v57 = vld [vmem:[#allocation6 + $0x508] sm:$0xff]  ;;  %v4576_v50 = vld [vmem:[#allocation6 + $0x6d0] sm:$0xff] }
 0x712   :  { %7259 = vmatpush1.bf16.msra.mxu0 %v7258_v40  ;;  %7323 = vmatpush1.bf16.msra.mxu1 %v7322_v10  ;;  %v4463_v40 = vld [vmem:[#allocation6 + $0x348] sm:$0xff]  ;;  %v4454_v10 = vld [vmem:[#allocation6 + $0x300] sm:$0xff] }
 0x713   :  { %7261 = vmatprep.subr.bf16.mxu0 %v7260_v0  ;;  %7325 = vmatprep.subr.bf16.mxu1 %v7324_v19  ;;  %v7276_v58 = vpack.c.bf16 %v4463_v40, %v4455_v43  ;;  %v7278_v18 = vpack.c.bf16 %v4462_v12, %v4454_v10  ;;  %v4456_v0 = vld [vmem:[#allocation6 + $0x310] sm:$0xff]  ;;  %v4526_v43 = vld [vmem:[#allocation6 + $0x540] sm:$0xff]  ;;  %v4535_v12 = vld [vmem:[#allocation6 + $0x588] sm:$0xff] }
 0x714   :  { %v4464_v19 = vld [vmem:[#allocation6 + $0x350] sm:$0xff] }
 0x715   :  { %v7342_v4 = vpack.c.bf16 %v4464_v19, %v4456_v0  ;;  %v4545_v19 = vld [vmem:[#allocation6 + $0x5d8] sm:$0xff] }
 0x716   :  { %7263 = vmatpush1.bf16.msra.mxu0 %v7262_v59  ;;  %7327 = vmatpush1.bf16.msra.mxu1 %v7326_v25  ;;  %v4473_v59 = vld [vmem:[#allocation6 + $0x398] sm:$0xff]  ;;  %v4478_v25 = vld [vmem:[#allocation6 + $0x3c0] sm:$0xff] }
 0x717   :  { %7265 = vmatprep.subr.bf16.mxu0 %v7264_v26  ;;  %7329 = vmatprep.subr.bf16.mxu1 %v7328_v17  ;;  %v7344_v26 = vpack.c.bf16 %v4481_v62, %v4473_v59  ;;  %v7282_v31 = vpack.c.bf16 %v4478_v25, %v4470_v22  ;;  %v7346_v17 = vpack.c.bf16 %v4480_v60, %v4472_v32  ;;  %v4544_v62 = vld [vmem:[#allocation6 + $0x5d0] sm:$0xff]  ;;  %v4551_v25 = vld [vmem:[#allocation6 + $0x608] sm:$0xff]  ;;  %v4561_v60 = vld [vmem:[#allocation6 + $0x658] sm:$0xff] }
 0x71a   :  { %7267 = vmatpush1.bf16.msra.mxu0 %v7266_v34  ;;  %7331 = vmatpush1.bf16.msra.mxu1 %v7330_v42  ;;  %v7284_v34 = vpack.c.bf16 %v4495_v30, %v4487_v11  ;;  %v7348_v42 = vpack.c.bf16 %v4497_v35, %v4489_v33  ;;  %v4558_v11 = vld [vmem:[#allocation6 + $0x640] sm:$0xff]  ;;  %v4560_v35 = vld [vmem:[#allocation6 + $0x650] sm:$0xff] }
 0x71b   :  { %v3740_v28 = vpop.xlane.xlu0 %3739  ;;  %7269 = vmatprep.subr.bf16.mxu0 %v7268_v61 }
 0x71c   :  { %3741 = vst.msk [vmem:[#allocation3] sm:$0xff] %vm3132_vm8, %v3740_v28  ;;  %v7332_v28 = vpack.c.bf16 %v4433_v13, %v4425_v38  ;;  %v4494_v38 = vld [vmem:[#allocation6 + $0x440] sm:$0xff]  ;;  %v4488_v13 = vld [vmem:[#allocation6 + $0x410] sm:$0xff] }
 0x71d   :  { %v7286_v61 = vpack.c.bf16 %v4494_v38, %v4486_v37  ;;  %v4567_v38 = vld [vmem:[#allocation6 + $0x688] sm:$0xff] }
 0x71e   :  { %7333 = vmatprep.subr.bf16.mxu1 %v7332_v28  ;;  %7271 = vmatpush1.bf16.msra.mxu0 %v7270_v49  ;;  %v4496_v28 = vld [vmem:[#allocation6 + $0x450] sm:$0xff]  ;;  %v7288_v49 = vpack.c.bf16 %v4511_v45, %v4503_v44  ;;  %v4574_v44 = vld [vmem:[#allocation6 + $0x6c0] sm:$0xff] }
 0x71f   :  { %7335 = vmatpush1.bf16.msra.mxu1 %v7334_v51  ;;  %7273 = vmatprep.subr.bf16.mxu0 %v7272_v55  ;;  %v4502_v51 = vld [vmem:[#allocation6 + $0x480] sm:$0xff]  ;;  %v4504_v55 = vld [vmem:[#allocation6 + $0x490] sm:$0xff] }
 0x720   :  { %7337 = vmatprep.subr.bf16.mxu1 %v7336_v1  ;;  %v7290_v54 = vpack.c.bf16 %v4510_v52, %v4502_v51  ;;  %v7354_v39 = vpack.c.bf16 %v4512_v29, %v4504_v55  ;;  %v4527_v1 = vld [vmem:[#allocation6 + $0x548] sm:$0xff]  ;;  %v4593_v55 = vld [vmem:[#allocation6 + $0x758] sm:$0xff] }
 0x721   :  { %v7292_v5 = vpack.c.bf16 %v4527_v1, %v4519_v57  ;;  %v4583_v51 = vld [vmem:[#allocation6 + $0x708] sm:$0xff]  ;;  %v4582_v57 = vld [vmem:[#allocation6 + $0x700] sm:$0xff] }
 0x722   :  { %7275 = vmatpush1.bf16.msra.mxu0 %v7274_v3  ;;  %v4521_v3 = vld [vmem:[#allocation6 + $0x518] sm:$0xff]  ;;  %v4590_v1 = vld [vmem:[#allocation6 + $0x740] sm:$0xff] }
 0x723   :  { %7339 = vmatpush1.bf16.msra.mxu1 %v7338_v7  ;;  %7277 = vmatprep.subr.bf16.mxu0 %v7276_v58  ;;  %v4518_v7 = vld [vmem:[#allocation6 + $0x500] sm:$0xff]  ;;  %v7356_v40 = vpack.c.bf16 %v4529_v6, %v4521_v3  ;;  %v4520_v58 = vld [vmem:[#allocation6 + $0x510] sm:$0xff] }
 0x724   :  { %7341 = vmatprep.subr.bf16.mxu1 %v7340_v14  ;;  %v7294_v9 = vpack.c.bf16 %v4526_v43, %v4518_v7  ;;  %v7358_v10 = vpack.c.bf16 %v4528_v41, %v4520_v58  ;;  %v4543_v14 = vld [vmem:[#allocation6 + $0x5c8] sm:$0xff]  ;;  %v4584_v3 = vld [vmem:[#allocation6 + $0x710] sm:$0xff]  ;;  %v4601_v58 = vld [vmem:[#allocation6 + $0x798] sm:$0xff] }
 0x725   :  { %v7296_v0 = vpack.c.bf16 %v4543_v14, %v4535_v12  ;;  %v4592_v6 = vld [vmem:[#allocation6 + $0x750] sm:$0xff]  ;;  %v4599_v7 = vld [vmem:[#allocation6 + $0x788] sm:$0xff]  ;;  %v4609_v41 = vld [vmem:[#allocation6 + $0x7d8] sm:$0xff] }
 0x726   :  { %7279 = vmatpush1.bf16.msra.mxu0 %v7278_v18  ;;  %v4537_v18 = vld [vmem:[#allocation6 + $0x598] sm:$0xff]  ;;  %v4607_v43 = vld [vmem:[#allocation6 + $0x7c8] sm:$0xff]  ;;  %v7376_v12 = vpack.c.bf16 %v4609_v41, %v4601_v58  ;;  %v4606_v14 = vld [vmem:[#allocation6 + $0x7c0] sm:$0xff] }
 0x727   :  { %7343 = vmatpush1.bf16.msra.mxu1 %v7342_v4  ;;  %7281 = vmatprep.subr.bf16.mxu0 %v7280_v21  ;;  %v4534_v4 = vld [vmem:[#allocation6 + $0x580] sm:$0xff]  ;;  %v7360_v20 = vpack.c.bf16 %v4545_v19, %v4537_v18  ;;  %v4536_v21 = vld [vmem:[#allocation6 + $0x590] sm:$0xff] }
 0x728   :  { %7345 = vmatprep.subr.bf16.mxu1 %v7344_v26  ;;  %v7298_v59 = vpack.c.bf16 %v4542_v63, %v4534_v4  ;;  %v7362_v22 = vpack.c.bf16 %v4544_v62, %v4536_v21  ;;  %v4559_v26 = vld [vmem:[#allocation6 + $0x648] sm:$0xff]  ;;  %v4600_v18 = vld [vmem:[#allocation6 + $0x790] sm:$0xff]  ;;  %v4373_v62 = vld [vmem:[#allocation6 + $0x78] sm:$0xff] }
 0x729   :  { %v7300_v32 = vpack.c.bf16 %v4559_v26, %v4551_v25  ;;  %v4363_v63 = vld [vmem:[#allocation6 + $0x28] sm:$0xff] }
 0x72a   :  { %7283 = vmatpush1.bf16.msra.mxu0 %v7282_v31  ;;  %v4553_v31 = vld [vmem:[#allocation6 + $0x618] sm:$0xff] }
 0x72b   :  { %7347 = vmatpush1.bf16.msra.mxu1 %v7346_v17  ;;  %7285 = vmatprep.subr.bf16.mxu0 %v7284_v34  ;;  %v4550_v17 = vld [vmem:[#allocation6 + $0x600] sm:$0xff]  ;;  %v7364_v30 = vpack.c.bf16 %v4561_v60, %v4553_v31  ;;  %v4552_v34 = vld [vmem:[#allocation6 + $0x610] sm:$0xff] }
 0x72c   :  { %7349 = vmatprep.subr.bf16.mxu1 %v7348_v42  ;;  %v7302_v33 = vpack.c.bf16 %v4558_v11, %v4550_v17  ;;  %v7366_v37 = vpack.c.bf16 %v4560_v35, %v4552_v34  ;;  %v4575_v42 = vld [vmem:[#allocation6 + $0x6c8] sm:$0xff] }
 0x72e   :  { %7287 = vmatpush1.bf16.msra.mxu0 %v7286_v61  ;;  %v4569_v61 = vld [vmem:[#allocation6 + $0x698] sm:$0xff] }
 0x72f   :  { %7289 = vmatprep.subr.bf16.mxu0 %v7288_v49  ;;  %v4568_v49 = vld [vmem:[#allocation6 + $0x690] sm:$0xff] }
 0x730   :  { %v7370_v52 = vpack.c.bf16 %v4576_v50, %v4568_v49 }
 0x732   :  { %7291 = vmatpush1.bf16.msra.mxu0 %v7290_v54  ;;  %v4585_v54 = vld [vmem:[#allocation6 + $0x718] sm:$0xff] }
 0x733   :  { %7293 = vmatprep.subr.bf16.mxu0 %v7292_v5  ;;  %v7310_v5 = vpack.c.bf16 %v4590_v1, %v4582_v57 }
 0x736   :  { %7295 = vmatpush1.bf16.msra.mxu0 %v7294_v9  ;;  %v7312_v9 = vpack.c.bf16 %v4607_v43, %v4599_v7 }
 0x737   :  { %7297 = vmatprep.subr.bf16.mxu0 %v7296_v0  ;;  %v4608_v0 = vld [vmem:[#allocation6 + $0x7d0] sm:$0xff] }
 0x738   :  { %v7378_v4 = vpack.c.bf16 %v4608_v0, %v4600_v18 }
 0x73a   :  { %7299 = vmatpush1.bf16.msra.mxu0 %v7298_v59  ;;  %v4365_v59 = vld [vmem:[#allocation6 + $0x38] sm:$0xff] }
 0x73b   :  { %7301 = vmatprep.subr.bf16.mxu0 %v7300_v32 }
 0x73e   :  { %7303 = vmatpush1.bf16.msra.mxu0 %v7302_v33 }
 0x75d   :  { %v3744_v24 = vpop.xlane.xlu1 %3743 }
 0x75e   :  { %3745 = vst.msk [vmem:[#allocation4] sm:$0xff] %vm3127_vm7, %v3744_v24  ;;  %v7350_v24 = vpack.c.bf16 %v4496_v28, %v4488_v13  ;;  %v7304_v13 = vpack.c.bf16 %v4575_v42, %v4567_v38  ;;  %v4577_v28 = vld [vmem:[#allocation6 + $0x6d8] sm:$0xff] }
 0x75f   :  { %v7368_v45 = vpack.c.bf16 %v4577_v28, %v4569_v61 }
 0x760   :  { %7351 = vmatpush1.bf16.msra.mxu1 %v7350_v24  ;;  %v4566_v24 = vld [vmem:[#allocation6 + $0x680] sm:$0xff]  ;;  %7305 = vmatprep.subr.bf16.mxu0 %v7304_v13 }
 0x761   :  { %7353 = vmatprep.subr.bf16.mxu1 %v7352_v53  ;;  %v7306_v46 = vpack.c.bf16 %v4574_v44, %v4566_v24  ;;  %v4591_v53 = vld [vmem:[#allocation6 + $0x748] sm:$0xff] }
 0x762   :  { %v7308_v29 = vpack.c.bf16 %v4591_v53, %v4583_v51 }
 0x763   :  { %7307 = vmatpush1.bf16.msra.mxu0 %v7306_v46 }
 0x764   :  { %7355 = vmatpush1.bf16.msra.mxu1 %v7354_v39  ;;  %v7372_v39 = vpack.c.bf16 %v4593_v55, %v4585_v54  ;;  %7309 = vmatprep.subr.bf16.mxu0 %v7308_v29  ;;  %v8164_v54 = vld [vmem:[%s8772_s4] ss:$0 sm:$0xff] }
 0x765   :  { %7357 = vmatprep.subr.bf16.mxu1 %v7356_v40  ;;  %v7374_v40 = vpack.c.bf16 %v4592_v6, %v4584_v3 }
 0x767   :  { %7311 = vmatpush1.bf16.msra.mxu0 %v7310_v5 }
 0x768   :  { %7359 = vmatpush1.bf16.msra.mxu1 %v7358_v10  ;;  %v4598_v10 = vld [vmem:[#allocation6 + $0x780] sm:$0xff]  ;;  %7313 = vmatprep.subr.bf16.mxu0 %v7312_v9 }
 0x769   :  { %7361 = vmatprep.subr.bf16.mxu1 %v7360_v20  ;;  %v7314_v19 = vpack.c.bf16 %v4606_v14, %v4598_v10  ;;  %v4371_v20 = vld [vmem:[#allocation6 + $0x68] sm:$0xff] }
 0x76a   :  { %v7380_v21 = vpack.c.bf16 %v4371_v20, %v4363_v63 }
 0x76b   :  { %7315 = vmatpush1.bf16.msra.mxu0 %v7314_v19 }
 0x76c   :  { %7363 = vmatpush1.bf16.msra.mxu1 %v7362_v22  ;;  %v7444_v22 = vpack.c.bf16 %v4373_v62, %v4365_v59  ;;  %7381 = vmatprep.subr.bf16.mxu0 %v7380_v21  ;;  %v4362_v59 = vld [vmem:[#allocation6 + $0x20] sm:$0xff]  ;;  %v4364_v62 = vld [vmem:[#allocation6 + $0x30] sm:$0xff] }
 0x76d   :  { %7365 = vmatprep.subr.bf16.mxu1 %v7364_v30  ;;  %v4370_v21 = vld [vmem:[#allocation6 + $0x60] sm:$0xff] }
 0x770   :  { %7367 = vmatpush1.bf16.msra.mxu1 %v7366_v37 }
 0x771   :  { %7369 = vmatprep.subr.bf16.mxu1 %v7368_v45 }
 0x774   :  { %7371 = vmatpush1.bf16.msra.mxu1 %v7370_v52 }
 0x775   :  { %7373 = vmatprep.subr.bf16.mxu1 %v7372_v39 }
 0x778   :  { %7375 = vmatpush1.bf16.msra.mxu1 %v7374_v40 }
 0x779   :  { %7377 = vmatprep.subr.bf16.mxu1 %v7376_v12 }
 0x77c   :  { %7379 = vmatpush1.bf16.msra.mxu1 %v7378_v4 }
 0x77d   :  { %7445 = vmatprep.subr.bf16.mxu1 %v7444_v22  ;;  %v4372_v22 = vld [vmem:[#allocation6 + $0x70] sm:$0xff] }
 0x7a0   :  { %v4068_v25 = vpop.f32.mrb[10].mxu0  ;;  %v4139_v26 = vpop.f32.mrb[10].mxu1 }
 0x7a1   :  { %v7774_v31 = vadd.f32 %v4068_v25, %v8498_v15  ;;  %v4070_v32 = vpop.f32.mrb[11].mxu0  ;;  %v4141_v60 = vpop.f32.mrb[11].mxu1  ;;  %v7790_v33 = vadd.f32 %v4139_v26, %v8507_v23 }
 0x7a2   :  { %v7775_v17 = vadd.f32 %v4070_v32, %v8501_v16  ;;  %v7791_v34 = vadd.f32 %v4141_v60, %v8512_v27  ;;  %v4387_v32 = vld [vmem:[#allocation6 + $0xe8] sm:$0xff]  ;;  %v4381_v60 = vld [vmem:[#allocation6 + $0xb8] sm:$0xff] }
 0x7a3   :  { %v5665_v11 = vmul.f32 -1.442695, %v7774_v31  ;;  %v5667_v35 = vmul.f32 -1.442695, %v7790_v33  ;;  %v4379_v31 = vld [vmem:[#allocation6 + $0xa8] sm:$0xff]  ;;  %v4389_v33 = vld [vmem:[#allocation6 + $0xf8] sm:$0xff] }
 0x7a4   :  { %v5666_v30 = vmul.f32 -1.442695, %v7775_v17 }
 0x7a5   :  { %8056 = vpow2.f32 %v5665_v11  ;;  %v7382_v11 = vpack.c.bf16 %v4370_v21, %v4362_v59 }
 0x7a6   :  { %8058 = vpow2.f32 %v5666_v30  ;;  %v7446_v30 = vpack.c.bf16 %v4372_v22, %v4364_v62  ;;  %v4428_v62 = vld [vmem:[#allocation6 + $0x230] sm:$0xff] }
 0x7a7   :  { %8060 = vtanh.f32 %v7791_v34  ;;  %v4378_v34 = vld [vmem:[#allocation6 + $0xa0] sm:$0xff]  ;;  %v4436_v22 = vld [vmem:[#allocation6 + $0x270] sm:$0xff] }
 0x7a8   :  { %8062 = vpow2.f32 %v5667_v35  ;;  %v4380_v35 = vld [vmem:[#allocation6 + $0xb0] sm:$0xff] }
 0x7af   :  { %v8057_v37 = vpop.eup %8056 }
 0x7b0   :  { %v4311_v38 = vadd.f32 1.0, %v8057_v37  ;;  %v8059_v42 = vpop.eup %8058  ;;  %v4388_v37 = vld [vmem:[#allocation6 + $0xf0] sm:$0xff] }
 0x7b1   :  { %v4312_v61 = vadd.f32 1.0, %v8059_v42  ;;  %v8061_v13 = vpop.eup %8060  ;;  %v8165_v42 = vld [vmem:[%s8773_s5] ss:$0 sm:$0xff] }
 0x7b2   :  { %8064 = vrcp.f32 %v4311_v38  ;;  %v8063_v28 = vpop.eup %8062  ;;  %v4395_v38 = vld [vmem:[#allocation6 + $0x128] sm:$0xff] }
 0x7b3   :  { %8066 = vrcp.f32 %v4312_v61  ;;  %v4313_v46 = vadd.f32 1.0, %v8063_v28  ;;  %v4403_v28 = vld [vmem:[#allocation6 + $0x168] sm:$0xff] }
 0x7b5   :  { %8068 = vrcp.f32 %v4313_v46 }
 0x7bc   :  { %v8065_v24 = vpop.eup %8064 }
 0x7bd   :  { %v4322_v44 = vmul.f32 %v8065_v24, %v8061_v13  ;;  %v8067_v45 = vpop.eup %8066  ;;  %v7384_v13 = vpack.c.bf16 %v4387_v32, %v4379_v31  ;;  %v4397_v24 = vld [vmem:[#allocation6 + $0x138] sm:$0xff] }
 0x7be   :  { %v4321_v49 = vmul.f32 %v8067_v45, %v8654_v36  ;;  %v7448_v45 = vpack.c.bf16 %v4389_v33, %v4381_v60  ;;  %v4445_v31 = vld [vmem:[#allocation6 + $0x2b8] sm:$0xff] }
 0x7bf   :  { %v8069_v51 = vpop.eup %8068  ;;  %v4453_v32 = vld [vmem:[#allocation6 + $0x2f8] sm:$0xff] }
 0x7c0   :  { %v8685_v50 = vadd.f32 %v4322_v44, %v4321_v49  ;;  %v4405_v44 = vld [vmem:[#allocation6 + $0x178] sm:$0xff]  ;;  %v7450_v49 = vpack.c.bf16 %v4388_v37, %v4380_v35  ;;  %v4452_v35 = vld [vmem:[#allocation6 + $0x2f0] sm:$0xff]  ;;  %v4459_v37 = vld [vmem:[#allocation6 + $0x328] sm:$0xff] }
 0x7c2   :  { %8070 = vtanh.f32 %v8685_v50 }
 0x7cc   :  { %v8071_v52 = vpop.eup %8070 }
 0x7cd   :  { %v8688_v53 = vmul.f32 %v8071_v52, %v8069_v51  ;;  %v4394_v51 = vld [vmem:[#allocation6 + $0x120] sm:$0xff] }
 0x7ce   :  { %v4402_v52 = vld [vmem:[#allocation6 + $0x160] sm:$0xff] }
 0x7cf   :  { %v4350_v55 = vmul.f32 %v8164_v54, %v8688_v53  ;;  %v7388_v54 = vpack.c.bf16 %v4403_v28, %v4395_v38  ;;  %v4467_v38 = vld [vmem:[#allocation6 + $0x368] sm:$0xff] }
 0x7d1   :  { %4351 = vadd.xlane.f32.xlu0 %v4350_v55  ;;  %v7452_v55 = vpack.c.bf16 %v4405_v44, %v4397_v24  ;;  %v4458_v24 = vld [vmem:[#allocation6 + $0x320] sm:$0xff] }
 0x7d2   :  { %v4466_v44 = vld [vmem:[#allocation6 + $0x360] sm:$0xff] }
 0x7e0   :  { %v4210_v29 = vpop.f32.mrb[20].mxu0  ;;  %v4281_v39 = vpop.f32.mrb[20].mxu1 }
 0x7e1   :  { %v7800_v36 = vadd.f32 %v4210_v29, %v8527_v47  ;;  %v4212_v57 = vpop.f32.mrb[21].mxu0  ;;  %v4283_v1 = vpop.f32.mrb[21].mxu1  ;;  %v7816_v7 = vadd.f32 %v4281_v39, %v8536_v56  ;;  %v4396_v29 = vld [vmem:[#allocation6 + $0x130] sm:$0xff] }
 0x7e2   :  { %v7801_v3 = vadd.f32 %v4212_v57, %v8530_v48  ;;  %v7817_v43 = vadd.f32 %v4283_v1, %v8541_v2  ;;  %v4404_v39 = vld [vmem:[#allocation6 + $0x170] sm:$0xff]  ;;  %v4419_v57 = vld [vmem:[#allocation6 + $0x1e8] sm:$0xff]  ;;  %v4413_v1 = vld [vmem:[#allocation6 + $0x1b8] sm:$0xff] }
 0x7e3   :  { %v5668_v5 = vmul.f32 -1.442695, %v7800_v36  ;;  %v5670_v40 = vmul.f32 -1.442695, %v7816_v7  ;;  %v4411_v36 = vld [vmem:[#allocation6 + $0x1a8] sm:$0xff]  ;;  %v4410_v7 = vld [vmem:[#allocation6 + $0x1a0] sm:$0xff] }
 0x7e4   :  { %v5669_v6 = vmul.f32 -1.442695, %v7801_v3  ;;  %v4421_v3 = vld [vmem:[#allocation6 + $0x1f8] sm:$0xff] }
 0x7e5   :  { %8072 = vpow2.f32 %v5668_v5  ;;  %v7390_v5 = vpack.c.bf16 %v4402_v52, %v4394_v51  ;;  %v4468_v51 = vld [vmem:[#allocation6 + $0x370] sm:$0xff]  ;;  %v4475_v52 = vld [vmem:[#allocation6 + $0x3a8] sm:$0xff] }
 0x7e6   :  { %8074 = vpow2.f32 %v5669_v6  ;;  %v7454_v6 = vpack.c.bf16 %v4404_v39, %v4396_v29  ;;  %v4485_v29 = vld [vmem:[#allocation6 + $0x3f8] sm:$0xff]  ;;  %v7406_v39 = vpack.c.bf16 %v4466_v44, %v4458_v24  ;;  %v4532_v24 = vld [vmem:[#allocation6 + $0x570] sm:$0xff]  ;;  %v4539_v44 = vld [vmem:[#allocation6 + $0x5a8] sm:$0xff] }
 0x7e7   :  { %8076 = vtanh.f32 %v7817_v43  ;;  %v4418_v43 = vld [vmem:[#allocation6 + $0x1e0] sm:$0xff] }
 0x7e8   :  { %8078 = vpow2.f32 %v5670_v40  ;;  %v7392_v40 = vpack.c.bf16 %v4419_v57, %v4411_v36  ;;  %v4474_v57 = vld [vmem:[#allocation6 + $0x3a0] sm:$0xff] }
 0x7ef   :  { %v8073_v9 = vpop.eup %8072 }
 0x7f0   :  { %v4335_v58 = vadd.f32 1.0, %v8073_v9  ;;  %v8075_v41 = vpop.eup %8074  ;;  %v7456_v9 = vpack.c.bf16 %v4421_v3, %v4413_v1  ;;  %v4482_v1 = vld [vmem:[#allocation6 + $0x3e0] sm:$0xff] }
 0x7f1   :  { %v4336_v10 = vadd.f32 1.0, %v8075_v41  ;;  %v8077_v12 = vpop.eup %8076  ;;  %v4420_v41 = vld [vmem:[#allocation6 + $0x1f0] sm:$0xff] }
 0x7f2   :  { %8080 = vrcp.f32 %v4335_v58  ;;  %v8079_v14 = vpop.eup %8078  ;;  %v4412_v58 = vld [vmem:[#allocation6 + $0x1b0] sm:$0xff] }
 0x7f3   :  { %8082 = vrcp.f32 %v4336_v10  ;;  %v4337_v4 = vadd.f32 1.0, %v8079_v14  ;;  %v4427_v10 = vld [vmem:[#allocation6 + $0x228] sm:$0xff]  ;;  %v4429_v14 = vld [vmem:[#allocation6 + $0x238] sm:$0xff] }
 0x7f5   :  { %8084 = vrcp.f32 %v4337_v4  ;;  %v4426_v4 = vld [vmem:[#allocation6 + $0x220] sm:$0xff] }
 0x7fc   :  { %v8081_v18 = vpop.eup %8080 }
 0x7fd   :  { %v4346_v0 = vmul.f32 %v8081_v18, %v8077_v12  ;;  %v8083_v19 = vpop.eup %8082  ;;  %v4435_v12 = vld [vmem:[#allocation6 + $0x268] sm:$0xff]  ;;  %v4437_v18 = vld [vmem:[#allocation6 + $0x278] sm:$0xff] }
 0x7fe   :  { %v4345_v63 = vmul.f32 %v8083_v19, %v8668_v8  ;;  %v4386_v8 = vld [vmem:[#allocation6 + $0xe0] sm:$0xff]  ;;  %v7458_v19 = vpack.c.bf16 %v4420_v41, %v4412_v58  ;;  %v7396_v59 = vpack.c.bf16 %v4435_v12, %v4427_v10  ;;  %v7460_v21 = vpack.c.bf16 %v4437_v18, %v4429_v14  ;;  %v4501_v58 = vld [vmem:[#allocation6 + $0x478] sm:$0xff] }
 0x7ff   :  { %v8085_v25 = vpop.eup %8084  ;;  %v7386_v46 = vpack.c.bf16 %v4386_v8, %v4378_v34  ;;  %v7464_v34 = vpack.c.bf16 %v4453_v32, %v4445_v31  ;;  %v4444_v8 = vld [vmem:[#allocation6 + $0x2b0] sm:$0xff]  ;;  %v7410_v41 = vpack.c.bf16 %v4482_v1, %v4474_v57  ;;  %v4490_v12 = vld [vmem:[#allocation6 + $0x420] sm:$0xff]  ;;  %v4555_v1 = vld [vmem:[#allocation6 + $0x628] sm:$0xff] }
 0x800   :  { %v8699_v20 = vadd.f32 %v4346_v0, %v4345_v63  ;;  %v7394_v0 = vpack.c.bf16 %v4418_v43, %v4410_v7  ;;  %v4434_v63 = vld [vmem:[#allocation6 + $0x260] sm:$0xff]  ;;  %v7466_v28 = vpack.c.bf16 %v4452_v35, %v4444_v8  ;;  %v4484_v7 = vld [vmem:[#allocation6 + $0x3f0] sm:$0xff]  ;;  %v4491_v43 = vld [vmem:[#allocation6 + $0x428] sm:$0xff] }
 0x801   :  { %v7398_v60 = vpack.c.bf16 %v4434_v63, %v4426_v4  ;;  %v4498_v14 = vld [vmem:[#allocation6 + $0x460] sm:$0xff]  ;;  %v4500_v4 = vld [vmem:[#allocation6 + $0x470] sm:$0xff]  ;;  %v4507_v63 = vld [vmem:[#allocation6 + $0x4a8] sm:$0xff] }
 0x802   :  { %8086 = vtanh.f32 %v8699_v20  ;;  %v4514_v31 = vld [vmem:[#allocation6 + $0x4e0] sm:$0xff]  ;;  %v4533_v8 = vld [vmem:[#allocation6 + $0x578] sm:$0xff]  ;;  %v4548_v57 = vld [vmem:[#allocation6 + $0x5f0] sm:$0xff] }
 0x80c   :  { %v8087_v26 = vpop.eup %8086 }
 0x80d   :  { %v4349_v17 = vmul.f32 %v8087_v26, %v8085_v25  ;;  %v4443_v25 = vld [vmem:[#allocation6 + $0x2a8] sm:$0xff] }
 0x80e   :  { %v4451_v26 = vld [vmem:[#allocation6 + $0x2e8] sm:$0xff] }
 0x80f   :  { %4678 = vmatprep.mubr.f32.mxu0 %v4349_v17  ;;  %4749 = vmatprep.mubr.f32.mxu1 %v4349_v17  ;;  %v4354_v61 = vmul.f32 %v8165_v42, %v4349_v17  ;;  %v7400_v33 = vpack.c.bf16 %v4451_v26, %v4443_v25  ;;  %v4461_v42 = vld [vmem:[#allocation6 + $0x338] sm:$0xff]  ;;  %v4506_v26 = vld [vmem:[#allocation6 + $0x4a0] sm:$0xff] }
 0x810   :  { %4679 = vmatmul.mubr.f32.vlgmr.msra.gmra.mrb[12].mxu0 %v8688_v53  ;;  %4750 = vmatmul.mubr.f32.vlgmr.msra.gmra.mrb[12].mxu1 %v8688_v53  ;;  %v7418_v35 = vpack.c.bf16 %v4514_v31, %v4506_v26  ;;  %v4580_v26 = vld [vmem:[#allocation6 + $0x6f0] sm:$0xff]  ;;  %v4587_v31 = vld [vmem:[#allocation6 + $0x728] sm:$0xff] }
 0x811   :  { %7383 = vmatpush1.bf16.msra.mxu0 %v7382_v11  ;;  %7447 = vmatpush1.bf16.msra.mxu1 %v7446_v30  ;;  %v4442_v11 = vld [vmem:[#allocation6 + $0x2a0] sm:$0xff] }
 0x812   :  { %4820 = vmatprep.mubr.f32.mxu0 %v4349_v17  ;;  %4891 = vmatprep.mubr.f32.mxu1 %v4349_v17  ;;  %v7462_v17 = vpack.c.bf16 %v4436_v22, %v4428_v62  ;;  %v4450_v30 = vld [vmem:[#allocation6 + $0x2e0] sm:$0xff]  ;;  %v4517_v62 = vld [vmem:[#allocation6 + $0x4f8] sm:$0xff]  ;;  %v7414_v22 = vpack.c.bf16 %v4498_v14, %v4490_v12  ;;  %v4564_v12 = vld [vmem:[#allocation6 + $0x670] sm:$0xff] }
 0x813   :  { %4355 = vadd.xlane.f32.xlu1 %v4354_v61  ;;  %7385 = vmatprep.subr.bf16.mxu0 %v7384_v13  ;;  %v4469_v61 = vld [vmem:[#allocation6 + $0x378] sm:$0xff]  ;;  %v7402_v13 = vpack.c.bf16 %v4450_v30, %v4442_v11  ;;  %v4516_v11 = vld [vmem:[#allocation6 + $0x4f0] sm:$0xff]  ;;  %v4523_v30 = vld [vmem:[#allocation6 + $0x528] sm:$0xff] }
 0x814   :  { %7449 = vmatprep.subr.bf16.mxu1 %v7448_v45  ;;  %v7404_v45 = vpack.c.bf16 %v4467_v38, %v4459_v37  ;;  %v4522_v38 = vld [vmem:[#allocation6 + $0x520] sm:$0xff]  ;;  %v4571_v14 = vld [vmem:[#allocation6 + $0x6a8] sm:$0xff] }
 0x815   :  { %7387 = vmatpush1.bf16.msra.mxu0 %v7386_v46  ;;  %7451 = vmatpush1.bf16.msra.mxu1 %v7450_v49  ;;  %v7468_v46 = vpack.c.bf16 %v4469_v61, %v4461_v42  ;;  %v4460_v49 = vld [vmem:[#allocation6 + $0x330] sm:$0xff]  ;;  %v4530_v42 = vld [vmem:[#allocation6 + $0x560] sm:$0xff] }
 0x816   :  { %7389 = vmatprep.subr.bf16.mxu0 %v7388_v54  ;;  %7453 = vmatprep.subr.bf16.mxu1 %v7452_v55  ;;  %v4483_v54 = vld [vmem:[#allocation6 + $0x3e8] sm:$0xff]  ;;  %v4477_v55 = vld [vmem:[#allocation6 + $0x3b8] sm:$0xff]  ;;  %v7470_v36 = vpack.c.bf16 %v4468_v51, %v4460_v49  ;;  %v7422_v51 = vpack.c.bf16 %v4530_v42, %v4522_v38  ;;  %v4596_v38 = vld [vmem:[#allocation6 + $0x770] sm:$0xff] }
 0x817   :  { %v7408_v3 = vpack.c.bf16 %v4483_v54, %v4475_v52  ;;  %v4549_v49 = vld [vmem:[#allocation6 + $0x5f8] sm:$0xff]  ;;  %v4538_v54 = vld [vmem:[#allocation6 + $0x5a0] sm:$0xff]  ;;  %v4603_v42 = vld [vmem:[#allocation6 + $0x7a8] sm:$0xff] }
 0x819   :  { %7391 = vmatpush1.bf16.msra.mxu0 %v7390_v5  ;;  %7455 = vmatpush1.bf16.msra.mxu1 %v7454_v6  ;;  %v7472_v5 = vpack.c.bf16 %v4485_v29, %v4477_v55  ;;  %v4476_v6 = vld [vmem:[#allocation6 + $0x3b0] sm:$0xff]  ;;  %v4546_v55 = vld [vmem:[#allocation6 + $0x5e0] sm:$0xff] }
 0x81a   :  { %7393 = vmatprep.subr.bf16.mxu0 %v7392_v40  ;;  %7457 = vmatprep.subr.bf16.mxu1 %v7456_v9  ;;  %v4499_v40 = vld [vmem:[#allocation6 + $0x468] sm:$0xff]  ;;  %v4493_v9 = vld [vmem:[#allocation6 + $0x438] sm:$0xff]  ;;  %v7474_v10 = vpack.c.bf16 %v4484_v7, %v4476_v6  ;;  %v7426_v7 = vpack.c.bf16 %v4546_v55, %v4538_v54  ;;  %v4612_v54 = vld [vmem:[#allocation6 + $0x7f0] sm:$0xff] }
 0x81b   :  { %v7412_v18 = vpack.c.bf16 %v4499_v40, %v4491_v43  ;;  %v4565_v6 = vld [vmem:[#allocation6 + $0x678] sm:$0xff]  ;;  %v4554_v40 = vld [vmem:[#allocation6 + $0x620] sm:$0xff] }
 0x81d   :  { %7395 = vmatpush1.bf16.msra.mxu0 %v7394_v0  ;;  %7459 = vmatpush1.bf16.msra.mxu1 %v7458_v19  ;;  %v7476_v0 = vpack.c.bf16 %v4501_v58, %v4493_v9  ;;  %v4492_v19 = vld [vmem:[#allocation6 + $0x430] sm:$0xff]  ;;  %v4562_v9 = vld [vmem:[#allocation6 + $0x660] sm:$0xff] }
 0x81e   :  { %7397 = vmatprep.subr.bf16.mxu0 %v7396_v59  ;;  %7461 = vmatprep.subr.bf16.mxu1 %v7460_v21  ;;  %v4515_v59 = vld [vmem:[#allocation6 + $0x4e8] sm:$0xff]  ;;  %v4509_v21 = vld [vmem:[#allocation6 + $0x4b8] sm:$0xff]  ;;  %v7478_v25 = vpack.c.bf16 %v4500_v4, %v4492_v19  ;;  %v7430_v4 = vpack.c.bf16 %v4562_v9, %v4554_v40  ;;  %v4972_v9 = vld [vmem:[#allocation6 + $0x10] sm:$0xff] }
 0x81f   :  { %v7416_v32 = vpack.c.bf16 %v4515_v59, %v4507_v63  ;;  %v4581_v19 = vld [vmem:[#allocation6 + $0x6f8] sm:$0xff]  ;;  %v4570_v59 = vld [vmem:[#allocation6 + $0x6a0] sm:$0xff] }
 0x821   :  { %7399 = vmatpush1.bf16.msra.mxu0 %v7398_v60  ;;  %7463 = vmatpush1.bf16.msra.mxu1 %v7462_v17  ;;  %v7480_v60 = vpack.c.bf16 %v4517_v62, %v4509_v21  ;;  %v4508_v17 = vld [vmem:[#allocation6 + $0x4b0] sm:$0xff]  ;;  %v4578_v21 = vld [vmem:[#allocation6 + $0x6e0] sm:$0xff] }
 0x822   :  { %7401 = vmatprep.subr.bf16.mxu0 %v7400_v33  ;;  %7465 = vmatprep.subr.bf16.mxu1 %v7464_v34  ;;  %v4531_v33 = vld [vmem:[#allocation6 + $0x568] sm:$0xff]  ;;  %v4525_v34 = vld [vmem:[#allocation6 + $0x538] sm:$0xff]  ;;  %v7482_v37 = vpack.c.bf16 %v4516_v11, %v4508_v17  ;;  %v7434_v11 = vpack.c.bf16 %v4578_v21, %v4570_v59  ;;  %v4988_v59 = vld [vmem:[#allocation6 + $0x90] sm:$0xff] }
 0x823   :  { %v7420_v61 = vpack.c.bf16 %v4531_v33, %v4523_v30  ;;  %v4597_v17 = vld [vmem:[#allocation6 + $0x778] sm:$0xff]  ;;  %v4586_v33 = vld [vmem:[#allocation6 + $0x720] sm:$0xff]  ;;  %v4996_v21 = vld [vmem:[#allocation6 + $0xd0] sm:$0xff] }
 0x825   :  { %7403 = vmatpush1.bf16.msra.mxu0 %v7402_v13  ;;  %7467 = vmatpush1.bf16.msra.mxu1 %v7466_v28  ;;  %v7484_v13 = vpack.c.bf16 %v4533_v8, %v4525_v34  ;;  %v4524_v28 = vld [vmem:[#allocation6 + $0x530] sm:$0xff]  ;;  %v4594_v34 = vld [vmem:[#allocation6 + $0x760] sm:$0xff] }
 0x826   :  { %7405 = vmatprep.subr.bf16.mxu0 %v7404_v45  ;;  %7469 = vmatprep.subr.bf16.mxu1 %v7468_v46  ;;  %v4547_v45 = vld [vmem:[#allocation6 + $0x5e8] sm:$0xff]  ;;  %v4541_v46 = vld [vmem:[#allocation6 + $0x5b8] sm:$0xff]  ;;  %v7486_v52 = vpack.c.bf16 %v4532_v24, %v4524_v28  ;;  %v7438_v24 = vpack.c.bf16 %v4594_v34, %v4586_v33  ;;  %v5012_v34 = vld [vmem:[#allocation6 + $0x150] sm:$0xff] }
 0x827   :  { %v7424_v29 = vpack.c.bf16 %v4547_v45, %v4539_v44  ;;  %v4613_v28 = vld [vmem:[#allocation6 + $0x7f8] sm:$0xff]  ;;  %v4602_v45 = vld [vmem:[#allocation6 + $0x7a0] sm:$0xff] }
 0x829   :  { %7407 = vmatpush1.bf16.msra.mxu0 %v7406_v39  ;;  %7471 = vmatpush1.bf16.msra.mxu1 %v7470_v36  ;;  %v7488_v39 = vpack.c.bf16 %v4549_v49, %v4541_v46  ;;  %v4540_v36 = vld [vmem:[#allocation6 + $0x5b0] sm:$0xff] }
 0x82a   :  { %7409 = vmatprep.subr.bf16.mxu0 %v7408_v3  ;;  %7473 = vmatprep.subr.bf16.mxu1 %v7472_v5  ;;  %v4563_v3 = vld [vmem:[#allocation6 + $0x668] sm:$0xff]  ;;  %v4557_v5 = vld [vmem:[#allocation6 + $0x638] sm:$0xff]  ;;  %v7490_v43 = vpack.c.bf16 %v4548_v57, %v4540_v36 }
 0x82b   :  { %v7428_v58 = vpack.c.bf16 %v4563_v3, %v4555_v1  ;;  %v4971_v36 = vld [vmem:[#allocation6 + $0x8] sm:$0xff]  ;;  %v4973_v1 = vld [vmem:[#allocation6 + $0x18] sm:$0xff] }
 0x82c   :  { %v4979_v57 = vld [vmem:[#allocation6 + $0x48] sm:$0xff] }
 0x82d   :  { %7411 = vmatpush1.bf16.msra.mxu0 %v7410_v41  ;;  %7475 = vmatpush1.bf16.msra.mxu1 %v7474_v10  ;;  %v7492_v41 = vpack.c.bf16 %v4565_v6, %v4557_v5  ;;  %v4556_v10 = vld [vmem:[#allocation6 + $0x630] sm:$0xff]  ;;  %v7508_v3 = vpack.c.bf16 %v4979_v57, %v4971_v36  ;;  %v4981_v5 = vld [vmem:[#allocation6 + $0x58] sm:$0xff]  ;;  %v4970_v6 = vld [vmem:[#allocation6] sm:$0xff] }
 0x82e   :  { %7413 = vmatprep.subr.bf16.mxu0 %v7412_v18  ;;  %7477 = vmatprep.subr.bf16.mxu1 %v7476_v0  ;;  %v4579_v18 = vld [vmem:[#allocation6 + $0x6e8] sm:$0xff]  ;;  %v4573_v0 = vld [vmem:[#allocation6 + $0x6b8] sm:$0xff]  ;;  %v7494_v63 = vpack.c.bf16 %v4564_v12, %v4556_v10  ;;  %v5034_v57 = vld [vmem:[#allocation6 + $0x200] sm:$0xff] }
 0x82f   :  { %v7432_v62 = vpack.c.bf16 %v4579_v18, %v4571_v14  ;;  %v4995_v10 = vld [vmem:[#allocation6 + $0xc8] sm:$0xff]  ;;  %v4989_v12 = vld [vmem:[#allocation6 + $0x98] sm:$0xff] }
 0x830   :  { %v4997_v18 = vld [vmem:[#allocation6 + $0xd8] sm:$0xff] }
 0x831   :  { %7415 = vmatpush1.bf16.msra.mxu0 %v7414_v22  ;;  %7479 = vmatpush1.bf16.msra.mxu1 %v7478_v25  ;;  %v7496_v22 = vpack.c.bf16 %v4581_v19, %v4573_v0  ;;  %v4572_v25 = vld [vmem:[#allocation6 + $0x6b0] sm:$0xff]  ;;  %v4986_v0 = vld [vmem:[#allocation6 + $0x80] sm:$0xff] }
 0x832   :  { %7417 = vmatprep.subr.bf16.mxu0 %v7416_v32  ;;  %7481 = vmatprep.subr.bf16.mxu1 %v7480_v60  ;;  %v4595_v32 = vld [vmem:[#allocation6 + $0x768] sm:$0xff]  ;;  %v4589_v60 = vld [vmem:[#allocation6 + $0x738] sm:$0xff]  ;;  %v7498_v30 = vpack.c.bf16 %v4580_v26, %v4572_v25  ;;  %v4994_v19 = vld [vmem:[#allocation6 + $0xc0] sm:$0xff] }
 0x833   :  { %v7436_v8 = vpack.c.bf16 %v4595_v32, %v4587_v31  ;;  %v5011_v25 = vld [vmem:[#allocation6 + $0x148] sm:$0xff]  ;;  %v5005_v26 = vld [vmem:[#allocation6 + $0x118] sm:$0xff] }
 0x834   :  { %v5013_v31 = vld [vmem:[#allocation6 + $0x158] sm:$0xff] }
 0x835   :  { %7419 = vmatpush1.bf16.msra.mxu0 %v7418_v35  ;;  %7483 = vmatpush1.bf16.msra.mxu1 %v7482_v37  ;;  %v7500_v35 = vpack.c.bf16 %v4597_v17, %v4589_v60  ;;  %v4588_v37 = vld [vmem:[#allocation6 + $0x730] sm:$0xff]  ;;  %v7580_v60 = vpack.c.bf16 %v5013_v31, %v5005_v26  ;;  %v5002_v17 = vld [vmem:[#allocation6 + $0x100] sm:$0xff] }
 0x836   :  { %7421 = vmatprep.subr.bf16.mxu0 %v7420_v61  ;;  %7485 = vmatprep.subr.bf16.mxu1 %v7484_v13  ;;  %v4611_v61 = vld [vmem:[#allocation6 + $0x7e8] sm:$0xff]  ;;  %v4605_v13 = vld [vmem:[#allocation6 + $0x7b8] sm:$0xff]  ;;  %v7502_v44 = vpack.c.bf16 %v4596_v38, %v4588_v37 }
 0x837   :  { %v7440_v46 = vpack.c.bf16 %v4611_v61, %v4603_v42  ;;  %v7504_v49 = vpack.c.bf16 %v4613_v28, %v4605_v13  ;;  %v5021_v42 = vld [vmem:[#allocation6 + $0x198] sm:$0xff]  ;;  %v5018_v13 = vld [vmem:[#allocation6 + $0x180] sm:$0xff] }
 0x838   :  { %v5029_v61 = vld [vmem:[#allocation6 + $0x1d8] sm:$0xff] }
 0x839   :  { %7423 = vmatpush1.bf16.msra.mxu0 %v7422_v51  ;;  %7487 = vmatpush1.bf16.msra.mxu1 %v7486_v52  ;;  %v4610_v51 = vld [vmem:[#allocation6 + $0x7e0] sm:$0xff]  ;;  %v4604_v52 = vld [vmem:[#allocation6 + $0x7b0] sm:$0xff]  ;;  %v7584_v28 = vpack.c.bf16 %v5029_v61, %v5021_v42 }
 0x83a   :  { %7425 = vmatprep.subr.bf16.mxu0 %v7424_v29  ;;  %7489 = vmatprep.subr.bf16.mxu1 %v7488_v39  ;;  %v7442_v55 = vpack.c.bf16 %v4610_v51, %v4602_v45  ;;  %v7506_v29 = vpack.c.bf16 %v4612_v54, %v4604_v52  ;;  %v5028_v45 = vld [vmem:[#allocation6 + $0x1d0] sm:$0xff]  ;;  %v5043_v51 = vld [vmem:[#allocation6 + $0x248] sm:$0xff]  ;;  %v5037_v52 = vld [vmem:[#allocation6 + $0x218] sm:$0xff] }
 0x83b   :  { %v5084_v61 = vld [vmem:[#allocation6 + $0x390] sm:$0xff] }
 0x83d   :  { %7427 = vmatpush1.bf16.msra.mxu0 %v7426_v7  ;;  %7491 = vmatpush1.bf16.msra.mxu1 %v7490_v43  ;;  %v4978_v7 = vld [vmem:[#allocation6 + $0x40] sm:$0xff]  ;;  %v7572_v43 = vpack.c.bf16 %v4981_v5, %v4973_v1 }
 0x83e   :  { %7429 = vmatprep.subr.bf16.mxu0 %v7428_v58  ;;  %7493 = vmatprep.subr.bf16.mxu1 %v7492_v41  ;;  %v7510_v40 = vpack.c.bf16 %v4978_v7, %v4970_v6  ;;  %v4980_v58 = vld [vmem:[#allocation6 + $0x50] sm:$0xff]  ;;  %v5042_v1 = vld [vmem:[#allocation6 + $0x240] sm:$0xff] }
 0x83f   :  { %v7574_v41 = vpack.c.bf16 %v4980_v58, %v4972_v9  ;;  %v7526_v5 = vpack.c.bf16 %v5042_v1, %v5034_v57  ;;  %v5044_v6 = vld [vmem:[#allocation6 + $0x250] sm:$0xff]  ;;  %v5053_v9 = vld [vmem:[#allocation6 + $0x298] sm:$0xff]  ;;  %v5115_v57 = vld [vmem:[#allocation6 + $0x488] sm:$0xff] }
 0x840   :  { %v5123_v1 = vld [vmem:[#allocation6 + $0x4c8] sm:$0xff] }
 0x841   :  { %7431 = vmatpush1.bf16.msra.mxu0 %v7430_v4  ;;  %7495 = vmatpush1.bf16.msra.mxu1 %v7494_v63  ;;  %v7576_v4 = vpack.c.bf16 %v4997_v18, %v4989_v12  ;;  %v7514_v63 = vpack.c.bf16 %v4994_v19, %v4986_v0  ;;  %v5052_v18 = vld [vmem:[#allocation6 + $0x290] sm:$0xff] }
 0x842   :  { %7433 = vmatprep.subr.bf16.mxu0 %v7432_v62  ;;  %7497 = vmatprep.subr.bf16.mxu1 %v7496_v22  ;;  %v5003_v62 = vld [vmem:[#allocation6 + $0x108] sm:$0xff]  ;;  %v7578_v22 = vpack.c.bf16 %v4996_v21, %v4988_v59  ;;  %v5060_v0 = vld [vmem:[#allocation6 + $0x2d0] sm:$0xff]  ;;  %v5069_v59 = vld [vmem:[#allocation6 + $0x318] sm:$0xff] }
 0x843   :  { %v7516_v32 = vpack.c.bf16 %v5011_v25, %v5003_v62  ;;  %v7594_v19 = vpack.c.bf16 %v5060_v0, %v5052_v18  ;;  %v5077_v62 = vld [vmem:[#allocation6 + $0x358] sm:$0xff]  ;;  %v5074_v25 = vld [vmem:[#allocation6 + $0x340] sm:$0xff] }
 0x844   :  { %v7596_v26 = vpack.c.bf16 %v5077_v62, %v5069_v59  ;;  %v5141_v0 = vld [vmem:[#allocation6 + $0x558] sm:$0xff]  ;;  %v5140_v62 = vld [vmem:[#allocation6 + $0x550] sm:$0xff] }
 0x845   :  { %7435 = vmatpush1.bf16.msra.mxu0 %v7434_v11  ;;  %7499 = vmatpush1.bf16.msra.mxu1 %v7498_v30  ;;  %v5010_v11 = vld [vmem:[#allocation6 + $0x140] sm:$0xff]  ;;  %v5004_v30 = vld [vmem:[#allocation6 + $0x110] sm:$0xff] }
 0x846   :  { %7437 = vmatprep.subr.bf16.mxu0 %v7436_v8  ;;  %7501 = vmatprep.subr.bf16.mxu1 %v7500_v35  ;;  %v7518_v33 = vpack.c.bf16 %v5010_v11, %v5002_v17  ;;  %v5019_v8 = vld [vmem:[#allocation6 + $0x188] sm:$0xff]  ;;  %v7582_v37 = vpack.c.bf16 %v5012_v34, %v5004_v30 }
 0x847   :  { %v5027_v35 = vld [vmem:[#allocation6 + $0x1c8] sm:$0xff] }
 0x848   :  { %v7520_v38 = vpack.c.bf16 %v5027_v35, %v5019_v8  ;;  %v5083_v11 = vld [vmem:[#allocation6 + $0x388] sm:$0xff]  ;;  %v5093_v8 = vld [vmem:[#allocation6 + $0x3d8] sm:$0xff]  ;;  %v5082_v35 = vld [vmem:[#allocation6 + $0x380] sm:$0xff] }
 0x849   :  { %7439 = vmatpush1.bf16.msra.mxu0 %v7438_v24  ;;  %7503 = vmatpush1.bf16.msra.mxu1 %v7502_v44  ;;  %v5026_v24 = vld [vmem:[#allocation6 + $0x1c0] sm:$0xff]  ;;  %v5020_v44 = vld [vmem:[#allocation6 + $0x190] sm:$0xff]  ;;  %v5091_v30 = vld [vmem:[#allocation6 + $0x3c8] sm:$0xff] }
 0x84a   :  { %7441 = vmatprep.subr.bf16.mxu0 %v7440_v46  ;;  %7505 = vmatprep.subr.bf16.mxu1 %v7504_v49  ;;  %v7522_v46 = vpack.c.bf16 %v5026_v24, %v5018_v13  ;;  %v5035_v49 = vld [vmem:[#allocation6 + $0x208] sm:$0xff]  ;;  %v7586_v54 = vpack.c.bf16 %v5028_v45, %v5020_v44  ;;  %v7536_v34 = vpack.c.bf16 %v5091_v30, %v5083_v11  ;;  %v5092_v13 = vld [vmem:[#allocation6 + $0x3d0] sm:$0xff]  ;;  %v5101_v45 = vld [vmem:[#allocation6 + $0x418] sm:$0xff] }
 0x84b   :  { %v5099_v24 = vld [vmem:[#allocation6 + $0x408] sm:$0xff]  ;;  %v5154_v11 = vld [vmem:[#allocation6 + $0x5c0] sm:$0xff] }
 0x84c   :  { %v5107_v44 = vld [vmem:[#allocation6 + $0x448] sm:$0xff] }
 0x84d   :  { %7443 = vmatpush1.bf16.msra.mxu0 %v7442_v55  ;;  %7507 = vmatpush1.bf16.msra.mxu1 %v7506_v29  ;;  %v7524_v55 = vpack.c.bf16 %v5043_v51, %v5035_v49  ;;  %v5045_v29 = vld [vmem:[#allocation6 + $0x258] sm:$0xff]  ;;  %v5098_v51 = vld [vmem:[#allocation6 + $0x400] sm:$0xff] }
 0x84e   :  { %7509 = vmatprep.subr.bf16.mxu0 %v7508_v3  ;;  %7573 = vmatprep.subr.bf16.mxu1 %v7572_v43  ;;  %v5036_v3 = vld [vmem:[#allocation6 + $0x210] sm:$0xff]  ;;  %v5051_v43 = vld [vmem:[#allocation6 + $0x288] sm:$0xff]  ;;  %v5109_v49 = vld [vmem:[#allocation6 + $0x458] sm:$0xff] }
 0x84f   :  { %v7590_v7 = vpack.c.bf16 %v5044_v6, %v5036_v3  ;;  %v5117_v3 = vld [vmem:[#allocation6 + $0x498] sm:$0xff] }
 0x850   :  { %4821 = vmatmul.mubr.f32.vlgmr.msra.gmra.mrb[18].mxu0 %v8688_v53  ;;  %4892 = vmatmul.mubr.f32.vlgmr.msra.gmra.mrb[18].mxu1 %v8688_v53  ;;  %v4987_v53 = vld [vmem:[#allocation6 + $0x88] sm:$0xff]  ;;  %v5125_v6 = vld [vmem:[#allocation6 + $0x4d8] sm:$0xff] }
 0x851   :  { %7511 = vmatpush1.bf16.msra.mxu0 %v7510_v40  ;;  %7575 = vmatpush1.bf16.msra.mxu1 %v7574_v41  ;;  %v7512_v14 = vpack.c.bf16 %v4995_v10, %v4987_v53  ;;  %v5059_v40 = vld [vmem:[#allocation6 + $0x2c8] sm:$0xff]  ;;  %v5061_v41 = vld [vmem:[#allocation6 + $0x2d8] sm:$0xff]  ;;  %v5050_v53 = vld [vmem:[#allocation6 + $0x280] sm:$0xff] }
 0x852   :  { %7577 = vmatprep.subr.bf16.mxu1 %v7576_v4  ;;  %v7528_v58 = vpack.c.bf16 %v5059_v40, %v5051_v43  ;;  %v5058_v10 = vld [vmem:[#allocation6 + $0x2c0] sm:$0xff]  ;;  %v7592_v12 = vpack.c.bf16 %v5061_v41, %v5053_v9  ;;  %v5067_v4 = vld [vmem:[#allocation6 + $0x308] sm:$0xff]  ;;  %v7608_v40 = vpack.c.bf16 %v5125_v6, %v5117_v3  ;;  %v5124_v41 = vld [vmem:[#allocation6 + $0x4d0] sm:$0xff] }
 0x853   :  { %7513 = vmatprep.subr.bf16.mxu0 %v7512_v14  ;;  %v7530_v14 = vpack.c.bf16 %v5058_v10, %v5050_v53  ;;  %v5122_v43 = vld [vmem:[#allocation6 + $0x4c0] sm:$0xff]  ;;  %v5131_v10 = vld [vmem:[#allocation6 + $0x508] sm:$0xff]  ;;  %v5188_v6 = vld [vmem:[#allocation6 + $0x6d0] sm:$0xff] }
 0x855   :  { %7515 = vmatpush1.bf16.msra.mxu0 %v7514_v63  ;;  %7579 = vmatpush1.bf16.msra.mxu1 %v7578_v22  ;;  %v5075_v63 = vld [vmem:[#allocation6 + $0x348] sm:$0xff]  ;;  %v5066_v22 = vld [vmem:[#allocation6 + $0x300] sm:$0xff] }
 0x856   :  { %7517 = vmatprep.subr.bf16.mxu0 %v7516_v32  ;;  %7581 = vmatprep.subr.bf16.mxu1 %v7580_v60  ;;  %v7532_v21 = vpack.c.bf16 %v5075_v63, %v5067_v4  ;;  %v7534_v31 = vpack.c.bf16 %v5074_v25, %v5066_v22  ;;  %v5068_v32 = vld [vmem:[#allocation6 + $0x310] sm:$0xff]  ;;  %v5138_v4 = vld [vmem:[#allocation6 + $0x540] sm:$0xff]  ;;  %v5147_v25 = vld [vmem:[#allocation6 + $0x588] sm:$0xff] }
 0x857   :  { %v5076_v60 = vld [vmem:[#allocation6 + $0x350] sm:$0xff] }
 0x858   :  { %v7598_v17 = vpack.c.bf16 %v5076_v60, %v5068_v32  ;;  %v5157_v60 = vld [vmem:[#allocation6 + $0x5d8] sm:$0xff] }
 0x859   :  { %7519 = vmatpush1.bf16.msra.mxu0 %v7518_v33  ;;  %7583 = vmatpush1.bf16.msra.mxu1 %v7582_v37  ;;  %v5085_v33 = vld [vmem:[#allocation6 + $0x398] sm:$0xff]  ;;  %v5090_v37 = vld [vmem:[#allocation6 + $0x3c0] sm:$0xff] }
 0x85a   :  { %7521 = vmatprep.subr.bf16.mxu0 %v7520_v38  ;;  %7585 = vmatprep.subr.bf16.mxu1 %v7584_v28  ;;  %v7600_v38 = vpack.c.bf16 %v5093_v8, %v5085_v33  ;;  %v7538_v42 = vpack.c.bf16 %v5090_v37, %v5082_v35  ;;  %v7602_v28 = vpack.c.bf16 %v5092_v13, %v5084_v61  ;;  %v5156_v8 = vld [vmem:[#allocation6 + $0x5d0] sm:$0xff]  ;;  %v5163_v37 = vld [vmem:[#allocation6 + $0x608] sm:$0xff]  ;;  %v5173_v13 = vld [vmem:[#allocation6 + $0x658] sm:$0xff] }
 0x85d   :  { %7523 = vmatpush1.bf16.msra.mxu0 %v7522_v46  ;;  %7587 = vmatpush1.bf16.msra.mxu1 %v7586_v54  ;;  %v7540_v46 = vpack.c.bf16 %v5107_v44, %v5099_v24  ;;  %v7604_v54 = vpack.c.bf16 %v5109_v49, %v5101_v45  ;;  %v5170_v24 = vld [vmem:[#allocation6 + $0x640] sm:$0xff]  ;;  %v5172_v49 = vld [vmem:[#allocation6 + $0x650] sm:$0xff] }
 0x85e   :  { %v4352_v39 = vpop.xlane.xlu0 %4351  ;;  %7525 = vmatprep.subr.bf16.mxu0 %v7524_v55 }
 0x85f   :  { %4353 = vst.msk [vmem:[#allocation3] sm:$0xff] %vm2518_vm6, %v4352_v39  ;;  %v7588_v39 = vpack.c.bf16 %v5045_v29, %v5037_v52  ;;  %v5106_v52 = vld [vmem:[#allocation6 + $0x440] sm:$0xff]  ;;  %v5100_v29 = vld [vmem:[#allocation6 + $0x410] sm:$0xff] }
 0x860   :  { %v7542_v55 = vpack.c.bf16 %v5106_v52, %v5098_v51  ;;  %v5179_v52 = vld [vmem:[#allocation6 + $0x688] sm:$0xff] }
 0x861   :  { %7589 = vmatprep.subr.bf16.mxu1 %v7588_v39  ;;  %7527 = vmatpush1.bf16.msra.mxu0 %v7526_v5  ;;  %v5108_v39 = vld [vmem:[#allocation6 + $0x450] sm:$0xff]  ;;  %v7544_v5 = vpack.c.bf16 %v5123_v1, %v5115_v57  ;;  %v5186_v57 = vld [vmem:[#allocation6 + $0x6c0] sm:$0xff] }
 0x862   :  { %7591 = vmatpush1.bf16.msra.mxu1 %v7590_v7  ;;  %7529 = vmatprep.subr.bf16.mxu0 %v7528_v58  ;;  %v5114_v7 = vld [vmem:[#allocation6 + $0x480] sm:$0xff]  ;;  %v5116_v58 = vld [vmem:[#allocation6 + $0x490] sm:$0xff] }
 0x863   :  { %7593 = vmatprep.subr.bf16.mxu1 %v7592_v12  ;;  %v7546_v9 = vpack.c.bf16 %v5122_v43, %v5114_v7  ;;  %v7610_v53 = vpack.c.bf16 %v5124_v41, %v5116_v58  ;;  %v5139_v12 = vld [vmem:[#allocation6 + $0x548] sm:$0xff]  ;;  %v5205_v58 = vld [vmem:[#allocation6 + $0x758] sm:$0xff] }
 0x864   :  { %v7548_v18 = vpack.c.bf16 %v5139_v12, %v5131_v10  ;;  %v5195_v7 = vld [vmem:[#allocation6 + $0x708] sm:$0xff]  ;;  %v5194_v10 = vld [vmem:[#allocation6 + $0x700] sm:$0xff] }
 0x865   :  { %7531 = vmatpush1.bf16.msra.mxu0 %v7530_v14  ;;  %v5133_v14 = vld [vmem:[#allocation6 + $0x518] sm:$0xff]  ;;  %v5202_v12 = vld [vmem:[#allocation6 + $0x740] sm:$0xff] }
 0x866   :  { %7595 = vmatpush1.bf16.msra.mxu1 %v7594_v19  ;;  %7533 = vmatprep.subr.bf16.mxu0 %v7532_v21  ;;  %v5130_v19 = vld [vmem:[#allocation6 + $0x500] sm:$0xff]  ;;  %v7612_v63 = vpack.c.bf16 %v5141_v0, %v5133_v14  ;;  %v5132_v21 = vld [vmem:[#allocation6 + $0x510] sm:$0xff] }
 0x867   :  { %7597 = vmatprep.subr.bf16.mxu1 %v7596_v26  ;;  %v7550_v59 = vpack.c.bf16 %v5138_v4, %v5130_v19  ;;  %v7614_v22 = vpack.c.bf16 %v5140_v62, %v5132_v21  ;;  %v5155_v26 = vld [vmem:[#allocation6 + $0x5c8] sm:$0xff]  ;;  %v5196_v14 = vld [vmem:[#allocation6 + $0x710] sm:$0xff]  ;;  %v5213_v21 = vld [vmem:[#allocation6 + $0x798] sm:$0xff] }
 0x868   :  { %v7552_v32 = vpack.c.bf16 %v5155_v26, %v5147_v25  ;;  %v5204_v0 = vld [vmem:[#allocation6 + $0x750] sm:$0xff]  ;;  %v5211_v19 = vld [vmem:[#allocation6 + $0x788] sm:$0xff]  ;;  %v5221_v62 = vld [vmem:[#allocation6 + $0x7d8] sm:$0xff] }
 0x869   :  { %7535 = vmatpush1.bf16.msra.mxu0 %v7534_v31  ;;  %v5149_v31 = vld [vmem:[#allocation6 + $0x598] sm:$0xff]  ;;  %v5219_v4 = vld [vmem:[#allocation6 + $0x7c8] sm:$0xff]  ;;  %v7632_v25 = vpack.c.bf16 %v5221_v62, %v5213_v21  ;;  %v5218_v26 = vld [vmem:[#allocation6 + $0x7c0] sm:$0xff] }
 0x86a   :  { %7599 = vmatpush1.bf16.msra.mxu1 %v7598_v17  ;;  %7537 = vmatprep.subr.bf16.mxu0 %v7536_v34  ;;  %v5146_v17 = vld [vmem:[#allocation6 + $0x580] sm:$0xff]  ;;  %v7616_v30 = vpack.c.bf16 %v5157_v60, %v5149_v31  ;;  %v5148_v34 = vld [vmem:[#allocation6 + $0x590] sm:$0xff] }
 0x86b   :  { %7601 = vmatprep.subr.bf16.mxu1 %v7600_v38  ;;  %v7554_v33 = vpack.c.bf16 %v5154_v11, %v5146_v17  ;;  %v7618_v35 = vpack.c.bf16 %v5156_v8, %v5148_v34  ;;  %v5171_v38 = vld [vmem:[#allocation6 + $0x648] sm:$0xff]  ;;  %v5212_v31 = vld [vmem:[#allocation6 + $0x790] sm:$0xff]  ;;  %v4985_v8 = vld [vmem:[#allocation6 + $0x78] sm:$0xff] }
 0x86c   :  { %v7556_v61 = vpack.c.bf16 %v5171_v38, %v5163_v37  ;;  %v4975_v11 = vld [vmem:[#allocation6 + $0x28] sm:$0xff] }
 0x86d   :  { %7539 = vmatpush1.bf16.msra.mxu0 %v7538_v42  ;;  %v5165_v42 = vld [vmem:[#allocation6 + $0x618] sm:$0xff] }
 0x86e   :  { %7603 = vmatpush1.bf16.msra.mxu1 %v7602_v28  ;;  %7541 = vmatprep.subr.bf16.mxu0 %v7540_v46  ;;  %v5162_v28 = vld [vmem:[#allocation6 + $0x600] sm:$0xff]  ;;  %v7620_v44 = vpack.c.bf16 %v5173_v13, %v5165_v42  ;;  %v5164_v46 = vld [vmem:[#allocation6 + $0x610] sm:$0xff] }
 0x86f   :  { %7605 = vmatprep.subr.bf16.mxu1 %v7604_v54  ;;  %v7558_v45 = vpack.c.bf16 %v5170_v24, %v5162_v28  ;;  %v7622_v51 = vpack.c.bf16 %v5172_v49, %v5164_v46  ;;  %v5187_v54 = vld [vmem:[#allocation6 + $0x6c8] sm:$0xff] }
 0x871   :  { %7543 = vmatpush1.bf16.msra.mxu0 %v7542_v55  ;;  %v5181_v55 = vld [vmem:[#allocation6 + $0x698] sm:$0xff] }
 0x872   :  { %7545 = vmatprep.subr.bf16.mxu0 %v7544_v5  ;;  %v5180_v5 = vld [vmem:[#allocation6 + $0x690] sm:$0xff] }
 0x873   :  { %v7626_v43 = vpack.c.bf16 %v5188_v6, %v5180_v5 }
 0x875   :  { %7547 = vmatpush1.bf16.msra.mxu0 %v7546_v9  ;;  %v5197_v9 = vld [vmem:[#allocation6 + $0x718] sm:$0xff] }
 0x876   :  { %7549 = vmatprep.subr.bf16.mxu0 %v7548_v18  ;;  %v7566_v18 = vpack.c.bf16 %v5202_v12, %v5194_v10 }
 0x879   :  { %7551 = vmatpush1.bf16.msra.mxu0 %v7550_v59  ;;  %v7568_v59 = vpack.c.bf16 %v5219_v4, %v5211_v19 }
 0x87a   :  { %7553 = vmatprep.subr.bf16.mxu0 %v7552_v32  ;;  %v5220_v32 = vld [vmem:[#allocation6 + $0x7d0] sm:$0xff] }
 0x87b   :  { %v7634_v17 = vpack.c.bf16 %v5220_v32, %v5212_v31 }
 0x87d   :  { %7555 = vmatpush1.bf16.msra.mxu0 %v7554_v33  ;;  %v4977_v33 = vld [vmem:[#allocation6 + $0x38] sm:$0xff] }
 0x87e   :  { %7557 = vmatprep.subr.bf16.mxu0 %v7556_v61 }
 0x881   :  { %7559 = vmatpush1.bf16.msra.mxu0 %v7558_v45 }
 0x8a0   :  { %v4356_v36 = vpop.xlane.xlu1 %4355 }
 0x8a1   :  { %4357 = vst.msk [vmem:[#allocation4] sm:$0xff] %vm2513_vm5, %v4356_v36  ;;  %v7606_v36 = vpack.c.bf16 %v5108_v39, %v5100_v29  ;;  %v7560_v29 = vpack.c.bf16 %v5187_v54, %v5179_v52  ;;  %v5189_v39 = vld [vmem:[#allocation6 + $0x6d8] sm:$0xff] }
 0x8a2   :  { %v7624_v1 = vpack.c.bf16 %v5189_v39, %v5181_v55 }
 0x8a3   :  { %7607 = vmatpush1.bf16.msra.mxu1 %v7606_v36  ;;  %v5178_v36 = vld [vmem:[#allocation6 + $0x680] sm:$0xff]  ;;  %7561 = vmatprep.subr.bf16.mxu0 %v7560_v29 }
 0x8a4   :  { %7609 = vmatprep.subr.bf16.mxu1 %v7608_v40  ;;  %v7562_v3 = vpack.c.bf16 %v5186_v57, %v5178_v36  ;;  %v5203_v40 = vld [vmem:[#allocation6 + $0x748] sm:$0xff] }
 0x8a5   :  { %v7564_v41 = vpack.c.bf16 %v5203_v40, %v5195_v7 }
 0x8a6   :  { %7563 = vmatpush1.bf16.msra.mxu0 %v7562_v3 }
 0x8a7   :  { %7611 = vmatpush1.bf16.msra.mxu1 %v7610_v53  ;;  %v7628_v53 = vpack.c.bf16 %v5205_v58, %v5197_v9  ;;  %7565 = vmatprep.subr.bf16.mxu0 %v7564_v41  ;;  %v8724_v9 = vld [vmem:[%s8772_s4] ss:$0 sm:$0xff] }
 0x8a8   :  { %7613 = vmatprep.subr.bf16.mxu1 %v7612_v63  ;;  %v7630_v63 = vpack.c.bf16 %v5204_v0, %v5196_v14 }
 0x8aa   :  { %7567 = vmatpush1.bf16.msra.mxu0 %v7566_v18 }
 0x8ab   :  { %7615 = vmatpush1.bf16.msra.mxu1 %v7614_v22  ;;  %v5210_v22 = vld [vmem:[#allocation6 + $0x780] sm:$0xff]  ;;  %7569 = vmatprep.subr.bf16.mxu0 %v7568_v59 }
 0x8ac   :  { %7617 = vmatprep.subr.bf16.mxu1 %v7616_v30  ;;  %v7570_v60 = vpack.c.bf16 %v5218_v26, %v5210_v22  ;;  %v4983_v30 = vld [vmem:[#allocation6 + $0x68] sm:$0xff] }
 0x8ad   :  { %v7636_v34 = vpack.c.bf16 %v4983_v30, %v4975_v11 }
 0x8ae   :  { %7571 = vmatpush1.bf16.msra.mxu0 %v7570_v60 }
 0x8af   :  { %7619 = vmatpush1.bf16.msra.mxu1 %v7618_v35  ;;  %v7700_v35 = vpack.c.bf16 %v4985_v8, %v4977_v33  ;;  %7637 = vmatprep.subr.bf16.mxu0 %v7636_v34  ;;  %v4974_v33 = vld [vmem:[#allocation6 + $0x20] sm:$0xff]  ;;  %v4976_v8 = vld [vmem:[#allocation6 + $0x30] sm:$0xff] }
 0x8b0   :  { %7621 = vmatprep.subr.bf16.mxu1 %v7620_v44  ;;  %v4982_v34 = vld [vmem:[#allocation6 + $0x60] sm:$0xff] }
 0x8b3   :  { %7623 = vmatpush1.bf16.msra.mxu1 %v7622_v51 }
 0x8b4   :  { %7625 = vmatprep.subr.bf16.mxu1 %v7624_v1 }
 0x8b7   :  { %7627 = vmatpush1.bf16.msra.mxu1 %v7626_v43 }
 0x8b8   :  { %7629 = vmatprep.subr.bf16.mxu1 %v7628_v53 }
 0x8bb   :  { %7631 = vmatpush1.bf16.msra.mxu1 %v7630_v63 }
 0x8bc   :  { %7633 = vmatprep.subr.bf16.mxu1 %v7632_v25 }
 0x8bf   :  { %7635 = vmatpush1.bf16.msra.mxu1 %v7634_v17 }
 0x8c0   :  { %7701 = vmatprep.subr.bf16.mxu1 %v7700_v35  ;;  %v4984_v35 = vld [vmem:[#allocation6 + $0x70] sm:$0xff] }
 0x8e3   :  { %v4680_v37 = vpop.f32.mrb[12].mxu0  ;;  %v4751_v38 = vpop.f32.mrb[12].mxu1 }
 0x8e4   :  { %v7776_v42 = vadd.f32 %v4680_v37, %v8498_v15  ;;  %v4682_v61 = vpop.f32.mrb[13].mxu0  ;;  %v4753_v13 = vpop.f32.mrb[13].mxu1  ;;  %v7792_v45 = vadd.f32 %v4751_v38, %v8507_v23 }
 0x8e5   :  { %v7777_v28 = vadd.f32 %v4682_v61, %v8501_v16  ;;  %v7793_v46 = vadd.f32 %v4753_v13, %v8512_v27  ;;  %v4999_v61 = vld [vmem:[#allocation6 + $0xe8] sm:$0xff]  ;;  %v4993_v13 = vld [vmem:[#allocation6 + $0xb8] sm:$0xff] }
 0x8e6   :  { %v5671_v24 = vmul.f32 -1.442695, %v7776_v42  ;;  %v5673_v49 = vmul.f32 -1.442695, %v7792_v45  ;;  %v4991_v42 = vld [vmem:[#allocation6 + $0xa8] sm:$0xff]  ;;  %v5001_v45 = vld [vmem:[#allocation6 + $0xf8] sm:$0xff] }
 0x8e7   :  { %v5672_v44 = vmul.f32 -1.442695, %v7777_v28 }
 0x8e8   :  { %8088 = vpow2.f32 %v5671_v24  ;;  %v7638_v24 = vpack.c.bf16 %v4982_v34, %v4974_v33  ;;  %v5046_v33 = vld [vmem:[#allocation6 + $0x260] sm:$0xff] }
 0x8e9   :  { %8090 = vpow2.f32 %v5672_v44  ;;  %v7702_v44 = vpack.c.bf16 %v4984_v35, %v4976_v8  ;;  %v5040_v35 = vld [vmem:[#allocation6 + $0x230] sm:$0xff] }
 0x8ea   :  { %8092 = vtanh.f32 %v7793_v46  ;;  %v4990_v46 = vld [vmem:[#allocation6 + $0xa0] sm:$0xff] }
 0x8eb   :  { %8094 = vpow2.f32 %v5673_v49  ;;  %v4992_v49 = vld [vmem:[#allocation6 + $0xb0] sm:$0xff] }
 0x8f2   :  { %v8089_v51 = vpop.eup %8088 }
 0x8f3   :  { %v4923_v52 = vadd.f32 1.0, %v8089_v51  ;;  %v8091_v54 = vpop.eup %8090  ;;  %v5000_v51 = vld [vmem:[#allocation6 + $0xf0] sm:$0xff] }
 0x8f4   :  { %v4924_v55 = vadd.f32 1.0, %v8091_v54  ;;  %v8093_v29 = vpop.eup %8092  ;;  %v8739_v54 = vld [vmem:[%s8773_s5] ss:$0 sm:$0xff] }
 0x8f5   :  { %8096 = vrcp.f32 %v4923_v52  ;;  %v8095_v39 = vpop.eup %8094  ;;  %v5007_v52 = vld [vmem:[#allocation6 + $0x128] sm:$0xff] }
 0x8f6   :  { %8098 = vrcp.f32 %v4924_v55  ;;  %v4925_v3 = vadd.f32 1.0, %v8095_v39  ;;  %v5015_v39 = vld [vmem:[#allocation6 + $0x168] sm:$0xff] }
 0x8f8   :  { %8100 = vrcp.f32 %v4925_v3 }
 0x8ff   :  { %v8097_v36 = vpop.eup %8096 }
 0x900   :  { %v4934_v57 = vmul.f32 %v8097_v36, %v8093_v29  ;;  %v8099_v1 = vpop.eup %8098  ;;  %v7640_v29 = vpack.c.bf16 %v4999_v61, %v4991_v42  ;;  %v5009_v36 = vld [vmem:[#allocation6 + $0x138] sm:$0xff]  ;;  %v5063_v42 = vld [vmem:[#allocation6 + $0x2e8] sm:$0xff] }
 0x901   :  { %v4933_v5 = vmul.f32 %v8099_v1, %v8685_v50  ;;  %v7704_v1 = vpack.c.bf16 %v5001_v45, %v4993_v13  ;;  %v5057_v61 = vld [vmem:[#allocation6 + $0x2b8] sm:$0xff]  ;;  %v5062_v45 = vld [vmem:[#allocation6 + $0x2e0] sm:$0xff] }
 0x902   :  { %v8101_v7 = vpop.eup %8100  ;;  %v5065_v13 = vld [vmem:[#allocation6 + $0x2f8] sm:$0xff] }
 0x903   :  { %v8716_v6 = vadd.f32 %v4934_v57, %v4933_v5  ;;  %v5017_v57 = vld [vmem:[#allocation6 + $0x178] sm:$0xff]  ;;  %v7706_v5 = vpack.c.bf16 %v5000_v51, %v4992_v49  ;;  %v5056_v49 = vld [vmem:[#allocation6 + $0x2b0] sm:$0xff] }
 0x904   :  { %v5064_v51 = vld [vmem:[#allocation6 + $0x2f0] sm:$0xff] }
 0x905   :  { %8102 = vtanh.f32 %v8716_v6 }
 0x90f   :  { %v8103_v43 = vpop.eup %8102 }
 0x910   :  { %v8719_v40 = vmul.f32 %v8103_v43, %v8101_v7  ;;  %v5006_v7 = vld [vmem:[#allocation6 + $0x120] sm:$0xff] }
 0x911   :  { %v5014_v43 = vld [vmem:[#allocation6 + $0x160] sm:$0xff] }
 0x912   :  { %v4962_v58 = vmul.f32 %v8724_v9, %v8719_v40 }
 0x914   :  { %4963 = vadd.xlane.f32.xlu0 %v4962_v58  ;;  %v7644_v58 = vpack.c.bf16 %v5015_v39, %v5007_v52  ;;  %v5071_v52 = vld [vmem:[#allocation6 + $0x328] sm:$0xff]  ;;  %v5081_v39 = vld [vmem:[#allocation6 + $0x378] sm:$0xff] }
 0x923   :  { %v4822_v41 = vpop.f32.mrb[18].mxu0  ;;  %v4893_v50 = vpop.f32.mrb[18].mxu1 }
 0x924   :  { %v7798_v53 = vadd.f32 %v4822_v41, %v8527_v47  ;;  %v4824_v10 = vpop.f32.mrb[19].mxu0  ;;  %v4895_v12 = vpop.f32.mrb[19].mxu1  ;;  %v7814_v19 = vadd.f32 %v4893_v50, %v8536_v56  ;;  %v7708_v41 = vpack.c.bf16 %v5017_v57, %v5009_v36  ;;  %v5008_v50 = vld [vmem:[#allocation6 + $0x130] sm:$0xff]  ;;  %v7722_v57 = vpack.c.bf16 %v5064_v51, %v5056_v49  ;;  %v5143_v49 = vld [vmem:[#allocation6 + $0x568] sm:$0xff]  ;;  %v5137_v51 = vld [vmem:[#allocation6 + $0x538] sm:$0xff] }
 0x925   :  { %v7799_v14 = vadd.f32 %v4824_v10, %v8530_v48  ;;  %v7815_v4 = vadd.f32 %v4895_v12, %v8541_v2  ;;  %v5023_v10 = vld [vmem:[#allocation6 + $0x1a8] sm:$0xff] }
 0x926   :  { %v5674_v18 = vmul.f32 -1.442695, %v7798_v53  ;;  %v5676_v63 = vmul.f32 -1.442695, %v7814_v19  ;;  %v5016_v53 = vld [vmem:[#allocation6 + $0x170] sm:$0xff]  ;;  %v5031_v12 = vld [vmem:[#allocation6 + $0x1e8] sm:$0xff] }
 0x927   :  { %v5675_v0 = vmul.f32 -1.442695, %v7799_v14  ;;  %v5025_v14 = vld [vmem:[#allocation6 + $0x1b8] sm:$0xff]  ;;  %v7710_v19 = vpack.c.bf16 %v5016_v53, %v5008_v50  ;;  %v5095_v50 = vld [vmem:[#allocation6 + $0x3e8] sm:$0xff] }
 0x928   :  { %8104 = vpow2.f32 %v5674_v18  ;;  %v5033_v18 = vld [vmem:[#allocation6 + $0x1f8] sm:$0xff] }
 0x929   :  { %8106 = vpow2.f32 %v5675_v0  ;;  %v7646_v0 = vpack.c.bf16 %v5014_v43, %v5006_v7  ;;  %v5072_v43 = vld [vmem:[#allocation6 + $0x330] sm:$0xff]  ;;  %v5089_v53 = vld [vmem:[#allocation6 + $0x3b8] sm:$0xff] }
 0x92a   :  { %8108 = vtanh.f32 %v7815_v4  ;;  %v5022_v4 = vld [vmem:[#allocation6 + $0x1a0] sm:$0xff] }
 0x92b   :  { %8110 = vpow2.f32 %v5676_v63  ;;  %v5030_v63 = vld [vmem:[#allocation6 + $0x1e0] sm:$0xff] }
 0x932   :  { %v8105_v59 = vpop.eup %8104 }
 0x933   :  { %v4947_v21 = vadd.f32 1.0, %v8105_v59  ;;  %v8107_v62 = vpop.eup %8106  ;;  %v7648_v59 = vpack.c.bf16 %v5031_v12, %v5023_v10  ;;  %v5097_v10 = vld [vmem:[#allocation6 + $0x3f8] sm:$0xff] }
 0x934   :  { %v4948_v22 = vadd.f32 1.0, %v8107_v62  ;;  %v8109_v25 = vpop.eup %8108  ;;  %v5024_v62 = vld [vmem:[#allocation6 + $0x1b0] sm:$0xff] }
 0x935   :  { %8112 = vrcp.f32 %v4947_v21  ;;  %v8111_v26 = vpop.eup %8110  ;;  %v7712_v21 = vpack.c.bf16 %v5033_v18, %v5025_v14  ;;  %v5086_v18 = vld [vmem:[#allocation6 + $0x3a0] sm:$0xff] }
 0x936   :  { %8114 = vrcp.f32 %v4948_v22  ;;  %v4949_v17 = vadd.f32 1.0, %v8111_v26  ;;  %v5032_v22 = vld [vmem:[#allocation6 + $0x1f0] sm:$0xff]  ;;  %v5047_v26 = vld [vmem:[#allocation6 + $0x268] sm:$0xff] }
 0x938   :  { %8116 = vrcp.f32 %v4949_v17  ;;  %v7714_v17 = vpack.c.bf16 %v5032_v22, %v5024_v62  ;;  %v5111_v62 = vld [vmem:[#allocation6 + $0x468] sm:$0xff]  ;;  %v5105_v22 = vld [vmem:[#allocation6 + $0x438] sm:$0xff] }
 0x93f   :  { %v8113_v31 = vpop.eup %8112 }
 0x940   :  { %v4958_v32 = vmul.f32 %v8113_v31, %v8109_v25  ;;  %v8115_v60 = vpop.eup %8114  ;;  %v5039_v25 = vld [vmem:[#allocation6 + $0x228] sm:$0xff]  ;;  %v5041_v31 = vld [vmem:[#allocation6 + $0x238] sm:$0xff] }
 0x941   :  { %v4957_v11 = vmul.f32 %v8115_v60, %v8699_v20  ;;  %v4998_v20 = vld [vmem:[#allocation6 + $0xe0] sm:$0xff]  ;;  %v7650_v60 = vpack.c.bf16 %v5030_v63, %v5022_v4  ;;  %v7652_v34 = vpack.c.bf16 %v5047_v26, %v5039_v25  ;;  %v7728_v4 = vpack.c.bf16 %v5097_v10, %v5089_v53  ;;  %v5088_v63 = vld [vmem:[#allocation6 + $0x3b0] sm:$0xff]  ;;  %v5113_v25 = vld [vmem:[#allocation6 + $0x478] sm:$0xff] }
 0x942   :  { %v8117_v37 = vpop.eup %8116  ;;  %v7642_v3 = vpack.c.bf16 %v4998_v20, %v4990_v46  ;;  %v7720_v20 = vpack.c.bf16 %v5065_v13, %v5057_v61  ;;  %v5118_v13 = vld [vmem:[#allocation6 + $0x4a0] sm:$0xff] }
 0x943   :  { %v8733_v30 = vadd.f32 %v4958_v32, %v4957_v11  ;;  %v5049_v32 = vld [vmem:[#allocation6 + $0x278] sm:$0xff]  ;;  %v5038_v11 = vld [vmem:[#allocation6 + $0x220] sm:$0xff] }
 0x944   :  { %v7716_v8 = vpack.c.bf16 %v5049_v32, %v5041_v31  ;;  %v5102_v32 = vld [vmem:[#allocation6 + $0x420] sm:$0xff] }
 0x945   :  { %8118 = vtanh.f32 %v8733_v30  ;;  %v5150_v10 = vld [vmem:[#allocation6 + $0x5a0] sm:$0xff] }
 0x94f   :  { %v8119_v38 = vpop.eup %8118 }
 0x950   :  { %v4961_v28 = vmul.f32 %v8119_v38, %v8117_v37  ;;  %v5048_v37 = vld [vmem:[#allocation6 + $0x270] sm:$0xff]  ;;  %v5055_v38 = vld [vmem:[#allocation6 + $0x2a8] sm:$0xff] }
 0x951   :  { %v7656_v46 = vpack.c.bf16 %v5063_v42, %v5055_v38  ;;  %v5129_v38 = vld [vmem:[#allocation6 + $0x4f8] sm:$0xff] }
 0x952   :  { %5290 = vmatprep.mubr.f32.mxu0 %v4961_v28  ;;  %5361 = vmatprep.mubr.f32.mxu1 %v4961_v28  ;;  %v4966_v55 = vmul.f32 %v8739_v54, %v4961_v28 }
 0x953   :  { %5291 = vmatmul.mubr.f32.vlgmr.msra.gmra.mrb[14].mxu0 %v8719_v40  ;;  %5362 = vmatmul.mubr.f32.vlgmr.msra.gmra.mrb[14].mxu1 %v8719_v40 }
 0x954   :  { %7639 = vmatpush1.bf16.msra.mxu0 %v7638_v24  ;;  %7703 = vmatpush1.bf16.msra.mxu1 %v7702_v44  ;;  %v7718_v24 = vpack.c.bf16 %v5048_v37, %v5040_v35  ;;  %v5054_v44 = vld [vmem:[#allocation6 + $0x2a0] sm:$0xff]  ;;  %v5127_v35 = vld [vmem:[#allocation6 + $0x4e8] sm:$0xff]  ;;  %v5121_v37 = vld [vmem:[#allocation6 + $0x4b8] sm:$0xff] }
 0x955   :  { %5432 = vmatprep.mubr.f32.mxu0 %v4961_v28  ;;  %5503 = vmatprep.mubr.f32.mxu1 %v4961_v28  ;;  %v7654_v28 = vpack.c.bf16 %v5046_v33, %v5038_v11  ;;  %v7658_v36 = vpack.c.bf16 %v5062_v45, %v5054_v44  ;;  %v7732_v11 = vpack.c.bf16 %v5113_v25, %v5105_v22  ;;  %v5104_v33 = vld [vmem:[#allocation6 + $0x430] sm:$0xff]  ;;  %v5166_v25 = vld [vmem:[#allocation6 + $0x620] sm:$0xff] }
 0x956   :  { %4967 = vadd.xlane.f32.xlu1 %v4966_v55  ;;  %7641 = vmatprep.subr.bf16.mxu0 %v7640_v29  ;;  %v5079_v55 = vld [vmem:[#allocation6 + $0x368] sm:$0xff]  ;;  %v5073_v29 = vld [vmem:[#allocation6 + $0x338] sm:$0xff]  ;;  %v7736_v44 = vpack.c.bf16 %v5129_v38, %v5121_v37  ;;  %v5120_v45 = vld [vmem:[#allocation6 + $0x4b0] sm:$0xff] }
 0x957   :  { %7705 = vmatprep.subr.bf16.mxu1 %v7704_v1  ;;  %v5070_v1 = vld [vmem:[#allocation6 + $0x320] sm:$0xff]  ;;  %v7724_v7 = vpack.c.bf16 %v5081_v39, %v5073_v29 }
 0x958   :  { %7643 = vmatpush1.bf16.msra.mxu0 %v7642_v3  ;;  %7707 = vmatpush1.bf16.msra.mxu1 %v7706_v5  ;;  %v5078_v3 = vld [vmem:[#allocation6 + $0x360] sm:$0xff]  ;;  %v7660_v5 = vpack.c.bf16 %v5079_v55, %v5071_v52  ;;  %v5145_v52 = vld [vmem:[#allocation6 + $0x578] sm:$0xff] }
 0x959   :  { %7645 = vmatprep.subr.bf16.mxu0 %v7644_v58  ;;  %7709 = vmatprep.subr.bf16.mxu1 %v7708_v41  ;;  %v5080_v58 = vld [vmem:[#allocation6 + $0x370] sm:$0xff]  ;;  %v5087_v41 = vld [vmem:[#allocation6 + $0x3a8] sm:$0xff]  ;;  %v7662_v12 = vpack.c.bf16 %v5078_v3, %v5070_v1  ;;  %v5134_v39 = vld [vmem:[#allocation6 + $0x520] sm:$0xff]  ;;  %v7740_v1 = vpack.c.bf16 %v5145_v52, %v5137_v51 }
 0x95a   :  { %v7726_v14 = vpack.c.bf16 %v5080_v58, %v5072_v43  ;;  %v5136_v3 = vld [vmem:[#allocation6 + $0x530] sm:$0xff]  ;;  %v5159_v43 = vld [vmem:[#allocation6 + $0x5e8] sm:$0xff]  ;;  %v5153_v58 = vld [vmem:[#allocation6 + $0x5b8] sm:$0xff] }
 0x95b   :  { %v5182_v38 = vld [vmem:[#allocation6 + $0x6a0] sm:$0xff] }
 0x95c   :  { %7647 = vmatpush1.bf16.msra.mxu0 %v7646_v0  ;;  %7711 = vmatpush1.bf16.msra.mxu1 %v7710_v19  ;;  %v5094_v0 = vld [vmem:[#allocation6 + $0x3e0] sm:$0xff]  ;;  %v7664_v19 = vpack.c.bf16 %v5095_v50, %v5087_v41  ;;  %v5161_v41 = vld [vmem:[#allocation6 + $0x5f8] sm:$0xff] }
 0x95d   :  { %7649 = vmatprep.subr.bf16.mxu0 %v7648_v59  ;;  %7713 = vmatprep.subr.bf16.mxu1 %v7712_v21  ;;  %v5096_v59 = vld [vmem:[#allocation6 + $0x3f0] sm:$0xff]  ;;  %v5103_v21 = vld [vmem:[#allocation6 + $0x428] sm:$0xff]  ;;  %v7666_v26 = vpack.c.bf16 %v5094_v0, %v5086_v18  ;;  %v7744_v18 = vpack.c.bf16 %v5161_v41, %v5153_v58  ;;  %v5198_v52 = vld [vmem:[#allocation6 + $0x720] sm:$0xff] }
 0x95e   :  { %v7730_v31 = vpack.c.bf16 %v5096_v59, %v5088_v63  ;;  %v5152_v0 = vld [vmem:[#allocation6 + $0x5b0] sm:$0xff]  ;;  %v5175_v63 = vld [vmem:[#allocation6 + $0x668] sm:$0xff]  ;;  %v5169_v59 = vld [vmem:[#allocation6 + $0x638] sm:$0xff] }
 0x95f   :  { %v5214_v41 = vld [vmem:[#allocation6 + $0x7a0] sm:$0xff] }
 0x960   :  { %7651 = vmatpush1.bf16.msra.mxu0 %v7650_v60  ;;  %7715 = vmatpush1.bf16.msra.mxu1 %v7714_v17  ;;  %v5110_v60 = vld [vmem:[#allocation6 + $0x460] sm:$0xff]  ;;  %v7668_v17 = vpack.c.bf16 %v5111_v62, %v5103_v21  ;;  %v5177_v21 = vld [vmem:[#allocation6 + $0x678] sm:$0xff] }
 0x961   :  { %7653 = vmatprep.subr.bf16.mxu0 %v7652_v34  ;;  %7717 = vmatprep.subr.bf16.mxu1 %v7716_v8  ;;  %v5112_v34 = vld [vmem:[#allocation6 + $0x470] sm:$0xff]  ;;  %v5119_v8 = vld [vmem:[#allocation6 + $0x4a8] sm:$0xff]  ;;  %v7670_v42 = vpack.c.bf16 %v5110_v60, %v5102_v32  ;;  %v7748_v32 = vpack.c.bf16 %v5177_v21, %v5169_v59 }
 0x962   :  { %v7734_v61 = vpack.c.bf16 %v5112_v34, %v5104_v33  ;;  %v5168_v60 = vld [vmem:[#allocation6 + $0x630] sm:$0xff]  ;;  %v5191_v33 = vld [vmem:[#allocation6 + $0x6e8] sm:$0xff]  ;;  %v5185_v34 = vld [vmem:[#allocation6 + $0x6b8] sm:$0xff] }
 0x964   :  { %7655 = vmatpush1.bf16.msra.mxu0 %v7654_v28  ;;  %7719 = vmatpush1.bf16.msra.mxu1 %v7718_v24  ;;  %v5126_v28 = vld [vmem:[#allocation6 + $0x4e0] sm:$0xff]  ;;  %v7672_v24 = vpack.c.bf16 %v5127_v35, %v5119_v8  ;;  %v5193_v8 = vld [vmem:[#allocation6 + $0x6f8] sm:$0xff] }
 0x965   :  { %7657 = vmatprep.subr.bf16.mxu0 %v7656_v46  ;;  %7721 = vmatprep.subr.bf16.mxu1 %v7720_v20  ;;  %v5128_v46 = vld [vmem:[#allocation6 + $0x4f0] sm:$0xff]  ;;  %v5135_v20 = vld [vmem:[#allocation6 + $0x528] sm:$0xff]  ;;  %v7674_v55 = vpack.c.bf16 %v5126_v28, %v5118_v13  ;;  %v7752_v13 = vpack.c.bf16 %v5193_v8, %v5185_v34 }
 0x966   :  { %v7738_v29 = vpack.c.bf16 %v5128_v46, %v5120_v45  ;;  %v5184_v28 = vld [vmem:[#allocation6 + $0x6b0] sm:$0xff]  ;;  %v5207_v45 = vld [vmem:[#allocation6 + $0x768] sm:$0xff]  ;;  %v5201_v46 = vld [vmem:[#allocation6 + $0x738] sm:$0xff] }
 0x968   :  { %7659 = vmatpush1.bf16.msra.mxu0 %v7658_v36  ;;  %7723 = vmatpush1.bf16.msra.mxu1 %v7722_v57  ;;  %v5142_v36 = vld [vmem:[#allocation6 + $0x560] sm:$0xff]  ;;  %v7676_v57 = vpack.c.bf16 %v5143_v49, %v5135_v20  ;;  %v5209_v20 = vld [vmem:[#allocation6 + $0x778] sm:$0xff] }
 0x969   :  { %7661 = vmatprep.subr.bf16.mxu0 %v7660_v5  ;;  %7725 = vmatprep.subr.bf16.mxu1 %v7724_v7  ;;  %v5144_v5 = vld [vmem:[#allocation6 + $0x570] sm:$0xff]  ;;  %v5151_v7 = vld [vmem:[#allocation6 + $0x5a8] sm:$0xff]  ;;  %v7678_v50 = vpack.c.bf16 %v5142_v36, %v5134_v39  ;;  %v7756_v39 = vpack.c.bf16 %v5209_v20, %v5201_v46 }
 0x96a   :  { %v7742_v53 = vpack.c.bf16 %v5144_v5, %v5136_v3  ;;  %v5200_v36 = vld [vmem:[#allocation6 + $0x730] sm:$0xff]  ;;  %v5223_v3 = vld [vmem:[#allocation6 + $0x7e8] sm:$0xff]  ;;  %v5217_v5 = vld [vmem:[#allocation6 + $0x7b8] sm:$0xff] }
 0x96c   :  { %7663 = vmatpush1.bf16.msra.mxu0 %v7662_v12  ;;  %7727 = vmatpush1.bf16.msra.mxu1 %v7726_v14  ;;  %v5158_v12 = vld [vmem:[#allocation6 + $0x5e0] sm:$0xff]  ;;  %v7680_v14 = vpack.c.bf16 %v5159_v43, %v5151_v7  ;;  %v5225_v7 = vld [vmem:[#allocation6 + $0x7f8] sm:$0xff] }
 0x96d   :  { %7665 = vmatprep.subr.bf16.mxu0 %v7664_v19  ;;  %7729 = vmatprep.subr.bf16.mxu1 %v7728_v4  ;;  %v5160_v19 = vld [vmem:[#allocation6 + $0x5f0] sm:$0xff]  ;;  %v5167_v4 = vld [vmem:[#allocation6 + $0x628] sm:$0xff]  ;;  %v7682_v62 = vpack.c.bf16 %v5158_v12, %v5150_v10  ;;  %v5222_v10 = vld [vmem:[#allocation6 + $0x7e0] sm:$0xff] }
 0x96e   :  { %v7746_v22 = vpack.c.bf16 %v5160_v19, %v5152_v0  ;;  %v5216_v12 = vld [vmem:[#allocation6 + $0x7b0] sm:$0xff] }
 0x970   :  { %7667 = vmatpush1.bf16.msra.mxu0 %v7666_v26  ;;  %7731 = vmatpush1.bf16.msra.mxu1 %v7730_v31  ;;  %v5174_v26 = vld [vmem:[#allocation6 + $0x660] sm:$0xff]  ;;  %v7684_v31 = vpack.c.bf16 %v5175_v63, %v5167_v4 }
 0x971   :  { %7669 = vmatprep.subr.bf16.mxu0 %v7668_v17  ;;  %7733 = vmatprep.subr.bf16.mxu1 %v7732_v11  ;;  %v5176_v17 = vld [vmem:[#allocation6 + $0x670] sm:$0xff]  ;;  %v5183_v11 = vld [vmem:[#allocation6 + $0x6a8] sm:$0xff]  ;;  %v7686_v35 = vpack.c.bf16 %v5174_v26, %v5166_v25 }
 0x972   :  { %v7750_v37 = vpack.c.bf16 %v5176_v17, %v5168_v60 }
 0x974   :  { %7671 = vmatpush1.bf16.msra.mxu0 %v7670_v42  ;;  %7735 = vmatpush1.bf16.msra.mxu1 %v7734_v61  ;;  %v5190_v42 = vld [vmem:[#allocation6 + $0x6e0] sm:$0xff]  ;;  %v7688_v61 = vpack.c.bf16 %v5191_v33, %v5183_v11 }
 0x975   :  { %7673 = vmatprep.subr.bf16.mxu0 %v7672_v24  ;;  %7737 = vmatprep.subr.bf16.mxu1 %v7736_v44  ;;  %v5192_v24 = vld [vmem:[#allocation6 + $0x6f0] sm:$0xff]  ;;  %v5199_v44 = vld [vmem:[#allocation6 + $0x728] sm:$0xff]  ;;  %v7690_v49 = vpack.c.bf16 %v5190_v42, %v5182_v38 }
 0x976   :  { %v7754_v51 = vpack.c.bf16 %v5192_v24, %v5184_v28 }
 0x978   :  { %7675 = vmatpush1.bf16.msra.mxu0 %v7674_v55  ;;  %7739 = vmatpush1.bf16.msra.mxu1 %v7738_v29  ;;  %v5206_v55 = vld [vmem:[#allocation6 + $0x760] sm:$0xff]  ;;  %v7692_v29 = vpack.c.bf16 %v5207_v45, %v5199_v44 }
 0x979   :  { %7677 = vmatprep.subr.bf16.mxu0 %v7676_v57  ;;  %7741 = vmatprep.subr.bf16.mxu1 %v7740_v1  ;;  %v5208_v57 = vld [vmem:[#allocation6 + $0x770] sm:$0xff]  ;;  %v5215_v1 = vld [vmem:[#allocation6 + $0x7a8] sm:$0xff]  ;;  %v7694_v43 = vpack.c.bf16 %v5206_v55, %v5198_v52 }
 0x97a   :  { %v7758_v58 = vpack.c.bf16 %v5208_v57, %v5200_v36 }
 0x97c   :  { %7679 = vmatpush1.bf16.msra.mxu0 %v7678_v50  ;;  %7743 = vmatpush1.bf16.msra.mxu1 %v7742_v53  ;;  %v7696_v50 = vpack.c.bf16 %v5223_v3, %v5215_v1  ;;  %v7760_v53 = vpack.c.bf16 %v5225_v7, %v5217_v5 }
 0x97d   :  { %7681 = vmatprep.subr.bf16.mxu0 %v7680_v14  ;;  %7745 = vmatprep.subr.bf16.mxu1 %v7744_v18  ;;  %v5224_v14 = vld [vmem:[#allocation6 + $0x7f0] sm:$0xff]  ;;  %v7698_v18 = vpack.c.bf16 %v5222_v10, %v5214_v41 }
 0x97e   :  { %v7762_v0 = vpack.c.bf16 %v5224_v14, %v5216_v12 }
 0x980   :  { %7683 = vmatpush1.bf16.msra.mxu0 %v7682_v62  ;;  %7747 = vmatpush1.bf16.msra.mxu1 %v7746_v22 }
 0x981   :  { %7685 = vmatprep.subr.bf16.mxu0 %v7684_v31  ;;  %7749 = vmatprep.subr.bf16.mxu1 %v7748_v32 }
 0x984   :  { %7687 = vmatpush1.bf16.msra.mxu0 %v7686_v35  ;;  %7751 = vmatpush1.bf16.msra.mxu1 %v7750_v37 }
 0x985   :  { %7689 = vmatprep.subr.bf16.mxu0 %v7688_v61  ;;  %7753 = vmatprep.subr.bf16.mxu1 %v7752_v13 }
 0x988   :  { %7691 = vmatpush1.bf16.msra.mxu0 %v7690_v49  ;;  %7755 = vmatpush1.bf16.msra.mxu1 %v7754_v51 }
 0x989   :  { %7693 = vmatprep.subr.bf16.mxu0 %v7692_v29  ;;  %7757 = vmatprep.subr.bf16.mxu1 %v7756_v39 }
 0x98c   :  { %7695 = vmatpush1.bf16.msra.mxu0 %v7694_v43  ;;  %7759 = vmatpush1.bf16.msra.mxu1 %v7758_v58 }
 0x98d   :  { %7697 = vmatprep.subr.bf16.mxu0 %v7696_v50  ;;  %7761 = vmatprep.subr.bf16.mxu1 %v7760_v53 }
 0x990   :  { %7699 = vmatpush1.bf16.msra.mxu0 %v7698_v18  ;;  %7763 = vmatpush1.bf16.msra.mxu1 %v7762_v0 }
 0x993   :  { %5433 = vmatmul.mubr.f32.vlgmr.msra.gmra.mrb[16].mxu0 %v8719_v40  ;;  %5504 = vmatmul.mubr.f32.vlgmr.msra.gmra.mrb[16].mxu1 %v8719_v40 }
 0x9a1   :  { %v4964_v19 = vpop.xlane.xlu0 %4963 }
 0x9a2   :  { %4965 = vst.msk [vmem:[#allocation3] sm:$0xff] %vm1904_vm4, %v4964_v19 }
 0x9e3   :  { %v4968_v4 = vpop.xlane.xlu1 %4967 }
 0x9e4   :  { %4969 = vst.msk [vmem:[#allocation4] sm:$0xff] %vm1899_vm3, %v4968_v4 }
 0xa26   :  { %v5292_v63 = vpop.f32.mrb[14].mxu0  ;;  %v5363_v59 = vpop.f32.mrb[14].mxu1 }
 0xa27   :  { %v7778_v21 = vadd.f32 %v5292_v63, %v8498_v15  ;;  %v5294_v62 = vpop.f32.mrb[15].mxu0  ;;  %v5365_v22 = vpop.f32.mrb[15].mxu1  ;;  %v7794_v40 = vadd.f32 %v5363_v59, %v8507_v23 }
 0xa28   :  { %v7779_v25 = vadd.f32 %v5294_v62, %v8501_v16  ;;  %v7795_v32 = vadd.f32 %v5365_v22, %v8512_v27 }
 0xa29   :  { %v5677_v26 = vmul.f32 -1.442695, %v7778_v21  ;;  %v5679_v60 = vmul.f32 -1.442695, %v7794_v40 }
 0xa2a   :  { %v5678_v31 = vmul.f32 -1.442695, %v7779_v25 }
 0xa2b   :  { %8120 = vpow2.f32 %v5677_v26 }
 0xa2c   :  { %8122 = vpow2.f32 %v5678_v31 }
 0xa2d   :  { %8124 = vtanh.f32 %v7795_v32 }
 0xa2e   :  { %8126 = vpow2.f32 %v5679_v60 }
 0xa35   :  { %v8121_v17 = vpop.eup %8120 }
 0xa36   :  { %v5535_v11 = vadd.f32 1.0, %v8121_v17  ;;  %v8123_v33 = vpop.eup %8122 }
 0xa37   :  { %v5536_v15 = vadd.f32 1.0, %v8123_v33  ;;  %v8125_v34 = vpop.eup %8124 }
 0xa38   :  { %8128 = vrcp.f32 %v5535_v11  ;;  %v8127_v8 = vpop.eup %8126 }
 0xa39   :  { %8130 = vrcp.f32 %v5536_v15  ;;  %v5537_v38 = vadd.f32 1.0, %v8127_v8 }
 0xa3b   :  { %8132 = vrcp.f32 %v5537_v38 }
 0xa42   :  { %v8129_v16 = vpop.eup %8128 }
 0xa43   :  { %v5546_v35 = vmul.f32 %v8129_v16, %v8125_v34  ;;  %v8131_v37 = vpop.eup %8130 }
 0xa44   :  { %v5545_v42 = vmul.f32 %v8131_v37, %v8716_v6 }
 0xa45   :  { %v8133_v27 = vpop.eup %8132 }
 0xa46   :  { %v5547_v23 = vadd.f32 %v5546_v35, %v5545_v42 }
 0xa48   :  { %8134 = vtanh.f32 %v5547_v23 }
 0xa52   :  { %v8135_v61 = vpop.eup %8134 }
 0xa53   :  { %v5549_v13 = vmul.f32 %v8135_v61, %v8133_v27 }
 0xa55   :  { %v5574_v28 = vmul.f32 %v8724_v9, %v5549_v13 }
 0xa57   :  { %5575 = vadd.xlane.f32.xlu0 %v5574_v28 }
 0xa66   :  { %v5434_v24 = vpop.f32.mrb[16].mxu0  ;;  %v5505_v44 = vpop.f32.mrb[16].mxu1 }
 0xa67   :  { %v7796_v45 = vadd.f32 %v5434_v24, %v8527_v47  ;;  %v5436_v46 = vpop.f32.mrb[17].mxu0  ;;  %v5507_v20 = vpop.f32.mrb[17].mxu1  ;;  %v7812_v6 = vadd.f32 %v5505_v44, %v8536_v56 }
 0xa68   :  { %v7797_v49 = vadd.f32 %v5436_v46, %v8530_v48  ;;  %v7813_v55 = vadd.f32 %v5507_v20, %v8541_v2 }
 0xa69   :  { %v5680_v51 = vmul.f32 -1.442695, %v7796_v45  ;;  %v5682_v29 = vmul.f32 -1.442695, %v7812_v6 }
 0xa6a   :  { %v5681_v52 = vmul.f32 -1.442695, %v7797_v49 }
 0xa6b   :  { %8136 = vpow2.f32 %v5680_v51 }
 0xa6c   :  { %8138 = vpow2.f32 %v5681_v52 }
 0xa6d   :  { %8140 = vtanh.f32 %v7813_v55 }
 0xa6e   :  { %8142 = vpow2.f32 %v5682_v29 }
 0xa75   :  { %v8137_v39 = vpop.eup %8136 }
 0xa76   :  { %v5559_v9 = vadd.f32 1.0, %v8137_v39  ;;  %v8139_v36 = vpop.eup %8138 }
 0xa77   :  { %v5560_v47 = vadd.f32 1.0, %v8139_v36  ;;  %v8141_v57 = vpop.eup %8140 }
 0xa78   :  { %8144 = vrcp.f32 %v5559_v9  ;;  %v8143_v1 = vpop.eup %8142 }
 0xa79   :  { %8146 = vrcp.f32 %v5560_v47  ;;  %v5561_v7 = vadd.f32 1.0, %v8143_v1 }
 0xa7b   :  { %8148 = vrcp.f32 %v5561_v7 }
 0xa82   :  { %v8145_v48 = vpop.eup %8144 }
 0xa83   :  { %v5570_v3 = vmul.f32 %v8145_v48, %v8141_v57  ;;  %v8147_v5 = vpop.eup %8146 }
 0xa84   :  { %v5569_v43 = vmul.f32 %v8147_v5, %v8733_v30  ;;  %v5586_v30 = vstv %s8774_s6 }
 0xa85   :  { %v8149_v2 = vpop.eup %8148 }
 0xa86   :  { %v5571_v56 = vadd.f32 %v5570_v3, %v5569_v43 }
 0xa88   :  { %8150 = vtanh.f32 %v5571_v56 }
 0xa92   :  { %v8151_v58 = vpop.eup %8150 }
 0xa93   :  { %v5573_v41 = vmul.f32 %v8151_v58, %v8149_v2 }
 0xa95   :  { %v5578_v50 = vmul.f32 %v8739_v54, %v5573_v41 }
 0xa97   :  { %5579 = vadd.xlane.f32.xlu1 %v5578_v50 }
 0xae4   :  { %v5576_v53 = vpop.xlane.xlu0 %5575 }
 0xae5   :  { %5577 = vst.msk [vmem:[#allocation3] sm:$0xff] %vm1290_vm2, %v5576_v53 }
 0xaec   :  { %v5582_v12 = vld [vmem:[#allocation3] sm:$0xff] }
 0xb24   :  { %v5580_v10 = vpop.xlane.xlu1 %5579 }
 0xb25   :  { %5581 = vst.msk [vmem:[#allocation4] sm:$0xff] %vm1279_vm1, %v5580_v10 }
 0xb2c   :  { %v5583_v14 = vld [vmem:[#allocation4] sm:$0xff] }
 0xb2d   :  { %v5584_v18 = vadd.f32 %v5583_v14, %v5582_v12 }
 0xb2f   :  { %v5587_v0 = vadd.f32 %v5586_v30, %v5584_v18 }
 0xb31   :  { %v5683_v19 = vmul.f32 -1.442695, %v5587_v0 }
 0xb33   :  { %8152 = vpow2.f32 %v5683_v19 }
 0xb3d   :  { %v8153_v4 = vpop.eup %8152 }
 0xb3e   :  { %v5591_v63 = vadd.f32 1.0, %v8153_v4 }
 0xb40   :  { %8154 = vrcp.f32 %v5591_v63 }
 0xb4a   :  { %v8155_v54 = vpop.eup %8154 }
 0xb4b   :  { %5595 = vst.msk [vmem:[%s8775_s7] sm:$0xff] %vm5594_vm9, %v8155_v54 }
 0xb4c   :  { %5600 = vsyncpa [#allocation7], 1 }

</bundles_post_ra>
